<compile_context>
chip_gen: v7x
topology: tpu7x:2x2x1
jax: 0.10.0
libtpu: 0.0.40
codegen_flags: <defaults>
</compile_context>

<pallas_src>
import functools

import jax
import jax.numpy as jnp
from jax.experimental import pallas as pl
from jax.experimental.pallas import tpu as pltpu


# ----------------------------------------------------------------------------
# Kernel A: fused conv1 (1x1) + conv_f (1x1), tiled over pixels
# ----------------------------------------------------------------------------
def _conv1_convf_kernel(x_ref, w1_ref, b1_ref, wf_ref, bf_ref, c1_ref, cf_ref):
    c1 = jnp.dot(x_ref[...], w1_ref[...], preferred_element_type=jnp.float32)
    c1 = c1 + b1_ref[...]
    c1_ref[...] = c1.astype(jnp.bfloat16)
    cf = jnp.dot(c1.astype(jnp.bfloat16), wf_ref[...],
                 preferred_element_type=jnp.float32) + bf_ref[...]
    cf_ref[...] = cf


def conv1_convf(x2d, w1, b1, wf, bf, tile=512):
    P, C = x2d.shape
    f = w1.shape[1]
    P_pad = ((P + tile - 1) // tile) * tile
    if P_pad != P:
        x2d = jnp.pad(x2d, ((0, P_pad - P), (0, 0)))
    c1, cf = pl.pallas_call(
        _conv1_convf_kernel,
        out_shape=(jax.ShapeDtypeStruct((P_pad, f), jnp.bfloat16),
                   jax.ShapeDtypeStruct((P_pad, f), jnp.float32)),
        grid=(P_pad // tile,),
        in_specs=[
            pl.BlockSpec((tile, C), lambda i: (i, 0)),
            pl.BlockSpec((C, f), lambda i: (0, 0)),
            pl.BlockSpec((1, f), lambda i: (0, 0)),
            pl.BlockSpec((f, f), lambda i: (0, 0)),
            pl.BlockSpec((1, f), lambda i: (0, 0)),
        ],
        out_specs=(pl.BlockSpec((tile, f), lambda i: (i, 0)),
                   pl.BlockSpec((tile, f), lambda i: (i, 0))),
        compiler_params=pltpu.CompilerParams(dimension_semantics=("parallel",)),
    )(x2d, w1, b1, wf, bf)
    return c1[:P], cf[:P]


# ----------------------------------------------------------------------------
# Kernel B: conv2 (3x3, stride 2, no padding) as 9 shifted-slice matmuls
# over wrapper-prepared even/odd phase planes (no im2col buffer).
# ----------------------------------------------------------------------------
def _conv2_kernel(p00, p01, p10, p11, w_ref, b_ref, o_ref, *, Lout, Wh, f):
    phases = (p00, p01, p10, p11)
    acc = jnp.zeros((Lout, f), jnp.float32) + b_ref[...]
    for kh in range(3):
        for kw in range(3):
            pidx = (kh % 2) * 2 + (kw % 2)
            off = (kh // 2) * Wh + (kw // 2)
            acc = acc + jnp.dot(phases[pidx][off:off + Lout, :],
                                w_ref[kh * 3 + kw],
                                preferred_element_type=jnp.float32)
    o_ref[...] = acc.astype(o_ref.dtype)


def conv2_stride2(c1_nhwc, w2_taps, b2):
    B, H, W, f = c1_nhwc.shape
    Ho, Wo = (H - 3) // 2 + 1, (W - 3) // 2 + 1
    H2, W2 = H + (H % 2), W + (W % 2)
    xpad = jnp.pad(c1_nhwc, ((0, 0), (0, H2 - H), (0, W2 - W), (0, 0)))
    Hh, Wh = H2 // 2, W2 // 2
    Lout = Ho * Wh
    Lpad = Hh * Wh + Wh
    flat = []
    for pa in (0, 1):
        for pb in (0, 1):
            ph = xpad[:, pa::2, pb::2, :].reshape(B, Hh * Wh, f)
            flat.append(jnp.pad(ph, ((0, 0), (0, Lpad - Hh * Wh), (0, 0))))
    out = pl.pallas_call(
        functools.partial(_conv2_kernel, Lout=Lout, Wh=Wh, f=f),
        out_shape=jax.ShapeDtypeStruct((B, Lout, f), jnp.bfloat16),
        grid=(B,),
        in_specs=[pl.BlockSpec((None, Lpad, f), lambda b: (b, 0, 0))] * 4 + [
            pl.BlockSpec((9, f, f), lambda b: (0, 0, 0)),
            pl.BlockSpec((1, f), lambda b: (0, 0)),
        ],
        out_specs=pl.BlockSpec((None, Lout, f), lambda b: (b, 0, 0)),
        compiler_params=pltpu.CompilerParams(dimension_semantics=("parallel",)),
    )(*flat, w2_taps, b2)
    return out.reshape(B, Ho, Wh, f)[:, :, :Wo, :]      # (B, Ho, Wo, f) bf16


# ----------------------------------------------------------------------------
# Kernel C: fused maxpool(7,3) + conv_max(+relu) + conv3(+relu) + conv3_
#           + W-axis bilinear upsample.  Everything stays resident in VMEM.
# The pooled map lives in a zero-padded, flattened (rows, channels) scratch so
# every 3x3 tap is a contiguous row slice feeding a 2D MXU matmul.
# ----------------------------------------------------------------------------
def _pooled_branch_kernel(pp_ref, wcm_ref, bcm_ref, w3_ref, b3_ref,
                          w3b_ref, b3b_ref, mask_ref, mw_ref, t_ref,
                          buf_a, buf_b, *, Hp, Wp, f):
    Hq, Wq = Hp + 2, Wp + 2
    Lp = Hq * Wq
    m = Wq + 1

    # 7x7 / stride-3 max-pool via 3x3 phase planes: 49 unit-stride shifted maxes
    vm = None
    for i in range(7):
        for jj in range(7):
            tap = (i % 3) * 3 + (jj % 3)
            slab = pp_ref[tap * Hq + i // 3: tap * Hq + i // 3 + Hp,
                          jj // 3: jj // 3 + Wp, :].astype(jnp.float32)
            vm = slab if vm is None else jnp.maximum(vm, slab)

    buf_a[...] = jnp.zeros_like(buf_a)
    buf_b[...] = jnp.zeros_like(buf_b)
    for hp in range(Hp):
        s = m + (hp + 1) * Wq + 1
        buf_a[s:s + Wp, :] = vm[hp]

    mask = mask_ref[...]

    def conv3x3(src, dst, w_ref, b_ref, relu, apply_mask):
        acc = jnp.zeros((Lp, f), jnp.float32) + b_ref[...]
        for kh in range(3):
            for kw in range(3):
                off = (kh - 1) * Wq + (kw - 1)
                lhs = src[m + off:m + off + Lp, :].astype(jnp.bfloat16)
                acc = acc + jnp.dot(lhs, w_ref[kh * 3 + kw],
                                    preferred_element_type=jnp.float32)
        if relu:
            acc = jnp.maximum(acc, 0.0)
        if apply_mask:
            acc = acc * mask          # re-zero the padding ring for the next conv
        dst[m:m + Lp, :] = acc

    conv3x3(buf_a, buf_b, wcm_ref, bcm_ref, relu=True, apply_mask=True)    # conv_max
    conv3x3(buf_b, buf_a, w3_ref, b3_ref, relu=True, apply_mask=True)      # conv3
    conv3x3(buf_a, buf_b, w3b_ref, b3b_ref, relu=False, apply_mask=False)  # conv3_

    # separable bilinear, W axis: t[p] = Mw @ c3[p]
    mw = mw_ref[...]
    for hp in range(Hp):
        s = m + (hp + 1) * Wq + 1
        t_ref[hp, :, :] = jnp.dot(mw, buf_b[s:s + Wp, :],
                                  preferred_element_type=jnp.float32)


def pooled_branch(c1c, Hp, Wp, W, wcm, bcm, w3, b3, w3b, b3b):
    B, Ho, Wo, f = c1c.shape
    Hq, Wq = Hp + 2, Wp + 2
    Lp = Hq * Wq
    # 3x3 pool-phase decomposition of c1 (stride-3 handled wrapper-side)
    planes = []
    for a in range(3):
        for b in range(3):
            ph = c1c[:, a::3, b::3, :]
            planes.append(jnp.pad(
                ph, ((0, 0), (0, Hq - ph.shape[1]), (0, Wq - ph.shape[2]), (0, 0))))
    pp = jnp.concatenate(planes, axis=1)                # (B, 9*Hq, Wq, f) bf16
    mask = jnp.zeros((Hq, Wq), jnp.float32).at[1:Hp + 1, 1:Wp + 1].set(1.0)
    mask = mask.reshape(Lp, 1)
    Mw = bilinear_matrix(W, Wp)                          # (W, Wp) f32
    Lext = Lp + 2 * (Wq + 1)
    return pl.pallas_call(
        functools.partial(_pooled_branch_kernel, Hp=Hp, Wp=Wp, f=f),
        out_shape=jax.ShapeDtypeStruct((B, Hp, W, f), jnp.float32),
        grid=(B,),
        in_specs=[
            pl.BlockSpec((None, 9 * Hq, Wq, f), lambda b: (b, 0, 0, 0)),
            pl.BlockSpec((9, f, f), lambda b: (0, 0, 0)),
            pl.BlockSpec((1, f), lambda b: (0, 0)),
            pl.BlockSpec((9, f, f), lambda b: (0, 0, 0)),
            pl.BlockSpec((1, f), lambda b: (0, 0)),
            pl.BlockSpec((9, f, f), lambda b: (0, 0, 0)),
            pl.BlockSpec((1, f), lambda b: (0, 0)),
            pl.BlockSpec((Lp, 1), lambda b: (0, 0)),
            pl.BlockSpec((W, Wp), lambda b: (0, 0)),
        ],
        out_specs=pl.BlockSpec((None, Hp, W, f), lambda b: (b, 0, 0, 0)),
        scratch_shapes=[pltpu.VMEM((Lext, f), jnp.float32),
                        pltpu.VMEM((Lext, f), jnp.float32)],
        compiler_params=pltpu.CompilerParams(dimension_semantics=("parallel",)),
    )(pp, wcm, bcm, w3, b3, w3b, b3b, mask, Mw)


# ----------------------------------------------------------------------------
# Kernel D: epilogue.  H-axis bilinear upsample (2-tap gather with scalar-
# prefetched indices) + conv_f skip add + conv4 (1x1) + sigmoid + x * m.
# ----------------------------------------------------------------------------
def _epilogue_kernel(i0_ref, i1_ref, t_ref, cf_ref, x_ref, w0_ref, w1_ref,
                     w4_ref, b4_ref, o_ref, up_scr, *, rows, W):
    j = pl.program_id(1)
    for r in range(rows):
        h = j * rows + r
        p0 = i0_ref[h]
        p1 = i1_ref[h]
        a0 = w0_ref[r:r + 1, :]
        a1 = w1_ref[r:r + 1, :]
        up_scr[r * W:(r + 1) * W, :] = a0 * t_ref[p0] + a1 * t_ref[p1]
    z = up_scr[...] + cf_ref[...]
    c4 = jnp.dot(z.astype(jnp.bfloat16), w4_ref[...],
                 preferred_element_type=jnp.float32) + b4_ref[...]
    gate = 1.0 / (1.0 + jnp.exp(-c4))
    o_ref[...] = (x_ref[...] * gate).astype(o_ref.dtype)


def epilogue(i0h, i1h, w0h, w1h, t, cf3, x3, w4, b4, rows):
    B, HW, C = x3.shape
    Hp, W, f = t.shape[1], t.shape[2], t.shape[3]
    H = HW // W
    return pl.pallas_call(
        functools.partial(_epilogue_kernel, rows=rows, W=W),
        out_shape=jax.ShapeDtypeStruct((B, HW, C), jnp.float32),
        grid_spec=pltpu.PrefetchScalarGridSpec(
            num_scalar_prefetch=2,
            grid=(B, H // rows),
            in_specs=[
                pl.BlockSpec((None, Hp, W, f), lambda b, j, s0, s1: (b, 0, 0, 0)),
                pl.BlockSpec((None, rows * W, f), lambda b, j, s0, s1: (b, j, 0)),
                pl.BlockSpec((None, rows * W, C), lambda b, j, s0, s1: (b, j, 0)),
                pl.BlockSpec((rows, 1), lambda b, j, s0, s1: (j, 0)),
                pl.BlockSpec((rows, 1), lambda b, j, s0, s1: (j, 0)),
                pl.BlockSpec((f, C), lambda b, j, s0, s1: (0, 0)),
                pl.BlockSpec((1, C), lambda b, j, s0, s1: (0, 0)),
            ],
            out_specs=pl.BlockSpec((None, rows * W, C),
                                   lambda b, j, s0, s1: (b, j, 0)),
            scratch_shapes=[pltpu.VMEM((rows * W, f), jnp.float32)],
        ),
        compiler_params=pltpu.CompilerParams(
            dimension_semantics=("parallel", "arbitrary")),
    )(i0h.astype(jnp.int32), i1h.astype(jnp.int32),
      t, cf3, x3, w0h.reshape(-1, 1), w1h.reshape(-1, 1), w4, b4)


# ----------------------------------------------------------------------------
# Plain-JAX glue: weight layout, bilinear coefficients, tile-size pick
# ----------------------------------------------------------------------------
def conv3x3_taps(w):
    """PyTorch (Cout, Cin, 3, 3) -> (9, Cin, Cout), tap index = kh*3 + kw."""
    cout, cin = w.shape[0], w.shape[1]
    return jnp.transpose(w, (2, 3, 1, 0)).reshape(9, cin, cout)


def bilinear_1d(out_size, in_size):
    """F.interpolate(mode='bilinear', align_corners=False) 1-D coefficients."""
    scale = in_size / out_size
    dst = jnp.arange(out_size, dtype=jnp.float32)
    src = jnp.maximum((dst + 0.5) * scale - 0.5, 0.0)
    i0 = jnp.clip(jnp.floor(src).astype(jnp.int32), 0, in_size - 1)
    i1 = jnp.minimum(i0 + 1, in_size - 1)
    w1 = src - i0.astype(jnp.float32)
    return i0, i1, 1.0 - w1, w1


def bilinear_matrix(out_size, in_size):
    i0, i1, w0, w1 = bilinear_1d(out_size, in_size)
    return (w0[:, None] * jax.nn.one_hot(i0, in_size, dtype=jnp.float32) +
            w1[:, None] * jax.nn.one_hot(i1, in_size, dtype=jnp.float32))


def pick_rows(H, W, cap_pixels=512):
    """Largest divisor of H that is a multiple of 8 and keeps rows*W <= cap."""
    cap = max(1, cap_pixels // W)
    best = None
    for r in range(1, min(H, cap) + 1):
        if H % r == 0 and r % 8 == 0:
            best = r
    return best if best is not None else H


# ----------------------------------------------------------------------------
# ESA forward
# ----------------------------------------------------------------------------
def esa_forward(x_nchw, p):
    B, C, H, W = x_nchw.shape
    f = p["w1"].shape[0]
    x_nhwc = jnp.transpose(x_nchw, (0, 2, 3, 1)).astype(jnp.float32)

    # weight / bias layout plumbing (bf16 matmul operands, f32 biases)
    w1m = p["w1"].reshape(f, C).T.astype(jnp.bfloat16)
    b1 = p["b1"].reshape(1, f).astype(jnp.float32)
    wfm = p["wf"].reshape(f, f).T.astype(jnp.bfloat16)
    bfv = p["bf"].reshape(1, f).astype(jnp.float32)
    w4m = p["w4"].reshape(C, f).T.astype(jnp.bfloat16)
    b4 = p["b4"].reshape(1, C).astype(jnp.float32)
    w2t = conv3x3_taps(p["w2"]).astype(jnp.bfloat16)
    b2 = p["b2"].reshape(1, f).astype(jnp.float32)
    wcmt = conv3x3_taps(p["w_cm"]).astype(jnp.bfloat16)
    bcm = p["b_cm"].reshape(1, f).astype(jnp.float32)
    w3t = conv3x3_taps(p["w3"]).astype(jnp.bfloat16)
    b3 = p["b3"].reshape(1, f).astype(jnp.float32)
    w3bt = conv3x3_taps(p["w3_"]).astype(jnp.bfloat16)
    b3b = p["b3_"].reshape(1, f).astype(jnp.float32)

    # conv1 + conv_f (fused 1x1 convs over all pixels)
    P = B * H * W
    x2d = x_nhwc.reshape(P, C).astype(jnp.bfloat16)
    c1_flat, cf_flat = conv1_convf(x2d, w1m, b1, wfm, bfv)
    c1_nhwc = c1_flat.reshape(B, H, W, f)               # bf16

    # conv2 (3x3, stride 2, no padding)
    c1c = conv2_stride2(c1_nhwc, w2t, b2)               # (B, Ho, Wo, f) bf16
    Ho, Wo = c1c.shape[1], c1c.shape[2]

    # pooled branch: maxpool + conv_max + conv3 + conv3_ + W-upsample
    Hp, Wp = (Ho - 7) // 3 + 1, (Wo - 7) // 3 + 1
    t = pooled_branch(c1c, Hp, Wp, W, wcmt, bcm, w3t, b3, w3bt, b3b)

    # epilogue: H-upsample + conv_f add + conv4 + sigmoid + x * m
    i0h, i1h, w0h, w1h = bilinear_1d(H, Hp)
    rows = pick_rows(H, W)
    out_flat = epilogue(i0h, i1h, w0h, w1h, t,
                        cf_flat.reshape(B, H * W, f),
                        x_nhwc.reshape(B, H * W, C),
                        w4m, b4, rows)
    return jnp.transpose(out_flat.reshape(B, H, W, C), (0, 3, 1, 2))


# ----------------------------------------------------------------------------
# Deterministic parameter init + example run
# ----------------------------------------------------------------------------
def init_params(key, n_feats, f):
    ks = jax.random.split(key, 16)

    def w(k, shape, s=0.1):
        return (s * jax.random.normal(k, shape)).astype(jnp.float32)

    return dict(
        w1=w(ks[0], (f, n_feats, 1, 1)), b1=w(ks[1], (f,)),
        w2=w(ks[2], (f, f, 3, 3)),       b2=w(ks[3], (f,)),
        w_cm=w(ks[4], (f, f, 3, 3)),     b_cm=w(ks[5], (f,)),
        w3=w(ks[6], (f, f, 3, 3)),       b3=w(ks[7], (f,)),
        w3_=w(ks[8], (f, f, 3, 3)),      b3_=w(ks[9], (f,)),
        wf=w(ks[10], (f, f, 1, 1)),      bf=w(ks[11], (f,)),
        w4=w(ks[12], (n_feats, f, 1, 1)), b4=w(ks[13], (n_feats,)),
    )


if __name__ == "__main__":
    B, n_feats, H, W = 2, 8, 32, 32
    esa_channels = 16

    key = jax.random.PRNGKey(0)
    k_x, k_p = jax.random.split(key)
    x = jax.random.normal(k_x, (B, n_feats, H, W), dtype=jnp.float32)
    params = init_params(k_p, n_feats, esa_channels)

    fwd = jax.jit(esa_forward)
    out = jax.block_until_ready(fwd(x, params))

    assert out.shape == x.shape, out.shape
    assert bool(jnp.isfinite(out).all())
    print("KERNEL_OK")
</pallas_src>

<mosaic_0001>
module attributes {stable_mosaic.version = 11 : i64} {
  func.func @_conv1_convf_kernel(%arg0: i32, %arg1: memref<512x8xbf16, #tpu.memory_space<vmem>>, %arg2: memref<8x16xbf16, #tpu.memory_space<vmem>>, %arg3: memref<1x16xf32, #tpu.memory_space<vmem>>, %arg4: memref<16x16xbf16, #tpu.memory_space<vmem>>, %arg5: memref<1x16xf32, #tpu.memory_space<vmem>>, %arg6: memref<512x16xbf16, #tpu.memory_space<vmem>>, %arg7: memref<512x16xf32, #tpu.memory_space<vmem>>) attributes {dimension_semantics = [#tpu.dimension_semantics<parallel>], iteration_bounds = array<i64: 4>, scalar_prefetch = 0 : i64, scratch_operands = 0 : i64, tpu.core_type = #tpu.core_type<tc>, window_params = [{transform_indices = @transform_0, window_bounds = array<i64: 512, 8>}, {pipeline_mode = #tpu.pipeline_mode<synchronous>, transform_indices = @transform_1, window_bounds = array<i64: 8, 16>}, {pipeline_mode = #tpu.pipeline_mode<synchronous>, transform_indices = @transform_2, window_bounds = array<i64: 1, 16>}, {pipeline_mode = #tpu.pipeline_mode<synchronous>, transform_indices = @transform_3, window_bounds = array<i64: 16, 16>}, {pipeline_mode = #tpu.pipeline_mode<synchronous>, transform_indices = @transform_4, window_bounds = array<i64: 1, 16>}, {transform_indices = @transform_5, window_bounds = array<i64: 512, 16>}, {transform_indices = @transform_6, window_bounds = array<i64: 512, 16>}]} {
    %c0 = arith.constant 0 : index
    %c0_0 = arith.constant 0 : index
    %0 = vector.load %arg1[%c0, %c0_0] : memref<512x8xbf16, #tpu.memory_space<vmem>>, vector<512x8xbf16>
    %c0_1 = arith.constant 0 : index
    %c0_2 = arith.constant 0 : index
    %1 = vector.load %arg2[%c0_1, %c0_2] : memref<8x16xbf16, #tpu.memory_space<vmem>>, vector<8x16xbf16>
    %cst = arith.constant dense<0.000000e+00> : vector<512x16xf32>
    %2 = tpu.matmul %0, %1, %cst {dimension_numbers = #tpu.dot_dimension_numbers<[1], [0], [0], [1], [0, 0, 1, 1], [], []>} : vector<512x8xbf16>, vector<8x16xbf16>, vector<512x16xf32> -> vector<512x16xf32>
    %c0_3 = arith.constant 0 : index
    %c0_4 = arith.constant 0 : index
    %3 = vector.load %arg3[%c0_3, %c0_4] : memref<1x16xf32, #tpu.memory_space<vmem>>, vector<1x16xf32>
    %4 = vector.broadcast %3 : vector<1x16xf32> to vector<512x16xf32>
    %5 = arith.addf %2, %4 : vector<512x16xf32>
    %6 = arith.truncf %5 : vector<512x16xf32> to vector<512x16xbf16>
    %c0_5 = arith.constant 0 : index
    %c0_6 = arith.constant 0 : index
    %7 = vector.load %arg6[%c0_5, %c0_6] : memref<512x16xbf16, #tpu.memory_space<vmem>>, vector<512x16xbf16>
    tpu.vector_store %arg6[%c0_5, %c0_6], %6 {strides = array<i32>} : memref<512x16xbf16, #tpu.memory_space<vmem>>, vector<512x16xbf16>,
    %8 = arith.truncf %5 : vector<512x16xf32> to vector<512x16xbf16>
    %c0_7 = arith.constant 0 : index
    %c0_8 = arith.constant 0 : index
    %9 = vector.load %arg4[%c0_7, %c0_8] : memref<16x16xbf16, #tpu.memory_space<vmem>>, vector<16x16xbf16>
    %cst_9 = arith.constant dense<0.000000e+00> : vector<512x16xf32>
    %10 = tpu.matmul %8, %9, %cst_9 {dimension_numbers = #tpu.dot_dimension_numbers<[1], [0], [0], [1], [0, 0, 1, 1], [], []>} : vector<512x16xbf16>, vector<16x16xbf16>, vector<512x16xf32> -> vector<512x16xf32>
    %c0_10 = arith.constant 0 : index
    %c0_11 = arith.constant 0 : index
    %11 = vector.load %arg5[%c0_10, %c0_11] : memref<1x16xf32, #tpu.memory_space<vmem>>, vector<1x16xf32>
    %12 = vector.broadcast %11 : vector<1x16xf32> to vector<512x16xf32>
    %13 = arith.addf %10, %12 : vector<512x16xf32>
    %c0_12 = arith.constant 0 : index
    %c0_13 = arith.constant 0 : index
    %14 = vector.load %arg7[%c0_12, %c0_13] : memref<512x16xf32, #tpu.memory_space<vmem>>, vector<512x16xf32>
    tpu.vector_store %arg7[%c0_12, %c0_13], %13 {strides = array<i32>} : memref<512x16xf32, #tpu.memory_space<vmem>>, vector<512x16xf32>,
    return
  }
  func.func @transform_0(%arg0: i32) -> (i32, i32) {
    %c0_i32 = arith.constant 0 : i32
    %c0_i32_0 = arith.constant 0 : i32
    return %arg0, %c0_i32 : i32, i32
  }
  func.func @transform_1(%arg0: i32) -> (i32, i32) {
    %c0_i32 = arith.constant 0 : i32
    %c0_i32_0 = arith.constant 0 : i32
    %c0_i32_1 = arith.constant 0 : i32
    return %c0_i32, %c0_i32_0 : i32, i32
  }
  func.func @transform_2(%arg0: i32) -> (i32, i32) {
    %c0_i32 = arith.constant 0 : i32
    %c0_i32_0 = arith.constant 0 : i32
    %c0_i32_1 = arith.constant 0 : i32
    return %c0_i32, %c0_i32_0 : i32, i32
  }
  func.func @transform_3(%arg0: i32) -> (i32, i32) {
    %c0_i32 = arith.constant 0 : i32
    %c0_i32_0 = arith.constant 0 : i32
    %c0_i32_1 = arith.constant 0 : i32
    return %c0_i32, %c0_i32_0 : i32, i32
  }
  func.func @transform_4(%arg0: i32) -> (i32, i32) {
    %c0_i32 = arith.constant 0 : i32
    %c0_i32_0 = arith.constant 0 : i32
    %c0_i32_1 = arith.constant 0 : i32
    return %c0_i32, %c0_i32_0 : i32, i32
  }
  func.func @transform_5(%arg0: i32) -> (i32, i32) {
    %c0_i32 = arith.constant 0 : i32
    %c0_i32_0 = arith.constant 0 : i32
    return %arg0, %c0_i32 : i32, i32
  }
  func.func @transform_6(%arg0: i32) -> (i32, i32) {
    %c0_i32 = arith.constant 0 : i32
    %c0_i32_0 = arith.constant 0 : i32
    return %arg0, %c0_i32 : i32, i32
  }
}

module attributes {stable_mosaic.version = 11 : i64} {
  func.func @_conv2_kernel(%arg0: i32, %arg1: memref<1x272x16xbf16, #tpu.memory_space<vmem>>, %arg2: memref<1x272x16xbf16, #tpu.memory_space<vmem>>, %arg3: memref<1x272x16xbf16, #tpu.memory_space<vmem>>, %arg4: memref<1x272x16xbf16, #tpu.memory_space<vmem>>, %arg5: memref<9x16x16xbf16, #tpu.memory_space<vmem>>, %arg6: memref<1x16xf32, #tpu.memory_space<vmem>>, %arg7: memref<1x240x16xbf16, #tpu.memory_space<vmem>>) attributes {dimension_semantics = [#tpu.dimension_semantics<parallel>], iteration_bounds = array<i64: 2>, scalar_prefetch = 0 : i64, scratch_operands = 0 : i64, tpu.core_type = #tpu.core_type<tc>, window_params = [{transform_indices = @transform_0, window_bounds = array<i64: 1, 272, 16>}, {transform_indices = @transform_1, window_bounds = array<i64: 1, 272, 16>}, {transform_indices = @transform_2, window_bounds = array<i64: 1, 272, 16>}, {transform_indices = @transform_3, window_bounds = array<i64: 1, 272, 16>}, {pipeline_mode = #tpu.pipeline_mode<synchronous>, transform_indices = @transform_4, window_bounds = array<i64: 9, 16, 16>}, {pipeline_mode = #tpu.pipeline_mode<synchronous>, transform_indices = @transform_5, window_bounds = array<i64: 1, 16>}, {transform_indices = @transform_6, window_bounds = array<i64: 1, 240, 16>}]} {
    %cst = arith.constant 0.000000e+00 : f32
    %0 = vector.broadcast %cst : f32 to vector<240x16xf32>
    %c0 = arith.constant 0 : index
    %c0_0 = arith.constant 0 : index
    %1 = vector.load %arg6[%c0, %c0_0] : memref<1x16xf32, #tpu.memory_space<vmem>>, vector<1x16xf32>
    %2 = vector.broadcast %1 : vector<1x16xf32> to vector<240x16xf32>
    %3 = arith.addf %0, %2 : vector<240x16xf32>
    %c0_1 = arith.constant 0 : index
    %c0_2 = arith.constant 0 : index
    %c0_3 = arith.constant 0 : index
    %4 = vector.load %arg1[%c0_1, %c0_2, %c0_3] : memref<1x272x16xbf16, #tpu.memory_space<vmem>>, vector<1x240x16xbf16>
    %5 = vector.shape_cast %4 : vector<1x240x16xbf16> to vector<240x16xbf16>
    %c0_4 = arith.constant 0 : index
    %c0_5 = arith.constant 0 : index
    %c0_6 = arith.constant 0 : index
    %6 = vector.load %arg5[%c0_4, %c0_5, %c0_6] : memref<9x16x16xbf16, #tpu.memory_space<vmem>>, vector<1x16x16xbf16>
    %7 = vector.shape_cast %6 : vector<1x16x16xbf16> to vector<16x16xbf16>
    %cst_7 = arith.constant dense<0.000000e+00> : vector<240x16xf32>
    %8 = tpu.matmul %5, %7, %cst_7 {dimension_numbers = #tpu.dot_dimension_numbers<[1], [0], [0], [1], [0, 0, 1, 1], [], []>} : vector<240x16xbf16>, vector<16x16xbf16>, vector<240x16xf32> -> vector<240x16xf32>
    %9 = arith.addf %3, %8 : vector<240x16xf32>
    %c0_8 = arith.constant 0 : index
    %c0_9 = arith.constant 0 : index
    %c0_10 = arith.constant 0 : index
    %10 = vector.load %arg2[%c0_8, %c0_9, %c0_10] : memref<1x272x16xbf16, #tpu.memory_space<vmem>>, vector<1x240x16xbf16>
    %11 = vector.shape_cast %10 : vector<1x240x16xbf16> to vector<240x16xbf16>
    %c1 = arith.constant 1 : index
    %c0_11 = arith.constant 0 : index
    %c0_12 = arith.constant 0 : index
    %12 = vector.load %arg5[%c1, %c0_11, %c0_12] : memref<9x16x16xbf16, #tpu.memory_space<vmem>>, vector<1x16x16xbf16>
    %13 = vector.shape_cast %12 : vector<1x16x16xbf16> to vector<16x16xbf16>
    %cst_13 = arith.constant dense<0.000000e+00> : vector<240x16xf32>
    %14 = tpu.matmul %11, %13, %cst_13 {dimension_numbers = #tpu.dot_dimension_numbers<[1], [0], [0], [1], [0, 0, 1, 1], [], []>} : vector<240x16xbf16>, vector<16x16xbf16>, vector<240x16xf32> -> vector<240x16xf32>
    %15 = arith.addf %9, %14 : vector<240x16xf32>
    %c0_14 = arith.constant 0 : index
    %c1_15 = arith.constant 1 : index
    %c0_16 = arith.constant 0 : index
    %16 = vector.load %arg1[%c0_14, %c1_15, %c0_16] : memref<1x272x16xbf16, #tpu.memory_space<vmem>>, vector<1x240x16xbf16>
    %17 = vector.shape_cast %16 : vector<1x240x16xbf16> to vector<240x16xbf16>
    %c2 = arith.constant 2 : index
    %c0_17 = arith.constant 0 : index
    %c0_18 = arith.constant 0 : index
    %18 = vector.load %arg5[%c2, %c0_17, %c0_18] : memref<9x16x16xbf16, #tpu.memory_space<vmem>>, vector<1x16x16xbf16>
    %19 = vector.shape_cast %18 : vector<1x16x16xbf16> to vector<16x16xbf16>
    %cst_19 = arith.constant dense<0.000000e+00> : vector<240x16xf32>
    %20 = tpu.matmul %17, %19, %cst_19 {dimension_numbers = #tpu.dot_dimension_numbers<[1], [0], [0], [1], [0, 0, 1, 1], [], []>} : vector<240x16xbf16>, vector<16x16xbf16>, vector<240x16xf32> -> vector<240x16xf32>
    %21 = arith.addf %15, %20 : vector<240x16xf32>
    %c0_20 = arith.constant 0 : index
    %c0_21 = arith.constant 0 : index
    %c0_22 = arith.constant 0 : index
    %22 = vector.load %arg3[%c0_20, %c0_21, %c0_22] : memref<1x272x16xbf16, #tpu.memory_space<vmem>>, vector<1x240x16xbf16>
    %23 = vector.shape_cast %22 : vector<1x240x16xbf16> to vector<240x16xbf16>
    %c3 = arith.constant 3 : index
    %c0_23 = arith.constant 0 : index
    %c0_24 = arith.constant 0 : index
    %24 = vector.load %arg5[%c3, %c0_23, %c0_24] : memref<9x16x16xbf16, #tpu.memory_space<vmem>>, vector<1x16x16xbf16>
    %25 = vector.shape_cast %24 : vector<1x16x16xbf16> to vector<16x16xbf16>
    %cst_25 = arith.constant dense<0.000000e+00> : vector<240x16xf32>
    %26 = tpu.matmul %23, %25, %cst_25 {dimension_numbers = #tpu.dot_dimension_numbers<[1], [0], [0], [1], [0, 0, 1, 1], [], []>} : vector<240x16xbf16>, vector<16x16xbf16>, vector<240x16xf32> -> vector<240x16xf32>
    %27 = arith.addf %21, %26 : vector<240x16xf32>
    %c0_26 = arith.constant 0 : index
    %c0_27 = arith.constant 0 : index
    %c0_28 = arith.constant 0 : index
    %28 = vector.load %arg4[%c0_26, %c0_27, %c0_28] : memref<1x272x16xbf16, #tpu.memory_space<vmem>>, vector<1x240x16xbf16>
    %29 = vector.shape_cast %28 : vector<1x240x16xbf16> to vector<240x16xbf16>
    %c4 = arith.constant 4 : index
    %c0_29 = arith.constant 0 : index
    %c0_30 = arith.constant 0 : index
    %30 = vector.load %arg5[%c4, %c0_29, %c0_30] : memref<9x16x16xbf16, #tpu.memory_space<vmem>>, vector<1x16x16xbf16>
    %31 = vector.shape_cast %30 : vector<1x16x16xbf16> to vector<16x16xbf16>
    %cst_31 = arith.constant dense<0.000000e+00> : vector<240x16xf32>
    %32 = tpu.matmul %29, %31, %cst_31 {dimension_numbers = #tpu.dot_dimension_numbers<[1], [0], [0], [1], [0, 0, 1, 1], [], []>} : vector<240x16xbf16>, vector<16x16xbf16>, vector<240x16xf32> -> vector<240x16xf32>
    %33 = arith.addf %27, %32 : vector<240x16xf32>
    %c0_32 = arith.constant 0 : index
    %c1_33 = arith.constant 1 : index
    %c0_34 = arith.constant 0 : index
    %34 = vector.load %arg3[%c0_32, %c1_33, %c0_34] : memref<1x272x16xbf16, #tpu.memory_space<vmem>>, vector<1x240x16xbf16>
    %35 = vector.shape_cast %34 : vector<1x240x16xbf16> to vector<240x16xbf16>
    %c5 = arith.constant 5 : index
    %c0_35 = arith.constant 0 : index
    %c0_36 = arith.constant 0 : index
    %36 = vector.load %arg5[%c5, %c0_35, %c0_36] : memref<9x16x16xbf16, #tpu.memory_space<vmem>>, vector<1x16x16xbf16>
    %37 = vector.shape_cast %36 : vector<1x16x16xbf16> to vector<16x16xbf16>
    %cst_37 = arith.constant dense<0.000000e+00> : vector<240x16xf32>
    %38 = tpu.matmul %35, %37, %cst_37 {dimension_numbers = #tpu.dot_dimension_numbers<[1], [0], [0], [1], [0, 0, 1, 1], [], []>} : vector<240x16xbf16>, vector<16x16xbf16>, vector<240x16xf32> -> vector<240x16xf32>
    %39 = arith.addf %33, %38 : vector<240x16xf32>
    %c0_38 = arith.constant 0 : index
    %c16 = arith.constant 16 : index
    %c0_39 = arith.constant 0 : index
    %40 = vector.load %arg1[%c0_38, %c16, %c0_39] : memref<1x272x16xbf16, #tpu.memory_space<vmem>>, vector<1x240x16xbf16>
    %41 = vector.shape_cast %40 : vector<1x240x16xbf16> to vector<240x16xbf16>
    %c6 = arith.constant 6 : index
    %c0_40 = arith.constant 0 : index
    %c0_41 = arith.constant 0 : index
    %42 = vector.load %arg5[%c6, %c0_40, %c0_41] : memref<9x16x16xbf16, #tpu.memory_space<vmem>>, vector<1x16x16xbf16>
    %43 = vector.shape_cast %42 : vector<1x16x16xbf16> to vector<16x16xbf16>
    %cst_42 = arith.constant dense<0.000000e+00> : vector<240x16xf32>
    %44 = tpu.matmul %41, %43, %cst_42 {dimension_numbers = #tpu.dot_dimension_numbers<[1], [0], [0], [1], [0, 0, 1, 1], [], []>} : vector<240x16xbf16>, vector<16x16xbf16>, vector<240x16xf32> -> vector<240x16xf32>
    %45 = arith.addf %39, %44 : vector<240x16xf32>
    %c0_43 = arith.constant 0 : index
    %c16_44 = arith.constant 16 : index
    %c0_45 = arith.constant 0 : index
    %46 = vector.load %arg2[%c0_43, %c16_44, %c0_45] : memref<1x272x16xbf16, #tpu.memory_space<vmem>>, vector<1x240x16xbf16>
    %47 = vector.shape_cast %46 : vector<1x240x16xbf16> to vector<240x16xbf16>
    %c7 = arith.constant 7 : index
    %c0_46 = arith.constant 0 : index
    %c0_47 = arith.constant 0 : index
    %48 = vector.load %arg5[%c7, %c0_46, %c0_47] : memref<9x16x16xbf16, #tpu.memory_space<vmem>>, vector<1x16x16xbf16>
    %49 = vector.shape_cast %48 : vector<1x16x16xbf16> to vector<16x16xbf16>
    %cst_48 = arith.constant dense<0.000000e+00> : vector<240x16xf32>
    %50 = tpu.matmul %47, %49, %cst_48 {dimension_numbers = #tpu.dot_dimension_numbers<[1], [0], [0], [1], [0, 0, 1, 1], [], []>} : vector<240x16xbf16>, vector<16x16xbf16>, vector<240x16xf32> -> vector<240x16xf32>
    %51 = arith.addf %45, %50 : vector<240x16xf32>
    %c0_49 = arith.constant 0 : index
    %c17 = arith.constant 17 : index
    %c0_50 = arith.constant 0 : index
    %52 = vector.load %arg1[%c0_49, %c17, %c0_50] : memref<1x272x16xbf16, #tpu.memory_space<vmem>>, vector<1x240x16xbf16>
    %53 = vector.shape_cast %52 : vector<1x240x16xbf16> to vector<240x16xbf16>
    %c8 = arith.constant 8 : index
    %c0_51 = arith.constant 0 : index
    %c0_52 = arith.constant 0 : index
    %54 = vector.load %arg5[%c8, %c0_51, %c0_52] : memref<9x16x16xbf16, #tpu.memory_space<vmem>>, vector<1x16x16xbf16>
    %55 = vector.shape_cast %54 : vector<1x16x16xbf16> to vector<16x16xbf16>
    %cst_53 = arith.constant dense<0.000000e+00> : vector<240x16xf32>
    %56 = tpu.matmul %53, %55, %cst_53 {dimension_numbers = #tpu.dot_dimension_numbers<[1], [0], [0], [1], [0, 0, 1, 1], [], []>} : vector<240x16xbf16>, vector<16x16xbf16>, vector<240x16xf32> -> vector<240x16xf32>
    %57 = arith.addf %51, %56 : vector<240x16xf32>
    %58 = arith.truncf %57 : vector<240x16xf32> to vector<240x16xbf16>
    %c0_54 = arith.constant 0 : index
    %c0_55 = arith.constant 0 : index
    %c0_56 = arith.constant 0 : index
    %59 = vector.load %arg7[%c0_54, %c0_55, %c0_56] : memref<1x240x16xbf16, #tpu.memory_space<vmem>>, vector<1x240x16xbf16>
    %60 = vector.shape_cast %59 : vector<1x240x16xbf16> to vector<240x16xbf16>
    %61 = vector.shape_cast %58 : vector<240x16xbf16> to vector<1x240x16xbf16>
    tpu.vector_store %arg7[%c0_54, %c0_55, %c0_56], %61 {strides = array<i32>} : memref<1x240x16xbf16, #tpu.memory_space<vmem>>, vector<1x240x16xbf16>,
    return
  }
  func.func @transform_0(%arg0: i32) -> (i32, i32, i32) {
    %c0_i32 = arith.constant 0 : i32
    %c0_i32_0 = arith.constant 0 : i32
    %c0_i32_1 = arith.constant 0 : i32
    return %arg0, %c0_i32, %c0_i32_0 : i32, i32, i32
  }
  func.func @transform_1(%arg0: i32) -> (i32, i32, i32) {
    %c0_i32 = arith.constant 0 : i32
    %c0_i32_0 = arith.constant 0 : i32
    %c0_i32_1 = arith.constant 0 : i32
    return %arg0, %c0_i32, %c0_i32_0 : i32, i32, i32
  }
  func.func @transform_2(%arg0: i32) -> (i32, i32, i32) {
    %c0_i32 = arith.constant 0 : i32
    %c0_i32_0 = arith.constant 0 : i32
    %c0_i32_1 = arith.constant 0 : i32
    return %arg0, %c0_i32, %c0_i32_0 : i32, i32, i32
  }
  func.func @transform_3(%arg0: i32) -> (i32, i32, i32) {
    %c0_i32 = arith.constant 0 : i32
    %c0_i32_0 = arith.constant 0 : i32
    %c0_i32_1 = arith.constant 0 : i32
    return %arg0, %c0_i32, %c0_i32_0 : i32, i32, i32
  }
  func.func @transform_4(%arg0: i32) -> (i32, i32, i32) {
    %c0_i32 = arith.constant 0 : i32
    %c0_i32_0 = arith.constant 0 : i32
    %c0_i32_1 = arith.constant 0 : i32
    %c0_i32_2 = arith.constant 0 : i32
    return %c0_i32, %c0_i32_0, %c0_i32_1 : i32, i32, i32
  }
  func.func @transform_5(%arg0: i32) -> (i32, i32) {
    %c0_i32 = arith.constant 0 : i32
    %c0_i32_0 = arith.constant 0 : i32
    %c0_i32_1 = arith.constant 0 : i32
    return %c0_i32, %c0_i32_0 : i32, i32
  }
  func.func @transform_6(%arg0: i32) -> (i32, i32, i32) {
    %c0_i32 = arith.constant 0 : i32
    %c0_i32_0 = arith.constant 0 : i32
    %c0_i32_1 = arith.constant 0 : i32
    return %arg0, %c0_i32, %c0_i32_0 : i32, i32, i32
  }
}

module attributes {stable_mosaic.version = 11 : i64} {
  func.func @_pooled_branch_kernel(%arg0: i32, %arg1: memref<1x45x5x16xbf16, #tpu.memory_space<vmem>>, %arg2: memref<9x16x16xbf16, #tpu.memory_space<vmem>>, %arg3: memref<1x16xf32, #tpu.memory_space<vmem>>, %arg4: memref<9x16x16xbf16, #tpu.memory_space<vmem>>, %arg5: memref<1x16xf32, #tpu.memory_space<vmem>>, %arg6: memref<9x16x16xbf16, #tpu.memory_space<vmem>>, %arg7: memref<1x16xf32, #tpu.memory_space<vmem>>, %arg8: memref<25x1xf32, #tpu.memory_space<vmem>>, %arg9: memref<32x3xf32, #tpu.memory_space<vmem>>, %arg10: memref<1x3x32x16xf32, #tpu.memory_space<vmem>>, %arg11: memref<37x16xf32, #tpu.memory_space<vmem>>, %arg12: memref<37x16xf32, #tpu.memory_space<vmem>>) attributes {dimension_semantics = [#tpu.dimension_semantics<parallel>], iteration_bounds = array<i64: 2>, scalar_prefetch = 0 : i64, scratch_operands = 2 : i64, tpu.core_type = #tpu.core_type<tc>, window_params = [{transform_indices = @transform_0, window_bounds = array<i64: 1, 45, 5, 16>}, {pipeline_mode = #tpu.pipeline_mode<synchronous>, transform_indices = @transform_1, window_bounds = array<i64: 9, 16, 16>}, {pipeline_mode = #tpu.pipeline_mode<synchronous>, transform_indices = @transform_2, window_bounds = array<i64: 1, 16>}, {pipeline_mode = #tpu.pipeline_mode<synchronous>, transform_indices = @transform_3, window_bounds = array<i64: 9, 16, 16>}, {pipeline_mode = #tpu.pipeline_mode<synchronous>, transform_indices = @transform_4, window_bounds = array<i64: 1, 16>}, {pipeline_mode = #tpu.pipeline_mode<synchronous>, transform_indices = @transform_5, window_bounds = array<i64: 9, 16, 16>}, {pipeline_mode = #tpu.pipeline_mode<synchronous>, transform_indices = @transform_6, window_bounds = array<i64: 1, 16>}, {pipeline_mode = #tpu.pipeline_mode<synchronous>, transform_indices = @transform_7, window_bounds = array<i64: 25, 1>}, {pipeline_mode = #tpu.pipeline_mode<synchronous>, transform_indices = @transform_8, window_bounds = array<i64: 32, 3>}, {transform_indices = @transform_9, window_bounds = array<i64: 1, 3, 32, 16>}]} {
    %c0 = arith.constant 0 : index
    %c0_0 = arith.constant 0 : index
    %c0_1 = arith.constant 0 : index
    %c0_2 = arith.constant 0 : index
    %0 = vector.load %arg1[%c0, %c0_0, %c0_1, %c0_2] : memref<1x45x5x16xbf16, #tpu.memory_space<vmem>>, vector<1x3x3x16xbf16>
    %1 = vector.shape_cast %0 : vector<1x3x3x16xbf16> to vector<3x3x16xbf16>
    %2 = arith.extf %1 : vector<3x3x16xbf16> to vector<3x3x16xf32>
    %c0_3 = arith.constant 0 : index
    %c5 = arith.constant 5 : index
    %c0_4 = arith.constant 0 : index
    %c0_5 = arith.constant 0 : index
    %3 = vector.load %arg1[%c0_3, %c5, %c0_4, %c0_5] : memref<1x45x5x16xbf16, #tpu.memory_space<vmem>>, vector<1x3x3x16xbf16>
    %4 = vector.shape_cast %3 : vector<1x3x3x16xbf16> to vector<3x3x16xbf16>
    %5 = arith.extf %4 : vector<3x3x16xbf16> to vector<3x3x16xf32>
    %6 = arith.maximumf %2, %5 : vector<3x3x16xf32>
    %c0_6 = arith.constant 0 : index
    %c10 = arith.constant 10 : index
    %c0_7 = arith.constant 0 : index
    %c0_8 = arith.constant 0 : index
    %7 = vector.load %arg1[%c0_6, %c10, %c0_7, %c0_8] : memref<1x45x5x16xbf16, #tpu.memory_space<vmem>>, vector<1x3x3x16xbf16>
    %8 = vector.shape_cast %7 : vector<1x3x3x16xbf16> to vector<3x3x16xbf16>
    %9 = arith.extf %8 : vector<3x3x16xbf16> to vector<3x3x16xf32>
    %10 = arith.maximumf %6, %9 : vector<3x3x16xf32>
    %c0_9 = arith.constant 0 : index
    %c0_10 = arith.constant 0 : index
    %c1 = arith.constant 1 : index
    %c0_11 = arith.constant 0 : index
    %11 = vector.load %arg1[%c0_9, %c0_10, %c1, %c0_11] : memref<1x45x5x16xbf16, #tpu.memory_space<vmem>>, vector<1x3x3x16xbf16>
    %12 = vector.shape_cast %11 : vector<1x3x3x16xbf16> to vector<3x3x16xbf16>
    %13 = arith.extf %12 : vector<3x3x16xbf16> to vector<3x3x16xf32>
    %14 = arith.maximumf %10, %13 : vector<3x3x16xf32>
    %c0_12 = arith.constant 0 : index
    %c5_13 = arith.constant 5 : index
    %c1_14 = arith.constant 1 : index
    %c0_15 = arith.constant 0 : index
    %15 = vector.load %arg1[%c0_12, %c5_13, %c1_14, %c0_15] : memref<1x45x5x16xbf16, #tpu.memory_space<vmem>>, vector<1x3x3x16xbf16>
    %16 = vector.shape_cast %15 : vector<1x3x3x16xbf16> to vector<3x3x16xbf16>
    %17 = arith.extf %16 : vector<3x3x16xbf16> to vector<3x3x16xf32>
    %18 = arith.maximumf %14, %17 : vector<3x3x16xf32>
    %c0_16 = arith.constant 0 : index
    %c10_17 = arith.constant 10 : index
    %c1_18 = arith.constant 1 : index
    %c0_19 = arith.constant 0 : index
    %19 = vector.load %arg1[%c0_16, %c10_17, %c1_18, %c0_19] : memref<1x45x5x16xbf16, #tpu.memory_space<vmem>>, vector<1x3x3x16xbf16>
    %20 = vector.shape_cast %19 : vector<1x3x3x16xbf16> to vector<3x3x16xbf16>
    %21 = arith.extf %20 : vector<3x3x16xbf16> to vector<3x3x16xf32>
    %22 = arith.maximumf %18, %21 : vector<3x3x16xf32>
    %c0_20 = arith.constant 0 : index
    %c0_21 = arith.constant 0 : index
    %c2 = arith.constant 2 : index
    %c0_22 = arith.constant 0 : index
    %23 = vector.load %arg1[%c0_20, %c0_21, %c2, %c0_22] : memref<1x45x5x16xbf16, #tpu.memory_space<vmem>>, vector<1x3x3x16xbf16>
    %24 = vector.shape_cast %23 : vector<1x3x3x16xbf16> to vector<3x3x16xbf16>
    %25 = arith.extf %24 : vector<3x3x16xbf16> to vector<3x3x16xf32>
    %26 = arith.maximumf %22, %25 : vector<3x3x16xf32>
    %c0_23 = arith.constant 0 : index
    %c15 = arith.constant 15 : index
    %c0_24 = arith.constant 0 : index
    %c0_25 = arith.constant 0 : index
    %27 = vector.load %arg1[%c0_23, %c15, %c0_24, %c0_25] : memref<1x45x5x16xbf16, #tpu.memory_space<vmem>>, vector<1x3x3x16xbf16>
    %28 = vector.shape_cast %27 : vector<1x3x3x16xbf16> to vector<3x3x16xbf16>
    %29 = arith.extf %28 : vector<3x3x16xbf16> to vector<3x3x16xf32>
    %30 = arith.maximumf %26, %29 : vector<3x3x16xf32>
    %c0_26 = arith.constant 0 : index
    %c20 = arith.constant 20 : index
    %c0_27 = arith.constant 0 : index
    %c0_28 = arith.constant 0 : index
    %31 = vector.load %arg1[%c0_26, %c20, %c0_27, %c0_28] : memref<1x45x5x16xbf16, #tpu.memory_space<vmem>>, vector<1x3x3x16xbf16>
    %32 = vector.shape_cast %31 : vector<1x3x3x16xbf16> to vector<3x3x16xbf16>
    %33 = arith.extf %32 : vector<3x3x16xbf16> to vector<3x3x16xf32>
    %34 = arith.maximumf %30, %33 : vector<3x3x16xf32>
    %c0_29 = arith.constant 0 : index
    %c25 = arith.constant 25 : index
    %c0_30 = arith.constant 0 : index
    %c0_31 = arith.constant 0 : index
    %35 = vector.load %arg1[%c0_29, %c25, %c0_30, %c0_31] : memref<1x45x5x16xbf16, #tpu.memory_space<vmem>>, vector<1x3x3x16xbf16>
    %36 = vector.shape_cast %35 : vector<1x3x3x16xbf16> to vector<3x3x16xbf16>
    %37 = arith.extf %36 : vector<3x3x16xbf16> to vector<3x3x16xf32>
    %38 = arith.maximumf %34, %37 : vector<3x3x16xf32>
    %c0_32 = arith.constant 0 : index
    %c15_33 = arith.constant 15 : index
    %c1_34 = arith.constant 1 : index
    %c0_35 = arith.constant 0 : index
    %39 = vector.load %arg1[%c0_32, %c15_33, %c1_34, %c0_35] : memref<1x45x5x16xbf16, #tpu.memory_space<vmem>>, vector<1x3x3x16xbf16>
    %40 = vector.shape_cast %39 : vector<1x3x3x16xbf16> to vector<3x3x16xbf16>
    %41 = arith.extf %40 : vector<3x3x16xbf16> to vector<3x3x16xf32>
    %42 = arith.maximumf %38, %41 : vector<3x3x16xf32>
    %c0_36 = arith.constant 0 : index
    %c20_37 = arith.constant 20 : index
    %c1_38 = arith.constant 1 : index
    %c0_39 = arith.constant 0 : index
    %43 = vector.load %arg1[%c0_36, %c20_37, %c1_38, %c0_39] : memref<1x45x5x16xbf16, #tpu.memory_space<vmem>>, vector<1x3x3x16xbf16>
    %44 = vector.shape_cast %43 : vector<1x3x3x16xbf16> to vector<3x3x16xbf16>
    %45 = arith.extf %44 : vector<3x3x16xbf16> to vector<3x3x16xf32>
    %46 = arith.maximumf %42, %45 : vector<3x3x16xf32>
    %c0_40 = arith.constant 0 : index
    %c25_41 = arith.constant 25 : index
    %c1_42 = arith.constant 1 : index
    %c0_43 = arith.constant 0 : index
    %47 = vector.load %arg1[%c0_40, %c25_41, %c1_42, %c0_43] : memref<1x45x5x16xbf16, #tpu.memory_space<vmem>>, vector<1x3x3x16xbf16>
    %48 = vector.shape_cast %47 : vector<1x3x3x16xbf16> to vector<3x3x16xbf16>
    %49 = arith.extf %48 : vector<3x3x16xbf16> to vector<3x3x16xf32>
    %50 = arith.maximumf %46, %49 : vector<3x3x16xf32>
    %c0_44 = arith.constant 0 : index
    %c15_45 = arith.constant 15 : index
    %c2_46 = arith.constant 2 : index
    %c0_47 = arith.constant 0 : index
    %51 = vector.load %arg1[%c0_44, %c15_45, %c2_46, %c0_47] : memref<1x45x5x16xbf16, #tpu.memory_space<vmem>>, vector<1x3x3x16xbf16>
    %52 = vector.shape_cast %51 : vector<1x3x3x16xbf16> to vector<3x3x16xbf16>
    %53 = arith.extf %52 : vector<3x3x16xbf16> to vector<3x3x16xf32>
    %54 = arith.maximumf %50, %53 : vector<3x3x16xf32>
    %c0_48 = arith.constant 0 : index
    %c30 = arith.constant 30 : index
    %c0_49 = arith.constant 0 : index
    %c0_50 = arith.constant 0 : index
    %55 = vector.load %arg1[%c0_48, %c30, %c0_49, %c0_50] : memref<1x45x5x16xbf16, #tpu.memory_space<vmem>>, vector<1x3x3x16xbf16>
    %56 = vector.shape_cast %55 : vector<1x3x3x16xbf16> to vector<3x3x16xbf16>
    %57 = arith.extf %56 : vector<3x3x16xbf16> to vector<3x3x16xf32>
    %58 = arith.maximumf %54, %57 : vector<3x3x16xf32>
    %c0_51 = arith.constant 0 : index
    %c35 = arith.constant 35 : index
    %c0_52 = arith.constant 0 : index
    %c0_53 = arith.constant 0 : index
    %59 = vector.load %arg1[%c0_51, %c35, %c0_52, %c0_53] : memref<1x45x5x16xbf16, #tpu.memory_space<vmem>>, vector<1x3x3x16xbf16>
    %60 = vector.shape_cast %59 : vector<1x3x3x16xbf16> to vector<3x3x16xbf16>
    %61 = arith.extf %60 : vector<3x3x16xbf16> to vector<3x3x16xf32>
    %62 = arith.maximumf %58, %61 : vector<3x3x16xf32>
    %c0_54 = arith.constant 0 : index
    %c40 = arith.constant 40 : index
    %c0_55 = arith.constant 0 : index
    %c0_56 = arith.constant 0 : index
    %63 = vector.load %arg1[%c0_54, %c40, %c0_55, %c0_56] : memref<1x45x5x16xbf16, #tpu.memory_space<vmem>>, vector<1x3x3x16xbf16>
    %64 = vector.shape_cast %63 : vector<1x3x3x16xbf16> to vector<3x3x16xbf16>
    %65 = arith.extf %64 : vector<3x3x16xbf16> to vector<3x3x16xf32>
    %66 = arith.maximumf %62, %65 : vector<3x3x16xf32>
    %c0_57 = arith.constant 0 : index
    %c30_58 = arith.constant 30 : index
    %c1_59 = arith.constant 1 : index
    %c0_60 = arith.constant 0 : index
    %67 = vector.load %arg1[%c0_57, %c30_58, %c1_59, %c0_60] : memref<1x45x5x16xbf16, #tpu.memory_space<vmem>>, vector<1x3x3x16xbf16>
    %68 = vector.shape_cast %67 : vector<1x3x3x16xbf16> to vector<3x3x16xbf16>
    %69 = arith.extf %68 : vector<3x3x16xbf16> to vector<3x3x16xf32>
    %70 = arith.maximumf %66, %69 : vector<3x3x16xf32>
    %c0_61 = arith.constant 0 : index
    %c35_62 = arith.constant 35 : index
    %c1_63 = arith.constant 1 : index
    %c0_64 = arith.constant 0 : index
    %71 = vector.load %arg1[%c0_61, %c35_62, %c1_63, %c0_64] : memref<1x45x5x16xbf16, #tpu.memory_space<vmem>>, vector<1x3x3x16xbf16>
    %72 = vector.shape_cast %71 : vector<1x3x3x16xbf16> to vector<3x3x16xbf16>
    %73 = arith.extf %72 : vector<3x3x16xbf16> to vector<3x3x16xf32>
    %74 = arith.maximumf %70, %73 : vector<3x3x16xf32>
    %c0_65 = arith.constant 0 : index
    %c40_66 = arith.constant 40 : index
    %c1_67 = arith.constant 1 : index
    %c0_68 = arith.constant 0 : index
    %75 = vector.load %arg1[%c0_65, %c40_66, %c1_67, %c0_68] : memref<1x45x5x16xbf16, #tpu.memory_space<vmem>>, vector<1x3x3x16xbf16>
    %76 = vector.shape_cast %75 : vector<1x3x3x16xbf16> to vector<3x3x16xbf16>
    %77 = arith.extf %76 : vector<3x3x16xbf16> to vector<3x3x16xf32>
    %78 = arith.maximumf %74, %77 : vector<3x3x16xf32>
    %c0_69 = arith.constant 0 : index
    %c30_70 = arith.constant 30 : index
    %c2_71 = arith.constant 2 : index
    %c0_72 = arith.constant 0 : index
    %79 = vector.load %arg1[%c0_69, %c30_70, %c2_71, %c0_72] : memref<1x45x5x16xbf16, #tpu.memory_space<vmem>>, vector<1x3x3x16xbf16>
    %80 = vector.shape_cast %79 : vector<1x3x3x16xbf16> to vector<3x3x16xbf16>
    %81 = arith.extf %80 : vector<3x3x16xbf16> to vector<3x3x16xf32>
    %82 = arith.maximumf %78, %81 : vector<3x3x16xf32>
    %c0_73 = arith.constant 0 : index
    %c1_74 = arith.constant 1 : index
    %c0_75 = arith.constant 0 : index
    %c0_76 = arith.constant 0 : index
    %83 = vector.load %arg1[%c0_73, %c1_74, %c0_75, %c0_76] : memref<1x45x5x16xbf16, #tpu.memory_space<vmem>>, vector<1x3x3x16xbf16>
    %84 = vector.shape_cast %83 : vector<1x3x3x16xbf16> to vector<3x3x16xbf16>
    %85 = arith.extf %84 : vector<3x3x16xbf16> to vector<3x3x16xf32>
    %86 = arith.maximumf %82, %85 : vector<3x3x16xf32>
    %c0_77 = arith.constant 0 : index
    %c6 = arith.constant 6 : index
    %c0_78 = arith.constant 0 : index
    %c0_79 = arith.constant 0 : index
    %87 = vector.load %arg1[%c0_77, %c6, %c0_78, %c0_79] : memref<1x45x5x16xbf16, #tpu.memory_space<vmem>>, vector<1x3x3x16xbf16>
    %88 = vector.shape_cast %87 : vector<1x3x3x16xbf16> to vector<3x3x16xbf16>
    %89 = arith.extf %88 : vector<3x3x16xbf16> to vector<3x3x16xf32>
    %90 = arith.maximumf %86, %89 : vector<3x3x16xf32>
    %c0_80 = arith.constant 0 : index
    %c11 = arith.constant 11 : index
    %c0_81 = arith.constant 0 : index
    %c0_82 = arith.constant 0 : index
    %91 = vector.load %arg1[%c0_80, %c11, %c0_81, %c0_82] : memref<1x45x5x16xbf16, #tpu.memory_space<vmem>>, vector<1x3x3x16xbf16>
    %92 = vector.shape_cast %91 : vector<1x3x3x16xbf16> to vector<3x3x16xbf16>
    %93 = arith.extf %92 : vector<3x3x16xbf16> to vector<3x3x16xf32>
    %94 = arith.maximumf %90, %93 : vector<3x3x16xf32>
    %c0_83 = arith.constant 0 : index
    %c1_84 = arith.constant 1 : index
    %c1_85 = arith.constant 1 : index
    %c0_86 = arith.constant 0 : index
    %95 = vector.load %arg1[%c0_83, %c1_84, %c1_85, %c0_86] : memref<1x45x5x16xbf16, #tpu.memory_space<vmem>>, vector<1x3x3x16xbf16>
    %96 = vector.shape_cast %95 : vector<1x3x3x16xbf16> to vector<3x3x16xbf16>
    %97 = arith.extf %96 : vector<3x3x16xbf16> to vector<3x3x16xf32>
    %98 = arith.maximumf %94, %97 : vector<3x3x16xf32>
    %c0_87 = arith.constant 0 : index
    %c6_88 = arith.constant 6 : index
    %c1_89 = arith.constant 1 : index
    %c0_90 = arith.constant 0 : index
    %99 = vector.load %arg1[%c0_87, %c6_88, %c1_89, %c0_90] : memref<1x45x5x16xbf16, #tpu.memory_space<vmem>>, vector<1x3x3x16xbf16>
    %100 = vector.shape_cast %99 : vector<1x3x3x16xbf16> to vector<3x3x16xbf16>
    %101 = arith.extf %100 : vector<3x3x16xbf16> to vector<3x3x16xf32>
    %102 = arith.maximumf %98, %101 : vector<3x3x16xf32>
    %c0_91 = arith.constant 0 : index
    %c11_92 = arith.constant 11 : index
    %c1_93 = arith.constant 1 : index
    %c0_94 = arith.constant 0 : index
    %103 = vector.load %arg1[%c0_91, %c11_92, %c1_93, %c0_94] : memref<1x45x5x16xbf16, #tpu.memory_space<vmem>>, vector<1x3x3x16xbf16>
    %104 = vector.shape_cast %103 : vector<1x3x3x16xbf16> to vector<3x3x16xbf16>
    %105 = arith.extf %104 : vector<3x3x16xbf16> to vector<3x3x16xf32>
    %106 = arith.maximumf %102, %105 : vector<3x3x16xf32>
    %c0_95 = arith.constant 0 : index
    %c1_96 = arith.constant 1 : index
    %c2_97 = arith.constant 2 : index
    %c0_98 = arith.constant 0 : index
    %107 = vector.load %arg1[%c0_95, %c1_96, %c2_97, %c0_98] : memref<1x45x5x16xbf16, #tpu.memory_space<vmem>>, vector<1x3x3x16xbf16>
    %108 = vector.shape_cast %107 : vector<1x3x3x16xbf16> to vector<3x3x16xbf16>
    %109 = arith.extf %108 : vector<3x3x16xbf16> to vector<3x3x16xf32>
    %110 = arith.maximumf %106, %109 : vector<3x3x16xf32>
    %c0_99 = arith.constant 0 : index
    %c16 = arith.constant 16 : index
    %c0_100 = arith.constant 0 : index
    %c0_101 = arith.constant 0 : index
    %111 = vector.load %arg1[%c0_99, %c16, %c0_100, %c0_101] : memref<1x45x5x16xbf16, #tpu.memory_space<vmem>>, vector<1x3x3x16xbf16>
    %112 = vector.shape_cast %111 : vector<1x3x3x16xbf16> to vector<3x3x16xbf16>
    %113 = arith.extf %112 : vector<3x3x16xbf16> to vector<3x3x16xf32>
    %114 = arith.maximumf %110, %113 : vector<3x3x16xf32>
    %c0_102 = arith.constant 0 : index
    %c21 = arith.constant 21 : index
    %c0_103 = arith.constant 0 : index
    %c0_104 = arith.constant 0 : index
    %115 = vector.load %arg1[%c0_102, %c21, %c0_103, %c0_104] : memref<1x45x5x16xbf16, #tpu.memory_space<vmem>>, vector<1x3x3x16xbf16>
    %116 = vector.shape_cast %115 : vector<1x3x3x16xbf16> to vector<3x3x16xbf16>
    %117 = arith.extf %116 : vector<3x3x16xbf16> to vector<3x3x16xf32>
    %118 = arith.maximumf %114, %117 : vector<3x3x16xf32>
    %c0_105 = arith.constant 0 : index
    %c26 = arith.constant 26 : index
    %c0_106 = arith.constant 0 : index
    %c0_107 = arith.constant 0 : index
    %119 = vector.load %arg1[%c0_105, %c26, %c0_106, %c0_107] : memref<1x45x5x16xbf16, #tpu.memory_space<vmem>>, vector<1x3x3x16xbf16>
    %120 = vector.shape_cast %119 : vector<1x3x3x16xbf16> to vector<3x3x16xbf16>
    %121 = arith.extf %120 : vector<3x3x16xbf16> to vector<3x3x16xf32>
    %122 = arith.maximumf %118, %121 : vector<3x3x16xf32>
    %c0_108 = arith.constant 0 : index
    %c16_109 = arith.constant 16 : index
    %c1_110 = arith.constant 1 : index
    %c0_111 = arith.constant 0 : index
    %123 = vector.load %arg1[%c0_108, %c16_109, %c1_110, %c0_111] : memref<1x45x5x16xbf16, #tpu.memory_space<vmem>>, vector<1x3x3x16xbf16>
    %124 = vector.shape_cast %123 : vector<1x3x3x16xbf16> to vector<3x3x16xbf16>
    %125 = arith.extf %124 : vector<3x3x16xbf16> to vector<3x3x16xf32>
    %126 = arith.maximumf %122, %125 : vector<3x3x16xf32>
    %c0_112 = arith.constant 0 : index
    %c21_113 = arith.constant 21 : index
    %c1_114 = arith.constant 1 : index
    %c0_115 = arith.constant 0 : index
    %127 = vector.load %arg1[%c0_112, %c21_113, %c1_114, %c0_115] : memref<1x45x5x16xbf16, #tpu.memory_space<vmem>>, vector<1x3x3x16xbf16>
    %128 = vector.shape_cast %127 : vector<1x3x3x16xbf16> to vector<3x3x16xbf16>
    %129 = arith.extf %128 : vector<3x3x16xbf16> to vector<3x3x16xf32>
    %130 = arith.maximumf %126, %129 : vector<3x3x16xf32>
    %c0_116 = arith.constant 0 : index
    %c26_117 = arith.constant 26 : index
    %c1_118 = arith.constant 1 : index
    %c0_119 = arith.constant 0 : index
    %131 = vector.load %arg1[%c0_116, %c26_117, %c1_118, %c0_119] : memref<1x45x5x16xbf16, #tpu.memory_space<vmem>>, vector<1x3x3x16xbf16>
    %132 = vector.shape_cast %131 : vector<1x3x3x16xbf16> to vector<3x3x16xbf16>
    %133 = arith.extf %132 : vector<3x3x16xbf16> to vector<3x3x16xf32>
    %134 = arith.maximumf %130, %133 : vector<3x3x16xf32>
    %c0_120 = arith.constant 0 : index
    %c16_121 = arith.constant 16 : index
    %c2_122 = arith.constant 2 : index
    %c0_123 = arith.constant 0 : index
    %135 = vector.load %arg1[%c0_120, %c16_121, %c2_122, %c0_123] : memref<1x45x5x16xbf16, #tpu.memory_space<vmem>>, vector<1x3x3x16xbf16>
    %136 = vector.shape_cast %135 : vector<1x3x3x16xbf16> to vector<3x3x16xbf16>
    %137 = arith.extf %136 : vector<3x3x16xbf16> to vector<3x3x16xf32>
    %138 = arith.maximumf %134, %137 : vector<3x3x16xf32>
    %c0_124 = arith.constant 0 : index
    %c31 = arith.constant 31 : index
    %c0_125 = arith.constant 0 : index
    %c0_126 = arith.constant 0 : index
    %139 = vector.load %arg1[%c0_124, %c31, %c0_125, %c0_126] : memref<1x45x5x16xbf16, #tpu.memory_space<vmem>>, vector<1x3x3x16xbf16>
    %140 = vector.shape_cast %139 : vector<1x3x3x16xbf16> to vector<3x3x16xbf16>
    %141 = arith.extf %140 : vector<3x3x16xbf16> to vector<3x3x16xf32>
    %142 = arith.maximumf %138, %141 : vector<3x3x16xf32>
    %c0_127 = arith.constant 0 : index
    %c36 = arith.constant 36 : index
    %c0_128 = arith.constant 0 : index
    %c0_129 = arith.constant 0 : index
    %143 = vector.load %arg1[%c0_127, %c36, %c0_128, %c0_129] : memref<1x45x5x16xbf16, #tpu.memory_space<vmem>>, vector<1x3x3x16xbf16>
    %144 = vector.shape_cast %143 : vector<1x3x3x16xbf16> to vector<3x3x16xbf16>
    %145 = arith.extf %144 : vector<3x3x16xbf16> to vector<3x3x16xf32>
    %146 = arith.maximumf %142, %145 : vector<3x3x16xf32>
    %c0_130 = arith.constant 0 : index
    %c41 = arith.constant 41 : index
    %c0_131 = arith.constant 0 : index
    %c0_132 = arith.constant 0 : index
    %147 = vector.load %arg1[%c0_130, %c41, %c0_131, %c0_132] : memref<1x45x5x16xbf16, #tpu.memory_space<vmem>>, vector<1x3x3x16xbf16>
    %148 = vector.shape_cast %147 : vector<1x3x3x16xbf16> to vector<3x3x16xbf16>
    %149 = arith.extf %148 : vector<3x3x16xbf16> to vector<3x3x16xf32>
    %150 = arith.maximumf %146, %149 : vector<3x3x16xf32>
    %c0_133 = arith.constant 0 : index
    %c31_134 = arith.constant 31 : index
    %c1_135 = arith.constant 1 : index
    %c0_136 = arith.constant 0 : index
    %151 = vector.load %arg1[%c0_133, %c31_134, %c1_135, %c0_136] : memref<1x45x5x16xbf16, #tpu.memory_space<vmem>>, vector<1x3x3x16xbf16>
    %152 = vector.shape_cast %151 : vector<1x3x3x16xbf16> to vector<3x3x16xbf16>
    %153 = arith.extf %152 : vector<3x3x16xbf16> to vector<3x3x16xf32>
    %154 = arith.maximumf %150, %153 : vector<3x3x16xf32>
    %c0_137 = arith.constant 0 : index
    %c36_138 = arith.constant 36 : index
    %c1_139 = arith.constant 1 : index
    %c0_140 = arith.constant 0 : index
    %155 = vector.load %arg1[%c0_137, %c36_138, %c1_139, %c0_140] : memref<1x45x5x16xbf16, #tpu.memory_space<vmem>>, vector<1x3x3x16xbf16>
    %156 = vector.shape_cast %155 : vector<1x3x3x16xbf16> to vector<3x3x16xbf16>
    %157 = arith.extf %156 : vector<3x3x16xbf16> to vector<3x3x16xf32>
    %158 = arith.maximumf %154, %157 : vector<3x3x16xf32>
    %c0_141 = arith.constant 0 : index
    %c41_142 = arith.constant 41 : index
    %c1_143 = arith.constant 1 : index
    %c0_144 = arith.constant 0 : index
    %159 = vector.load %arg1[%c0_141, %c41_142, %c1_143, %c0_144] : memref<1x45x5x16xbf16, #tpu.memory_space<vmem>>, vector<1x3x3x16xbf16>
    %160 = vector.shape_cast %159 : vector<1x3x3x16xbf16> to vector<3x3x16xbf16>
    %161 = arith.extf %160 : vector<3x3x16xbf16> to vector<3x3x16xf32>
    %162 = arith.maximumf %158, %161 : vector<3x3x16xf32>
    %c0_145 = arith.constant 0 : index
    %c31_146 = arith.constant 31 : index
    %c2_147 = arith.constant 2 : index
    %c0_148 = arith.constant 0 : index
    %163 = vector.load %arg1[%c0_145, %c31_146, %c2_147, %c0_148] : memref<1x45x5x16xbf16, #tpu.memory_space<vmem>>, vector<1x3x3x16xbf16>
    %164 = vector.shape_cast %163 : vector<1x3x3x16xbf16> to vector<3x3x16xbf16>
    %165 = arith.extf %164 : vector<3x3x16xbf16> to vector<3x3x16xf32>
    %166 = arith.maximumf %162, %165 : vector<3x3x16xf32>
    %c0_149 = arith.constant 0 : index
    %c2_150 = arith.constant 2 : index
    %c0_151 = arith.constant 0 : index
    %c0_152 = arith.constant 0 : index
    %167 = vector.load %arg1[%c0_149, %c2_150, %c0_151, %c0_152] : memref<1x45x5x16xbf16, #tpu.memory_space<vmem>>, vector<1x3x3x16xbf16>
    %168 = vector.shape_cast %167 : vector<1x3x3x16xbf16> to vector<3x3x16xbf16>
    %169 = arith.extf %168 : vector<3x3x16xbf16> to vector<3x3x16xf32>
    %170 = arith.maximumf %166, %169 : vector<3x3x16xf32>
    %c0_153 = arith.constant 0 : index
    %c7 = arith.constant 7 : index
    %c0_154 = arith.constant 0 : index
    %c0_155 = arith.constant 0 : index
    %171 = vector.load %arg1[%c0_153, %c7, %c0_154, %c0_155] : memref<1x45x5x16xbf16, #tpu.memory_space<vmem>>, vector<1x3x3x16xbf16>
    %172 = vector.shape_cast %171 : vector<1x3x3x16xbf16> to vector<3x3x16xbf16>
    %173 = arith.extf %172 : vector<3x3x16xbf16> to vector<3x3x16xf32>
    %174 = arith.maximumf %170, %173 : vector<3x3x16xf32>
    %c0_156 = arith.constant 0 : index
    %c12 = arith.constant 12 : index
    %c0_157 = arith.constant 0 : index
    %c0_158 = arith.constant 0 : index
    %175 = vector.load %arg1[%c0_156, %c12, %c0_157, %c0_158] : memref<1x45x5x16xbf16, #tpu.memory_space<vmem>>, vector<1x3x3x16xbf16>
    %176 = vector.shape_cast %175 : vector<1x3x3x16xbf16> to vector<3x3x16xbf16>
    %177 = arith.extf %176 : vector<3x3x16xbf16> to vector<3x3x16xf32>
    %178 = arith.maximumf %174, %177 : vector<3x3x16xf32>
    %c0_159 = arith.constant 0 : index
    %c2_160 = arith.constant 2 : index
    %c1_161 = arith.constant 1 : index
    %c0_162 = arith.constant 0 : index
    %179 = vector.load %arg1[%c0_159, %c2_160, %c1_161, %c0_162] : memref<1x45x5x16xbf16, #tpu.memory_space<vmem>>, vector<1x3x3x16xbf16>
    %180 = vector.shape_cast %179 : vector<1x3x3x16xbf16> to vector<3x3x16xbf16>
    %181 = arith.extf %180 : vector<3x3x16xbf16> to vector<3x3x16xf32>
    %182 = arith.maximumf %178, %181 : vector<3x3x16xf32>
    %c0_163 = arith.constant 0 : index
    %c7_164 = arith.constant 7 : index
    %c1_165 = arith.constant 1 : index
    %c0_166 = arith.constant 0 : index
    %183 = vector.load %arg1[%c0_163, %c7_164, %c1_165, %c0_166] : memref<1x45x5x16xbf16, #tpu.memory_space<vmem>>, vector<1x3x3x16xbf16>
    %184 = vector.shape_cast %183 : vector<1x3x3x16xbf16> to vector<3x3x16xbf16>
    %185 = arith.extf %184 : vector<3x3x16xbf16> to vector<3x3x16xf32>
    %186 = arith.maximumf %182, %185 : vector<3x3x16xf32>
    %c0_167 = arith.constant 0 : index
    %c12_168 = arith.constant 12 : index
    %c1_169 = arith.constant 1 : index
    %c0_170 = arith.constant 0 : index
    %187 = vector.load %arg1[%c0_167, %c12_168, %c1_169, %c0_170] : memref<1x45x5x16xbf16, #tpu.memory_space<vmem>>, vector<1x3x3x16xbf16>
    %188 = vector.shape_cast %187 : vector<1x3x3x16xbf16> to vector<3x3x16xbf16>
    %189 = arith.extf %188 : vector<3x3x16xbf16> to vector<3x3x16xf32>
    %190 = arith.maximumf %186, %189 : vector<3x3x16xf32>
    %c0_171 = arith.constant 0 : index
    %c2_172 = arith.constant 2 : index
    %c2_173 = arith.constant 2 : index
    %c0_174 = arith.constant 0 : index
    %191 = vector.load %arg1[%c0_171, %c2_172, %c2_173, %c0_174] : memref<1x45x5x16xbf16, #tpu.memory_space<vmem>>, vector<1x3x3x16xbf16>
    %192 = vector.shape_cast %191 : vector<1x3x3x16xbf16> to vector<3x3x16xbf16>
    %193 = arith.extf %192 : vector<3x3x16xbf16> to vector<3x3x16xf32>
    %194 = arith.maximumf %190, %193 : vector<3x3x16xf32>
    %cst = arith.constant 0.000000e+00 : f32
    %195 = vector.broadcast %cst : f32 to vector<37x16xf32>
    %c0_175 = arith.constant 0 : index
    %c0_176 = arith.constant 0 : index
    %196 = vector.load %arg11[%c0_175, %c0_176] : memref<37x16xf32, #tpu.memory_space<vmem>>, vector<37x16xf32>
    tpu.vector_store %arg11[%c0_175, %c0_176], %195 {strides = array<i32>} : memref<37x16xf32, #tpu.memory_space<vmem>>, vector<37x16xf32>,
    %cst_177 = arith.constant 0.000000e+00 : f32
    %197 = vector.broadcast %cst_177 : f32 to vector<37x16xf32>
    %c0_178 = arith.constant 0 : index
    %c0_179 = arith.constant 0 : index
    %198 = vector.load %arg12[%c0_178, %c0_179] : memref<37x16xf32, #tpu.memory_space<vmem>>, vector<37x16xf32>
    tpu.vector_store %arg12[%c0_178, %c0_179], %197 {strides = array<i32>} : memref<37x16xf32, #tpu.memory_space<vmem>>, vector<37x16xf32>,
    %199 = vector.extract_strided_slice %194 {offsets = [0, 0, 0], sizes = [1, 3, 16], strides = [1, 1, 1]} : vector<3x3x16xf32> to vector<1x3x16xf32>
    %200 = vector.shape_cast %199 : vector<1x3x16xf32> to vector<3x16xf32>
    %c12_180 = arith.constant 12 : index
    %c0_181 = arith.constant 0 : index
    %201 = vector.load %arg11[%c12_180, %c0_181] : memref<37x16xf32, #tpu.memory_space<vmem>>, vector<3x16xf32>
    tpu.vector_store %arg11[%c12_180, %c0_181], %200 {strides = array<i32>} : memref<37x16xf32, #tpu.memory_space<vmem>>, vector<3x16xf32>,
    %202 = vector.extract_strided_slice %194 {offsets = [1, 0, 0], sizes = [1, 3, 16], strides = [1, 1, 1]} : vector<3x3x16xf32> to vector<1x3x16xf32>
    %203 = vector.shape_cast %202 : vector<1x3x16xf32> to vector<3x16xf32>
    %c17 = arith.constant 17 : index
    %c0_182 = arith.constant 0 : index
    %204 = vector.load %arg11[%c17, %c0_182] : memref<37x16xf32, #tpu.memory_space<vmem>>, vector<3x16xf32>
    tpu.vector_store %arg11[%c17, %c0_182], %203 {strides = array<i32>} : memref<37x16xf32, #tpu.memory_space<vmem>>, vector<3x16xf32>,
    %205 = vector.extract_strided_slice %194 {offsets = [2, 0, 0], sizes = [1, 3, 16], strides = [1, 1, 1]} : vector<3x3x16xf32> to vector<1x3x16xf32>
    %206 = vector.shape_cast %205 : vector<1x3x16xf32> to vector<3x16xf32>
    %c22 = arith.constant 22 : index
    %c0_183 = arith.constant 0 : index
    %207 = vector.load %arg11[%c22, %c0_183] : memref<37x16xf32, #tpu.memory_space<vmem>>, vector<3x16xf32>
    tpu.vector_store %arg11[%c22, %c0_183], %206 {strides = array<i32>} : memref<37x16xf32, #tpu.memory_space<vmem>>, vector<3x16xf32>,
    %c0_184 = arith.constant 0 : index
    %c0_185 = arith.constant 0 : index
    %208 = vector.load %arg8[%c0_184, %c0_185] : memref<25x1xf32, #tpu.memory_space<vmem>>, vector<25x1xf32>
    %cst_186 = arith.constant 0.000000e+00 : f32
    %209 = vector.broadcast %cst_186 : f32 to vector<25x16xf32>
    %c0_187 = arith.constant 0 : index
    %c0_188 = arith.constant 0 : index
    %210 = vector.load %arg3[%c0_187, %c0_188] : memref<1x16xf32, #tpu.memory_space<vmem>>, vector<1x16xf32>
    %211 = vector.broadcast %210 : vector<1x16xf32> to vector<25x16xf32>
    %212 = arith.addf %209, %211 : vector<25x16xf32>
    %c0_189 = arith.constant 0 : index
    %c0_190 = arith.constant 0 : index
    %213 = vector.load %arg11[%c0_189, %c0_190] : memref<37x16xf32, #tpu.memory_space<vmem>>, vector<25x16xf32>
    %214 = arith.truncf %213 : vector<25x16xf32> to vector<25x16xbf16>
    %c0_191 = arith.constant 0 : index
    %c0_192 = arith.constant 0 : index
    %c0_193 = arith.constant 0 : index
    %215 = vector.load %arg2[%c0_191, %c0_192, %c0_193] : memref<9x16x16xbf16, #tpu.memory_space<vmem>>, vector<1x16x16xbf16>
    %216 = vector.shape_cast %215 : vector<1x16x16xbf16> to vector<16x16xbf16>
    %cst_194 = arith.constant dense<0.000000e+00> : vector<25x16xf32>
    %217 = tpu.matmul %214, %216, %cst_194 {dimension_numbers = #tpu.dot_dimension_numbers<[1], [0], [0], [1], [0, 0, 1, 1], [], []>} : vector<25x16xbf16>, vector<16x16xbf16>, vector<25x16xf32> -> vector<25x16xf32>
    %218 = arith.addf %212, %217 : vector<25x16xf32>
    %c1_195 = arith.constant 1 : index
    %c0_196 = arith.constant 0 : index
    %219 = vector.load %arg11[%c1_195, %c0_196] : memref<37x16xf32, #tpu.memory_space<vmem>>, vector<25x16xf32>
    %220 = arith.truncf %219 : vector<25x16xf32> to vector<25x16xbf16>
    %c1_197 = arith.constant 1 : index
    %c0_198 = arith.constant 0 : index
    %c0_199 = arith.constant 0 : index
    %221 = vector.load %arg2[%c1_197, %c0_198, %c0_199] : memref<9x16x16xbf16, #tpu.memory_space<vmem>>, vector<1x16x16xbf16>
    %222 = vector.shape_cast %221 : vector<1x16x16xbf16> to vector<16x16xbf16>
    %cst_200 = arith.constant dense<0.000000e+00> : vector<25x16xf32>
    %223 = tpu.matmul %220, %222, %cst_200 {dimension_numbers = #tpu.dot_dimension_numbers<[1], [0], [0], [1], [0, 0, 1, 1], [], []>} : vector<25x16xbf16>, vector<16x16xbf16>, vector<25x16xf32> -> vector<25x16xf32>
    %224 = arith.addf %218, %223 : vector<25x16xf32>
    %c2_201 = arith.constant 2 : index
    %c0_202 = arith.constant 0 : index
    %225 = vector.load %arg11[%c2_201, %c0_202] : memref<37x16xf32, #tpu.memory_space<vmem>>, vector<25x16xf32>
    %226 = arith.truncf %225 : vector<25x16xf32> to vector<25x16xbf16>
    %c2_203 = arith.constant 2 : index
    %c0_204 = arith.constant 0 : index
    %c0_205 = arith.constant 0 : index
    %227 = vector.load %arg2[%c2_203, %c0_204, %c0_205] : memref<9x16x16xbf16, #tpu.memory_space<vmem>>, vector<1x16x16xbf16>
    %228 = vector.shape_cast %227 : vector<1x16x16xbf16> to vector<16x16xbf16>
    %cst_206 = arith.constant dense<0.000000e+00> : vector<25x16xf32>
    %229 = tpu.matmul %226, %228, %cst_206 {dimension_numbers = #tpu.dot_dimension_numbers<[1], [0], [0], [1], [0, 0, 1, 1], [], []>} : vector<25x16xbf16>, vector<16x16xbf16>, vector<25x16xf32> -> vector<25x16xf32>
    %230 = arith.addf %224, %229 : vector<25x16xf32>
    %c5_207 = arith.constant 5 : index
    %c0_208 = arith.constant 0 : index
    %231 = vector.load %arg11[%c5_207, %c0_208] : memref<37x16xf32, #tpu.memory_space<vmem>>, vector<25x16xf32>
    %232 = arith.truncf %231 : vector<25x16xf32> to vector<25x16xbf16>
    %c3 = arith.constant 3 : index
    %c0_209 = arith.constant 0 : index
    %c0_210 = arith.constant 0 : index
    %233 = vector.load %arg2[%c3, %c0_209, %c0_210] : memref<9x16x16xbf16, #tpu.memory_space<vmem>>, vector<1x16x16xbf16>
    %234 = vector.shape_cast %233 : vector<1x16x16xbf16> to vector<16x16xbf16>
    %cst_211 = arith.constant dense<0.000000e+00> : vector<25x16xf32>
    %235 = tpu.matmul %232, %234, %cst_211 {dimension_numbers = #tpu.dot_dimension_numbers<[1], [0], [0], [1], [0, 0, 1, 1], [], []>} : vector<25x16xbf16>, vector<16x16xbf16>, vector<25x16xf32> -> vector<25x16xf32>
    %236 = arith.addf %230, %235 : vector<25x16xf32>
    %c6_212 = arith.constant 6 : index
    %c0_213 = arith.constant 0 : index
    %237 = vector.load %arg11[%c6_212, %c0_213] : memref<37x16xf32, #tpu.memory_space<vmem>>, vector<25x16xf32>
    %238 = arith.truncf %237 : vector<25x16xf32> to vector<25x16xbf16>
    %c4 = arith.constant 4 : index
    %c0_214 = arith.constant 0 : index
    %c0_215 = arith.constant 0 : index
    %239 = vector.load %arg2[%c4, %c0_214, %c0_215] : memref<9x16x16xbf16, #tpu.memory_space<vmem>>, vector<1x16x16xbf16>
    %240 = vector.shape_cast %239 : vector<1x16x16xbf16> to vector<16x16xbf16>
    %cst_216 = arith.constant dense<0.000000e+00> : vector<25x16xf32>
    %241 = tpu.matmul %238, %240, %cst_216 {dimension_numbers = #tpu.dot_dimension_numbers<[1], [0], [0], [1], [0, 0, 1, 1], [], []>} : vector<25x16xbf16>, vector<16x16xbf16>, vector<25x16xf32> -> vector<25x16xf32>
    %242 = arith.addf %236, %241 : vector<25x16xf32>
    %c7_217 = arith.constant 7 : index
    %c0_218 = arith.constant 0 : index
    %243 = vector.load %arg11[%c7_217, %c0_218] : memref<37x16xf32, #tpu.memory_space<vmem>>, vector<25x16xf32>
    %244 = arith.truncf %243 : vector<25x16xf32> to vector<25x16xbf16>
    %c5_219 = arith.constant 5 : index
    %c0_220 = arith.constant 0 : index
    %c0_221 = arith.constant 0 : index
    %245 = vector.load %arg2[%c5_219, %c0_220, %c0_221] : memref<9x16x16xbf16, #tpu.memory_space<vmem>>, vector<1x16x16xbf16>
    %246 = vector.shape_cast %245 : vector<1x16x16xbf16> to vector<16x16xbf16>
    %cst_222 = arith.constant dense<0.000000e+00> : vector<25x16xf32>
    %247 = tpu.matmul %244, %246, %cst_222 {dimension_numbers = #tpu.dot_dimension_numbers<[1], [0], [0], [1], [0, 0, 1, 1], [], []>} : vector<25x16xbf16>, vector<16x16xbf16>, vector<25x16xf32> -> vector<25x16xf32>
    %248 = arith.addf %242, %247 : vector<25x16xf32>
    %c10_223 = arith.constant 10 : index
    %c0_224 = arith.constant 0 : index
    %249 = vector.load %arg11[%c10_223, %c0_224] : memref<37x16xf32, #tpu.memory_space<vmem>>, vector<25x16xf32>
    %250 = arith.truncf %249 : vector<25x16xf32> to vector<25x16xbf16>
    %c6_225 = arith.constant 6 : index
    %c0_226 = arith.constant 0 : index
    %c0_227 = arith.constant 0 : index
    %251 = vector.load %arg2[%c6_225, %c0_226, %c0_227] : memref<9x16x16xbf16, #tpu.memory_space<vmem>>, vector<1x16x16xbf16>
    %252 = vector.shape_cast %251 : vector<1x16x16xbf16> to vector<16x16xbf16>
    %cst_228 = arith.constant dense<0.000000e+00> : vector<25x16xf32>
    %253 = tpu.matmul %250, %252, %cst_228 {dimension_numbers = #tpu.dot_dimension_numbers<[1], [0], [0], [1], [0, 0, 1, 1], [], []>} : vector<25x16xbf16>, vector<16x16xbf16>, vector<25x16xf32> -> vector<25x16xf32>
    %254 = arith.addf %248, %253 : vector<25x16xf32>
    %c11_229 = arith.constant 11 : index
    %c0_230 = arith.constant 0 : index
    %255 = vector.load %arg11[%c11_229, %c0_230] : memref<37x16xf32, #tpu.memory_space<vmem>>, vector<25x16xf32>
    %256 = arith.truncf %255 : vector<25x16xf32> to vector<25x16xbf16>
    %c7_231 = arith.constant 7 : index
    %c0_232 = arith.constant 0 : index
    %c0_233 = arith.constant 0 : index
    %257 = vector.load %arg2[%c7_231, %c0_232, %c0_233] : memref<9x16x16xbf16, #tpu.memory_space<vmem>>, vector<1x16x16xbf16>
    %258 = vector.shape_cast %257 : vector<1x16x16xbf16> to vector<16x16xbf16>
    %cst_234 = arith.constant dense<0.000000e+00> : vector<25x16xf32>
    %259 = tpu.matmul %256, %258, %cst_234 {dimension_numbers = #tpu.dot_dimension_numbers<[1], [0], [0], [1], [0, 0, 1, 1], [], []>} : vector<25x16xbf16>, vector<16x16xbf16>, vector<25x16xf32> -> vector<25x16xf32>
    %260 = arith.addf %254, %259 : vector<25x16xf32>
    %c12_235 = arith.constant 12 : index
    %c0_236 = arith.constant 0 : index
    %261 = vector.load %arg11[%c12_235, %c0_236] : memref<37x16xf32, #tpu.memory_space<vmem>>, vector<25x16xf32>
    %262 = arith.truncf %261 : vector<25x16xf32> to vector<25x16xbf16>
    %c8 = arith.constant 8 : index
    %c0_237 = arith.constant 0 : index
    %c0_238 = arith.constant 0 : index
    %263 = vector.load %arg2[%c8, %c0_237, %c0_238] : memref<9x16x16xbf16, #tpu.memory_space<vmem>>, vector<1x16x16xbf16>
    %264 = vector.shape_cast %263 : vector<1x16x16xbf16> to vector<16x16xbf16>
    %cst_239 = arith.constant dense<0.000000e+00> : vector<25x16xf32>
    %265 = tpu.matmul %262, %264, %cst_239 {dimension_numbers = #tpu.dot_dimension_numbers<[1], [0], [0], [1], [0, 0, 1, 1], [], []>} : vector<25x16xbf16>, vector<16x16xbf16>, vector<25x16xf32> -> vector<25x16xf32>
    %266 = arith.addf %260, %265 : vector<25x16xf32>
    %cst_240 = arith.constant 0.000000e+00 : f32
    %267 = vector.broadcast %cst_240 : f32 to vector<25x16xf32>
    %268 = arith.maximumf %266, %267 : vector<25x16xf32>
    %269 = vector.broadcast %208 : vector<25x1xf32> to vector<25x16xf32>
    %270 = arith.mulf %268, %269 : vector<25x16xf32>
    %c6_241 = arith.constant 6 : index
    %c0_242 = arith.constant 0 : index
    %271 = vector.load %arg12[%c6_241, %c0_242] : memref<37x16xf32, #tpu.memory_space<vmem>>, vector<25x16xf32>
    tpu.vector_store %arg12[%c6_241, %c0_242], %270 {strides = array<i32>} : memref<37x16xf32, #tpu.memory_space<vmem>>, vector<25x16xf32>,
    %cst_243 = arith.constant 0.000000e+00 : f32
    %272 = vector.broadcast %cst_243 : f32 to vector<25x16xf32>
    %c0_244 = arith.constant 0 : index
    %c0_245 = arith.constant 0 : index
    %273 = vector.load %arg5[%c0_244, %c0_245] : memref<1x16xf32, #tpu.memory_space<vmem>>, vector<1x16xf32>
    %274 = vector.broadcast %273 : vector<1x16xf32> to vector<25x16xf32>
    %275 = arith.addf %272, %274 : vector<25x16xf32>
    %c0_246 = arith.constant 0 : index
    %c0_247 = arith.constant 0 : index
    %276 = vector.load %arg12[%c0_246, %c0_247] : memref<37x16xf32, #tpu.memory_space<vmem>>, vector<25x16xf32>
    %277 = arith.truncf %276 : vector<25x16xf32> to vector<25x16xbf16>
    %c0_248 = arith.constant 0 : index
    %c0_249 = arith.constant 0 : index
    %c0_250 = arith.constant 0 : index
    %278 = vector.load %arg4[%c0_248, %c0_249, %c0_250] : memref<9x16x16xbf16, #tpu.memory_space<vmem>>, vector<1x16x16xbf16>
    %279 = vector.shape_cast %278 : vector<1x16x16xbf16> to vector<16x16xbf16>
    %cst_251 = arith.constant dense<0.000000e+00> : vector<25x16xf32>
    %280 = tpu.matmul %277, %279, %cst_251 {dimension_numbers = #tpu.dot_dimension_numbers<[1], [0], [0], [1], [0, 0, 1, 1], [], []>} : vector<25x16xbf16>, vector<16x16xbf16>, vector<25x16xf32> -> vector<25x16xf32>
    %281 = arith.addf %275, %280 : vector<25x16xf32>
    %c1_252 = arith.constant 1 : index
    %c0_253 = arith.constant 0 : index
    %282 = vector.load %arg12[%c1_252, %c0_253] : memref<37x16xf32, #tpu.memory_space<vmem>>, vector<25x16xf32>
    %283 = arith.truncf %282 : vector<25x16xf32> to vector<25x16xbf16>
    %c1_254 = arith.constant 1 : index
    %c0_255 = arith.constant 0 : index
    %c0_256 = arith.constant 0 : index
    %284 = vector.load %arg4[%c1_254, %c0_255, %c0_256] : memref<9x16x16xbf16, #tpu.memory_space<vmem>>, vector<1x16x16xbf16>
    %285 = vector.shape_cast %284 : vector<1x16x16xbf16> to vector<16x16xbf16>
    %cst_257 = arith.constant dense<0.000000e+00> : vector<25x16xf32>
    %286 = tpu.matmul %283, %285, %cst_257 {dimension_numbers = #tpu.dot_dimension_numbers<[1], [0], [0], [1], [0, 0, 1, 1], [], []>} : vector<25x16xbf16>, vector<16x16xbf16>, vector<25x16xf32> -> vector<25x16xf32>
    %287 = arith.addf %281, %286 : vector<25x16xf32>
    %c2_258 = arith.constant 2 : index
    %c0_259 = arith.constant 0 : index
    %288 = vector.load %arg12[%c2_258, %c0_259] : memref<37x16xf32, #tpu.memory_space<vmem>>, vector<25x16xf32>
    %289 = arith.truncf %288 : vector<25x16xf32> to vector<25x16xbf16>
    %c2_260 = arith.constant 2 : index
    %c0_261 = arith.constant 0 : index
    %c0_262 = arith.constant 0 : index
    %290 = vector.load %arg4[%c2_260, %c0_261, %c0_262] : memref<9x16x16xbf16, #tpu.memory_space<vmem>>, vector<1x16x16xbf16>
    %291 = vector.shape_cast %290 : vector<1x16x16xbf16> to vector<16x16xbf16>
    %cst_263 = arith.constant dense<0.000000e+00> : vector<25x16xf32>
    %292 = tpu.matmul %289, %291, %cst_263 {dimension_numbers = #tpu.dot_dimension_numbers<[1], [0], [0], [1], [0, 0, 1, 1], [], []>} : vector<25x16xbf16>, vector<16x16xbf16>, vector<25x16xf32> -> vector<25x16xf32>
    %293 = arith.addf %287, %292 : vector<25x16xf32>
    %c5_264 = arith.constant 5 : index
    %c0_265 = arith.constant 0 : index
    %294 = vector.load %arg12[%c5_264, %c0_265] : memref<37x16xf32, #tpu.memory_space<vmem>>, vector<25x16xf32>
    %295 = arith.truncf %294 : vector<25x16xf32> to vector<25x16xbf16>
    %c3_266 = arith.constant 3 : index
    %c0_267 = arith.constant 0 : index
    %c0_268 = arith.constant 0 : index
    %296 = vector.load %arg4[%c3_266, %c0_267, %c0_268] : memref<9x16x16xbf16, #tpu.memory_space<vmem>>, vector<1x16x16xbf16>
    %297 = vector.shape_cast %296 : vector<1x16x16xbf16> to vector<16x16xbf16>
    %cst_269 = arith.constant dense<0.000000e+00> : vector<25x16xf32>
    %298 = tpu.matmul %295, %297, %cst_269 {dimension_numbers = #tpu.dot_dimension_numbers<[1], [0], [0], [1], [0, 0, 1, 1], [], []>} : vector<25x16xbf16>, vector<16x16xbf16>, vector<25x16xf32> -> vector<25x16xf32>
    %299 = arith.addf %293, %298 : vector<25x16xf32>
    %c6_270 = arith.constant 6 : index
    %c0_271 = arith.constant 0 : index
    %300 = vector.load %arg12[%c6_270, %c0_271] : memref<37x16xf32, #tpu.memory_space<vmem>>, vector<25x16xf32>
    %301 = arith.truncf %300 : vector<25x16xf32> to vector<25x16xbf16>
    %c4_272 = arith.constant 4 : index
    %c0_273 = arith.constant 0 : index
    %c0_274 = arith.constant 0 : index
    %302 = vector.load %arg4[%c4_272, %c0_273, %c0_274] : memref<9x16x16xbf16, #tpu.memory_space<vmem>>, vector<1x16x16xbf16>
    %303 = vector.shape_cast %302 : vector<1x16x16xbf16> to vector<16x16xbf16>
    %cst_275 = arith.constant dense<0.000000e+00> : vector<25x16xf32>
    %304 = tpu.matmul %301, %303, %cst_275 {dimension_numbers = #tpu.dot_dimension_numbers<[1], [0], [0], [1], [0, 0, 1, 1], [], []>} : vector<25x16xbf16>, vector<16x16xbf16>, vector<25x16xf32> -> vector<25x16xf32>
    %305 = arith.addf %299, %304 : vector<25x16xf32>
    %c7_276 = arith.constant 7 : index
    %c0_277 = arith.constant 0 : index
    %306 = vector.load %arg12[%c7_276, %c0_277] : memref<37x16xf32, #tpu.memory_space<vmem>>, vector<25x16xf32>
    %307 = arith.truncf %306 : vector<25x16xf32> to vector<25x16xbf16>
    %c5_278 = arith.constant 5 : index
    %c0_279 = arith.constant 0 : index
    %c0_280 = arith.constant 0 : index
    %308 = vector.load %arg4[%c5_278, %c0_279, %c0_280] : memref<9x16x16xbf16, #tpu.memory_space<vmem>>, vector<1x16x16xbf16>
    %309 = vector.shape_cast %308 : vector<1x16x16xbf16> to vector<16x16xbf16>
    %cst_281 = arith.constant dense<0.000000e+00> : vector<25x16xf32>
    %310 = tpu.matmul %307, %309, %cst_281 {dimension_numbers = #tpu.dot_dimension_numbers<[1], [0], [0], [1], [0, 0, 1, 1], [], []>} : vector<25x16xbf16>, vector<16x16xbf16>, vector<25x16xf32> -> vector<25x16xf32>
    %311 = arith.addf %305, %310 : vector<25x16xf32>
    %c10_282 = arith.constant 10 : index
    %c0_283 = arith.constant 0 : index
    %312 = vector.load %arg12[%c10_282, %c0_283] : memref<37x16xf32, #tpu.memory_space<vmem>>, vector<25x16xf32>
    %313 = arith.truncf %312 : vector<25x16xf32> to vector<25x16xbf16>
    %c6_284 = arith.constant 6 : index
    %c0_285 = arith.constant 0 : index
    %c0_286 = arith.constant 0 : index
    %314 = vector.load %arg4[%c6_284, %c0_285, %c0_286] : memref<9x16x16xbf16, #tpu.memory_space<vmem>>, vector<1x16x16xbf16>
    %315 = vector.shape_cast %314 : vector<1x16x16xbf16> to vector<16x16xbf16>
    %cst_287 = arith.constant dense<0.000000e+00> : vector<25x16xf32>
    %316 = tpu.matmul %313, %315, %cst_287 {dimension_numbers = #tpu.dot_dimension_numbers<[1], [0], [0], [1], [0, 0, 1, 1], [], []>} : vector<25x16xbf16>, vector<16x16xbf16>, vector<25x16xf32> -> vector<25x16xf32>
    %317 = arith.addf %311, %316 : vector<25x16xf32>
    %c11_288 = arith.constant 11 : index
    %c0_289 = arith.constant 0 : index
    %318 = vector.load %arg12[%c11_288, %c0_289] : memref<37x16xf32, #tpu.memory_space<vmem>>, vector<25x16xf32>
    %319 = arith.truncf %318 : vector<25x16xf32> to vector<25x16xbf16>
    %c7_290 = arith.constant 7 : index
    %c0_291 = arith.constant 0 : index
    %c0_292 = arith.constant 0 : index
    %320 = vector.load %arg4[%c7_290, %c0_291, %c0_292] : memref<9x16x16xbf16, #tpu.memory_space<vmem>>, vector<1x16x16xbf16>
    %321 = vector.shape_cast %320 : vector<1x16x16xbf16> to vector<16x16xbf16>
    %cst_293 = arith.constant dense<0.000000e+00> : vector<25x16xf32>
    %322 = tpu.matmul %319, %321, %cst_293 {dimension_numbers = #tpu.dot_dimension_numbers<[1], [0], [0], [1], [0, 0, 1, 1], [], []>} : vector<25x16xbf16>, vector<16x16xbf16>, vector<25x16xf32> -> vector<25x16xf32>
    %323 = arith.addf %317, %322 : vector<25x16xf32>
    %c12_294 = arith.constant 12 : index
    %c0_295 = arith.constant 0 : index
    %324 = vector.load %arg12[%c12_294, %c0_295] : memref<37x16xf32, #tpu.memory_space<vmem>>, vector<25x16xf32>
    %325 = arith.truncf %324 : vector<25x16xf32> to vector<25x16xbf16>
    %c8_296 = arith.constant 8 : index
    %c0_297 = arith.constant 0 : index
    %c0_298 = arith.constant 0 : index
    %326 = vector.load %arg4[%c8_296, %c0_297, %c0_298] : memref<9x16x16xbf16, #tpu.memory_space<vmem>>, vector<1x16x16xbf16>
    %327 = vector.shape_cast %326 : vector<1x16x16xbf16> to vector<16x16xbf16>
    %cst_299 = arith.constant dense<0.000000e+00> : vector<25x16xf32>
    %328 = tpu.matmul %325, %327, %cst_299 {dimension_numbers = #tpu.dot_dimension_numbers<[1], [0], [0], [1], [0, 0, 1, 1], [], []>} : vector<25x16xbf16>, vector<16x16xbf16>, vector<25x16xf32> -> vector<25x16xf32>
    %329 = arith.addf %323, %328 : vector<25x16xf32>
    %cst_300 = arith.constant 0.000000e+00 : f32
    %330 = vector.broadcast %cst_300 : f32 to vector<25x16xf32>
    %331 = arith.maximumf %329, %330 : vector<25x16xf32>
    %332 = vector.broadcast %208 : vector<25x1xf32> to vector<25x16xf32>
    %333 = arith.mulf %331, %332 : vector<25x16xf32>
    %c6_301 = arith.constant 6 : index
    %c0_302 = arith.constant 0 : index
    %334 = vector.load %arg11[%c6_301, %c0_302] : memref<37x16xf32, #tpu.memory_space<vmem>>, vector<25x16xf32>
    tpu.vector_store %arg11[%c6_301, %c0_302], %333 {strides = array<i32>} : memref<37x16xf32, #tpu.memory_space<vmem>>, vector<25x16xf32>,
    %cst_303 = arith.constant 0.000000e+00 : f32
    %335 = vector.broadcast %cst_303 : f32 to vector<25x16xf32>
    %c0_304 = arith.constant 0 : index
    %c0_305 = arith.constant 0 : index
    %336 = vector.load %arg7[%c0_304, %c0_305] : memref<1x16xf32, #tpu.memory_space<vmem>>, vector<1x16xf32>
    %337 = vector.broadcast %336 : vector<1x16xf32> to vector<25x16xf32>
    %338 = arith.addf %335, %337 : vector<25x16xf32>
    %c0_306 = arith.constant 0 : index
    %c0_307 = arith.constant 0 : index
    %339 = vector.load %arg11[%c0_306, %c0_307] : memref<37x16xf32, #tpu.memory_space<vmem>>, vector<25x16xf32>
    %340 = arith.truncf %339 : vector<25x16xf32> to vector<25x16xbf16>
    %c0_308 = arith.constant 0 : index
    %c0_309 = arith.constant 0 : index
    %c0_310 = arith.constant 0 : index
    %341 = vector.load %arg6[%c0_308, %c0_309, %c0_310] : memref<9x16x16xbf16, #tpu.memory_space<vmem>>, vector<1x16x16xbf16>
    %342 = vector.shape_cast %341 : vector<1x16x16xbf16> to vector<16x16xbf16>
    %cst_311 = arith.constant dense<0.000000e+00> : vector<25x16xf32>
    %343 = tpu.matmul %340, %342, %cst_311 {dimension_numbers = #tpu.dot_dimension_numbers<[1], [0], [0], [1], [0, 0, 1, 1], [], []>} : vector<25x16xbf16>, vector<16x16xbf16>, vector<25x16xf32> -> vector<25x16xf32>
    %344 = arith.addf %338, %343 : vector<25x16xf32>
    %c1_312 = arith.constant 1 : index
    %c0_313 = arith.constant 0 : index
    %345 = vector.load %arg11[%c1_312, %c0_313] : memref<37x16xf32, #tpu.memory_space<vmem>>, vector<25x16xf32>
    %346 = arith.truncf %345 : vector<25x16xf32> to vector<25x16xbf16>
    %c1_314 = arith.constant 1 : index
    %c0_315 = arith.constant 0 : index
    %c0_316 = arith.constant 0 : index
    %347 = vector.load %arg6[%c1_314, %c0_315, %c0_316] : memref<9x16x16xbf16, #tpu.memory_space<vmem>>, vector<1x16x16xbf16>
    %348 = vector.shape_cast %347 : vector<1x16x16xbf16> to vector<16x16xbf16>
    %cst_317 = arith.constant dense<0.000000e+00> : vector<25x16xf32>
    %349 = tpu.matmul %346, %348, %cst_317 {dimension_numbers = #tpu.dot_dimension_numbers<[1], [0], [0], [1], [0, 0, 1, 1], [], []>} : vector<25x16xbf16>, vector<16x16xbf16>, vector<25x16xf32> -> vector<25x16xf32>
    %350 = arith.addf %344, %349 : vector<25x16xf32>
    %c2_318 = arith.constant 2 : index
    %c0_319 = arith.constant 0 : index
    %351 = vector.load %arg11[%c2_318, %c0_319] : memref<37x16xf32, #tpu.memory_space<vmem>>, vector<25x16xf32>
    %352 = arith.truncf %351 : vector<25x16xf32> to vector<25x16xbf16>
    %c2_320 = arith.constant 2 : index
    %c0_321 = arith.constant 0 : index
    %c0_322 = arith.constant 0 : index
    %353 = vector.load %arg6[%c2_320, %c0_321, %c0_322] : memref<9x16x16xbf16, #tpu.memory_space<vmem>>, vector<1x16x16xbf16>
    %354 = vector.shape_cast %353 : vector<1x16x16xbf16> to vector<16x16xbf16>
    %cst_323 = arith.constant dense<0.000000e+00> : vector<25x16xf32>
    %355 = tpu.matmul %352, %354, %cst_323 {dimension_numbers = #tpu.dot_dimension_numbers<[1], [0], [0], [1], [0, 0, 1, 1], [], []>} : vector<25x16xbf16>, vector<16x16xbf16>, vector<25x16xf32> -> vector<25x16xf32>
    %356 = arith.addf %350, %355 : vector<25x16xf32>
    %c5_324 = arith.constant 5 : index
    %c0_325 = arith.constant 0 : index
    %357 = vector.load %arg11[%c5_324, %c0_325] : memref<37x16xf32, #tpu.memory_space<vmem>>, vector<25x16xf32>
    %358 = arith.truncf %357 : vector<25x16xf32> to vector<25x16xbf16>
    %c3_326 = arith.constant 3 : index
    %c0_327 = arith.constant 0 : index
    %c0_328 = arith.constant 0 : index
    %359 = vector.load %arg6[%c3_326, %c0_327, %c0_328] : memref<9x16x16xbf16, #tpu.memory_space<vmem>>, vector<1x16x16xbf16>
    %360 = vector.shape_cast %359 : vector<1x16x16xbf16> to vector<16x16xbf16>
    %cst_329 = arith.constant dense<0.000000e+00> : vector<25x16xf32>
    %361 = tpu.matmul %358, %360, %cst_329 {dimension_numbers = #tpu.dot_dimension_numbers<[1], [0], [0], [1], [0, 0, 1, 1], [], []>} : vector<25x16xbf16>, vector<16x16xbf16>, vector<25x16xf32> -> vector<25x16xf32>
    %362 = arith.addf %356, %361 : vector<25x16xf32>
    %c6_330 = arith.constant 6 : index
    %c0_331 = arith.constant 0 : index
    %363 = vector.load %arg11[%c6_330, %c0_331] : memref<37x16xf32, #tpu.memory_space<vmem>>, vector<25x16xf32>
    %364 = arith.truncf %363 : vector<25x16xf32> to vector<25x16xbf16>
    %c4_332 = arith.constant 4 : index
    %c0_333 = arith.constant 0 : index
    %c0_334 = arith.constant 0 : index
    %365 = vector.load %arg6[%c4_332, %c0_333, %c0_334] : memref<9x16x16xbf16, #tpu.memory_space<vmem>>, vector<1x16x16xbf16>
    %366 = vector.shape_cast %365 : vector<1x16x16xbf16> to vector<16x16xbf16>
    %cst_335 = arith.constant dense<0.000000e+00> : vector<25x16xf32>
    %367 = tpu.matmul %364, %366, %cst_335 {dimension_numbers = #tpu.dot_dimension_numbers<[1], [0], [0], [1], [0, 0, 1, 1], [], []>} : vector<25x16xbf16>, vector<16x16xbf16>, vector<25x16xf32> -> vector<25x16xf32>
    %368 = arith.addf %362, %367 : vector<25x16xf32>
    %c7_336 = arith.constant 7 : index
    %c0_337 = arith.constant 0 : index
    %369 = vector.load %arg11[%c7_336, %c0_337] : memref<37x16xf32, #tpu.memory_space<vmem>>, vector<25x16xf32>
    %370 = arith.truncf %369 : vector<25x16xf32> to vector<25x16xbf16>
    %c5_338 = arith.constant 5 : index
    %c0_339 = arith.constant 0 : index
    %c0_340 = arith.constant 0 : index
    %371 = vector.load %arg6[%c5_338, %c0_339, %c0_340] : memref<9x16x16xbf16, #tpu.memory_space<vmem>>, vector<1x16x16xbf16>
    %372 = vector.shape_cast %371 : vector<1x16x16xbf16> to vector<16x16xbf16>
    %cst_341 = arith.constant dense<0.000000e+00> : vector<25x16xf32>
    %373 = tpu.matmul %370, %372, %cst_341 {dimension_numbers = #tpu.dot_dimension_numbers<[1], [0], [0], [1], [0, 0, 1, 1], [], []>} : vector<25x16xbf16>, vector<16x16xbf16>, vector<25x16xf32> -> vector<25x16xf32>
    %374 = arith.addf %368, %373 : vector<25x16xf32>
    %c10_342 = arith.constant 10 : index
    %c0_343 = arith.constant 0 : index
    %375 = vector.load %arg11[%c10_342, %c0_343] : memref<37x16xf32, #tpu.memory_space<vmem>>, vector<25x16xf32>
    %376 = arith.truncf %375 : vector<25x16xf32> to vector<25x16xbf16>
    %c6_344 = arith.constant 6 : index
    %c0_345 = arith.constant 0 : index
    %c0_346 = arith.constant 0 : index
    %377 = vector.load %arg6[%c6_344, %c0_345, %c0_346] : memref<9x16x16xbf16, #tpu.memory_space<vmem>>, vector<1x16x16xbf16>
    %378 = vector.shape_cast %377 : vector<1x16x16xbf16> to vector<16x16xbf16>
    %cst_347 = arith.constant dense<0.000000e+00> : vector<25x16xf32>
    %379 = tpu.matmul %376, %378, %cst_347 {dimension_numbers = #tpu.dot_dimension_numbers<[1], [0], [0], [1], [0, 0, 1, 1], [], []>} : vector<25x16xbf16>, vector<16x16xbf16>, vector<25x16xf32> -> vector<25x16xf32>
    %380 = arith.addf %374, %379 : vector<25x16xf32>
    %c11_348 = arith.constant 11 : index
    %c0_349 = arith.constant 0 : index
    %381 = vector.load %arg11[%c11_348, %c0_349] : memref<37x16xf32, #tpu.memory_space<vmem>>, vector<25x16xf32>
    %382 = arith.truncf %381 : vector<25x16xf32> to vector<25x16xbf16>
    %c7_350 = arith.constant 7 : index
    %c0_351 = arith.constant 0 : index
    %c0_352 = arith.constant 0 : index
    %383 = vector.load %arg6[%c7_350, %c0_351, %c0_352] : memref<9x16x16xbf16, #tpu.memory_space<vmem>>, vector<1x16x16xbf16>
    %384 = vector.shape_cast %383 : vector<1x16x16xbf16> to vector<16x16xbf16>
    %cst_353 = arith.constant dense<0.000000e+00> : vector<25x16xf32>
    %385 = tpu.matmul %382, %384, %cst_353 {dimension_numbers = #tpu.dot_dimension_numbers<[1], [0], [0], [1], [0, 0, 1, 1], [], []>} : vector<25x16xbf16>, vector<16x16xbf16>, vector<25x16xf32> -> vector<25x16xf32>
    %386 = arith.addf %380, %385 : vector<25x16xf32>
    %c12_354 = arith.constant 12 : index
    %c0_355 = arith.constant 0 : index
    %387 = vector.load %arg11[%c12_354, %c0_355] : memref<37x16xf32, #tpu.memory_space<vmem>>, vector<25x16xf32>
    %388 = arith.truncf %387 : vector<25x16xf32> to vector<25x16xbf16>
    %c8_356 = arith.constant 8 : index
    %c0_357 = arith.constant 0 : index
    %c0_358 = arith.constant 0 : index
    %389 = vector.load %arg6[%c8_356, %c0_357, %c0_358] : memref<9x16x16xbf16, #tpu.memory_space<vmem>>, vector<1x16x16xbf16>
    %390 = vector.shape_cast %389 : vector<1x16x16xbf16> to vector<16x16xbf16>
    %cst_359 = arith.constant dense<0.000000e+00> : vector<25x16xf32>
    %391 = tpu.matmul %388, %390, %cst_359 {dimension_numbers = #tpu.dot_dimension_numbers<[1], [0], [0], [1], [0, 0, 1, 1], [], []>} : vector<25x16xbf16>, vector<16x16xbf16>, vector<25x16xf32> -> vector<25x16xf32>
    %392 = arith.addf %386, %391 : vector<25x16xf32>
    %c6_360 = arith.constant 6 : index
    %c0_361 = arith.constant 0 : index
    %393 = vector.load %arg12[%c6_360, %c0_361] : memref<37x16xf32, #tpu.memory_space<vmem>>, vector<25x16xf32>
    tpu.vector_store %arg12[%c6_360, %c0_361], %392 {strides = array<i32>} : memref<37x16xf32, #tpu.memory_space<vmem>>, vector<25x16xf32>,
    %c0_362 = arith.constant 0 : index
    %c0_363 = arith.constant 0 : index
    %394 = vector.load %arg9[%c0_362, %c0_363] : memref<32x3xf32, #tpu.memory_space<vmem>>, vector<32x3xf32>
    %c12_364 = arith.constant 12 : index
    %c0_365 = arith.constant 0 : index
    %395 = vector.load %arg12[%c12_364, %c0_365] : memref<37x16xf32, #tpu.memory_space<vmem>>, vector<3x16xf32>
    %cst_366 = arith.constant dense<0.000000e+00> : vector<32x16xf32>
    %396 = tpu.matmul %394, %395, %cst_366 {dimension_numbers = #tpu.dot_dimension_numbers<[1], [0], [0], [1], [0, 0, 1, 1], [], []>} : vector<32x3xf32>, vector<3x16xf32>, vector<32x16xf32> -> vector<32x16xf32>
    %c0_367 = arith.constant 0 : index
    %c0_368 = arith.constant 0 : index
    %c0_369 = arith.constant 0 : index
    %c0_370 = arith.constant 0 : index
    %397 = vector.load %arg10[%c0_367, %c0_368, %c0_369, %c0_370] : memref<1x3x32x16xf32, #tpu.memory_space<vmem>>, vector<1x1x32x16xf32>
    %398 = vector.shape_cast %397 : vector<1x1x32x16xf32> to vector<32x16xf32>
    %399 = vector.shape_cast %396 : vector<32x16xf32> to vector<1x1x32x16xf32>
    tpu.vector_store %arg10[%c0_367, %c0_368, %c0_369, %c0_370], %399 {strides = array<i32>} : memref<1x3x32x16xf32, #tpu.memory_space<vmem>>, vector<1x1x32x16xf32>,
    %c17_371 = arith.constant 17 : index
    %c0_372 = arith.constant 0 : index
    %400 = vector.load %arg12[%c17_371, %c0_372] : memref<37x16xf32, #tpu.memory_space<vmem>>, vector<3x16xf32>
    %cst_373 = arith.constant dense<0.000000e+00> : vector<32x16xf32>
    %401 = tpu.matmul %394, %400, %cst_373 {dimension_numbers = #tpu.dot_dimension_numbers<[1], [0], [0], [1], [0, 0, 1, 1], [], []>} : vector<32x3xf32>, vector<3x16xf32>, vector<32x16xf32> -> vector<32x16xf32>
    %c0_374 = arith.constant 0 : index
    %c1_375 = arith.constant 1 : index
    %c0_376 = arith.constant 0 : index
    %c0_377 = arith.constant 0 : index
    %402 = vector.load %arg10[%c0_374, %c1_375, %c0_376, %c0_377] : memref<1x3x32x16xf32, #tpu.memory_space<vmem>>, vector<1x1x32x16xf32>
    %403 = vector.shape_cast %402 : vector<1x1x32x16xf32> to vector<32x16xf32>
    %404 = vector.shape_cast %401 : vector<32x16xf32> to vector<1x1x32x16xf32>
    tpu.vector_store %arg10[%c0_374, %c1_375, %c0_376, %c0_377], %404 {strides = array<i32>} : memref<1x3x32x16xf32, #tpu.memory_space<vmem>>, vector<1x1x32x16xf32>,
    %c22_378 = arith.constant 22 : index
    %c0_379 = arith.constant 0 : index
    %405 = vector.load %arg12[%c22_378, %c0_379] : memref<37x16xf32, #tpu.memory_space<vmem>>, vector<3x16xf32>
    %cst_380 = arith.constant dense<0.000000e+00> : vector<32x16xf32>
    %406 = tpu.matmul %394, %405, %cst_380 {dimension_numbers = #tpu.dot_dimension_numbers<[1], [0], [0], [1], [0, 0, 1, 1], [], []>} : vector<32x3xf32>, vector<3x16xf32>, vector<32x16xf32> -> vector<32x16xf32>
    %c0_381 = arith.constant 0 : index
    %c2_382 = arith.constant 2 : index
    %c0_383 = arith.constant 0 : index
    %c0_384 = arith.constant 0 : index
    %407 = vector.load %arg10[%c0_381, %c2_382, %c0_383, %c0_384] : memref<1x3x32x16xf32, #tpu.memory_space<vmem>>, vector<1x1x32x16xf32>
    %408 = vector.shape_cast %407 : vector<1x1x32x16xf32> to vector<32x16xf32>
    %409 = vector.shape_cast %406 : vector<32x16xf32> to vector<1x1x32x16xf32>
    tpu.vector_store %arg10[%c0_381, %c2_382, %c0_383, %c0_384], %409 {strides = array<i32>} : memref<1x3x32x16xf32, #tpu.memory_space<vmem>>, vector<1x1x32x16xf32>,
    return
  }
  func.func @transform_0(%arg0: i32) -> (i32, i32, i32, i32) {
    %c0_i32 = arith.constant 0 : i32
    %c0_i32_0 = arith.constant 0 : i32
    %c0_i32_1 = arith.constant 0 : i32
    %c0_i32_2 = arith.constant 0 : i32
    return %arg0, %c0_i32, %c0_i32_0, %c0_i32_1 : i32, i32, i32, i32
  }
  func.func @transform_1(%arg0: i32) -> (i32, i32, i32) {
    %c0_i32 = arith.constant 0 : i32
    %c0_i32_0 = arith.constant 0 : i32
    %c0_i32_1 = arith.constant 0 : i32
    %c0_i32_2 = arith.constant 0 : i32
    return %c0_i32, %c0_i32_0, %c0_i32_1 : i32, i32, i32
  }
  func.func @transform_2(%arg0: i32) -> (i32, i32) {
    %c0_i32 = arith.constant 0 : i32
    %c0_i32_0 = arith.constant 0 : i32
    %c0_i32_1 = arith.constant 0 : i32
    return %c0_i32, %c0_i32_0 : i32, i32
  }
  func.func @transform_3(%arg0: i32) -> (i32, i32, i32) {
    %c0_i32 = arith.constant 0 : i32
    %c0_i32_0 = arith.constant 0 : i32
    %c0_i32_1 = arith.constant 0 : i32
    %c0_i32_2 = arith.constant 0 : i32
    return %c0_i32, %c0_i32_0, %c0_i32_1 : i32, i32, i32
  }
  func.func @transform_4(%arg0: i32) -> (i32, i32) {
    %c0_i32 = arith.constant 0 : i32
    %c0_i32_0 = arith.constant 0 : i32
    %c0_i32_1 = arith.constant 0 : i32
    return %c0_i32, %c0_i32_0 : i32, i32
  }
  func.func @transform_5(%arg0: i32) -> (i32, i32, i32) {
    %c0_i32 = arith.constant 0 : i32
    %c0_i32_0 = arith.constant 0 : i32
    %c0_i32_1 = arith.constant 0 : i32
    %c0_i32_2 = arith.constant 0 : i32
    return %c0_i32, %c0_i32_0, %c0_i32_1 : i32, i32, i32
  }
  func.func @transform_6(%arg0: i32) -> (i32, i32) {
    %c0_i32 = arith.constant 0 : i32
    %c0_i32_0 = arith.constant 0 : i32
    %c0_i32_1 = arith.constant 0 : i32
    return %c0_i32, %c0_i32_0 : i32, i32
  }
  func.func @transform_7(%arg0: i32) -> (i32, i32) {
    %c0_i32 = arith.constant 0 : i32
    %c0_i32_0 = arith.constant 0 : i32
    %c0_i32_1 = arith.constant 0 : i32
    return %c0_i32, %c0_i32_0 : i32, i32
  }
  func.func @transform_8(%arg0: i32) -> (i32, i32) {
    %c0_i32 = arith.constant 0 : i32
    %c0_i32_0 = arith.constant 0 : i32
    %c0_i32_1 = arith.constant 0 : i32
    return %c0_i32, %c0_i32_0 : i32, i32
  }
  func.func @transform_9(%arg0: i32) -> (i32, i32, i32, i32) {
    %c0_i32 = arith.constant 0 : i32
    %c0_i32_0 = arith.constant 0 : i32
    %c0_i32_1 = arith.constant 0 : i32
    %c0_i32_2 = arith.constant 0 : i32
    return %arg0, %c0_i32, %c0_i32_0, %c0_i32_1 : i32, i32, i32, i32
  }
}

module attributes {stable_mosaic.version = 11 : i64} {
  func.func @_epilogue_kernel(%arg0: i32, %arg1: i32, %arg2: memref<32xi32, #tpu.memory_space<smem>>, %arg3: memref<32xi32, #tpu.memory_space<smem>>, %arg4: memref<1x3x32x16xf32, #tpu.memory_space<vmem>>, %arg5: memref<1x512x16xf32, #tpu.memory_space<vmem>>, %arg6: memref<1x512x8xf32, #tpu.memory_space<vmem>>, %arg7: memref<16x1xf32, #tpu.memory_space<vmem>>, %arg8: memref<16x1xf32, #tpu.memory_space<vmem>>, %arg9: memref<16x8xbf16, #tpu.memory_space<vmem>>, %arg10: memref<1x8xf32, #tpu.memory_space<vmem>>, %arg11: memref<1x512x8xf32, #tpu.memory_space<vmem>>, %arg12: memref<512x16xf32, #tpu.memory_space<vmem>>) attributes {dimension_semantics = [#tpu.dimension_semantics<parallel>, #tpu.dimension_semantics<arbitrary>], iteration_bounds = array<i64: 2, 2>, scalar_prefetch = 2 : i64, scratch_operands = 1 : i64, tpu.core_type = #tpu.core_type<tc>, window_params = [{transform_indices = @transform_0, window_bounds = array<i64: 1, 3, 32, 16>}, {transform_indices = @transform_1, window_bounds = array<i64: 1, 512, 16>}, {transform_indices = @transform_2, window_bounds = array<i64: 1, 512, 8>}, {transform_indices = @transform_3, window_bounds = array<i64: 16, 1>}, {transform_indices = @transform_4, window_bounds = array<i64: 16, 1>}, {pipeline_mode = #tpu.pipeline_mode<synchronous>, transform_indices = @transform_5, window_bounds = array<i64: 16, 8>}, {pipeline_mode = #tpu.pipeline_mode<synchronous>, transform_indices = @transform_6, window_bounds = array<i64: 1, 8>}, {transform_indices = @transform_7, window_bounds = array<i64: 1, 512, 8>}]} {
    %c16_i32 = arith.constant 16 : i32
    %0 = arith.muli %arg1, %c16_i32 : i32
    %c0_i32 = arith.constant 0 : i32
    %1 = arith.addi %0, %c0_i32 : i32
    %2 = arith.index_cast %1 : i32 to index
    %3 = memref.load %arg2[%2] : memref<32xi32, #tpu.memory_space<smem>>
    %4 = arith.index_cast %1 : i32 to index
    %5 = memref.load %arg3[%4] : memref<32xi32, #tpu.memory_space<smem>>
    %c0 = arith.constant 0 : index
    %c0_0 = arith.constant 0 : index
    %6 = vector.load %arg7[%c0, %c0_0] : memref<16x1xf32, #tpu.memory_space<vmem>>, vector<1x1xf32>
    %c0_1 = arith.constant 0 : index
    %c0_2 = arith.constant 0 : index
    %7 = vector.load %arg8[%c0_1, %c0_2] : memref<16x1xf32, #tpu.memory_space<vmem>>, vector<1x1xf32>
    %c0_3 = arith.constant 0 : index
    %8 = arith.index_cast %3 : i32 to index
    %c0_4 = arith.constant 0 : index
    %c0_5 = arith.constant 0 : index
    %9 = vector.load %arg4[%c0_3, %8, %c0_4, %c0_5] : memref<1x3x32x16xf32, #tpu.memory_space<vmem>>, vector<1x1x32x16xf32>
    %10 = vector.shape_cast %9 : vector<1x1x32x16xf32> to vector<32x16xf32>
    %11 = vector.broadcast %6 : vector<1x1xf32> to vector<32x16xf32>
    %12 = arith.mulf %11, %10 : vector<32x16xf32>
    %c0_6 = arith.constant 0 : index
    %13 = arith.index_cast %5 : i32 to index
    %c0_7 = arith.constant 0 : index
    %c0_8 = arith.constant 0 : index
    %14 = vector.load %arg4[%c0_6, %13, %c0_7, %c0_8] : memref<1x3x32x16xf32, #tpu.memory_space<vmem>>, vector<1x1x32x16xf32>
    %15 = vector.shape_cast %14 : vector<1x1x32x16xf32> to vector<32x16xf32>
    %16 = vector.broadcast %7 : vector<1x1xf32> to vector<32x16xf32>
    %17 = arith.mulf %16, %15 : vector<32x16xf32>
    %18 = arith.addf %12, %17 : vector<32x16xf32>
    %c0_9 = arith.constant 0 : index
    %c0_10 = arith.constant 0 : index
    %19 = vector.load %arg12[%c0_9, %c0_10] : memref<512x16xf32, #tpu.memory_space<vmem>>, vector<32x16xf32>
    tpu.vector_store %arg12[%c0_9, %c0_10], %18 {strides = array<i32>} : memref<512x16xf32, #tpu.memory_space<vmem>>, vector<32x16xf32>,
    %c16_i32_11 = arith.constant 16 : i32
    %20 = arith.muli %arg1, %c16_i32_11 : i32
    %c1_i32 = arith.constant 1 : i32
    %21 = arith.addi %20, %c1_i32 : i32
    %22 = arith.index_cast %21 : i32 to index
    %23 = memref.load %arg2[%22] : memref<32xi32, #tpu.memory_space<smem>>
    %24 = arith.index_cast %21 : i32 to index
    %25 = memref.load %arg3[%24] : memref<32xi32, #tpu.memory_space<smem>>
    %c1 = arith.constant 1 : index
    %c0_12 = arith.constant 0 : index
    %26 = vector.load %arg7[%c1, %c0_12] : memref<16x1xf32, #tpu.memory_space<vmem>>, vector<1x1xf32>
    %c1_13 = arith.constant 1 : index
    %c0_14 = arith.constant 0 : index
    %27 = vector.load %arg8[%c1_13, %c0_14] : memref<16x1xf32, #tpu.memory_space<vmem>>, vector<1x1xf32>
    %c0_15 = arith.constant 0 : index
    %28 = arith.index_cast %23 : i32 to index
    %c0_16 = arith.constant 0 : index
    %c0_17 = arith.constant 0 : index
    %29 = vector.load %arg4[%c0_15, %28, %c0_16, %c0_17] : memref<1x3x32x16xf32, #tpu.memory_space<vmem>>, vector<1x1x32x16xf32>
    %30 = vector.shape_cast %29 : vector<1x1x32x16xf32> to vector<32x16xf32>
    %31 = vector.broadcast %26 : vector<1x1xf32> to vector<32x16xf32>
    %32 = arith.mulf %31, %30 : vector<32x16xf32>
    %c0_18 = arith.constant 0 : index
    %33 = arith.index_cast %25 : i32 to index
    %c0_19 = arith.constant 0 : index
    %c0_20 = arith.constant 0 : index
    %34 = vector.load %arg4[%c0_18, %33, %c0_19, %c0_20] : memref<1x3x32x16xf32, #tpu.memory_space<vmem>>, vector<1x1x32x16xf32>
    %35 = vector.shape_cast %34 : vector<1x1x32x16xf32> to vector<32x16xf32>
    %36 = vector.broadcast %27 : vector<1x1xf32> to vector<32x16xf32>
    %37 = arith.mulf %36, %35 : vector<32x16xf32>
    %38 = arith.addf %32, %37 : vector<32x16xf32>
    %c32 = arith.constant 32 : index
    %c0_21 = arith.constant 0 : index
    %39 = vector.load %arg12[%c32, %c0_21] : memref<512x16xf32, #tpu.memory_space<vmem>>, vector<32x16xf32>
    tpu.vector_store %arg12[%c32, %c0_21], %38 {strides = array<i32>} : memref<512x16xf32, #tpu.memory_space<vmem>>, vector<32x16xf32>,
    %c16_i32_22 = arith.constant 16 : i32
    %40 = arith.muli %arg1, %c16_i32_22 : i32
    %c2_i32 = arith.constant 2 : i32
    %41 = arith.addi %40, %c2_i32 : i32
    %42 = arith.index_cast %41 : i32 to index
    %43 = memref.load %arg2[%42] : memref<32xi32, #tpu.memory_space<smem>>
    %44 = arith.index_cast %41 : i32 to index
    %45 = memref.load %arg3[%44] : memref<32xi32, #tpu.memory_space<smem>>
    %c2 = arith.constant 2 : index
    %c0_23 = arith.constant 0 : index
    %46 = vector.load %arg7[%c2, %c0_23] : memref<16x1xf32, #tpu.memory_space<vmem>>, vector<1x1xf32>
    %c2_24 = arith.constant 2 : index
    %c0_25 = arith.constant 0 : index
    %47 = vector.load %arg8[%c2_24, %c0_25] : memref<16x1xf32, #tpu.memory_space<vmem>>, vector<1x1xf32>
    %c0_26 = arith.constant 0 : index
    %48 = arith.index_cast %43 : i32 to index
    %c0_27 = arith.constant 0 : index
    %c0_28 = arith.constant 0 : index
    %49 = vector.load %arg4[%c0_26, %48, %c0_27, %c0_28] : memref<1x3x32x16xf32, #tpu.memory_space<vmem>>, vector<1x1x32x16xf32>
    %50 = vector.shape_cast %49 : vector<1x1x32x16xf32> to vector<32x16xf32>
    %51 = vector.broadcast %46 : vector<1x1xf32> to vector<32x16xf32>
    %52 = arith.mulf %51, %50 : vector<32x16xf32>
    %c0_29 = arith.constant 0 : index
    %53 = arith.index_cast %45 : i32 to index
    %c0_30 = arith.constant 0 : index
    %c0_31 = arith.constant 0 : index
    %54 = vector.load %arg4[%c0_29, %53, %c0_30, %c0_31] : memref<1x3x32x16xf32, #tpu.memory_space<vmem>>, vector<1x1x32x16xf32>
    %55 = vector.shape_cast %54 : vector<1x1x32x16xf32> to vector<32x16xf32>
    %56 = vector.broadcast %47 : vector<1x1xf32> to vector<32x16xf32>
    %57 = arith.mulf %56, %55 : vector<32x16xf32>
    %58 = arith.addf %52, %57 : vector<32x16xf32>
    %c64 = arith.constant 64 : index
    %c0_32 = arith.constant 0 : index
    %59 = vector.load %arg12[%c64, %c0_32] : memref<512x16xf32, #tpu.memory_space<vmem>>, vector<32x16xf32>
    tpu.vector_store %arg12[%c64, %c0_32], %58 {strides = array<i32>} : memref<512x16xf32, #tpu.memory_space<vmem>>, vector<32x16xf32>,
    %c16_i32_33 = arith.constant 16 : i32
    %60 = arith.muli %arg1, %c16_i32_33 : i32
    %c3_i32 = arith.constant 3 : i32
    %61 = arith.addi %60, %c3_i32 : i32
    %62 = arith.index_cast %61 : i32 to index
    %63 = memref.load %arg2[%62] : memref<32xi32, #tpu.memory_space<smem>>
    %64 = arith.index_cast %61 : i32 to index
    %65 = memref.load %arg3[%64] : memref<32xi32, #tpu.memory_space<smem>>
    %c3 = arith.constant 3 : index
    %c0_34 = arith.constant 0 : index
    %66 = vector.load %arg7[%c3, %c0_34] : memref<16x1xf32, #tpu.memory_space<vmem>>, vector<1x1xf32>
    %c3_35 = arith.constant 3 : index
    %c0_36 = arith.constant 0 : index
    %67 = vector.load %arg8[%c3_35, %c0_36] : memref<16x1xf32, #tpu.memory_space<vmem>>, vector<1x1xf32>
    %c0_37 = arith.constant 0 : index
    %68 = arith.index_cast %63 : i32 to index
    %c0_38 = arith.constant 0 : index
    %c0_39 = arith.constant 0 : index
    %69 = vector.load %arg4[%c0_37, %68, %c0_38, %c0_39] : memref<1x3x32x16xf32, #tpu.memory_space<vmem>>, vector<1x1x32x16xf32>
    %70 = vector.shape_cast %69 : vector<1x1x32x16xf32> to vector<32x16xf32>
    %71 = vector.broadcast %66 : vector<1x1xf32> to vector<32x16xf32>
    %72 = arith.mulf %71, %70 : vector<32x16xf32>
    %c0_40 = arith.constant 0 : index
    %73 = arith.index_cast %65 : i32 to index
    %c0_41 = arith.constant 0 : index
    %c0_42 = arith.constant 0 : index
    %74 = vector.load %arg4[%c0_40, %73, %c0_41, %c0_42] : memref<1x3x32x16xf32, #tpu.memory_space<vmem>>, vector<1x1x32x16xf32>
    %75 = vector.shape_cast %74 : vector<1x1x32x16xf32> to vector<32x16xf32>
    %76 = vector.broadcast %67 : vector<1x1xf32> to vector<32x16xf32>
    %77 = arith.mulf %76, %75 : vector<32x16xf32>
    %78 = arith.addf %72, %77 : vector<32x16xf32>
    %c96 = arith.constant 96 : index
    %c0_43 = arith.constant 0 : index
    %79 = vector.load %arg12[%c96, %c0_43] : memref<512x16xf32, #tpu.memory_space<vmem>>, vector<32x16xf32>
    tpu.vector_store %arg12[%c96, %c0_43], %78 {strides = array<i32>} : memref<512x16xf32, #tpu.memory_space<vmem>>, vector<32x16xf32>,
    %c16_i32_44 = arith.constant 16 : i32
    %80 = arith.muli %arg1, %c16_i32_44 : i32
    %c4_i32 = arith.constant 4 : i32
    %81 = arith.addi %80, %c4_i32 : i32
    %82 = arith.index_cast %81 : i32 to index
    %83 = memref.load %arg2[%82] : memref<32xi32, #tpu.memory_space<smem>>
    %84 = arith.index_cast %81 : i32 to index
    %85 = memref.load %arg3[%84] : memref<32xi32, #tpu.memory_space<smem>>
    %c4 = arith.constant 4 : index
    %c0_45 = arith.constant 0 : index
    %86 = vector.load %arg7[%c4, %c0_45] : memref<16x1xf32, #tpu.memory_space<vmem>>, vector<1x1xf32>
    %c4_46 = arith.constant 4 : index
    %c0_47 = arith.constant 0 : index
    %87 = vector.load %arg8[%c4_46, %c0_47] : memref<16x1xf32, #tpu.memory_space<vmem>>, vector<1x1xf32>
    %c0_48 = arith.constant 0 : index
    %88 = arith.index_cast %83 : i32 to index
    %c0_49 = arith.constant 0 : index
    %c0_50 = arith.constant 0 : index
    %89 = vector.load %arg4[%c0_48, %88, %c0_49, %c0_50] : memref<1x3x32x16xf32, #tpu.memory_space<vmem>>, vector<1x1x32x16xf32>
    %90 = vector.shape_cast %89 : vector<1x1x32x16xf32> to vector<32x16xf32>
    %91 = vector.broadcast %86 : vector<1x1xf32> to vector<32x16xf32>
    %92 = arith.mulf %91, %90 : vector<32x16xf32>
    %c0_51 = arith.constant 0 : index
    %93 = arith.index_cast %85 : i32 to index
    %c0_52 = arith.constant 0 : index
    %c0_53 = arith.constant 0 : index
    %94 = vector.load %arg4[%c0_51, %93, %c0_52, %c0_53] : memref<1x3x32x16xf32, #tpu.memory_space<vmem>>, vector<1x1x32x16xf32>
    %95 = vector.shape_cast %94 : vector<1x1x32x16xf32> to vector<32x16xf32>
    %96 = vector.broadcast %87 : vector<1x1xf32> to vector<32x16xf32>
    %97 = arith.mulf %96, %95 : vector<32x16xf32>
    %98 = arith.addf %92, %97 : vector<32x16xf32>
    %c128 = arith.constant 128 : index
    %c0_54 = arith.constant 0 : index
    %99 = vector.load %arg12[%c128, %c0_54] : memref<512x16xf32, #tpu.memory_space<vmem>>, vector<32x16xf32>
    tpu.vector_store %arg12[%c128, %c0_54], %98 {strides = array<i32>} : memref<512x16xf32, #tpu.memory_space<vmem>>, vector<32x16xf32>,
    %c16_i32_55 = arith.constant 16 : i32
    %100 = arith.muli %arg1, %c16_i32_55 : i32
    %c5_i32 = arith.constant 5 : i32
    %101 = arith.addi %100, %c5_i32 : i32
    %102 = arith.index_cast %101 : i32 to index
    %103 = memref.load %arg2[%102] : memref<32xi32, #tpu.memory_space<smem>>
    %104 = arith.index_cast %101 : i32 to index
    %105 = memref.load %arg3[%104] : memref<32xi32, #tpu.memory_space<smem>>
    %c5 = arith.constant 5 : index
    %c0_56 = arith.constant 0 : index
    %106 = vector.load %arg7[%c5, %c0_56] : memref<16x1xf32, #tpu.memory_space<vmem>>, vector<1x1xf32>
    %c5_57 = arith.constant 5 : index
    %c0_58 = arith.constant 0 : index
    %107 = vector.load %arg8[%c5_57, %c0_58] : memref<16x1xf32, #tpu.memory_space<vmem>>, vector<1x1xf32>
    %c0_59 = arith.constant 0 : index
    %108 = arith.index_cast %103 : i32 to index
    %c0_60 = arith.constant 0 : index
    %c0_61 = arith.constant 0 : index
    %109 = vector.load %arg4[%c0_59, %108, %c0_60, %c0_61] : memref<1x3x32x16xf32, #tpu.memory_space<vmem>>, vector<1x1x32x16xf32>
    %110 = vector.shape_cast %109 : vector<1x1x32x16xf32> to vector<32x16xf32>
    %111 = vector.broadcast %106 : vector<1x1xf32> to vector<32x16xf32>
    %112 = arith.mulf %111, %110 : vector<32x16xf32>
    %c0_62 = arith.constant 0 : index
    %113 = arith.index_cast %105 : i32 to index
    %c0_63 = arith.constant 0 : index
    %c0_64 = arith.constant 0 : index
    %114 = vector.load %arg4[%c0_62, %113, %c0_63, %c0_64] : memref<1x3x32x16xf32, #tpu.memory_space<vmem>>, vector<1x1x32x16xf32>
    %115 = vector.shape_cast %114 : vector<1x1x32x16xf32> to vector<32x16xf32>
    %116 = vector.broadcast %107 : vector<1x1xf32> to vector<32x16xf32>
    %117 = arith.mulf %116, %115 : vector<32x16xf32>
    %118 = arith.addf %112, %117 : vector<32x16xf32>
    %c160 = arith.constant 160 : index
    %c0_65 = arith.constant 0 : index
    %119 = vector.load %arg12[%c160, %c0_65] : memref<512x16xf32, #tpu.memory_space<vmem>>, vector<32x16xf32>
    tpu.vector_store %arg12[%c160, %c0_65], %118 {strides = array<i32>} : memref<512x16xf32, #tpu.memory_space<vmem>>, vector<32x16xf32>,
    %c16_i32_66 = arith.constant 16 : i32
    %120 = arith.muli %arg1, %c16_i32_66 : i32
    %c6_i32 = arith.constant 6 : i32
    %121 = arith.addi %120, %c6_i32 : i32
    %122 = arith.index_cast %121 : i32 to index
    %123 = memref.load %arg2[%122] : memref<32xi32, #tpu.memory_space<smem>>
    %124 = arith.index_cast %121 : i32 to index
    %125 = memref.load %arg3[%124] : memref<32xi32, #tpu.memory_space<smem>>
    %c6 = arith.constant 6 : index
    %c0_67 = arith.constant 0 : index
    %126 = vector.load %arg7[%c6, %c0_67] : memref<16x1xf32, #tpu.memory_space<vmem>>, vector<1x1xf32>
    %c6_68 = arith.constant 6 : index
    %c0_69 = arith.constant 0 : index
    %127 = vector.load %arg8[%c6_68, %c0_69] : memref<16x1xf32, #tpu.memory_space<vmem>>, vector<1x1xf32>
    %c0_70 = arith.constant 0 : index
    %128 = arith.index_cast %123 : i32 to index
    %c0_71 = arith.constant 0 : index
    %c0_72 = arith.constant 0 : index
    %129 = vector.load %arg4[%c0_70, %128, %c0_71, %c0_72] : memref<1x3x32x16xf32, #tpu.memory_space<vmem>>, vector<1x1x32x16xf32>
    %130 = vector.shape_cast %129 : vector<1x1x32x16xf32> to vector<32x16xf32>
    %131 = vector.broadcast %126 : vector<1x1xf32> to vector<32x16xf32>
    %132 = arith.mulf %131, %130 : vector<32x16xf32>
    %c0_73 = arith.constant 0 : index
    %133 = arith.index_cast %125 : i32 to index
    %c0_74 = arith.constant 0 : index
    %c0_75 = arith.constant 0 : index
    %134 = vector.load %arg4[%c0_73, %133, %c0_74, %c0_75] : memref<1x3x32x16xf32, #tpu.memory_space<vmem>>, vector<1x1x32x16xf32>
    %135 = vector.shape_cast %134 : vector<1x1x32x16xf32> to vector<32x16xf32>
    %136 = vector.broadcast %127 : vector<1x1xf32> to vector<32x16xf32>
    %137 = arith.mulf %136, %135 : vector<32x16xf32>
    %138 = arith.addf %132, %137 : vector<32x16xf32>
    %c192 = arith.constant 192 : index
    %c0_76 = arith.constant 0 : index
    %139 = vector.load %arg12[%c192, %c0_76] : memref<512x16xf32, #tpu.memory_space<vmem>>, vector<32x16xf32>
    tpu.vector_store %arg12[%c192, %c0_76], %138 {strides = array<i32>} : memref<512x16xf32, #tpu.memory_space<vmem>>, vector<32x16xf32>,
    %c16_i32_77 = arith.constant 16 : i32
    %140 = arith.muli %arg1, %c16_i32_77 : i32
    %c7_i32 = arith.constant 7 : i32
    %141 = arith.addi %140, %c7_i32 : i32
    %142 = arith.index_cast %141 : i32 to index
    %143 = memref.load %arg2[%142] : memref<32xi32, #tpu.memory_space<smem>>
    %144 = arith.index_cast %141 : i32 to index
    %145 = memref.load %arg3[%144] : memref<32xi32, #tpu.memory_space<smem>>
    %c7 = arith.constant 7 : index
    %c0_78 = arith.constant 0 : index
    %146 = vector.load %arg7[%c7, %c0_78] : memref<16x1xf32, #tpu.memory_space<vmem>>, vector<1x1xf32>
    %c7_79 = arith.constant 7 : index
    %c0_80 = arith.constant 0 : index
    %147 = vector.load %arg8[%c7_79, %c0_80] : memref<16x1xf32, #tpu.memory_space<vmem>>, vector<1x1xf32>
    %c0_81 = arith.constant 0 : index
    %148 = arith.index_cast %143 : i32 to index
    %c0_82 = arith.constant 0 : index
    %c0_83 = arith.constant 0 : index
    %149 = vector.load %arg4[%c0_81, %148, %c0_82, %c0_83] : memref<1x3x32x16xf32, #tpu.memory_space<vmem>>, vector<1x1x32x16xf32>
    %150 = vector.shape_cast %149 : vector<1x1x32x16xf32> to vector<32x16xf32>
    %151 = vector.broadcast %146 : vector<1x1xf32> to vector<32x16xf32>
    %152 = arith.mulf %151, %150 : vector<32x16xf32>
    %c0_84 = arith.constant 0 : index
    %153 = arith.index_cast %145 : i32 to index
    %c0_85 = arith.constant 0 : index
    %c0_86 = arith.constant 0 : index
    %154 = vector.load %arg4[%c0_84, %153, %c0_85, %c0_86] : memref<1x3x32x16xf32, #tpu.memory_space<vmem>>, vector<1x1x32x16xf32>
    %155 = vector.shape_cast %154 : vector<1x1x32x16xf32> to vector<32x16xf32>
    %156 = vector.broadcast %147 : vector<1x1xf32> to vector<32x16xf32>
    %157 = arith.mulf %156, %155 : vector<32x16xf32>
    %158 = arith.addf %152, %157 : vector<32x16xf32>
    %c224 = arith.constant 224 : index
    %c0_87 = arith.constant 0 : index
    %159 = vector.load %arg12[%c224, %c0_87] : memref<512x16xf32, #tpu.memory_space<vmem>>, vector<32x16xf32>
    tpu.vector_store %arg12[%c224, %c0_87], %158 {strides = array<i32>} : memref<512x16xf32, #tpu.memory_space<vmem>>, vector<32x16xf32>,
    %c16_i32_88 = arith.constant 16 : i32
    %160 = arith.muli %arg1, %c16_i32_88 : i32
    %c8_i32 = arith.constant 8 : i32
    %161 = arith.addi %160, %c8_i32 : i32
    %162 = arith.index_cast %161 : i32 to index
    %163 = memref.load %arg2[%162] : memref<32xi32, #tpu.memory_space<smem>>
    %164 = arith.index_cast %161 : i32 to index
    %165 = memref.load %arg3[%164] : memref<32xi32, #tpu.memory_space<smem>>
    %c8 = arith.constant 8 : index
    %c0_89 = arith.constant 0 : index
    %166 = vector.load %arg7[%c8, %c0_89] : memref<16x1xf32, #tpu.memory_space<vmem>>, vector<1x1xf32>
    %c8_90 = arith.constant 8 : index
    %c0_91 = arith.constant 0 : index
    %167 = vector.load %arg8[%c8_90, %c0_91] : memref<16x1xf32, #tpu.memory_space<vmem>>, vector<1x1xf32>
    %c0_92 = arith.constant 0 : index
    %168 = arith.index_cast %163 : i32 to index
    %c0_93 = arith.constant 0 : index
    %c0_94 = arith.constant 0 : index
    %169 = vector.load %arg4[%c0_92, %168, %c0_93, %c0_94] : memref<1x3x32x16xf32, #tpu.memory_space<vmem>>, vector<1x1x32x16xf32>
    %170 = vector.shape_cast %169 : vector<1x1x32x16xf32> to vector<32x16xf32>
    %171 = vector.broadcast %166 : vector<1x1xf32> to vector<32x16xf32>
    %172 = arith.mulf %171, %170 : vector<32x16xf32>
    %c0_95 = arith.constant 0 : index
    %173 = arith.index_cast %165 : i32 to index
    %c0_96 = arith.constant 0 : index
    %c0_97 = arith.constant 0 : index
    %174 = vector.load %arg4[%c0_95, %173, %c0_96, %c0_97] : memref<1x3x32x16xf32, #tpu.memory_space<vmem>>, vector<1x1x32x16xf32>
    %175 = vector.shape_cast %174 : vector<1x1x32x16xf32> to vector<32x16xf32>
    %176 = vector.broadcast %167 : vector<1x1xf32> to vector<32x16xf32>
    %177 = arith.mulf %176, %175 : vector<32x16xf32>
    %178 = arith.addf %172, %177 : vector<32x16xf32>
    %c256 = arith.constant 256 : index
    %c0_98 = arith.constant 0 : index
    %179 = vector.load %arg12[%c256, %c0_98] : memref<512x16xf32, #tpu.memory_space<vmem>>, vector<32x16xf32>
    tpu.vector_store %arg12[%c256, %c0_98], %178 {strides = array<i32>} : memref<512x16xf32, #tpu.memory_space<vmem>>, vector<32x16xf32>,
    %c16_i32_99 = arith.constant 16 : i32
    %180 = arith.muli %arg1, %c16_i32_99 : i32
    %c9_i32 = arith.constant 9 : i32
    %181 = arith.addi %180, %c9_i32 : i32
    %182 = arith.index_cast %181 : i32 to index
    %183 = memref.load %arg2[%182] : memref<32xi32, #tpu.memory_space<smem>>
    %184 = arith.index_cast %181 : i32 to index
    %185 = memref.load %arg3[%184] : memref<32xi32, #tpu.memory_space<smem>>
    %c9 = arith.constant 9 : index
    %c0_100 = arith.constant 0 : index
    %186 = vector.load %arg7[%c9, %c0_100] : memref<16x1xf32, #tpu.memory_space<vmem>>, vector<1x1xf32>
    %c9_101 = arith.constant 9 : index
    %c0_102 = arith.constant 0 : index
    %187 = vector.load %arg8[%c9_101, %c0_102] : memref<16x1xf32, #tpu.memory_space<vmem>>, vector<1x1xf32>
    %c0_103 = arith.constant 0 : index
    %188 = arith.index_cast %183 : i32 to index
    %c0_104 = arith.constant 0 : index
    %c0_105 = arith.constant 0 : index
    %189 = vector.load %arg4[%c0_103, %188, %c0_104, %c0_105] : memref<1x3x32x16xf32, #tpu.memory_space<vmem>>, vector<1x1x32x16xf32>
    %190 = vector.shape_cast %189 : vector<1x1x32x16xf32> to vector<32x16xf32>
    %191 = vector.broadcast %186 : vector<1x1xf32> to vector<32x16xf32>
    %192 = arith.mulf %191, %190 : vector<32x16xf32>
    %c0_106 = arith.constant 0 : index
    %193 = arith.index_cast %185 : i32 to index
    %c0_107 = arith.constant 0 : index
    %c0_108 = arith.constant 0 : index
    %194 = vector.load %arg4[%c0_106, %193, %c0_107, %c0_108] : memref<1x3x32x16xf32, #tpu.memory_space<vmem>>, vector<1x1x32x16xf32>
    %195 = vector.shape_cast %194 : vector<1x1x32x16xf32> to vector<32x16xf32>
    %196 = vector.broadcast %187 : vector<1x1xf32> to vector<32x16xf32>
    %197 = arith.mulf %196, %195 : vector<32x16xf32>
    %198 = arith.addf %192, %197 : vector<32x16xf32>
    %c288 = arith.constant 288 : index
    %c0_109 = arith.constant 0 : index
    %199 = vector.load %arg12[%c288, %c0_109] : memref<512x16xf32, #tpu.memory_space<vmem>>, vector<32x16xf32>
    tpu.vector_store %arg12[%c288, %c0_109], %198 {strides = array<i32>} : memref<512x16xf32, #tpu.memory_space<vmem>>, vector<32x16xf32>,
    %c16_i32_110 = arith.constant 16 : i32
    %200 = arith.muli %arg1, %c16_i32_110 : i32
    %c10_i32 = arith.constant 10 : i32
    %201 = arith.addi %200, %c10_i32 : i32
    %202 = arith.index_cast %201 : i32 to index
    %203 = memref.load %arg2[%202] : memref<32xi32, #tpu.memory_space<smem>>
    %204 = arith.index_cast %201 : i32 to index
    %205 = memref.load %arg3[%204] : memref<32xi32, #tpu.memory_space<smem>>
    %c10 = arith.constant 10 : index
    %c0_111 = arith.constant 0 : index
    %206 = vector.load %arg7[%c10, %c0_111] : memref<16x1xf32, #tpu.memory_space<vmem>>, vector<1x1xf32>
    %c10_112 = arith.constant 10 : index
    %c0_113 = arith.constant 0 : index
    %207 = vector.load %arg8[%c10_112, %c0_113] : memref<16x1xf32, #tpu.memory_space<vmem>>, vector<1x1xf32>
    %c0_114 = arith.constant 0 : index
    %208 = arith.index_cast %203 : i32 to index
    %c0_115 = arith.constant 0 : index
    %c0_116 = arith.constant 0 : index
    %209 = vector.load %arg4[%c0_114, %208, %c0_115, %c0_116] : memref<1x3x32x16xf32, #tpu.memory_space<vmem>>, vector<1x1x32x16xf32>
    %210 = vector.shape_cast %209 : vector<1x1x32x16xf32> to vector<32x16xf32>
    %211 = vector.broadcast %206 : vector<1x1xf32> to vector<32x16xf32>
    %212 = arith.mulf %211, %210 : vector<32x16xf32>
    %c0_117 = arith.constant 0 : index
    %213 = arith.index_cast %205 : i32 to index
    %c0_118 = arith.constant 0 : index
    %c0_119 = arith.constant 0 : index
    %214 = vector.load %arg4[%c0_117, %213, %c0_118, %c0_119] : memref<1x3x32x16xf32, #tpu.memory_space<vmem>>, vector<1x1x32x16xf32>
    %215 = vector.shape_cast %214 : vector<1x1x32x16xf32> to vector<32x16xf32>
    %216 = vector.broadcast %207 : vector<1x1xf32> to vector<32x16xf32>
    %217 = arith.mulf %216, %215 : vector<32x16xf32>
    %218 = arith.addf %212, %217 : vector<32x16xf32>
    %c320 = arith.constant 320 : index
    %c0_120 = arith.constant 0 : index
    %219 = vector.load %arg12[%c320, %c0_120] : memref<512x16xf32, #tpu.memory_space<vmem>>, vector<32x16xf32>
    tpu.vector_store %arg12[%c320, %c0_120], %218 {strides = array<i32>} : memref<512x16xf32, #tpu.memory_space<vmem>>, vector<32x16xf32>,
    %c16_i32_121 = arith.constant 16 : i32
    %220 = arith.muli %arg1, %c16_i32_121 : i32
    %c11_i32 = arith.constant 11 : i32
    %221 = arith.addi %220, %c11_i32 : i32
    %222 = arith.index_cast %221 : i32 to index
    %223 = memref.load %arg2[%222] : memref<32xi32, #tpu.memory_space<smem>>
    %224 = arith.index_cast %221 : i32 to index
    %225 = memref.load %arg3[%224] : memref<32xi32, #tpu.memory_space<smem>>
    %c11 = arith.constant 11 : index
    %c0_122 = arith.constant 0 : index
    %226 = vector.load %arg7[%c11, %c0_122] : memref<16x1xf32, #tpu.memory_space<vmem>>, vector<1x1xf32>
    %c11_123 = arith.constant 11 : index
    %c0_124 = arith.constant 0 : index
    %227 = vector.load %arg8[%c11_123, %c0_124] : memref<16x1xf32, #tpu.memory_space<vmem>>, vector<1x1xf32>
    %c0_125 = arith.constant 0 : index
    %228 = arith.index_cast %223 : i32 to index
    %c0_126 = arith.constant 0 : index
    %c0_127 = arith.constant 0 : index
    %229 = vector.load %arg4[%c0_125, %228, %c0_126, %c0_127] : memref<1x3x32x16xf32, #tpu.memory_space<vmem>>, vector<1x1x32x16xf32>
    %230 = vector.shape_cast %229 : vector<1x1x32x16xf32> to vector<32x16xf32>
    %231 = vector.broadcast %226 : vector<1x1xf32> to vector<32x16xf32>
    %232 = arith.mulf %231, %230 : vector<32x16xf32>
    %c0_128 = arith.constant 0 : index
    %233 = arith.index_cast %225 : i32 to index
    %c0_129 = arith.constant 0 : index
    %c0_130 = arith.constant 0 : index
    %234 = vector.load %arg4[%c0_128, %233, %c0_129, %c0_130] : memref<1x3x32x16xf32, #tpu.memory_space<vmem>>, vector<1x1x32x16xf32>
    %235 = vector.shape_cast %234 : vector<1x1x32x16xf32> to vector<32x16xf32>
    %236 = vector.broadcast %227 : vector<1x1xf32> to vector<32x16xf32>
    %237 = arith.mulf %236, %235 : vector<32x16xf32>
    %238 = arith.addf %232, %237 : vector<32x16xf32>
    %c352 = arith.constant 352 : index
    %c0_131 = arith.constant 0 : index
    %239 = vector.load %arg12[%c352, %c0_131] : memref<512x16xf32, #tpu.memory_space<vmem>>, vector<32x16xf32>
    tpu.vector_store %arg12[%c352, %c0_131], %238 {strides = array<i32>} : memref<512x16xf32, #tpu.memory_space<vmem>>, vector<32x16xf32>,
    %c16_i32_132 = arith.constant 16 : i32
    %240 = arith.muli %arg1, %c16_i32_132 : i32
    %c12_i32 = arith.constant 12 : i32
    %241 = arith.addi %240, %c12_i32 : i32
    %242 = arith.index_cast %241 : i32 to index
    %243 = memref.load %arg2[%242] : memref<32xi32, #tpu.memory_space<smem>>
    %244 = arith.index_cast %241 : i32 to index
    %245 = memref.load %arg3[%244] : memref<32xi32, #tpu.memory_space<smem>>
    %c12 = arith.constant 12 : index
    %c0_133 = arith.constant 0 : index
    %246 = vector.load %arg7[%c12, %c0_133] : memref<16x1xf32, #tpu.memory_space<vmem>>, vector<1x1xf32>
    %c12_134 = arith.constant 12 : index
    %c0_135 = arith.constant 0 : index
    %247 = vector.load %arg8[%c12_134, %c0_135] : memref<16x1xf32, #tpu.memory_space<vmem>>, vector<1x1xf32>
    %c0_136 = arith.constant 0 : index
    %248 = arith.index_cast %243 : i32 to index
    %c0_137 = arith.constant 0 : index
    %c0_138 = arith.constant 0 : index
    %249 = vector.load %arg4[%c0_136, %248, %c0_137, %c0_138] : memref<1x3x32x16xf32, #tpu.memory_space<vmem>>, vector<1x1x32x16xf32>
    %250 = vector.shape_cast %249 : vector<1x1x32x16xf32> to vector<32x16xf32>
    %251 = vector.broadcast %246 : vector<1x1xf32> to vector<32x16xf32>
    %252 = arith.mulf %251, %250 : vector<32x16xf32>
    %c0_139 = arith.constant 0 : index
    %253 = arith.index_cast %245 : i32 to index
    %c0_140 = arith.constant 0 : index
    %c0_141 = arith.constant 0 : index
    %254 = vector.load %arg4[%c0_139, %253, %c0_140, %c0_141] : memref<1x3x32x16xf32, #tpu.memory_space<vmem>>, vector<1x1x32x16xf32>
    %255 = vector.shape_cast %254 : vector<1x1x32x16xf32> to vector<32x16xf32>
    %256 = vector.broadcast %247 : vector<1x1xf32> to vector<32x16xf32>
    %257 = arith.mulf %256, %255 : vector<32x16xf32>
    %258 = arith.addf %252, %257 : vector<32x16xf32>
    %c384 = arith.constant 384 : index
    %c0_142 = arith.constant 0 : index
    %259 = vector.load %arg12[%c384, %c0_142] : memref<512x16xf32, #tpu.memory_space<vmem>>, vector<32x16xf32>
    tpu.vector_store %arg12[%c384, %c0_142], %258 {strides = array<i32>} : memref<512x16xf32, #tpu.memory_space<vmem>>, vector<32x16xf32>,
    %c16_i32_143 = arith.constant 16 : i32
    %260 = arith.muli %arg1, %c16_i32_143 : i32
    %c13_i32 = arith.constant 13 : i32
    %261 = arith.addi %260, %c13_i32 : i32
    %262 = arith.index_cast %261 : i32 to index
    %263 = memref.load %arg2[%262] : memref<32xi32, #tpu.memory_space<smem>>
    %264 = arith.index_cast %261 : i32 to index
    %265 = memref.load %arg3[%264] : memref<32xi32, #tpu.memory_space<smem>>
    %c13 = arith.constant 13 : index
    %c0_144 = arith.constant 0 : index
    %266 = vector.load %arg7[%c13, %c0_144] : memref<16x1xf32, #tpu.memory_space<vmem>>, vector<1x1xf32>
    %c13_145 = arith.constant 13 : index
    %c0_146 = arith.constant 0 : index
    %267 = vector.load %arg8[%c13_145, %c0_146] : memref<16x1xf32, #tpu.memory_space<vmem>>, vector<1x1xf32>
    %c0_147 = arith.constant 0 : index
    %268 = arith.index_cast %263 : i32 to index
    %c0_148 = arith.constant 0 : index
    %c0_149 = arith.constant 0 : index
    %269 = vector.load %arg4[%c0_147, %268, %c0_148, %c0_149] : memref<1x3x32x16xf32, #tpu.memory_space<vmem>>, vector<1x1x32x16xf32>
    %270 = vector.shape_cast %269 : vector<1x1x32x16xf32> to vector<32x16xf32>
    %271 = vector.broadcast %266 : vector<1x1xf32> to vector<32x16xf32>
    %272 = arith.mulf %271, %270 : vector<32x16xf32>
    %c0_150 = arith.constant 0 : index
    %273 = arith.index_cast %265 : i32 to index
    %c0_151 = arith.constant 0 : index
    %c0_152 = arith.constant 0 : index
    %274 = vector.load %arg4[%c0_150, %273, %c0_151, %c0_152] : memref<1x3x32x16xf32, #tpu.memory_space<vmem>>, vector<1x1x32x16xf32>
    %275 = vector.shape_cast %274 : vector<1x1x32x16xf32> to vector<32x16xf32>
    %276 = vector.broadcast %267 : vector<1x1xf32> to vector<32x16xf32>
    %277 = arith.mulf %276, %275 : vector<32x16xf32>
    %278 = arith.addf %272, %277 : vector<32x16xf32>
    %c416 = arith.constant 416 : index
    %c0_153 = arith.constant 0 : index
    %279 = vector.load %arg12[%c416, %c0_153] : memref<512x16xf32, #tpu.memory_space<vmem>>, vector<32x16xf32>
    tpu.vector_store %arg12[%c416, %c0_153], %278 {strides = array<i32>} : memref<512x16xf32, #tpu.memory_space<vmem>>, vector<32x16xf32>,
    %c16_i32_154 = arith.constant 16 : i32
    %280 = arith.muli %arg1, %c16_i32_154 : i32
    %c14_i32 = arith.constant 14 : i32
    %281 = arith.addi %280, %c14_i32 : i32
    %282 = arith.index_cast %281 : i32 to index
    %283 = memref.load %arg2[%282] : memref<32xi32, #tpu.memory_space<smem>>
    %284 = arith.index_cast %281 : i32 to index
    %285 = memref.load %arg3[%284] : memref<32xi32, #tpu.memory_space<smem>>
    %c14 = arith.constant 14 : index
    %c0_155 = arith.constant 0 : index
    %286 = vector.load %arg7[%c14, %c0_155] : memref<16x1xf32, #tpu.memory_space<vmem>>, vector<1x1xf32>
    %c14_156 = arith.constant 14 : index
    %c0_157 = arith.constant 0 : index
    %287 = vector.load %arg8[%c14_156, %c0_157] : memref<16x1xf32, #tpu.memory_space<vmem>>, vector<1x1xf32>
    %c0_158 = arith.constant 0 : index
    %288 = arith.index_cast %283 : i32 to index
    %c0_159 = arith.constant 0 : index
    %c0_160 = arith.constant 0 : index
    %289 = vector.load %arg4[%c0_158, %288, %c0_159, %c0_160] : memref<1x3x32x16xf32, #tpu.memory_space<vmem>>, vector<1x1x32x16xf32>
    %290 = vector.shape_cast %289 : vector<1x1x32x16xf32> to vector<32x16xf32>
    %291 = vector.broadcast %286 : vector<1x1xf32> to vector<32x16xf32>
    %292 = arith.mulf %291, %290 : vector<32x16xf32>
    %c0_161 = arith.constant 0 : index
    %293 = arith.index_cast %285 : i32 to index
    %c0_162 = arith.constant 0 : index
    %c0_163 = arith.constant 0 : index
    %294 = vector.load %arg4[%c0_161, %293, %c0_162, %c0_163] : memref<1x3x32x16xf32, #tpu.memory_space<vmem>>, vector<1x1x32x16xf32>
    %295 = vector.shape_cast %294 : vector<1x1x32x16xf32> to vector<32x16xf32>
    %296 = vector.broadcast %287 : vector<1x1xf32> to vector<32x16xf32>
    %297 = arith.mulf %296, %295 : vector<32x16xf32>
    %298 = arith.addf %292, %297 : vector<32x16xf32>
    %c448 = arith.constant 448 : index
    %c0_164 = arith.constant 0 : index
    %299 = vector.load %arg12[%c448, %c0_164] : memref<512x16xf32, #tpu.memory_space<vmem>>, vector<32x16xf32>
    tpu.vector_store %arg12[%c448, %c0_164], %298 {strides = array<i32>} : memref<512x16xf32, #tpu.memory_space<vmem>>, vector<32x16xf32>,
    %c16_i32_165 = arith.constant 16 : i32
    %300 = arith.muli %arg1, %c16_i32_165 : i32
    %c15_i32 = arith.constant 15 : i32
    %301 = arith.addi %300, %c15_i32 : i32
    %302 = arith.index_cast %301 : i32 to index
    %303 = memref.load %arg2[%302] : memref<32xi32, #tpu.memory_space<smem>>
    %304 = arith.index_cast %301 : i32 to index
    %305 = memref.load %arg3[%304] : memref<32xi32, #tpu.memory_space<smem>>
    %c15 = arith.constant 15 : index
    %c0_166 = arith.constant 0 : index
    %306 = vector.load %arg7[%c15, %c0_166] : memref<16x1xf32, #tpu.memory_space<vmem>>, vector<1x1xf32>
    %c15_167 = arith.constant 15 : index
    %c0_168 = arith.constant 0 : index
    %307 = vector.load %arg8[%c15_167, %c0_168] : memref<16x1xf32, #tpu.memory_space<vmem>>, vector<1x1xf32>
    %c0_169 = arith.constant 0 : index
    %308 = arith.index_cast %303 : i32 to index
    %c0_170 = arith.constant 0 : index
    %c0_171 = arith.constant 0 : index
    %309 = vector.load %arg4[%c0_169, %308, %c0_170, %c0_171] : memref<1x3x32x16xf32, #tpu.memory_space<vmem>>, vector<1x1x32x16xf32>
    %310 = vector.shape_cast %309 : vector<1x1x32x16xf32> to vector<32x16xf32>
    %311 = vector.broadcast %306 : vector<1x1xf32> to vector<32x16xf32>
    %312 = arith.mulf %311, %310 : vector<32x16xf32>
    %c0_172 = arith.constant 0 : index
    %313 = arith.index_cast %305 : i32 to index
    %c0_173 = arith.constant 0 : index
    %c0_174 = arith.constant 0 : index
    %314 = vector.load %arg4[%c0_172, %313, %c0_173, %c0_174] : memref<1x3x32x16xf32, #tpu.memory_space<vmem>>, vector<1x1x32x16xf32>
    %315 = vector.shape_cast %314 : vector<1x1x32x16xf32> to vector<32x16xf32>
    %316 = vector.broadcast %307 : vector<1x1xf32> to vector<32x16xf32>
    %317 = arith.mulf %316, %315 : vector<32x16xf32>
    %318 = arith.addf %312, %317 : vector<32x16xf32>
    %c480 = arith.constant 480 : index
    %c0_175 = arith.constant 0 : index
    %319 = vector.load %arg12[%c480, %c0_175] : memref<512x16xf32, #tpu.memory_space<vmem>>, vector<32x16xf32>
    tpu.vector_store %arg12[%c480, %c0_175], %318 {strides = array<i32>} : memref<512x16xf32, #tpu.memory_space<vmem>>, vector<32x16xf32>,
    %c0_176 = arith.constant 0 : index
    %c0_177 = arith.constant 0 : index
    %320 = vector.load %arg12[%c0_176, %c0_177] : memref<512x16xf32, #tpu.memory_space<vmem>>, vector<512x16xf32>
    %c0_178 = arith.constant 0 : index
    %c0_179 = arith.constant 0 : index
    %c0_180 = arith.constant 0 : index
    %321 = vector.load %arg5[%c0_178, %c0_179, %c0_180] : memref<1x512x16xf32, #tpu.memory_space<vmem>>, vector<1x512x16xf32>
    %322 = vector.shape_cast %321 : vector<1x512x16xf32> to vector<512x16xf32>
    %323 = arith.addf %320, %322 : vector<512x16xf32>
    %324 = arith.truncf %323 : vector<512x16xf32> to vector<512x16xbf16>
    %c0_181 = arith.constant 0 : index
    %c0_182 = arith.constant 0 : index
    %325 = vector.load %arg9[%c0_181, %c0_182] : memref<16x8xbf16, #tpu.memory_space<vmem>>, vector<16x8xbf16>
    %cst = arith.constant dense<0.000000e+00> : vector<512x8xf32>
    %326 = tpu.matmul %324, %325, %cst {dimension_numbers = #tpu.dot_dimension_numbers<[1], [0], [0], [1], [0, 0, 1, 1], [], []>} : vector<512x16xbf16>, vector<16x8xbf16>, vector<512x8xf32> -> vector<512x8xf32>
    %c0_183 = arith.constant 0 : index
    %c0_184 = arith.constant 0 : index
    %327 = vector.load %arg10[%c0_183, %c0_184] : memref<1x8xf32, #tpu.memory_space<vmem>>, vector<1x8xf32>
    %328 = vector.broadcast %327 : vector<1x8xf32> to vector<512x8xf32>
    %329 = arith.addf %326, %328 : vector<512x8xf32>
    %cst_185 = arith.constant 0.000000e+00 : f32
    %330 = vector.broadcast %cst_185 : f32 to vector<512x8xf32>
    %331 = arith.subf %330, %329 : vector<512x8xf32>
    %332 = math.exp %331 : vector<512x8xf32>
    %cst_186 = arith.constant 1.000000e+00 : f32
    %333 = vector.broadcast %cst_186 : f32 to vector<512x8xf32>
    %334 = arith.addf %333, %332 : vector<512x8xf32>
    %cst_187 = arith.constant 1.000000e+00 : f32
    %335 = vector.broadcast %cst_187 : f32 to vector<512x8xf32>
    %336 = arith.divf %335, %334 : vector<512x8xf32>
    %c0_188 = arith.constant 0 : index
    %c0_189 = arith.constant 0 : index
    %c0_190 = arith.constant 0 : index
    %337 = vector.load %arg6[%c0_188, %c0_189, %c0_190] : memref<1x512x8xf32, #tpu.memory_space<vmem>>, vector<1x512x8xf32>
    %338 = vector.shape_cast %337 : vector<1x512x8xf32> to vector<512x8xf32>
    %339 = arith.mulf %338, %336 : vector<512x8xf32>
    %c0_191 = arith.constant 0 : index
    %c0_192 = arith.constant 0 : index
    %c0_193 = arith.constant 0 : index
    %340 = vector.load %arg11[%c0_191, %c0_192, %c0_193] : memref<1x512x8xf32, #tpu.memory_space<vmem>>, vector<1x512x8xf32>
    %341 = vector.shape_cast %340 : vector<1x512x8xf32> to vector<512x8xf32>
    %342 = vector.shape_cast %339 : vector<512x8xf32> to vector<1x512x8xf32>
    tpu.vector_store %arg11[%c0_191, %c0_192, %c0_193], %342 {strides = array<i32>} : memref<1x512x8xf32, #tpu.memory_space<vmem>>, vector<1x512x8xf32>,
    return
  }
  func.func @transform_0(%arg0: i32, %arg1: i32, %arg2: memref<32xi32, #tpu.memory_space<smem>>, %arg3: memref<32xi32, #tpu.memory_space<smem>>) -> (i32, i32, i32, i32) {
    %c0_i32 = arith.constant 0 : i32
    %c0_i32_0 = arith.constant 0 : i32
    %c0_i32_1 = arith.constant 0 : i32
    %c0_i32_2 = arith.constant 0 : i32
    return %arg0, %c0_i32, %c0_i32_0, %c0_i32_1 : i32, i32, i32, i32
  }
  func.func @transform_1(%arg0: i32, %arg1: i32, %arg2: memref<32xi32, #tpu.memory_space<smem>>, %arg3: memref<32xi32, #tpu.memory_space<smem>>) -> (i32, i32, i32) {
    %c0_i32 = arith.constant 0 : i32
    %c0_i32_0 = arith.constant 0 : i32
    return %arg0, %arg1, %c0_i32 : i32, i32, i32
  }
  func.func @transform_2(%arg0: i32, %arg1: i32, %arg2: memref<32xi32, #tpu.memory_space<smem>>, %arg3: memref<32xi32, #tpu.memory_space<smem>>) -> (i32, i32, i32) {
    %c0_i32 = arith.constant 0 : i32
    %c0_i32_0 = arith.constant 0 : i32
    return %arg0, %arg1, %c0_i32 : i32, i32, i32
  }
  func.func @transform_3(%arg0: i32, %arg1: i32, %arg2: memref<32xi32, #tpu.memory_space<smem>>, %arg3: memref<32xi32, #tpu.memory_space<smem>>) -> (i32, i32) {
    %c0_i32 = arith.constant 0 : i32
    %c0_i32_0 = arith.constant 0 : i32
    return %arg1, %c0_i32 : i32, i32
  }
  func.func @transform_4(%arg0: i32, %arg1: i32, %arg2: memref<32xi32, #tpu.memory_space<smem>>, %arg3: memref<32xi32, #tpu.memory_space<smem>>) -> (i32, i32) {
    %c0_i32 = arith.constant 0 : i32
    %c0_i32_0 = arith.constant 0 : i32
    return %arg1, %c0_i32 : i32, i32
  }
  func.func @transform_5(%arg0: i32, %arg1: i32, %arg2: memref<32xi32, #tpu.memory_space<smem>>, %arg3: memref<32xi32, #tpu.memory_space<smem>>) -> (i32, i32) {
    %c0_i32 = arith.constant 0 : i32
    %c0_i32_0 = arith.constant 0 : i32
    %c0_i32_1 = arith.constant 0 : i32
    return %c0_i32, %c0_i32_0 : i32, i32
  }
  func.func @transform_6(%arg0: i32, %arg1: i32, %arg2: memref<32xi32, #tpu.memory_space<smem>>, %arg3: memref<32xi32, #tpu.memory_space<smem>>) -> (i32, i32) {
    %c0_i32 = arith.constant 0 : i32
    %c0_i32_0 = arith.constant 0 : i32
    %c0_i32_1 = arith.constant 0 : i32
    return %c0_i32, %c0_i32_0 : i32, i32
  }
  func.func @transform_7(%arg0: i32, %arg1: i32, %arg2: memref<32xi32, #tpu.memory_space<smem>>, %arg3: memref<32xi32, #tpu.memory_space<smem>>) -> (i32, i32, i32) {
    %c0_i32 = arith.constant 0 : i32
    %c0_i32_0 = arith.constant 0 : i32
    return %arg0, %arg1, %c0_i32 : i32, i32, i32
  }
}

</mosaic_0001>

<bundles_post_ra>
// kernel: esa_forward.4
= control target key start
LH: loop header
LB: loop body
LE: loop exit
PB: predicated region body
PF: predicated region fallthrough
CT: control target
= control target key end

     0   :  { %s2291_s21 = smov 0   ;;  %s2821_s0 = inlined_call_operand.vmem [shape: bf16[2048,8], index: 0, kind: input, shape index: {}]   ;;  %s2822_s1 = inlined_call_operand.vmem [shape: bf16[8,16], index: 1, kind: input, shape index: {}]   ;;  %s2823_s2 = inlined_call_operand.vmem [shape: f32[1,16], index: 2, kind: input, shape index: {}]   ;;  %s2824_s3 = inlined_call_operand.vmem [shape: bf16[16,16], index: 3, kind: input, shape index: {}]   ;;  %s2825_s4 = inlined_call_operand.vmem [shape: f32[1,16], index: 4, kind: input, shape index: {}]   ;;  %s2826_s5 = inlined_call_operand.vmem [shape: bf16[2048,16], index: 5, kind: output, shape index: {0}]   ;;  %s2827_s6 = inlined_call_operand.vmem [shape: f32[2048,16], index: 6, kind: output, shape index: {1}]  }
   0x1 LB: > { %s1768_s22 = sadd.s32 4294967295, %s2254_s21   ;;  %p1772_p0 = scmp.ge.s32.totalorder %s2254_s21, 1  ;;  %s2254_s21 = sphi %s2291_s21, %s17_s21  }
   0x2   : > { %p216_p1 = scmp.lt.s32.totalorder %s2254_s21, 5 }
   0x4   : > { %p217_p2 = pnand %p1772_p0, %p216_p1 }
   0x5   : > { %v334_v0 = vld [vmem:[%s2822_s1] sm:$0xf] (!%p217_p2)  ;;  %vm599_vm0 = vcmask (!%p217_p2), 1043456   ;;  %s1773_s25 = sshll.u32 (!%p217_p2), %s1768_s22, 6  ;;  %vm502_vm1 = vcmask (!%p217_p2), 64512   ;;  %vm1148_vm2 = vcmask (!%p217_p2), 125952  }
   0x6   : > { %220 = sbr.rel (%p217_p2) target bundleno = 576 (0x240), region = 40  ;;  %2206 = vmatprep.subr.msk.bf16.mxu0 (!%p217_p2), %vm599_vm0, %v334_v0  ;;  %v601_v1 = vsel (!%p217_p2), %vm599_vm0, %v334_v0, 0  ;;  %p252_p3 = scmp.lt.s32.totalorder (!%p217_p2), %s1773_s25, 255  ;;  %v2247_v27 = vld [vmem:[%s2824_s3] sm:$0xff] (!%p217_p2)   ;;  %vm1228_vm3 = vcmask (!%p217_p2), 130048  }
   0x7   : > { %2075 = vmatpush3.bf16.msra.mxu0 (!%p217_p2), %v601_v1  ;;  %2140 = vmatprep.subr.bf16.mxu1 (!%p217_p2), %v2247_v27  ;;  %v2382_v35 = vld [vmem:[%s2823_s2] ss:$0 sm:$0xff] (!%p217_p2) }
   0x8   : > { %2141 = vmatpush3.bf16.msra.mxu1 (!%p217_p2), %v2247_v27 }
   0xd   : > { %s2829_s25 = smov (!%p252_p3, %s1773_s25), 255 }
   0xe   : > { %s1774_s26 = sshll.u32 %s2829_s25, 2  ;;  %s1778_s13 = sshll.u32 %s2829_s25, 3 }
   0xf   : > { %s2310_s29 = scalar_lea.vmem %s2821_s0, %s1774_s26  ;;  %s2390_s12 = scalar_lea.vmem %s2826_s5, %s1774_s26 }
  0x10   : > { %v2215_v2 = vld [vmem:[%s2310_s29] sm:$0xff]   ;;  %v2216_v3 = vld [vmem:[%s2310_s29 + $0x8] sm:$0xff]   ;;  %v2217_v4 = vld [vmem:[%s2310_s29 + $0x10] sm:$0xff]   ;;  %s2624_s18 = scalar_lea.vmem %s2827_s6, %s1778_s13 }
  0x11   : > { %2076 = vmatprep.mubr.msk.bf16.mxu0 %vm502_vm1, %v2215_v2  ;;  %v2218_v5 = vld [vmem:[%s2310_s29 + $0x18] sm:$0xff]   ;;  %v2219_v6 = vld [vmem:[%s2310_s29 + $0x20] sm:$0xff]   ;;  %v2220_v7 = vld [vmem:[%s2310_s29 + $0x28] sm:$0xff]  }
  0x12   : > { %2077 = vmatmul.mubr.msk.bf16.vlgmr.msra.gmra.mrb[0].mxu0 %vm502_vm1, %v2216_v3  ;;  %v2221_v8 = vld [vmem:[%s2310_s29 + $0x30] sm:$0xff]   ;;  %v2222_v9 = vld [vmem:[%s2310_s29 + $0x38] sm:$0xff]   ;;  %v2223_v10 = vld [vmem:[%s2310_s29 + $0x40] sm:$0xff]  }
  0x13   : > { %2080 = vmatprep.mubr.msk.bf16.mxu0 %vm502_vm1, %v2217_v4  ;;  %v2224_v11 = vld [vmem:[%s2310_s29 + $0x48] sm:$0xff]   ;;  %v2225_v12 = vld [vmem:[%s2310_s29 + $0x50] sm:$0xff]   ;;  %v2226_v13 = vld [vmem:[%s2310_s29 + $0x58] sm:$0xff]  }
  0x14   : > { %v2227_v14 = vld [vmem:[%s2310_s29 + $0x60] sm:$0xff]   ;;  %v2228_v15 = vld [vmem:[%s2310_s29 + $0x68] sm:$0xff]   ;;  %v2229_v16 = vld [vmem:[%s2310_s29 + $0x70] sm:$0xff]  }
  0x15   : > { %v2230_v17 = vld [vmem:[%s2310_s29 + $0x78] sm:$0xff]   ;;  %v2231_v18 = vld [vmem:[%s2310_s29 + $0x80] sm:$0xff]   ;;  %v2232_v19 = vld [vmem:[%s2310_s29 + $0x88] sm:$0xff]  }
  0x16   : > { %v2233_v20 = vld [vmem:[%s2310_s29 + $0x90] sm:$0xff]   ;;  %v2234_v21 = vld [vmem:[%s2310_s29 + $0x98] sm:$0xff]   ;;  %v2235_v22 = vld [vmem:[%s2310_s29 + $0xa0] sm:$0xff]  }
  0x17   : > { %v2236_v23 = vld [vmem:[%s2310_s29 + $0xa8] sm:$0xff]   ;;  %v2237_v24 = vld [vmem:[%s2310_s29 + $0xb0] sm:$0xff]   ;;  %v2238_v25 = vld [vmem:[%s2310_s29 + $0xb8] sm:$0xff]  }
  0x18   : > { %v2239_v26 = vld [vmem:[%s2310_s29 + $0xc0] sm:$0xff]   ;;  %v2240_v28 = vld [vmem:[%s2310_s29 + $0xc8] sm:$0xff]   ;;  %v2241_v29 = vld [vmem:[%s2310_s29 + $0xd0] sm:$0xff]  }
  0x19   : > { %v2242_v30 = vld [vmem:[%s2310_s29 + $0xd8] sm:$0xff]   ;;  %v2243_v31 = vld [vmem:[%s2310_s29 + $0xe0] sm:$0xff]   ;;  %v2244_v32 = vld [vmem:[%s2310_s29 + $0xe8] sm:$0xff]  }
  0x1a   : > { %2081 = vmatmul.mubr.msk.bf16.gmra.mrb[4].mxu0 %vm502_vm1, %v2218_v5  ;;  %v2245_v33 = vld [vmem:[%s2310_s29 + $0xf0] sm:$0xff]   ;;  %v2246_v34 = vld [vmem:[%s2310_s29 + $0xf8] sm:$0xff]  }
  0x1b   : > { %2084 = vmatprep.mubr.msk.bf16.mxu0 %vm502_vm1, %v2219_v6 }
  0x22   : > { %2085 = vmatmul.mubr.msk.bf16.gmra.mrb[8].mxu0 %vm502_vm1, %v2220_v7 }
  0x23   : > { %2088 = vmatprep.mubr.msk.bf16.mxu0 %vm502_vm1, %v2221_v8 }
  0x2a   : > { %2089 = vmatmul.mubr.msk.bf16.gmra.mrb[12].mxu0 %vm502_vm1, %v2222_v9 }
  0x2b   : > { %2092 = vmatprep.mubr.msk.bf16.mxu0 %vm502_vm1, %v2223_v10 }
  0x32   : > { %2093 = vmatmul.mubr.msk.bf16.gmra.mrb[16].mxu0 %vm502_vm1, %v2224_v11 }
  0x33   : > { %2096 = vmatprep.mubr.msk.bf16.mxu0 %vm502_vm1, %v2225_v12 }
  0x3a   : > { %2097 = vmatmul.mubr.msk.bf16.gmra.mrb[20].mxu0 %vm502_vm1, %v2226_v13 }
  0x3b   : > { %2100 = vmatprep.mubr.msk.bf16.mxu0 %vm502_vm1, %v2227_v14 }
  0x42   : > { %2101 = vmatmul.mubr.msk.bf16.gmra.mrb[24].mxu0 %vm502_vm1, %v2228_v15 }
  0x43   : > { %2104 = vmatprep.mubr.msk.bf16.mxu0 %vm502_vm1, %v2229_v16 }
  0x4a   : > { %2105 = vmatmul.mubr.msk.bf16.gmra.mrb[28].mxu0 %vm502_vm1, %v2230_v17 }
  0x4b   : > { %2108 = vmatprep.mubr.msk.bf16.mxu0 %vm502_vm1, %v2231_v18 }
  0x52   : > { %2109 = vmatmul.mubr.msk.bf16.gmra.mrb[32].mxu0 %vm502_vm1, %v2232_v19 }
  0x53   : > { %2112 = vmatprep.mubr.msk.bf16.mxu0 %vm502_vm1, %v2233_v20 }
  0x5a   : > { %2113 = vmatmul.mubr.msk.bf16.gmra.mrb[36].mxu0 %vm502_vm1, %v2234_v21 }
  0x5b   : > { %2116 = vmatprep.mubr.msk.bf16.mxu0 %vm502_vm1, %v2235_v22 }
  0x62   : > { %2117 = vmatmul.mubr.msk.bf16.gmra.mrb[40].mxu0 %vm502_vm1, %v2236_v23 }
  0x63   : > { %2120 = vmatprep.mubr.msk.bf16.mxu0 %vm502_vm1, %v2237_v24 }
  0x6a   : > { %2121 = vmatmul.mubr.msk.bf16.gmra.mrb[44].mxu0 %vm502_vm1, %v2238_v25 }
  0x6b   : > { %2124 = vmatprep.mubr.msk.bf16.mxu0 %vm502_vm1, %v2239_v26 }
  0x72   : > { %2125 = vmatmul.mubr.msk.bf16.gmra.mrb[48].mxu0 %vm502_vm1, %v2240_v28 }
  0x73   : > { %2128 = vmatprep.mubr.msk.bf16.mxu0 %vm502_vm1, %v2241_v29 }
  0x7a   : > { %2129 = vmatmul.mubr.msk.bf16.gmra.mrb[52].mxu0 %vm502_vm1, %v2242_v30 }
  0x7b   : > { %2132 = vmatprep.mubr.msk.bf16.mxu0 %vm502_vm1, %v2243_v31 }
  0x82   : > { %2133 = vmatmul.mubr.msk.bf16.gmra.mrb[56].mxu0 %vm502_vm1, %v2244_v32 }
  0x83   : > { %2136 = vmatprep.mubr.msk.bf16.mxu0 %vm502_vm1, %v2245_v33 }
  0x8a   : > { %2137 = vmatmul.mubr.msk.bf16.gmra.mrb[60].mxu0 %vm502_vm1, %v2246_v34 }
  0xe5   : > { %v2078_v36 = vpop.f32.mrb[0].mxu0 }
  0xe6   : > { %v646_v37 = vadd.f32 %v2078_v36, %v2382_v35  ;;  %v637_v38 = vpop.f32.mrb[1].mxu0 }
  0xe7   : > { %v638_v39 = vadd.f32 %v2382_v35, %v637_v38  ;;  %v2079_v40 = vpop.f32.mrb[2].mxu0 }
  0xe8   : > { %v1946_v41 = vpack.c.bf16 %v646_v37, %v646_v37  ;;  %v649_v42 = vadd.f32 %v2079_v40, %v2382_v35  ;;  %v640_v43 = vpop.f32.mrb[3].mxu0 }
  0xe9   : > { %v1944_v44 = vpack.c.bf16 %v638_v39, %v638_v39  ;;  %v641_v45 = vadd.f32 %v2382_v35, %v640_v43 }
  0xea   : > { %1151 = vst.msk [vmem:[%s2390_s12 + $0x8] sm:$0xf] %vm1148_vm2, %v1946_v41  ;;  %v893_v46 = vpack.c.bf16 %v649_v42, %v646_v37  ;;  %v1947_v47 = vpack.c.bf16 %v649_v42, %v649_v42 }
  0xeb   : > { %1149 = vst.msk [vmem:[%s2390_s12] sm:$0xf] %vm1148_vm2, %v1944_v44  ;;  %v1945_v48 = vpack.c.bf16 %v641_v45, %v641_v45  ;;  %v892_v49 = vpack.c.bf16 %v641_v45, %v638_v39 }
  0xec   : > { %1152 = vst.msk [vmem:[%s2390_s12 + $0xc] sm:$0xf] %vm1148_vm2, %v1947_v47 }
  0xed   : > { %1150 = vst.msk [vmem:[%s2390_s12 + $0x4] sm:$0xf] %vm1148_vm2, %v1945_v48  ;;  %v2082_v50 = vpop.f32.mrb[4].mxu0  ;;  %2142 = vmatprep.mubr.msk.bf16.mxu1 %vm1228_vm3, %v892_v49 }
  0xee   : > { %v662_v51 = vadd.f32 %v2082_v50, %v2382_v35  ;;  %v653_v52 = vpop.f32.mrb[5].mxu0  ;;  %2143 = vmatmul.mubr.msk.bf16.vlgmr.msra.gmra.mrb[0].mxu1 %vm1228_vm3, %v893_v46 }
  0xef   : > { %v654_v53 = vadd.f32 %v2382_v35, %v653_v52  ;;  %v2083_v54 = vpop.f32.mrb[6].mxu0 }
  0xf0   : > { %v1950_v55 = vpack.c.bf16 %v662_v51, %v662_v51  ;;  %v665_v56 = vadd.f32 %v2083_v54, %v2382_v35  ;;  %v656_v57 = vpop.f32.mrb[7].mxu0 }
  0xf1   : > { %v1948_v58 = vpack.c.bf16 %v654_v53, %v654_v53  ;;  %v657_v59 = vadd.f32 %v2382_v35, %v656_v57 }
  0xf2   : > { %1155 = vst.msk [vmem:[%s2390_s12 + $0x18] sm:$0xf] %vm1148_vm2, %v1950_v55  ;;  %v895_v60 = vpack.c.bf16 %v665_v56, %v662_v51  ;;  %v1951_v61 = vpack.c.bf16 %v665_v56, %v665_v56 }
  0xf3   : > { %1153 = vst.msk [vmem:[%s2390_s12 + $0x10] sm:$0xf] %vm1148_vm2, %v1948_v58  ;;  %v894_v62 = vpack.c.bf16 %v657_v59, %v654_v53  ;;  %v1949_v63 = vpack.c.bf16 %v657_v59, %v657_v59 }
  0xf4   : > { %1156 = vst.msk [vmem:[%s2390_s12 + $0x1c] sm:$0xf] %vm1148_vm2, %v1951_v61 }
  0xf5   : > { %1154 = vst.msk [vmem:[%s2390_s12 + $0x14] sm:$0xf] %vm1148_vm2, %v1949_v63  ;;  %v2086_v0 = vpop.f32.mrb[8].mxu0  ;;  %2146 = vmatprep.mubr.msk.bf16.mxu1 %vm1228_vm3, %v894_v62 }
  0xf6   : > { %v678_v1 = vadd.f32 %v2086_v0, %v2382_v35  ;;  %v669_v2 = vpop.f32.mrb[9].mxu0  ;;  %2147 = vmatmul.mubr.msk.bf16.gmra.mrb[4].mxu1 %vm1228_vm3, %v895_v60 }
  0xf7   : > { %v670_v3 = vadd.f32 %v2382_v35, %v669_v2  ;;  %v2087_v4 = vpop.f32.mrb[10].mxu0 }
  0xf8   : > { %v1954_v5 = vpack.c.bf16 %v678_v1, %v678_v1  ;;  %v681_v6 = vadd.f32 %v2087_v4, %v2382_v35  ;;  %v672_v7 = vpop.f32.mrb[11].mxu0 }
  0xf9   : > { %v1952_v8 = vpack.c.bf16 %v670_v3, %v670_v3  ;;  %v673_v9 = vadd.f32 %v2382_v35, %v672_v7 }
  0xfa   : > { %1159 = vst.msk [vmem:[%s2390_s12 + $0x28] sm:$0xf] %vm1148_vm2, %v1954_v5  ;;  %v897_v10 = vpack.c.bf16 %v681_v6, %v678_v1  ;;  %v1955_v11 = vpack.c.bf16 %v681_v6, %v681_v6 }
  0xfb   : > { %1157 = vst.msk [vmem:[%s2390_s12 + $0x20] sm:$0xf] %vm1148_vm2, %v1952_v8  ;;  %v896_v12 = vpack.c.bf16 %v673_v9, %v670_v3  ;;  %v1953_v13 = vpack.c.bf16 %v673_v9, %v673_v9 }
  0xfc   : > { %1160 = vst.msk [vmem:[%s2390_s12 + $0x2c] sm:$0xf] %vm1148_vm2, %v1955_v11 }
  0xfd   : > { %1158 = vst.msk [vmem:[%s2390_s12 + $0x24] sm:$0xf] %vm1148_vm2, %v1953_v13  ;;  %v2090_v14 = vpop.f32.mrb[12].mxu0  ;;  %2150 = vmatprep.mubr.msk.bf16.mxu1 %vm1228_vm3, %v896_v12 }
  0xfe   : > { %v694_v15 = vadd.f32 %v2090_v14, %v2382_v35  ;;  %v685_v16 = vpop.f32.mrb[13].mxu0  ;;  %2151 = vmatmul.mubr.msk.bf16.gmra.mrb[8].mxu1 %vm1228_vm3, %v897_v10 }
  0xff   : > { %v686_v17 = vadd.f32 %v2382_v35, %v685_v16  ;;  %v2091_v18 = vpop.f32.mrb[14].mxu0 }
 0x100   : > { %v1958_v19 = vpack.c.bf16 %v694_v15, %v694_v15  ;;  %v697_v20 = vadd.f32 %v2091_v18, %v2382_v35  ;;  %v688_v21 = vpop.f32.mrb[15].mxu0 }
 0x101   : > { %v1956_v22 = vpack.c.bf16 %v686_v17, %v686_v17  ;;  %v689_v23 = vadd.f32 %v2382_v35, %v688_v21 }
 0x102   : > { %1163 = vst.msk [vmem:[%s2390_s12 + $0x38] sm:$0xf] %vm1148_vm2, %v1958_v19  ;;  %v899_v24 = vpack.c.bf16 %v697_v20, %v694_v15  ;;  %v1959_v25 = vpack.c.bf16 %v697_v20, %v697_v20 }
 0x103   : > { %1161 = vst.msk [vmem:[%s2390_s12 + $0x30] sm:$0xf] %vm1148_vm2, %v1956_v22  ;;  %v898_v26 = vpack.c.bf16 %v689_v23, %v686_v17  ;;  %v1957_v27 = vpack.c.bf16 %v689_v23, %v689_v23 }
 0x104   : > { %1164 = vst.msk [vmem:[%s2390_s12 + $0x3c] sm:$0xf] %vm1148_vm2, %v1959_v25 }
 0x105   : > { %1162 = vst.msk [vmem:[%s2390_s12 + $0x34] sm:$0xf] %vm1148_vm2, %v1957_v27  ;;  %v2094_v28 = vpop.f32.mrb[16].mxu0  ;;  %2154 = vmatprep.mubr.msk.bf16.mxu1 %vm1228_vm3, %v898_v26 }
 0x106   : > { %v710_v29 = vadd.f32 %v2094_v28, %v2382_v35  ;;  %v701_v30 = vpop.f32.mrb[17].mxu0  ;;  %2155 = vmatmul.mubr.msk.bf16.gmra.mrb[12].mxu1 %vm1228_vm3, %v899_v24 }
 0x107   : > { %v702_v31 = vadd.f32 %v2382_v35, %v701_v30  ;;  %v2095_v32 = vpop.f32.mrb[18].mxu0 }
 0x108   : > { %v1962_v33 = vpack.c.bf16 %v710_v29, %v710_v29  ;;  %v713_v34 = vadd.f32 %v2095_v32, %v2382_v35  ;;  %v704_v36 = vpop.f32.mrb[19].mxu0 }
 0x109   : > { %v1960_v37 = vpack.c.bf16 %v702_v31, %v702_v31  ;;  %v705_v38 = vadd.f32 %v2382_v35, %v704_v36 }
 0x10a   : > { %1167 = vst.msk [vmem:[%s2390_s12 + $0x48] sm:$0xf] %vm1148_vm2, %v1962_v33  ;;  %v901_v39 = vpack.c.bf16 %v713_v34, %v710_v29  ;;  %v1963_v40 = vpack.c.bf16 %v713_v34, %v713_v34 }
 0x10b   : > { %1165 = vst.msk [vmem:[%s2390_s12 + $0x40] sm:$0xf] %vm1148_vm2, %v1960_v37  ;;  %v900_v41 = vpack.c.bf16 %v705_v38, %v702_v31  ;;  %v1961_v42 = vpack.c.bf16 %v705_v38, %v705_v38 }
 0x10c   : > { %1168 = vst.msk [vmem:[%s2390_s12 + $0x4c] sm:$0xf] %vm1148_vm2, %v1963_v40 }
 0x10d   : > { %1166 = vst.msk [vmem:[%s2390_s12 + $0x44] sm:$0xf] %vm1148_vm2, %v1961_v42  ;;  %v2098_v43 = vpop.f32.mrb[20].mxu0  ;;  %2158 = vmatprep.mubr.msk.bf16.mxu1 %vm1228_vm3, %v900_v41 }
 0x10e   : > { %v726_v44 = vadd.f32 %v2098_v43, %v2382_v35  ;;  %v717_v45 = vpop.f32.mrb[21].mxu0  ;;  %2159 = vmatmul.mubr.msk.bf16.gmra.mrb[16].mxu1 %vm1228_vm3, %v901_v39 }
 0x10f   : > { %v718_v46 = vadd.f32 %v2382_v35, %v717_v45  ;;  %v2099_v47 = vpop.f32.mrb[22].mxu0 }
 0x110   : > { %v1966_v48 = vpack.c.bf16 %v726_v44, %v726_v44  ;;  %v729_v49 = vadd.f32 %v2099_v47, %v2382_v35  ;;  %v720_v50 = vpop.f32.mrb[23].mxu0 }
 0x111   : > { %v1964_v51 = vpack.c.bf16 %v718_v46, %v718_v46  ;;  %v721_v52 = vadd.f32 %v2382_v35, %v720_v50 }
 0x112   : > { %1171 = vst.msk [vmem:[%s2390_s12 + $0x58] sm:$0xf] %vm1148_vm2, %v1966_v48  ;;  %v903_v53 = vpack.c.bf16 %v729_v49, %v726_v44  ;;  %v1967_v54 = vpack.c.bf16 %v729_v49, %v729_v49 }
 0x113   : > { %1169 = vst.msk [vmem:[%s2390_s12 + $0x50] sm:$0xf] %vm1148_vm2, %v1964_v51  ;;  %v902_v55 = vpack.c.bf16 %v721_v52, %v718_v46  ;;  %v1965_v56 = vpack.c.bf16 %v721_v52, %v721_v52 }
 0x114   : > { %1172 = vst.msk [vmem:[%s2390_s12 + $0x5c] sm:$0xf] %vm1148_vm2, %v1967_v54 }
 0x115   : > { %1170 = vst.msk [vmem:[%s2390_s12 + $0x54] sm:$0xf] %vm1148_vm2, %v1965_v56  ;;  %v2102_v57 = vpop.f32.mrb[24].mxu0  ;;  %2162 = vmatprep.mubr.msk.bf16.mxu1 %vm1228_vm3, %v902_v55 }
 0x116   : > { %v742_v58 = vadd.f32 %v2102_v57, %v2382_v35  ;;  %v733_v59 = vpop.f32.mrb[25].mxu0  ;;  %2163 = vmatmul.mubr.msk.bf16.gmra.mrb[20].mxu1 %vm1228_vm3, %v903_v53 }
 0x117   : > { %v734_v60 = vadd.f32 %v2382_v35, %v733_v59  ;;  %v2103_v61 = vpop.f32.mrb[26].mxu0 }
 0x118   : > { %v1970_v62 = vpack.c.bf16 %v742_v58, %v742_v58  ;;  %v745_v63 = vadd.f32 %v2103_v61, %v2382_v35  ;;  %v736_v0 = vpop.f32.mrb[27].mxu0 }
 0x119   : > { %v1968_v1 = vpack.c.bf16 %v734_v60, %v734_v60  ;;  %v737_v2 = vadd.f32 %v2382_v35, %v736_v0 }
 0x11a   : > { %1175 = vst.msk [vmem:[%s2390_s12 + $0x68] sm:$0xf] %vm1148_vm2, %v1970_v62  ;;  %v905_v3 = vpack.c.bf16 %v745_v63, %v742_v58  ;;  %v1971_v4 = vpack.c.bf16 %v745_v63, %v745_v63 }
 0x11b   : > { %1173 = vst.msk [vmem:[%s2390_s12 + $0x60] sm:$0xf] %vm1148_vm2, %v1968_v1  ;;  %v904_v5 = vpack.c.bf16 %v737_v2, %v734_v60  ;;  %v1969_v6 = vpack.c.bf16 %v737_v2, %v737_v2 }
 0x11c   : > { %1176 = vst.msk [vmem:[%s2390_s12 + $0x6c] sm:$0xf] %vm1148_vm2, %v1971_v4 }
 0x11d   : > { %1174 = vst.msk [vmem:[%s2390_s12 + $0x64] sm:$0xf] %vm1148_vm2, %v1969_v6  ;;  %v2106_v7 = vpop.f32.mrb[28].mxu0  ;;  %2166 = vmatprep.mubr.msk.bf16.mxu1 %vm1228_vm3, %v904_v5 }
 0x11e   : > { %v758_v8 = vadd.f32 %v2106_v7, %v2382_v35  ;;  %v749_v9 = vpop.f32.mrb[29].mxu0  ;;  %2167 = vmatmul.mubr.msk.bf16.gmra.mrb[24].mxu1 %vm1228_vm3, %v905_v3 }
 0x11f   : > { %v750_v10 = vadd.f32 %v2382_v35, %v749_v9  ;;  %v2107_v11 = vpop.f32.mrb[30].mxu0 }
 0x120   : > { %v1974_v12 = vpack.c.bf16 %v758_v8, %v758_v8  ;;  %v761_v13 = vadd.f32 %v2107_v11, %v2382_v35  ;;  %v752_v14 = vpop.f32.mrb[31].mxu0 }
 0x121   : > { %v1972_v15 = vpack.c.bf16 %v750_v10, %v750_v10  ;;  %v753_v16 = vadd.f32 %v2382_v35, %v752_v14 }
 0x122   : > { %1179 = vst.msk [vmem:[%s2390_s12 + $0x78] sm:$0xf] %vm1148_vm2, %v1974_v12  ;;  %v907_v17 = vpack.c.bf16 %v761_v13, %v758_v8  ;;  %v1975_v18 = vpack.c.bf16 %v761_v13, %v761_v13 }
 0x123   : > { %1177 = vst.msk [vmem:[%s2390_s12 + $0x70] sm:$0xf] %vm1148_vm2, %v1972_v15  ;;  %v906_v19 = vpack.c.bf16 %v753_v16, %v750_v10  ;;  %v1973_v20 = vpack.c.bf16 %v753_v16, %v753_v16 }
 0x124   : > { %1180 = vst.msk [vmem:[%s2390_s12 + $0x7c] sm:$0xf] %vm1148_vm2, %v1975_v18 }
 0x125   : > { %1178 = vst.msk [vmem:[%s2390_s12 + $0x74] sm:$0xf] %vm1148_vm2, %v1973_v20  ;;  %v2110_v21 = vpop.f32.mrb[32].mxu0  ;;  %2170 = vmatprep.mubr.msk.bf16.mxu1 %vm1228_vm3, %v906_v19 }
 0x126   : > { %v774_v22 = vadd.f32 %v2110_v21, %v2382_v35  ;;  %v765_v23 = vpop.f32.mrb[33].mxu0  ;;  %2171 = vmatmul.mubr.msk.bf16.gmra.mrb[28].mxu1 %vm1228_vm3, %v907_v17 }
 0x127   : > { %v766_v24 = vadd.f32 %v2382_v35, %v765_v23  ;;  %v2111_v25 = vpop.f32.mrb[34].mxu0 }
 0x128   : > { %v1978_v26 = vpack.c.bf16 %v774_v22, %v774_v22  ;;  %v777_v27 = vadd.f32 %v2111_v25, %v2382_v35  ;;  %v768_v28 = vpop.f32.mrb[35].mxu0 }
 0x129   : > { %v1976_v29 = vpack.c.bf16 %v766_v24, %v766_v24  ;;  %v769_v30 = vadd.f32 %v2382_v35, %v768_v28 }
 0x12a   : > { %1183 = vst.msk [vmem:[%s2390_s12 + $0x88] sm:$0xf] %vm1148_vm2, %v1978_v26  ;;  %v909_v31 = vpack.c.bf16 %v777_v27, %v774_v22  ;;  %v1979_v32 = vpack.c.bf16 %v777_v27, %v777_v27 }
 0x12b   : > { %1181 = vst.msk [vmem:[%s2390_s12 + $0x80] sm:$0xf] %vm1148_vm2, %v1976_v29  ;;  %v908_v33 = vpack.c.bf16 %v769_v30, %v766_v24  ;;  %v1977_v34 = vpack.c.bf16 %v769_v30, %v769_v30 }
 0x12c   : > { %1184 = vst.msk [vmem:[%s2390_s12 + $0x8c] sm:$0xf] %vm1148_vm2, %v1979_v32 }
 0x12d   : > { %1182 = vst.msk [vmem:[%s2390_s12 + $0x84] sm:$0xf] %vm1148_vm2, %v1977_v34  ;;  %v2114_v36 = vpop.f32.mrb[36].mxu0  ;;  %2174 = vmatprep.mubr.msk.bf16.mxu1 %vm1228_vm3, %v908_v33 }
 0x12e   : > { %v790_v37 = vadd.f32 %v2114_v36, %v2382_v35  ;;  %v781_v38 = vpop.f32.mrb[37].mxu0  ;;  %2175 = vmatmul.mubr.msk.bf16.gmra.mrb[32].mxu1 %vm1228_vm3, %v909_v31 }
 0x12f   : > { %v782_v39 = vadd.f32 %v2382_v35, %v781_v38  ;;  %v2115_v40 = vpop.f32.mrb[38].mxu0 }
 0x130   : > { %v1982_v41 = vpack.c.bf16 %v790_v37, %v790_v37  ;;  %v793_v42 = vadd.f32 %v2115_v40, %v2382_v35  ;;  %v784_v43 = vpop.f32.mrb[39].mxu0 }
 0x131   : > { %v1980_v44 = vpack.c.bf16 %v782_v39, %v782_v39  ;;  %v785_v45 = vadd.f32 %v2382_v35, %v784_v43 }
 0x132   : > { %1187 = vst.msk [vmem:[%s2390_s12 + $0x98] sm:$0xf] %vm1148_vm2, %v1982_v41  ;;  %v911_v46 = vpack.c.bf16 %v793_v42, %v790_v37  ;;  %v1983_v47 = vpack.c.bf16 %v793_v42, %v793_v42 }
 0x133   : > { %1185 = vst.msk [vmem:[%s2390_s12 + $0x90] sm:$0xf] %vm1148_vm2, %v1980_v44  ;;  %v910_v48 = vpack.c.bf16 %v785_v45, %v782_v39  ;;  %v1981_v49 = vpack.c.bf16 %v785_v45, %v785_v45 }
 0x134   : > { %1188 = vst.msk [vmem:[%s2390_s12 + $0x9c] sm:$0xf] %vm1148_vm2, %v1983_v47 }
 0x135   : > { %1186 = vst.msk [vmem:[%s2390_s12 + $0x94] sm:$0xf] %vm1148_vm2, %v1981_v49  ;;  %v2118_v50 = vpop.f32.mrb[40].mxu0  ;;  %2178 = vmatprep.mubr.msk.bf16.mxu1 %vm1228_vm3, %v910_v48 }
 0x136   : > { %v806_v51 = vadd.f32 %v2118_v50, %v2382_v35  ;;  %v797_v52 = vpop.f32.mrb[41].mxu0  ;;  %2179 = vmatmul.mubr.msk.bf16.gmra.mrb[36].mxu1 %vm1228_vm3, %v911_v46 }
 0x137   : > { %v798_v53 = vadd.f32 %v2382_v35, %v797_v52  ;;  %v2119_v54 = vpop.f32.mrb[42].mxu0 }
 0x138   : > { %v1986_v55 = vpack.c.bf16 %v806_v51, %v806_v51  ;;  %v809_v56 = vadd.f32 %v2119_v54, %v2382_v35  ;;  %v800_v57 = vpop.f32.mrb[43].mxu0 }
 0x139   : > { %v1984_v58 = vpack.c.bf16 %v798_v53, %v798_v53  ;;  %v801_v59 = vadd.f32 %v2382_v35, %v800_v57 }
 0x13a   : > { %1191 = vst.msk [vmem:[%s2390_s12 + $0xa8] sm:$0xf] %vm1148_vm2, %v1986_v55  ;;  %v913_v60 = vpack.c.bf16 %v809_v56, %v806_v51  ;;  %v1987_v61 = vpack.c.bf16 %v809_v56, %v809_v56 }
 0x13b   : > { %1189 = vst.msk [vmem:[%s2390_s12 + $0xa0] sm:$0xf] %vm1148_vm2, %v1984_v58  ;;  %v912_v62 = vpack.c.bf16 %v801_v59, %v798_v53  ;;  %v1985_v63 = vpack.c.bf16 %v801_v59, %v801_v59 }
 0x13c   : > { %1192 = vst.msk [vmem:[%s2390_s12 + $0xac] sm:$0xf] %vm1148_vm2, %v1987_v61 }
 0x13d   : > { %1190 = vst.msk [vmem:[%s2390_s12 + $0xa4] sm:$0xf] %vm1148_vm2, %v1985_v63  ;;  %v2122_v0 = vpop.f32.mrb[44].mxu0  ;;  %2182 = vmatprep.mubr.msk.bf16.mxu1 %vm1228_vm3, %v912_v62 }
 0x13e   : > { %v822_v1 = vadd.f32 %v2122_v0, %v2382_v35  ;;  %v813_v2 = vpop.f32.mrb[45].mxu0  ;;  %2183 = vmatmul.mubr.msk.bf16.gmra.mrb[40].mxu1 %vm1228_vm3, %v913_v60 }
 0x13f   : > { %v814_v3 = vadd.f32 %v2382_v35, %v813_v2  ;;  %v2123_v4 = vpop.f32.mrb[46].mxu0 }
 0x140   : > { %v1990_v5 = vpack.c.bf16 %v822_v1, %v822_v1  ;;  %v825_v6 = vadd.f32 %v2123_v4, %v2382_v35  ;;  %v816_v7 = vpop.f32.mrb[47].mxu0 }
 0x141   : > { %v1988_v8 = vpack.c.bf16 %v814_v3, %v814_v3  ;;  %v817_v9 = vadd.f32 %v2382_v35, %v816_v7 }
 0x142   : > { %1195 = vst.msk [vmem:[%s2390_s12 + $0xb8] sm:$0xf] %vm1148_vm2, %v1990_v5  ;;  %v915_v10 = vpack.c.bf16 %v825_v6, %v822_v1  ;;  %v1991_v11 = vpack.c.bf16 %v825_v6, %v825_v6 }
 0x143   : > { %1193 = vst.msk [vmem:[%s2390_s12 + $0xb0] sm:$0xf] %vm1148_vm2, %v1988_v8  ;;  %v914_v12 = vpack.c.bf16 %v817_v9, %v814_v3  ;;  %v1989_v13 = vpack.c.bf16 %v817_v9, %v817_v9 }
 0x144   : > { %1196 = vst.msk [vmem:[%s2390_s12 + $0xbc] sm:$0xf] %vm1148_vm2, %v1991_v11 }
 0x145   : > { %1194 = vst.msk [vmem:[%s2390_s12 + $0xb4] sm:$0xf] %vm1148_vm2, %v1989_v13  ;;  %v2126_v14 = vpop.f32.mrb[48].mxu0  ;;  %2186 = vmatprep.mubr.msk.bf16.mxu1 %vm1228_vm3, %v914_v12 }
 0x146   : > { %v838_v15 = vadd.f32 %v2126_v14, %v2382_v35  ;;  %v829_v16 = vpop.f32.mrb[49].mxu0  ;;  %2187 = vmatmul.mubr.msk.bf16.gmra.mrb[44].mxu1 %vm1228_vm3, %v915_v10 }
 0x147   : > { %v830_v17 = vadd.f32 %v2382_v35, %v829_v16  ;;  %v2127_v18 = vpop.f32.mrb[50].mxu0 }
 0x148   : > { %v1994_v19 = vpack.c.bf16 %v838_v15, %v838_v15  ;;  %v841_v20 = vadd.f32 %v2127_v18, %v2382_v35  ;;  %v832_v21 = vpop.f32.mrb[51].mxu0 }
 0x149   : > { %v1992_v22 = vpack.c.bf16 %v830_v17, %v830_v17  ;;  %v833_v23 = vadd.f32 %v2382_v35, %v832_v21 }
 0x14a   : > { %1199 = vst.msk [vmem:[%s2390_s12 + $0xc8] sm:$0xf] %vm1148_vm2, %v1994_v19  ;;  %v917_v24 = vpack.c.bf16 %v841_v20, %v838_v15  ;;  %v1995_v25 = vpack.c.bf16 %v841_v20, %v841_v20 }
 0x14b   : > { %1197 = vst.msk [vmem:[%s2390_s12 + $0xc0] sm:$0xf] %vm1148_vm2, %v1992_v22  ;;  %v916_v26 = vpack.c.bf16 %v833_v23, %v830_v17  ;;  %v1993_v27 = vpack.c.bf16 %v833_v23, %v833_v23 }
 0x14c   : > { %1200 = vst.msk [vmem:[%s2390_s12 + $0xcc] sm:$0xf] %vm1148_vm2, %v1995_v25 }
 0x14d   : > { %1198 = vst.msk [vmem:[%s2390_s12 + $0xc4] sm:$0xf] %vm1148_vm2, %v1993_v27  ;;  %v2130_v28 = vpop.f32.mrb[52].mxu0  ;;  %2190 = vmatprep.mubr.msk.bf16.mxu1 %vm1228_vm3, %v916_v26 }
 0x14e   : > { %v854_v29 = vadd.f32 %v2130_v28, %v2382_v35  ;;  %v845_v30 = vpop.f32.mrb[53].mxu0  ;;  %2191 = vmatmul.mubr.msk.bf16.gmra.mrb[48].mxu1 %vm1228_vm3, %v917_v24 }
 0x14f   : > { %v846_v31 = vadd.f32 %v2382_v35, %v845_v30  ;;  %v2131_v32 = vpop.f32.mrb[54].mxu0 }
 0x150   : > { %v1998_v33 = vpack.c.bf16 %v854_v29, %v854_v29  ;;  %v857_v34 = vadd.f32 %v2131_v32, %v2382_v35  ;;  %v848_v36 = vpop.f32.mrb[55].mxu0 }
 0x151   : > { %v1996_v37 = vpack.c.bf16 %v846_v31, %v846_v31  ;;  %v849_v38 = vadd.f32 %v2382_v35, %v848_v36 }
 0x152   : > { %1203 = vst.msk [vmem:[%s2390_s12 + $0xd8] sm:$0xf] %vm1148_vm2, %v1998_v33  ;;  %v919_v39 = vpack.c.bf16 %v857_v34, %v854_v29  ;;  %v1999_v40 = vpack.c.bf16 %v857_v34, %v857_v34 }
 0x153   : > { %1201 = vst.msk [vmem:[%s2390_s12 + $0xd0] sm:$0xf] %vm1148_vm2, %v1996_v37  ;;  %v918_v41 = vpack.c.bf16 %v849_v38, %v846_v31  ;;  %v1997_v42 = vpack.c.bf16 %v849_v38, %v849_v38 }
 0x154   : > { %1204 = vst.msk [vmem:[%s2390_s12 + $0xdc] sm:$0xf] %vm1148_vm2, %v1999_v40 }
 0x155   : > { %1202 = vst.msk [vmem:[%s2390_s12 + $0xd4] sm:$0xf] %vm1148_vm2, %v1997_v42  ;;  %v2134_v43 = vpop.f32.mrb[56].mxu0  ;;  %2194 = vmatprep.mubr.msk.bf16.mxu1 %vm1228_vm3, %v918_v41 }
 0x156   : > { %v870_v44 = vadd.f32 %v2134_v43, %v2382_v35  ;;  %v861_v45 = vpop.f32.mrb[57].mxu0  ;;  %2195 = vmatmul.mubr.msk.bf16.gmra.mrb[52].mxu1 %vm1228_vm3, %v919_v39 }
 0x157   : > { %v862_v46 = vadd.f32 %v2382_v35, %v861_v45  ;;  %v2135_v47 = vpop.f32.mrb[58].mxu0 }
 0x158   : > { %v2002_v48 = vpack.c.bf16 %v870_v44, %v870_v44  ;;  %v873_v49 = vadd.f32 %v2135_v47, %v2382_v35  ;;  %v864_v50 = vpop.f32.mrb[59].mxu0 }
 0x159   : > { %v2000_v51 = vpack.c.bf16 %v862_v46, %v862_v46  ;;  %v865_v52 = vadd.f32 %v2382_v35, %v864_v50 }
 0x15a   : > { %1207 = vst.msk [vmem:[%s2390_s12 + $0xe8] sm:$0xf] %vm1148_vm2, %v2002_v48  ;;  %v921_v53 = vpack.c.bf16 %v873_v49, %v870_v44  ;;  %v2003_v54 = vpack.c.bf16 %v873_v49, %v873_v49 }
 0x15b   : > { %1205 = vst.msk [vmem:[%s2390_s12 + $0xe0] sm:$0xf] %vm1148_vm2, %v2000_v51  ;;  %v920_v55 = vpack.c.bf16 %v865_v52, %v862_v46  ;;  %v2001_v56 = vpack.c.bf16 %v865_v52, %v865_v52 }
 0x15c   : > { %1208 = vst.msk [vmem:[%s2390_s12 + $0xec] sm:$0xf] %vm1148_vm2, %v2003_v54 }
 0x15d   : > { %1206 = vst.msk [vmem:[%s2390_s12 + $0xe4] sm:$0xf] %vm1148_vm2, %v2001_v56  ;;  %v2138_v57 = vpop.f32.mrb[60].mxu0  ;;  %2198 = vmatprep.mubr.msk.bf16.mxu1 %vm1228_vm3, %v920_v55 }
 0x15e   : > { %v886_v58 = vadd.f32 %v2138_v57, %v2382_v35  ;;  %v877_v59 = vpop.f32.mrb[61].mxu0  ;;  %2199 = vmatmul.mubr.msk.bf16.gmra.mrb[56].mxu1 %vm1228_vm3, %v921_v53 }
 0x15f   : > { %v878_v60 = vadd.f32 %v2382_v35, %v877_v59  ;;  %v2139_v61 = vpop.f32.mrb[62].mxu0 }
 0x160   : > { %v2006_v62 = vpack.c.bf16 %v886_v58, %v886_v58  ;;  %v889_v63 = vadd.f32 %v2139_v61, %v2382_v35  ;;  %v880_v0 = vpop.f32.mrb[63].mxu0 }
 0x161   : > { %v2004_v1 = vpack.c.bf16 %v878_v60, %v878_v60  ;;  %v881_v2 = vadd.f32 %v2382_v35, %v880_v0  ;;  %v2619_v35 = vld [vmem:[%s2825_s4] ss:$0 sm:$0xff] }
 0x162   : > { %1211 = vst.msk [vmem:[%s2390_s12 + $0xf8] sm:$0xf] %vm1148_vm2, %v2006_v62  ;;  %v923_v3 = vpack.c.bf16 %v889_v63, %v886_v58  ;;  %v2007_v4 = vpack.c.bf16 %v889_v63, %v889_v63 }
 0x163   : > { %1209 = vst.msk [vmem:[%s2390_s12 + $0xf0] sm:$0xf] %vm1148_vm2, %v2004_v1  ;;  %v922_v5 = vpack.c.bf16 %v881_v2, %v878_v60  ;;  %v2005_v6 = vpack.c.bf16 %v881_v2, %v881_v2 }
 0x164   : > { %1212 = vst.msk [vmem:[%s2390_s12 + $0xfc] sm:$0xf] %vm1148_vm2, %v2007_v4 }
 0x165   : > { %1210 = vst.msk [vmem:[%s2390_s12 + $0xf4] sm:$0xf] %vm1148_vm2, %v2005_v6  ;;  %2202 = vmatprep.mubr.msk.bf16.mxu1 %vm1228_vm3, %v922_v5 }
 0x166   : > { %2203 = vmatmul.mubr.msk.bf16.gmra.mrb[60].mxu1 %vm1228_vm3, %v923_v3 }
 0x1c1   : > { %v2144_v7 = vpop.f32.mrb[0].mxu1 }
 0x1c2   : > { %v1368_v8 = vadd.f32 %v2144_v7, %v2619_v35  ;;  %v1359_v9 = vpop.f32.mrb[1].mxu1 }
 0x1c3   : > { %v1360_v10 = vadd.f32 %v2619_v35, %v1359_v9  ;;  %v2145_v11 = vpop.f32.mrb[2].mxu1 }
 0x1c4   : > { %1616 = vst.msk [vmem:[%s2624_s18 + $0x10] sm:$0xff] %vm1228_vm3, %v1368_v8  ;;  %v1371_v12 = vadd.f32 %v2145_v11, %v2619_v35  ;;  %v1362_v13 = vpop.f32.mrb[3].mxu1 }
 0x1c5   : > { %1614 = vst.msk [vmem:[%s2624_s18] sm:$0xff] %vm1228_vm3, %v1360_v10  ;;  %v1363_v14 = vadd.f32 %v2619_v35, %v1362_v13 }
 0x1c6   : > { %1617 = vst.msk [vmem:[%s2624_s18 + $0x18] sm:$0xff] %vm1228_vm3, %v1371_v12 }
 0x1c7   : > { %1615 = vst.msk [vmem:[%s2624_s18 + $0x8] sm:$0xff] %vm1228_vm3, %v1363_v14 }
 0x1c9   : > { %v2148_v15 = vpop.f32.mrb[4].mxu1 }
 0x1ca   : > { %v1384_v16 = vadd.f32 %v2148_v15, %v2619_v35  ;;  %v1375_v17 = vpop.f32.mrb[5].mxu1 }
 0x1cb   : > { %v1376_v18 = vadd.f32 %v2619_v35, %v1375_v17  ;;  %v2149_v19 = vpop.f32.mrb[6].mxu1 }
 0x1cc   : > { %1620 = vst.msk [vmem:[%s2624_s18 + $0x30] sm:$0xff] %vm1228_vm3, %v1384_v16  ;;  %v1387_v20 = vadd.f32 %v2149_v19, %v2619_v35  ;;  %v1378_v21 = vpop.f32.mrb[7].mxu1 }
 0x1cd   : > { %1618 = vst.msk [vmem:[%s2624_s18 + $0x20] sm:$0xff] %vm1228_vm3, %v1376_v18  ;;  %v1379_v22 = vadd.f32 %v2619_v35, %v1378_v21 }
 0x1ce   : > { %1621 = vst.msk [vmem:[%s2624_s18 + $0x38] sm:$0xff] %vm1228_vm3, %v1387_v20 }
 0x1cf   : > { %1619 = vst.msk [vmem:[%s2624_s18 + $0x28] sm:$0xff] %vm1228_vm3, %v1379_v22 }
 0x1d1   : > { %v2152_v23 = vpop.f32.mrb[8].mxu1 }
 0x1d2   : > { %v1400_v24 = vadd.f32 %v2152_v23, %v2619_v35  ;;  %v1391_v25 = vpop.f32.mrb[9].mxu1 }
 0x1d3   : > { %v1392_v26 = vadd.f32 %v2619_v35, %v1391_v25  ;;  %v2153_v27 = vpop.f32.mrb[10].mxu1 }
 0x1d4   : > { %1624 = vst.msk [vmem:[%s2624_s18 + $0x50] sm:$0xff] %vm1228_vm3, %v1400_v24  ;;  %v1403_v28 = vadd.f32 %v2153_v27, %v2619_v35  ;;  %v1394_v29 = vpop.f32.mrb[11].mxu1 }
 0x1d5   : > { %1622 = vst.msk [vmem:[%s2624_s18 + $0x40] sm:$0xff] %vm1228_vm3, %v1392_v26  ;;  %v1395_v30 = vadd.f32 %v2619_v35, %v1394_v29 }
 0x1d6   : > { %1625 = vst.msk [vmem:[%s2624_s18 + $0x58] sm:$0xff] %vm1228_vm3, %v1403_v28 }
 0x1d7   : > { %1623 = vst.msk [vmem:[%s2624_s18 + $0x48] sm:$0xff] %vm1228_vm3, %v1395_v30 }
 0x1d9   : > { %v2156_v31 = vpop.f32.mrb[12].mxu1 }
 0x1da   : > { %v1416_v32 = vadd.f32 %v2156_v31, %v2619_v35  ;;  %v1407_v33 = vpop.f32.mrb[13].mxu1 }
 0x1db   : > { %v1408_v34 = vadd.f32 %v2619_v35, %v1407_v33  ;;  %v2157_v36 = vpop.f32.mrb[14].mxu1 }
 0x1dc   : > { %1628 = vst.msk [vmem:[%s2624_s18 + $0x70] sm:$0xff] %vm1228_vm3, %v1416_v32  ;;  %v1419_v37 = vadd.f32 %v2157_v36, %v2619_v35  ;;  %v1410_v38 = vpop.f32.mrb[15].mxu1 }
 0x1dd   : > { %1626 = vst.msk [vmem:[%s2624_s18 + $0x60] sm:$0xff] %vm1228_vm3, %v1408_v34  ;;  %v1411_v39 = vadd.f32 %v2619_v35, %v1410_v38 }
 0x1de   : > { %1629 = vst.msk [vmem:[%s2624_s18 + $0x78] sm:$0xff] %vm1228_vm3, %v1419_v37 }
 0x1df   : > { %1627 = vst.msk [vmem:[%s2624_s18 + $0x68] sm:$0xff] %vm1228_vm3, %v1411_v39 }
 0x1e1   : > { %v2160_v40 = vpop.f32.mrb[16].mxu1 }
 0x1e2   : > { %v1432_v41 = vadd.f32 %v2160_v40, %v2619_v35  ;;  %v1423_v42 = vpop.f32.mrb[17].mxu1 }
 0x1e3   : > { %v1424_v43 = vadd.f32 %v2619_v35, %v1423_v42  ;;  %v2161_v44 = vpop.f32.mrb[18].mxu1 }
 0x1e4   : > { %1632 = vst.msk [vmem:[%s2624_s18 + $0x90] sm:$0xff] %vm1228_vm3, %v1432_v41  ;;  %v1435_v45 = vadd.f32 %v2161_v44, %v2619_v35  ;;  %v1426_v46 = vpop.f32.mrb[19].mxu1 }
 0x1e5   : > { %1630 = vst.msk [vmem:[%s2624_s18 + $0x80] sm:$0xff] %vm1228_vm3, %v1424_v43  ;;  %v1427_v47 = vadd.f32 %v2619_v35, %v1426_v46 }
 0x1e6   : > { %1633 = vst.msk [vmem:[%s2624_s18 + $0x98] sm:$0xff] %vm1228_vm3, %v1435_v45 }
 0x1e7   : > { %1631 = vst.msk [vmem:[%s2624_s18 + $0x88] sm:$0xff] %vm1228_vm3, %v1427_v47 }
 0x1e9   : > { %v2164_v48 = vpop.f32.mrb[20].mxu1 }
 0x1ea   : > { %v1448_v49 = vadd.f32 %v2164_v48, %v2619_v35  ;;  %v1439_v50 = vpop.f32.mrb[21].mxu1 }
 0x1eb   : > { %v1440_v51 = vadd.f32 %v2619_v35, %v1439_v50  ;;  %v2165_v52 = vpop.f32.mrb[22].mxu1 }
 0x1ec   : > { %1636 = vst.msk [vmem:[%s2624_s18 + $0xb0] sm:$0xff] %vm1228_vm3, %v1448_v49  ;;  %v1451_v53 = vadd.f32 %v2165_v52, %v2619_v35  ;;  %v1442_v54 = vpop.f32.mrb[23].mxu1 }
 0x1ed   : > { %1634 = vst.msk [vmem:[%s2624_s18 + $0xa0] sm:$0xff] %vm1228_vm3, %v1440_v51  ;;  %v1443_v55 = vadd.f32 %v2619_v35, %v1442_v54 }
 0x1ee   : > { %1637 = vst.msk [vmem:[%s2624_s18 + $0xb8] sm:$0xff] %vm1228_vm3, %v1451_v53 }
 0x1ef   : > { %1635 = vst.msk [vmem:[%s2624_s18 + $0xa8] sm:$0xff] %vm1228_vm3, %v1443_v55 }
 0x1f1   : > { %v2168_v56 = vpop.f32.mrb[24].mxu1 }
 0x1f2   : > { %v1464_v57 = vadd.f32 %v2168_v56, %v2619_v35  ;;  %v1455_v58 = vpop.f32.mrb[25].mxu1 }
 0x1f3   : > { %v1456_v59 = vadd.f32 %v2619_v35, %v1455_v58  ;;  %v2169_v60 = vpop.f32.mrb[26].mxu1 }
 0x1f4   : > { %1640 = vst.msk [vmem:[%s2624_s18 + $0xd0] sm:$0xff] %vm1228_vm3, %v1464_v57  ;;  %v1467_v61 = vadd.f32 %v2169_v60, %v2619_v35  ;;  %v1458_v62 = vpop.f32.mrb[27].mxu1 }
 0x1f5   : > { %1638 = vst.msk [vmem:[%s2624_s18 + $0xc0] sm:$0xff] %vm1228_vm3, %v1456_v59  ;;  %v1459_v63 = vadd.f32 %v2619_v35, %v1458_v62 }
 0x1f6   : > { %1641 = vst.msk [vmem:[%s2624_s18 + $0xd8] sm:$0xff] %vm1228_vm3, %v1467_v61 }
 0x1f7   : > { %1639 = vst.msk [vmem:[%s2624_s18 + $0xc8] sm:$0xff] %vm1228_vm3, %v1459_v63 }
 0x1f9   : > { %v2172_v0 = vpop.f32.mrb[28].mxu1 }
 0x1fa   : > { %v1480_v1 = vadd.f32 %v2172_v0, %v2619_v35  ;;  %v1471_v2 = vpop.f32.mrb[29].mxu1 }
 0x1fb   : > { %v1472_v3 = vadd.f32 %v2619_v35, %v1471_v2  ;;  %v2173_v4 = vpop.f32.mrb[30].mxu1 }
 0x1fc   : > { %1644 = vst.msk [vmem:[%s2624_s18 + $0xf0] sm:$0xff] %vm1228_vm3, %v1480_v1  ;;  %v1483_v5 = vadd.f32 %v2173_v4, %v2619_v35  ;;  %v1474_v6 = vpop.f32.mrb[31].mxu1 }
 0x1fd   : > { %1642 = vst.msk [vmem:[%s2624_s18 + $0xe0] sm:$0xff] %vm1228_vm3, %v1472_v3  ;;  %v1475_v7 = vadd.f32 %v2619_v35, %v1474_v6 }
 0x1fe   : > { %1645 = vst.msk [vmem:[%s2624_s18 + $0xf8] sm:$0xff] %vm1228_vm3, %v1483_v5 }
 0x1ff   : > { %1643 = vst.msk [vmem:[%s2624_s18 + $0xe8] sm:$0xff] %vm1228_vm3, %v1475_v7 }
 0x201   : > { %v2176_v8 = vpop.f32.mrb[32].mxu1 }
 0x202   : > { %v1496_v9 = vadd.f32 %v2176_v8, %v2619_v35  ;;  %v1487_v10 = vpop.f32.mrb[33].mxu1 }
 0x203   : > { %v1488_v11 = vadd.f32 %v2619_v35, %v1487_v10  ;;  %v2177_v12 = vpop.f32.mrb[34].mxu1 }
 0x204   : > { %1648 = vst.msk [vmem:[%s2624_s18 + $0x110] sm:$0xff] %vm1228_vm3, %v1496_v9  ;;  %v1499_v13 = vadd.f32 %v2177_v12, %v2619_v35  ;;  %v1490_v14 = vpop.f32.mrb[35].mxu1 }
 0x205   : > { %1646 = vst.msk [vmem:[%s2624_s18 + $0x100] sm:$0xff] %vm1228_vm3, %v1488_v11  ;;  %v1491_v15 = vadd.f32 %v2619_v35, %v1490_v14 }
 0x206   : > { %1649 = vst.msk [vmem:[%s2624_s18 + $0x118] sm:$0xff] %vm1228_vm3, %v1499_v13 }
 0x207   : > { %1647 = vst.msk [vmem:[%s2624_s18 + $0x108] sm:$0xff] %vm1228_vm3, %v1491_v15 }
 0x209   : > { %v2180_v16 = vpop.f32.mrb[36].mxu1 }
 0x20a   : > { %v1512_v17 = vadd.f32 %v2180_v16, %v2619_v35  ;;  %v1503_v18 = vpop.f32.mrb[37].mxu1 }
 0x20b   : > { %v1504_v19 = vadd.f32 %v2619_v35, %v1503_v18  ;;  %v2181_v20 = vpop.f32.mrb[38].mxu1 }
 0x20c   : > { %1652 = vst.msk [vmem:[%s2624_s18 + $0x130] sm:$0xff] %vm1228_vm3, %v1512_v17  ;;  %v1515_v21 = vadd.f32 %v2181_v20, %v2619_v35  ;;  %v1506_v22 = vpop.f32.mrb[39].mxu1 }
 0x20d   : > { %1650 = vst.msk [vmem:[%s2624_s18 + $0x120] sm:$0xff] %vm1228_vm3, %v1504_v19  ;;  %v1507_v23 = vadd.f32 %v2619_v35, %v1506_v22 }
 0x20e   : > { %1653 = vst.msk [vmem:[%s2624_s18 + $0x138] sm:$0xff] %vm1228_vm3, %v1515_v21 }
 0x20f   : > { %1651 = vst.msk [vmem:[%s2624_s18 + $0x128] sm:$0xff] %vm1228_vm3, %v1507_v23 }
 0x211   : > { %v2184_v24 = vpop.f32.mrb[40].mxu1 }
 0x212   : > { %v1528_v25 = vadd.f32 %v2184_v24, %v2619_v35  ;;  %v1519_v26 = vpop.f32.mrb[41].mxu1 }
 0x213   : > { %v1520_v27 = vadd.f32 %v2619_v35, %v1519_v26  ;;  %v2185_v28 = vpop.f32.mrb[42].mxu1 }
 0x214   : > { %1656 = vst.msk [vmem:[%s2624_s18 + $0x150] sm:$0xff] %vm1228_vm3, %v1528_v25  ;;  %v1531_v29 = vadd.f32 %v2185_v28, %v2619_v35  ;;  %v1522_v30 = vpop.f32.mrb[43].mxu1 }
 0x215   : > { %1654 = vst.msk [vmem:[%s2624_s18 + $0x140] sm:$0xff] %vm1228_vm3, %v1520_v27  ;;  %v1523_v31 = vadd.f32 %v2619_v35, %v1522_v30 }
 0x216   : > { %1657 = vst.msk [vmem:[%s2624_s18 + $0x158] sm:$0xff] %vm1228_vm3, %v1531_v29 }
 0x217   : > { %1655 = vst.msk [vmem:[%s2624_s18 + $0x148] sm:$0xff] %vm1228_vm3, %v1523_v31 }
 0x219   : > { %v2188_v32 = vpop.f32.mrb[44].mxu1 }
 0x21a   : > { %v1544_v33 = vadd.f32 %v2188_v32, %v2619_v35  ;;  %v1535_v34 = vpop.f32.mrb[45].mxu1 }
 0x21b   : > { %v1536_v36 = vadd.f32 %v2619_v35, %v1535_v34  ;;  %v2189_v37 = vpop.f32.mrb[46].mxu1 }
 0x21c   : > { %1660 = vst.msk [vmem:[%s2624_s18 + $0x170] sm:$0xff] %vm1228_vm3, %v1544_v33  ;;  %v1547_v38 = vadd.f32 %v2189_v37, %v2619_v35  ;;  %v1538_v39 = vpop.f32.mrb[47].mxu1 }
 0x21d   : > { %1658 = vst.msk [vmem:[%s2624_s18 + $0x160] sm:$0xff] %vm1228_vm3, %v1536_v36  ;;  %v1539_v40 = vadd.f32 %v2619_v35, %v1538_v39 }
 0x21e   : > { %1661 = vst.msk [vmem:[%s2624_s18 + $0x178] sm:$0xff] %vm1228_vm3, %v1547_v38 }
 0x21f   : > { %1659 = vst.msk [vmem:[%s2624_s18 + $0x168] sm:$0xff] %vm1228_vm3, %v1539_v40 }
 0x221   : > { %v2192_v41 = vpop.f32.mrb[48].mxu1 }
 0x222   : > { %v1560_v42 = vadd.f32 %v2192_v41, %v2619_v35  ;;  %v1551_v43 = vpop.f32.mrb[49].mxu1 }
 0x223   : > { %v1552_v44 = vadd.f32 %v2619_v35, %v1551_v43  ;;  %v2193_v45 = vpop.f32.mrb[50].mxu1 }
 0x224   : > { %1664 = vst.msk [vmem:[%s2624_s18 + $0x190] sm:$0xff] %vm1228_vm3, %v1560_v42  ;;  %v1563_v46 = vadd.f32 %v2193_v45, %v2619_v35  ;;  %v1554_v47 = vpop.f32.mrb[51].mxu1 }
 0x225   : > { %1662 = vst.msk [vmem:[%s2624_s18 + $0x180] sm:$0xff] %vm1228_vm3, %v1552_v44  ;;  %v1555_v48 = vadd.f32 %v2619_v35, %v1554_v47 }
 0x226   : > { %1665 = vst.msk [vmem:[%s2624_s18 + $0x198] sm:$0xff] %vm1228_vm3, %v1563_v46 }
 0x227   : > { %1663 = vst.msk [vmem:[%s2624_s18 + $0x188] sm:$0xff] %vm1228_vm3, %v1555_v48 }
 0x229   : > { %v2196_v49 = vpop.f32.mrb[52].mxu1 }
 0x22a   : > { %v1576_v50 = vadd.f32 %v2196_v49, %v2619_v35  ;;  %v1567_v51 = vpop.f32.mrb[53].mxu1 }
 0x22b   : > { %v1568_v52 = vadd.f32 %v2619_v35, %v1567_v51  ;;  %v2197_v53 = vpop.f32.mrb[54].mxu1 }
 0x22c   : > { %1668 = vst.msk [vmem:[%s2624_s18 + $0x1b0] sm:$0xff] %vm1228_vm3, %v1576_v50  ;;  %v1579_v54 = vadd.f32 %v2197_v53, %v2619_v35  ;;  %v1570_v55 = vpop.f32.mrb[55].mxu1 }
 0x22d   : > { %1666 = vst.msk [vmem:[%s2624_s18 + $0x1a0] sm:$0xff] %vm1228_vm3, %v1568_v52  ;;  %v1571_v56 = vadd.f32 %v2619_v35, %v1570_v55 }
 0x22e   : > { %1669 = vst.msk [vmem:[%s2624_s18 + $0x1b8] sm:$0xff] %vm1228_vm3, %v1579_v54 }
 0x22f   : > { %1667 = vst.msk [vmem:[%s2624_s18 + $0x1a8] sm:$0xff] %vm1228_vm3, %v1571_v56 }
 0x231   : > { %v2200_v57 = vpop.f32.mrb[56].mxu1 }
 0x232   : > { %v1592_v58 = vadd.f32 %v2200_v57, %v2619_v35  ;;  %v1583_v59 = vpop.f32.mrb[57].mxu1 }
 0x233   : > { %v1584_v60 = vadd.f32 %v2619_v35, %v1583_v59  ;;  %v2201_v61 = vpop.f32.mrb[58].mxu1 }
 0x234   : > { %1672 = vst.msk [vmem:[%s2624_s18 + $0x1d0] sm:$0xff] %vm1228_vm3, %v1592_v58  ;;  %v1595_v62 = vadd.f32 %v2201_v61, %v2619_v35  ;;  %v1586_v63 = vpop.f32.mrb[59].mxu1 }
 0x235   : > { %1670 = vst.msk [vmem:[%s2624_s18 + $0x1c0] sm:$0xff] %vm1228_vm3, %v1584_v60  ;;  %v1587_v0 = vadd.f32 %v2619_v35, %v1586_v63 }
 0x236   : > { %1673 = vst.msk [vmem:[%s2624_s18 + $0x1d8] sm:$0xff] %vm1228_vm3, %v1595_v62 }
 0x237   : > { %1671 = vst.msk [vmem:[%s2624_s18 + $0x1c8] sm:$0xff] %vm1228_vm3, %v1587_v0 }
 0x239   : > { %v2204_v1 = vpop.f32.mrb[60].mxu1 }
 0x23a   : > { %v1608_v2 = vadd.f32 %v2204_v1, %v2619_v35  ;;  %v1599_v3 = vpop.f32.mrb[61].mxu1 }
 0x23b   : > { %v1600_v4 = vadd.f32 %v2619_v35, %v1599_v3  ;;  %v2205_v5 = vpop.f32.mrb[62].mxu1 }
 0x23c   : > { %1676 = vst.msk [vmem:[%s2624_s18 + $0x1f0] sm:$0xff] %vm1228_vm3, %v1608_v2  ;;  %v1611_v6 = vadd.f32 %v2205_v5, %v2619_v35  ;;  %v1602_v7 = vpop.f32.mrb[63].mxu1 }
 0x23d   : > { %1674 = vst.msk [vmem:[%s2624_s18 + $0x1e0] sm:$0xff] %vm1228_vm3, %v1600_v4  ;;  %v1603_v8 = vadd.f32 %v2619_v35, %v1602_v7 }
 0x23e   : > { %1677 = vst.msk [vmem:[%s2624_s18 + $0x1f8] sm:$0xff] %vm1228_vm3, %v1611_v6 }
 0x23f   : > { %1675 = vst.msk [vmem:[%s2624_s18 + $0x1e8] sm:$0xff] %vm1228_vm3, %v1603_v8 }
 0x240 PF: > { %s17_s21 = sadd.s32 1, %s2254_s21  }
 0x241   : > { %p14_p4 = scmp.ge.s32.totalorder %s17_s21, 6  }
 0x243   :  { %16 = sbr.rel (!%p14_p4) target bundleno = 1 (0x1), region = 82 }

// kernel: esa_forward.5
= control target key start
LH: loop header
LB: loop body
LE: loop exit
PB: predicated region body
PF: predicated region fallthrough
CT: control target
= control target key end

     0   :  { %s5786_s21 = smov 0   ;;  %s6579_s0 = inlined_call_operand.vmem [shape: bf16[2,272,16], index: 0, kind: input, shape index: {}]   ;;  %s6580_s1 = inlined_call_operand.vmem [shape: bf16[2,272,16], index: 1, kind: input, shape index: {}]   ;;  %s6581_s2 = inlined_call_operand.vmem [shape: bf16[2,272,16], index: 2, kind: input, shape index: {}]   ;;  %s6582_s3 = inlined_call_operand.vmem [shape: bf16[2,272,16], index: 3, kind: input, shape index: {}]   ;;  %s6583_s4 = inlined_call_operand.vmem [shape: bf16[9,16,16], index: 4, kind: input, shape index: {}]   ;;  %s6584_s5 = inlined_call_operand.vmem [shape: f32[1,16], index: 5, kind: input, shape index: {}]   ;;  %s6585_s6 = inlined_call_operand.vmem [shape: bf16[2,240,16], index: 6, kind: output, shape index: {}]  }
   0x1 LB: > { %s4026_s22 = sadd.s32 4294967295, %s5747_s21   ;;  %p4030_p0 = scmp.ge.s32.totalorder %s5747_s21, 1  ;;  %s5747_s21 = sphi %s5786_s21, %s16_s21  }
   0x2   : > { %p242_p1 = scmp.lt.s32.totalorder %s5747_s21, 3 }
   0x4   : > { %p243_p2 = pnand %p4030_p0, %p242_p1 }
   0x5   : > { %v5593_v0 = vld [vmem:[%s6583_s4 + $0x20] sm:$0xff] (!%p243_p2)   ;;  %v5749_v1 = vmov (!%p243_p2), 0.0   ;;  %vm5750_vm0 = vmmov (!%p243_p2), 0   ;;  %p287_p3 = scmp.lt.s32.totalorder (!%p243_p2), %s4026_s22, 1  ;;  %v5597_v3 = vld [vmem:[%s6583_s4 + $0x28] sm:$0xff] (!%p243_p2)   ;;  %vm434_vm1 = vcmask (!%p243_p2), 130048  }
   0x6   : > { %246 = sbr.rel (%p243_p2) target bundleno = 774 (0x306), region = 44  ;;  %4789 = vmatprep.subr.bf16.mxu0 (!%p243_p2), %v5749_v1  ;;  %4541 = vmatprep.subr.bf16.mxu1 (!%p243_p2), %v5749_v1  ;;  %v5594_v2 = vld [vmem:[%s6583_s4] sm:$0xff] (!%p243_p2)   ;;  %v5598_v4 = vld [vmem:[%s6583_s4 + $0x8] sm:$0xff] (!%p243_p2)   ;;  %vm1117_vm2 = vsmask.f32 (!%p243_p2), 7424  ;;  %v5616_v33 = vld [vmem:[%s6583_s4 + $0x30] sm:$0xff] (!%p243_p2)  }
   0x7   : > { %4790 = vmatpush3.bf16.msra.mxu0 (!%p243_p2), %v5593_v0  ;;  %4543 = vmatprep.mubr.msk.bf16.mxu1 (!%p243_p2), %vm5750_vm0, %v5749_v1  ;;  %vm3904_vm3 = vcmask (!%p243_p2), 125952  }
   0x8   : > { %4542 = vmatpush3.bf16.msra.mxu1 (!%p243_p2), %v5594_v2  ;;  %4791 = vmatprep.mubr.msk.bf16.mxu0 (!%p243_p2), %vm5750_vm0, %v5749_v1 }
   0x9   : > { %4851 = vmatprep.subr.bf16.mxu0 (!%p243_p2), %v5749_v1  ;;  %4603 = vmatprep.subr.bf16.mxu1 (!%p243_p2), %v5749_v1 }
   0xd   : > { %s6587_s22 = smov (!%p287_p3, %s4026_s22), 1 }
   0xe   : > { %s5811_s27 = smul.u32 136, %s6587_s22 }
   0xf   : > { %s5582_s12 = smul.u32 120, %s6587_s22 }
  0x10   : > { %s5820_s8 = scalar_lea.vmem %s6579_s0, %s5811_s27  ;;  %s5826_s11 = scalar_lea.vmem %s6582_s3, %s5811_s27 }
  0x11   : > { %v5595_v5 = vld [vmem:[%s5820_s8] sm:$0xff]   ;;  %v5599_v7 = vld [vmem:[%s5820_s8 + $0x8] sm:$0xff]   ;;  %v5601_v9 = vld [vmem:[%s5820_s8 + $0x10] sm:$0xff]   ;;  %s5855_s16 = scalar_lea.vmem %s6581_s2, %s5811_s27  ;;  %s5877_s19 = scalar_lea.vmem %s6580_s1, %s5811_s27 }
  0x12   : > { %v5596_v6 = vld [vmem:[%s5826_s11] sm:$0xff]   ;;  %4544 = vmatmul.mubr.msk.bf16.vlgmr.msra.gmra.mrb[0].mxu1 %vm434_vm1, %v5595_v5  ;;  %v5600_v8 = vld [vmem:[%s5826_s11 + $0x8] sm:$0xff]   ;;  %v5602_v10 = vld [vmem:[%s5826_s11 + $0x10] sm:$0xff]   ;;  %s6478_s15 = scalar_lea.vmem %s6585_s6, %s5582_s12 }
  0x13   : > { %4792 = vmatmul.mubr.msk.bf16.vlgmr.msra.gmra.mrb[0].mxu0 %vm434_vm1, %v5596_v6  ;;  %4604 = vmatpush3.bf16.msra.mxu1 %v5598_v4  ;;  %v5603_v11 = vld [vmem:[%s5820_s8 + $0x18] sm:$0xff]   ;;  %v5605_v13 = vld [vmem:[%s5820_s8 + $0x20] sm:$0xff]   ;;  %v5607_v15 = vld [vmem:[%s5820_s8 + $0x28] sm:$0xff]  }
  0x14   : > { %4852 = vmatpush3.bf16.msra.mxu0 %v5597_v3  ;;  %4547 = vmatprep.mubr.msk.bf16.mxu1 %vm5750_vm0, %v5749_v1  ;;  %v5604_v12 = vld [vmem:[%s5826_s11 + $0x18] sm:$0xff]   ;;  %v5606_v14 = vld [vmem:[%s5826_s11 + $0x20] sm:$0xff]   ;;  %v5608_v16 = vld [vmem:[%s5826_s11 + $0x28] sm:$0xff]  }
  0x15   : > { %4795 = vmatprep.mubr.msk.bf16.mxu0 %vm5750_vm0, %v5749_v1  ;;  %4913 = vmatprep.subr.bf16.mxu0 %v5749_v1  ;;  %v5609_v17 = vld [vmem:[%s5820_s8 + $0x30] sm:$0xff]   ;;  %v5614_v18 = vld [vmem:[%s5855_s16] sm:$0xff]   ;;  %v5615_v20 = vld [vmem:[%s5855_s16 + $0x8] sm:$0xff]  }
  0x16   : > { %4665 = vmatprep.subr.bf16.mxu1 %v5749_v1  ;;  %v5610_v19 = vld [vmem:[%s5826_s11 + $0x30] sm:$0xff]   ;;  %v2275_v21 = vshll.u32 %v5614_v18, 16  ;;  %v5611_v22 = vld [vmem:[%s5820_s8 + $0x38] sm:$0xff]   ;;  %v2273_v23 = vshrl.u32 %v5614_v18, 16  ;;  %v2280_v24 = vshll.u32 %v5615_v20, 16  ;;  %v2284_v28 = vshrl.u32 %v5615_v20, 16 }
  0x17   : > { %v5612_v25 = vld [vmem:[%s5826_s11 + $0x38] sm:$0xff]   ;;  %v5618_v27 = vld [vmem:[%s5855_s16 + $0x10] sm:$0xff]   ;;  %v5613_v29 = vld [vmem:[%s5820_s8 + $0x40] sm:$0xff]  }
  0x18   : > { %v2277_v26 = vrot.slane %v2275_v21, 1  ;;  %v2282_v31 = vrot.slane %v2280_v24, 1  ;;  %v2288_v32 = vshll.u32 %v5618_v27, 16  ;;  %v5620_v34 = vld [vmem:[%s5855_s16 + $0x18] sm:$0xff]   ;;  %v2292_v36 = vshrl.u32 %v5618_v27, 16  ;;  %v5617_v37 = vld [vmem:[%s5820_s8 + $0x48] sm:$0xff]  }
  0x19   : > { %v2296_v40 = vshll.u32 %v5620_v34, 16  ;;  %v5622_v41 = vld [vmem:[%s5855_s16 + $0x20] sm:$0xff]   ;;  %v2300_v43 = vshrl.u32 %v5620_v34, 16  ;;  %v5619_v44 = vld [vmem:[%s5820_s8 + $0x50] sm:$0xff]   ;;  %v5624_v48 = vld [vmem:[%s5855_s16 + $0x28] sm:$0xff]  }
  0x1a   : > { %4548 = vmatmul.mubr.msk.bf16.gmra.mrb[4].mxu1 %vm434_vm1, %v5599_v7  ;;  %v2278_v30 = vor.u32 %v2277_v26, %v2273_v23  ;;  %v2286_v38 = vor.u32 %v2284_v28, %v2282_v31  ;;  %v2290_v39 = vrot.slane %v2288_v32, 1  ;;  %v2304_v47 = vshll.u32 %v5622_v41, 16  ;;  %v5621_v51 = vld [vmem:[%s5820_s8 + $0x58] sm:$0xff]   ;;  %v5626_v55 = vld [vmem:[%s5855_s16 + $0x30] sm:$0xff]   ;;  %v5623_v58 = vld [vmem:[%s5820_s8 + $0x60] sm:$0xff]  }
  0x1b   : > { %4796 = vmatmul.mubr.msk.bf16.gmra.mrb[4].mxu0 %vm434_vm1, %v5600_v8  ;;  %4551 = vmatprep.mubr.msk.bf16.mxu1 %vm5750_vm0, %v5749_v1  ;;  %v2298_v46 = vrot.slane %v2296_v40, 1  ;;  %v2308_v50 = vshrl.u32 %v5622_v41, 16  ;;  %v2312_v54 = vshll.u32 %v5624_v48, 16  ;;  %v2316_v57 = vshrl.u32 %v5624_v48, 16  ;;  %v5628_v62 = vld [vmem:[%s5855_s16 + $0x38] sm:$0xff]   ;;  %v5625_v2 = vld [vmem:[%s5820_s8 + $0x68] sm:$0xff]  }
  0x1c   : > { %4799 = vmatprep.mubr.msk.bf16.mxu0 %vm5750_vm0, %v5749_v1  ;;  %v2283_v35 = vsel %vm1117_vm2, %v2278_v30, %v2282_v31  ;;  %v2291_v42 = vsel %vm1117_vm2, %v2286_v38, %v2290_v39  ;;  %v2294_v45 = vor.u32 %v2292_v36, %v2290_v39  ;;  %v2306_v53 = vrot.slane %v2304_v47, 1  ;;  %v5631_v18 = vld [vmem:[%s6583_s4 + $0x10] sm:$0xff]   ;;  %v5637_v31 = vld [vmem:[%s5855_s16 + $0x58] sm:$0xff]   ;;  %v5639_v38 = vld [vmem:[%s5855_s16 + $0x60] sm:$0xff]  }
  0x1d   : > { %v2302_v52 = vor.u32 %v2300_v43, %v2298_v46  ;;  %v2314_v60 = vrot.slane %v2312_v54, 1  ;;  %v2320_v61 = vshll.u32 %v5626_v55, 16  ;;  %v2324_v0 = vshrl.u32 %v5626_v55, 16  ;;  %v5635_v24 = vld [vmem:[%s5855_s16 + $0x50] sm:$0xff]   ;;  %v5636_v39 = vld [vmem:[%s5877_s19 + $0x18] sm:$0xff]  }
  0x1e   : > { %v2299_v49 = vsel %vm1117_vm2, %v2294_v45, %v2298_v46  ;;  %v2310_v59 = vor.u32 %v2308_v50, %v2306_v53  ;;  %v2328_v5 = vshll.u32 %v5628_v62, 16  ;;  %v2352_v28 = vshll.u32 %v5635_v24, 16  ;;  %v5634_v32 = vld [vmem:[%s5877_s19 + $0x10] sm:$0xff]   ;;  %v5641_v45 = vld [vmem:[%s5855_s16 + $0x68] sm:$0xff]   ;;  %v5638_v46 = vld [vmem:[%s5877_s19 + $0x20] sm:$0xff]  }
  0x1f   : > { %v2307_v56 = vsel %vm1117_vm2, %v2302_v52, %v2306_v53  ;;  %v2318_v3 = vor.u32 %v2316_v57, %v2314_v60  ;;  %v2322_v4 = vrot.slane %v2320_v61, 1  ;;  %v2356_v34 = vshrl.u32 %v5635_v24, 16  ;;  %v5643_v52 = vld [vmem:[%s5855_s16 + $0x70] sm:$0xff]   ;;  %v5640_v53 = vld [vmem:[%s5877_s19 + $0x28] sm:$0xff]  }
  0x20   : > { %v2315_v63 = vsel %vm1117_vm2, %v2310_v59, %v2314_v60  ;;  %v2330_v8 = vrot.slane %v2328_v5, 1  ;;  %v2354_v30 = vrot.slane %v2352_v28, 1  ;;  %v2364_v41 = vshrl.u32 %v5637_v31, 16  ;;  %v5645_v59 = vld [vmem:[%s5855_s16 + $0x78] ss:$0 sps:$4 sm:$0x11]  }
  0x21   : > { %v2323_v6 = vsel %vm1117_vm2, %v2318_v3, %v2322_v4  ;;  %v2326_v7 = vor.u32 %v2324_v0, %v2322_v4  ;;  %v2372_v48 = vshrl.u32 %v5639_v38, 16  ;;  %v2380_v55 = vshrl.u32 %v5641_v45, 16  ;;  %v5642_v60 = vld [vmem:[%s5877_s19 + $0x30] sm:$0xff]   ;;  %v5644_v3 = vld [vmem:[%s5877_s19 + $0x38] sm:$0xff]   ;;  %v5646_v5 = vld [vmem:[%s5877_s19 + $0x40] sm:$0xff]  }
  0x22   : > { %4552 = vmatmul.mubr.msk.bf16.gmra.mrb[8].mxu1 %vm434_vm1, %v5601_v9  ;;  %v5630_v9 = vld [vmem:[%s5855_s16 + $0x40] sm:$0xff]   ;;  %v2358_v36 = vor.u32 %v2356_v34, %v2354_v30  ;;  %v5665_v28 = vld [vmem:[%s5820_s8 + $0x10] sm:$0xff]  }
  0x23   : > { %4800 = vmatmul.mubr.msk.bf16.gmra.mrb[8].mxu0 %vm434_vm1, %v5602_v10  ;;  %4555 = vmatprep.mubr.msk.bf16.mxu1 %vm5750_vm0, %v5749_v1  ;;  %v5627_v10 = vld [vmem:[%s5820_s8 + $0x70] sm:$0xff]   ;;  %v2340_v20 = vshrl.u32 %v5630_v9, 16 }
  0x24   : > { %4803 = vmatprep.mubr.msk.bf16.mxu0 %vm5750_vm0, %v5749_v1 }
  0x2a   : > { %4556 = vmatmul.mubr.msk.bf16.gmra.mrb[12].mxu1 %vm434_vm1, %v5603_v11  ;;  %v2331_v11 = vsel %vm1117_vm2, %v2326_v7, %v2330_v8  ;;  %v5648_v7 = vld [vmem:[%s6583_s4 + $0x38] sm:$0xff]  }
  0x2b   : > { %4804 = vmatmul.mubr.msk.bf16.gmra.mrb[12].mxu0 %vm434_vm1, %v5604_v12  ;;  %4559 = vmatprep.mubr.msk.bf16.mxu1 %vm5750_vm0, %v5749_v1  ;;  %v2332_v12 = vshrl.u32 %v5628_v62, 16  ;;  %v2388_v62 = vshrl.u32 %v5643_v52, 16 }
  0x2c   : > { %4807 = vmatprep.mubr.msk.bf16.mxu0 %vm5750_vm0, %v5749_v1 }
  0x32   : > { %4560 = vmatmul.mubr.msk.bf16.gmra.mrb[16].mxu1 %vm434_vm1, %v5605_v13  ;;  %v2336_v13 = vshll.u32 %v5630_v9, 16  ;;  %v5650_v9 = vld [vmem:[%s5820_s8 + $0x10] sm:$0xff]  }
  0x33   : > { %4808 = vmatmul.mubr.msk.bf16.gmra.mrb[16].mxu0 %vm434_vm1, %v5606_v14  ;;  %4563 = vmatprep.mubr.msk.bf16.mxu1 %vm5750_vm0, %v5749_v1  ;;  %v2334_v14 = vor.u32 %v2332_v12, %v2330_v8  ;;  %v5649_v8 = vld [vmem:[%s5877_s19 + $0x48] sm:$0xff]   ;;  %v5653_v12 = vld [vmem:[%s5877_s19 + $0x58] sm:$0xff]  }
  0x34   : > { %4811 = vmatprep.mubr.msk.bf16.mxu0 %vm5750_vm0, %v5749_v1 }
  0x3a   : > { %4564 = vmatmul.mubr.msk.bf16.gmra.mrb[20].mxu1 %vm434_vm1, %v5607_v15  ;;  %v2338_v15 = vrot.slane %v2336_v13, 1  ;;  %v5654_v13 = vld [vmem:[%s5820_s8 + $0x20] sm:$0xff]  }
  0x3b   : > { %4812 = vmatmul.mubr.msk.bf16.gmra.mrb[20].mxu0 %vm434_vm1, %v5608_v16  ;;  %4567 = vmatprep.mubr.msk.bf16.mxu1 %vm5750_vm0, %v5749_v1  ;;  %v5633_v16 = vld [vmem:[%s5855_s16 + $0x48] sm:$0xff]  }
  0x3c   : > { %4815 = vmatprep.mubr.msk.bf16.mxu0 %vm5750_vm0, %v5749_v1  ;;  %v2344_v21 = vshll.u32 %v5633_v16, 16  ;;  %v2348_v27 = vshrl.u32 %v5633_v16, 16  ;;  %v5657_v16 = vld [vmem:[%s5877_s19 + $0x68] sm:$0xff]  }
  0x3e   : > { %v2346_v23 = vrot.slane %v2344_v21, 1  ;;  %v5659_v21 = vld [vmem:[%s5877_s19 + $0x70] sm:$0xff]  }
  0x42   : > { %4568 = vmatmul.mubr.msk.bf16.gmra.mrb[24].mxu1 %vm434_vm1, %v5609_v17  ;;  %v5629_v17 = vld [vmem:[%s5877_s19] sm:$0xff]  }
  0x43   : > { %4816 = vmatmul.mubr.msk.bf16.gmra.mrb[24].mxu0 %vm434_vm1, %v5610_v19  ;;  %4571 = vmatprep.mubr.msk.bf16.mxu1 %vm5750_vm0, %v5749_v1  ;;  %v2339_v19 = vsel %vm1117_vm2, %v2334_v14, %v2338_v15  ;;  %v5655_v14 = vld [vmem:[%s5877_s19 + $0x60] sm:$0xff]  }
  0x44   : > { %4819 = vmatprep.mubr.msk.bf16.mxu0 %vm5750_vm0, %v5749_v1 }
  0x4a   : > { %4572 = vmatmul.mubr.msk.bf16.gmra.mrb[28].mxu1 %vm434_vm1, %v5611_v22  ;;  %v2342_v22 = vor.u32 %v2340_v20, %v2338_v15  ;;  %v5656_v15 = vld [vmem:[%s5820_s8 + $0x28] sm:$0xff]  }
  0x4b   : > { %4820 = vmatmul.mubr.msk.bf16.gmra.mrb[28].mxu0 %vm434_vm1, %v5612_v25  ;;  %4575 = vmatprep.mubr.msk.bf16.mxu1 %vm5750_vm0, %v5749_v1  ;;  %v5632_v25 = vld [vmem:[%s5877_s19 + $0x8] sm:$0xff]  }
  0x4c   : > { %4853 = vmatprep.mubr.msk.bf16.mxu0 %vm5750_vm0, %v5749_v1  ;;  %v2347_v26 = vsel %vm1117_vm2, %v2342_v22, %v2346_v23  ;;  %v5660_v22 = vld [vmem:[%s5820_s8 + $0x38] sm:$0xff]  }
  0x52   : > { %4576 = vmatmul.mubr.msk.bf16.gmra.mrb[32].mxu1 %vm434_vm1, %v5613_v29  ;;  %v2350_v29 = vor.u32 %v2348_v27, %v2346_v23 }
  0x53   : > { %4854 = vmatmul.mubr.msk.bf16.vlgmr.msra.gmra.mrb[0].mxu0 %vm434_vm1, %v2283_v35  ;;  %4579 = vmatprep.mubr.msk.bf16.mxu1 %vm5750_vm0, %v5749_v1  ;;  %v2360_v35 = vshll.u32 %v5637_v31, 16  ;;  %v5664_v31 = vld [vmem:[%s6583_s4 + $0x18] sm:$0xff]  }
  0x54   : > { %4914 = vmatpush3.bf16.msra.mxu0 %v5616_v33  ;;  %4857 = vmatprep.mubr.msk.bf16.mxu0 %vm5750_vm0, %v5749_v1  ;;  %v2355_v33 = vsel %vm1117_vm2, %v2350_v29, %v2354_v30  ;;  %v5663_v30 = vld [vmem:[%s5820_s8 + $0x40] sm:$0xff]  }
  0x55   : > { %4975 = vmatprep.subr.bf16.mxu0 %v5749_v1 }
  0x5a   : > { %4580 = vmatmul.mubr.msk.bf16.gmra.mrb[36].mxu1 %vm434_vm1, %v5617_v37  ;;  %v2362_v37 = vrot.slane %v2360_v35, 1 }
  0x5b   : > { %4858 = vmatmul.mubr.msk.bf16.gmra.mrb[4].mxu0 %vm434_vm1, %v2291_v42  ;;  %4583 = vmatprep.mubr.msk.bf16.mxu1 %vm5750_vm0, %v5749_v1  ;;  %v2368_v42 = vshll.u32 %v5639_v38, 16  ;;  %v5666_v38 = vld [vmem:[%s5820_s8 + $0x48] sm:$0xff]  }
  0x5c   : > { %4861 = vmatprep.mubr.msk.bf16.mxu0 %vm5750_vm0, %v5749_v1  ;;  %v2363_v40 = vsel %vm1117_vm2, %v2358_v36, %v2362_v37  ;;  %v2366_v43 = vor.u32 %v2364_v41, %v2362_v37  ;;  %v5667_v36 = vld [vmem:[%s5820_s8 + $0x18] sm:$0xff]  }
  0x62   : > { %4584 = vmatmul.mubr.msk.bf16.gmra.mrb[40].mxu1 %vm434_vm1, %v5619_v44  ;;  %v2370_v44 = vrot.slane %v2368_v42, 1 }
  0x63   : > { %4862 = vmatmul.mubr.msk.bf16.gmra.mrb[8].mxu0 %vm434_vm1, %v2299_v49  ;;  %4587 = vmatprep.mubr.msk.bf16.mxu1 %vm5750_vm0, %v5749_v1  ;;  %v2376_v49 = vshll.u32 %v5641_v45, 16  ;;  %v5668_v45 = vld [vmem:[%s5820_s8 + $0x50] sm:$0xff]  }
  0x64   : > { %4865 = vmatprep.mubr.msk.bf16.mxu0 %vm5750_vm0, %v5749_v1  ;;  %v2371_v47 = vsel %vm1117_vm2, %v2366_v43, %v2370_v44  ;;  %v2374_v50 = vor.u32 %v2372_v48, %v2370_v44  ;;  %v5669_v43 = vld [vmem:[%s5820_s8 + $0x20] sm:$0xff]  }
  0x6a   : > { %4588 = vmatmul.mubr.msk.bf16.gmra.mrb[44].mxu1 %vm434_vm1, %v5621_v51  ;;  %v2378_v51 = vrot.slane %v2376_v49, 1 }
  0x6b   : > { %4866 = vmatmul.mubr.msk.bf16.gmra.mrb[12].mxu0 %vm434_vm1, %v2307_v56  ;;  %4591 = vmatprep.mubr.msk.bf16.mxu1 %vm5750_vm0, %v5749_v1  ;;  %v2384_v56 = vshll.u32 %v5643_v52, 16  ;;  %v5670_v52 = vld [vmem:[%s5820_s8 + $0x58] sm:$0xff]  }
  0x6c   : > { %4869 = vmatprep.mubr.msk.bf16.mxu0 %vm5750_vm0, %v5749_v1  ;;  %v2379_v54 = vsel %vm1117_vm2, %v2374_v50, %v2378_v51  ;;  %v2382_v57 = vor.u32 %v2380_v55, %v2378_v51  ;;  %v5671_v50 = vld [vmem:[%s5820_s8 + $0x28] sm:$0xff]  }
  0x72   : > { %4592 = vmatmul.mubr.msk.bf16.gmra.mrb[48].mxu1 %vm434_vm1, %v5623_v58  ;;  %v2386_v58 = vrot.slane %v2384_v56, 1 }
  0x73   : > { %4870 = vmatmul.mubr.msk.bf16.gmra.mrb[16].mxu0 %vm434_vm1, %v2315_v63  ;;  %4595 = vmatprep.mubr.msk.bf16.mxu1 %vm5750_vm0, %v5749_v1  ;;  %v2392_v63 = vshll.u32 %v5645_v59, 16  ;;  %v5672_v59 = vld [vmem:[%s5820_s8 + $0x60] sm:$0xff]  }
  0x74   : > { %4873 = vmatprep.mubr.msk.bf16.mxu0 %vm5750_vm0, %v5749_v1  ;;  %v2387_v61 = vsel %vm1117_vm2, %v2382_v57, %v2386_v58  ;;  %v2390_v0 = vor.u32 %v2388_v62, %v2386_v58  ;;  %v5673_v57 = vld [vmem:[%s5820_s8 + $0x30] sm:$0xff]  }
  0x7a   : > { %4596 = vmatmul.mubr.msk.bf16.gmra.mrb[52].mxu1 %vm434_vm1, %v5625_v2  ;;  %v2394_v2 = vrot.slane %v2392_v63, 1 }
  0x7b   : > { %4874 = vmatmul.mubr.msk.bf16.gmra.mrb[20].mxu0 %vm434_vm1, %v2323_v6  ;;  %4599 = vmatprep.mubr.msk.bf16.mxu1 %vm5750_vm0, %v5749_v1  ;;  %v5647_v6 = vld [vmem:[%s5820_s8 + $0x8] sm:$0xff]  }
  0x7c   : > { %4877 = vmatprep.mubr.msk.bf16.mxu0 %vm5750_vm0, %v5749_v1  ;;  %v2395_v4 = vsel %vm1117_vm2, %v2390_v0, %v2394_v2  ;;  %v5675_v0 = vld [vmem:[%s5820_s8 + $0x38] sm:$0xff]  }
  0x82   : > { %4600 = vmatmul.mubr.msk.bf16.gmra.mrb[56].mxu1 %vm434_vm1, %v5627_v10  ;;  %v5651_v10 = vld [vmem:[%s5877_s19 + $0x50] sm:$0xff]  }
  0x83   : > { %4878 = vmatmul.mubr.msk.bf16.gmra.mrb[24].mxu0 %vm434_vm1, %v2331_v11  ;;  %4605 = vmatprep.mubr.msk.bf16.mxu1 %vm5750_vm0, %v5749_v1  ;;  %v5652_v11 = vld [vmem:[%s5820_s8 + $0x18] sm:$0xff]  }
  0x84   : > { %4881 = vmatprep.mubr.msk.bf16.mxu0 %vm5750_vm0, %v5749_v1 }
  0x8a   : > { %4606 = vmatmul.mubr.msk.bf16.vlgmr.msra.gmra.mrb[0].mxu1 %vm434_vm1, %v5629_v17  ;;  %v5658_v17 = vld [vmem:[%s5820_s8 + $0x30] sm:$0xff]  }
  0x8b   : > { %4882 = vmatmul.mubr.msk.bf16.gmra.mrb[28].mxu0 %vm434_vm1, %v2339_v19  ;;  %4666 = vmatpush3.bf16.msra.mxu1 %v5631_v18  ;;  %v5661_v18 = vld [vmem:[%s5820_s8] sm:$0xff]   ;;  %v5662_v19 = vld [vmem:[%s5820_s8 + $0x8] sm:$0xff]  }
  0x8c   : > { %4609 = vmatprep.mubr.msk.bf16.mxu1 %vm5750_vm0, %v5749_v1  ;;  %4885 = vmatprep.mubr.msk.bf16.mxu0 %vm5750_vm0, %v5749_v1  ;;  %v1121_v20 = vshll.u32 %v5661_v18, 16  ;;  %v1119_v23 = vshrl.u32 %v5661_v18, 16 }
  0x8d   : > { %4727 = vmatprep.subr.bf16.mxu1 %v5749_v1 }
  0x8e   : > { %v1123_v24 = vrot.slane %v1121_v20, 1 }
  0x92   : > { %4610 = vmatmul.mubr.msk.bf16.gmra.mrb[4].mxu1 %vm434_vm1, %v5632_v25  ;;  %v1126_v25 = vshll.u32 %v5662_v19, 16 }
  0x93   : > { %4886 = vmatmul.mubr.msk.bf16.gmra.mrb[32].mxu0 %vm434_vm1, %v2347_v26  ;;  %4613 = vmatprep.mubr.msk.bf16.mxu1 %vm5750_vm0, %v5749_v1  ;;  %v1124_v26 = vor.u32 %v1123_v24, %v1119_v23  ;;  %v5680_v24 = vld [vmem:[%s5877_s19 + $0x8] sm:$0xff]  }
  0x94   : > { %4889 = vmatprep.mubr.msk.bf16.mxu0 %vm5750_vm0, %v5749_v1  ;;  %v1128_v27 = vrot.slane %v1126_v25, 1 }
  0x96   : > { %v1129_v29 = vsel %vm1117_vm2, %v1124_v26, %v1128_v27 }
  0x9a   : > { %4614 = vmatmul.mubr.msk.bf16.gmra.mrb[8].mxu1 %vm434_vm1, %v5634_v32  ;;  %v1130_v32 = vshrl.u32 %v5662_v19, 16 }
  0x9b   : > { %4890 = vmatmul.mubr.msk.bf16.gmra.mrb[36].mxu0 %vm434_vm1, %v2355_v33  ;;  %4617 = vmatprep.mubr.msk.bf16.mxu1 %vm5750_vm0, %v5749_v1  ;;  %v1134_v33 = vshll.u32 %v5665_v28, 16 }
  0x9c   : > { %4893 = vmatprep.mubr.msk.bf16.mxu0 %vm5750_vm0, %v5749_v1  ;;  %v1132_v34 = vor.u32 %v1130_v32, %v1128_v27  ;;  %v5681_v27 = vld [vmem:[%s6583_s4 + $0x40] sm:$0xff]   ;;  %v5683_v32 = vld [vmem:[%s5877_s19 + $0x10] sm:$0xff]  }
  0x9d   : > { %v1136_v35 = vrot.slane %v1134_v33, 1 }
  0x9f   : > { %v1137_v37 = vsel %vm1117_vm2, %v1132_v34, %v1136_v35 }
  0xa2   : > { %4618 = vmatmul.mubr.msk.bf16.gmra.mrb[12].mxu1 %vm434_vm1, %v5636_v39  ;;  %v1138_v39 = vshrl.u32 %v5665_v28, 16 }
  0xa3   : > { %4894 = vmatmul.mubr.msk.bf16.gmra.mrb[40].mxu0 %vm434_vm1, %v2363_v40  ;;  %4621 = vmatprep.mubr.msk.bf16.mxu1 %vm5750_vm0, %v5749_v1  ;;  %v1142_v40 = vshll.u32 %v5667_v36, 16 }
  0xa4   : > { %4897 = vmatprep.mubr.msk.bf16.mxu0 %vm5750_vm0, %v5749_v1  ;;  %v1140_v41 = vor.u32 %v1138_v39, %v1136_v35  ;;  %v5685_v39 = vld [vmem:[%s5877_s19 + $0x18] sm:$0xff]  }
  0xa5   : > { %v1144_v42 = vrot.slane %v1142_v40, 1 }
  0xa7   : > { %v1145_v44 = vsel %vm1117_vm2, %v1140_v41, %v1144_v42 }
  0xaa   : > { %4622 = vmatmul.mubr.msk.bf16.gmra.mrb[16].mxu1 %vm434_vm1, %v5638_v46  ;;  %v1146_v46 = vshrl.u32 %v5667_v36, 16 }
  0xab   : > { %4898 = vmatmul.mubr.msk.bf16.gmra.mrb[44].mxu0 %vm434_vm1, %v2371_v47  ;;  %4625 = vmatprep.mubr.msk.bf16.mxu1 %vm5750_vm0, %v5749_v1  ;;  %v1150_v47 = vshll.u32 %v5669_v43, 16 }
  0xac   : > { %4901 = vmatprep.mubr.msk.bf16.mxu0 %vm5750_vm0, %v5749_v1  ;;  %v1148_v48 = vor.u32 %v1146_v46, %v1144_v42  ;;  %v5687_v46 = vld [vmem:[%s5877_s19 + $0x20] sm:$0xff]  }
  0xad   : > { %v1152_v49 = vrot.slane %v1150_v47, 1 }
  0xaf   : > { %v1153_v51 = vsel %vm1117_vm2, %v1148_v48, %v1152_v49 }
  0xb2   : > { %4626 = vmatmul.mubr.msk.bf16.gmra.mrb[20].mxu1 %vm434_vm1, %v5640_v53  ;;  %v1154_v53 = vshrl.u32 %v5669_v43, 16 }
  0xb3   : > { %4902 = vmatmul.mubr.msk.bf16.gmra.mrb[48].mxu0 %vm434_vm1, %v2379_v54  ;;  %4629 = vmatprep.mubr.msk.bf16.mxu1 %vm5750_vm0, %v5749_v1  ;;  %v1158_v54 = vshll.u32 %v5671_v50, 16 }
  0xb4   : > { %4905 = vmatprep.mubr.msk.bf16.mxu0 %vm5750_vm0, %v5749_v1  ;;  %v1156_v55 = vor.u32 %v1154_v53, %v1152_v49  ;;  %v5689_v53 = vld [vmem:[%s5877_s19 + $0x28] sm:$0xff]  }
  0xb5   : > { %v1160_v56 = vrot.slane %v1158_v54, 1 }
  0xb7   : > { %v1161_v58 = vsel %vm1117_vm2, %v1156_v55, %v1160_v56 }
  0xba   : > { %4630 = vmatmul.mubr.msk.bf16.gmra.mrb[24].mxu1 %vm434_vm1, %v5642_v60  ;;  %v1162_v60 = vshrl.u32 %v5671_v50, 16 }
  0xbb   : > { %4906 = vmatmul.mubr.msk.bf16.gmra.mrb[52].mxu0 %vm434_vm1, %v2387_v61  ;;  %4633 = vmatprep.mubr.msk.bf16.mxu1 %vm5750_vm0, %v5749_v1  ;;  %v1166_v61 = vshll.u32 %v5673_v57, 16 }
  0xbc   : > { %4909 = vmatprep.mubr.msk.bf16.mxu0 %vm5750_vm0, %v5749_v1  ;;  %v1164_v62 = vor.u32 %v1162_v60, %v1160_v56  ;;  %v5691_v60 = vld [vmem:[%s5877_s19 + $0x30] sm:$0xff]  }
  0xbd   : > { %v1168_v63 = vrot.slane %v1166_v61, 1 }
  0xbf   : > { %v1169_v2 = vsel %vm1117_vm2, %v1164_v62, %v1168_v63 }
  0xc2   : > { %4634 = vmatmul.mubr.msk.bf16.gmra.mrb[28].mxu1 %vm434_vm1, %v5644_v3  ;;  %v5674_v3 = vld [vmem:[%s5820_s8 + $0x68] sm:$0xff]  }
  0xc3   : > { %4910 = vmatmul.mubr.msk.bf16.gmra.mrb[56].mxu0 %vm434_vm1, %v2395_v4  ;;  %4637 = vmatprep.mubr.msk.bf16.mxu1 %vm5750_vm0, %v5749_v1  ;;  %v1170_v4 = vshrl.u32 %v5673_v57, 16 }
  0xc4   : > { %4915 = vmatprep.mubr.msk.bf16.mxu0 %vm5750_vm0, %v5749_v1 }
  0xca   : > { %4638 = vmatmul.mubr.msk.bf16.gmra.mrb[32].mxu1 %vm434_vm1, %v5646_v5  ;;  %v1174_v5 = vshll.u32 %v5675_v0, 16 }
  0xcb   : > { %4916 = vmatmul.mubr.msk.bf16.vlgmr.msra.gmra.mrb[0].mxu0 %vm434_vm1, %v5647_v6  ;;  %4641 = vmatprep.mubr.msk.bf16.mxu1 %vm5750_vm0, %v5749_v1  ;;  %v1172_v6 = vor.u32 %v1170_v4, %v1168_v63  ;;  %v5694_v4 = vld [vmem:[%s5855_s16] sm:$0xff]  }
  0xcc   : > { %4976 = vmatpush3.bf16.msra.mxu0 %v5648_v7  ;;  %4919 = vmatprep.mubr.msk.bf16.mxu0 %vm5750_vm0, %v5749_v1  ;;  %v1176_v7 = vrot.slane %v1174_v5, 1  ;;  %v5695_v5 = vld [vmem:[%s5877_s19 + $0x40] sm:$0xff]  }
  0xcd   : > { %5037 = vmatprep.subr.bf16.mxu0 %v5749_v1 }
  0xd2   : > { %4642 = vmatmul.mubr.msk.bf16.gmra.mrb[36].mxu1 %vm434_vm1, %v5649_v8  ;;  %v5677_v8 = vld [vmem:[%s5820_s8 + $0x40] sm:$0xff]  }
  0xd3   : > { %4920 = vmatmul.mubr.msk.bf16.gmra.mrb[4].mxu0 %vm434_vm1, %v5650_v9  ;;  %4645 = vmatprep.mubr.msk.bf16.mxu1 %vm5750_vm0, %v5749_v1  ;;  %v1177_v9 = vsel %vm1117_vm2, %v1172_v6, %v1176_v7  ;;  %v1186_v18 = vshrl.u32 %v5677_v8, 16  ;;  %v5740_v6 = vld [vmem:[%s6583_s4 + $0x20] sm:$0xff]  }
  0xd4   : > { %4923 = vmatprep.mubr.msk.bf16.mxu0 %vm5750_vm0, %v5749_v1 }
  0xda   : > { %4646 = vmatmul.mubr.msk.bf16.gmra.mrb[40].mxu1 %vm434_vm1, %v5651_v10  ;;  %v5676_v10 = vld [vmem:[%s5820_s8 + $0x70] sm:$0xff]  }
  0xdb   : > { %4924 = vmatmul.mubr.msk.bf16.gmra.mrb[8].mxu0 %vm434_vm1, %v5652_v11  ;;  %4649 = vmatprep.mubr.msk.bf16.mxu1 %vm5750_vm0, %v5749_v1  ;;  %v1178_v11 = vshrl.u32 %v5675_v0, 16 }
  0xdc   : > { %4927 = vmatprep.mubr.msk.bf16.mxu0 %vm5750_vm0, %v5749_v1 }
  0xe2   : > { %4650 = vmatmul.mubr.msk.bf16.gmra.mrb[44].mxu1 %vm434_vm1, %v5653_v12  ;;  %v1182_v12 = vshll.u32 %v5677_v8, 16  ;;  %v5697_v8 = vld [vmem:[%s5877_s19 + $0x48] sm:$0xff]  }
  0xe3   : > { %4928 = vmatmul.mubr.msk.bf16.gmra.mrb[12].mxu0 %vm434_vm1, %v5654_v13  ;;  %4653 = vmatprep.mubr.msk.bf16.mxu1 %vm5750_vm0, %v5749_v1  ;;  %v1180_v13 = vor.u32 %v1178_v11, %v1176_v7  ;;  %v5696_v7 = vld [vmem:[%s5855_s16 + $0x8] sm:$0xff]   ;;  %v5700_v11 = vld [vmem:[%s5855_s16 + $0x18] sm:$0xff]  }
  0xe4   : > { %4931 = vmatprep.mubr.msk.bf16.mxu0 %vm5750_vm0, %v5749_v1 }
  0xea   : > { %4654 = vmatmul.mubr.msk.bf16.gmra.mrb[48].mxu1 %vm434_vm1, %v5655_v14  ;;  %v1184_v14 = vrot.slane %v1182_v12, 1  ;;  %v5701_v12 = vld [vmem:[%s5877_s19 + $0x58] sm:$0xff]  }
  0xeb   : > { %4932 = vmatmul.mubr.msk.bf16.gmra.mrb[16].mxu0 %vm434_vm1, %v5656_v15  ;;  %4657 = vmatprep.mubr.msk.bf16.mxu1 %vm5750_vm0, %v5749_v1  ;;  %v5679_v15 = vld [vmem:[%s5820_s8 + $0x48] sm:$0xff]  }
  0xec   : > { %4935 = vmatprep.mubr.msk.bf16.mxu0 %vm5750_vm0, %v5749_v1  ;;  %v1190_v19 = vshll.u32 %v5679_v15, 16  ;;  %v1188_v20 = vor.u32 %v1186_v18, %v1184_v14  ;;  %v1194_v25 = vshrl.u32 %v5679_v15, 16  ;;  %v5704_v15 = vld [vmem:[%s5855_s16 + $0x28] sm:$0xff]   ;;  %v5707_v18 = vld [vmem:[%s5877_s19 + $0x70] sm:$0xff]  }
  0xf2   : > { %4658 = vmatmul.mubr.msk.bf16.gmra.mrb[52].mxu1 %vm434_vm1, %v5657_v16  ;;  %v1185_v16 = vsel %vm1117_vm2, %v1180_v13, %v1184_v14  ;;  %v5702_v13 = vld [vmem:[%s5855_s16 + $0x20] sm:$0xff]  }
  0xf3   : > { %4936 = vmatmul.mubr.msk.bf16.gmra.mrb[20].mxu0 %vm434_vm1, %v5658_v17  ;;  %4661 = vmatprep.mubr.msk.bf16.mxu1 %vm5750_vm0, %v5749_v1  ;;  %v5678_v17 = vld [vmem:[%s5820_s8 + $0x78] sm:$0xff]   ;;  %v5703_v14 = vld [vmem:[%s5877_s19 + $0x60] sm:$0xff]  }
  0xf4   : > { %4939 = vmatprep.mubr.msk.bf16.mxu0 %vm5750_vm0, %v5749_v1 }
  0xfa   : > { %4662 = vmatmul.mubr.msk.bf16.gmra.mrb[56].mxu1 %vm434_vm1, %v5659_v21  ;;  %v1192_v21 = vrot.slane %v1190_v19, 1  ;;  %v5711_v19 = vld [vmem:[%s5820_s8 + $0x8] sm:$0xff]  }
  0xfb   : > { %4940 = vmatmul.mubr.msk.bf16.gmra.mrb[24].mxu0 %vm434_vm1, %v5660_v22  ;;  %4667 = vmatprep.mubr.msk.bf16.mxu1 %vm5750_vm0, %v5749_v1  ;;  %v5682_v22 = vld [vmem:[%s5820_s8 + $0x50] sm:$0xff]  }
  0xfc   : > { %4943 = vmatprep.mubr.msk.bf16.mxu0 %vm5750_vm0, %v5749_v1  ;;  %v1193_v23 = vsel %vm1117_vm2, %v1188_v20, %v1192_v21  ;;  %v1198_v26 = vshll.u32 %v5682_v22, 16  ;;  %v1196_v28 = vor.u32 %v1194_v25, %v1192_v21  ;;  %v1202_v33 = vshrl.u32 %v5682_v22, 16  ;;  %v5712_v20 = vld [vmem:[%s5820_s8 + $0x10] sm:$0xff]   ;;  %v5708_v22 = vld [vmem:[%s5855_s16 + $0x38] sm:$0xff]  }
  0xfd   : > { %v3429_v21 = vshll.u32 %v5711_v19, 16 }
  0xff   : > { %v3431_v25 = vrot.slane %v3429_v21, 1 }
 0x102   : > { %4668 = vmatmul.mubr.msk.bf16.vlgmr.msra.gmra.mrb[0].mxu1 %vm434_vm1, %v1129_v29  ;;  %v1200_v29 = vrot.slane %v1198_v26, 1  ;;  %v3434_v26 = vshll.u32 %v5712_v20, 16 }
 0x103   : > { %4944 = vmatmul.mubr.msk.bf16.gmra.mrb[28].mxu0 %vm434_vm1, %v5663_v30  ;;  %4728 = vmatpush3.bf16.msra.mxu1 %v5664_v31  ;;  %v5684_v30 = vld [vmem:[%s5820_s8 + $0x58] sm:$0xff]  }
 0x104   : > { %4671 = vmatprep.mubr.msk.bf16.mxu1 %vm5750_vm0, %v5749_v1  ;;  %4947 = vmatprep.mubr.msk.bf16.mxu0 %vm5750_vm0, %v5749_v1  ;;  %v1201_v31 = vsel %vm1117_vm2, %v1196_v28, %v1200_v29  ;;  %v1206_v34 = vshll.u32 %v5684_v30, 16  ;;  %v1204_v35 = vor.u32 %v1202_v33, %v1200_v29  ;;  %v1210_v40 = vshrl.u32 %v5684_v30, 16  ;;  %v5714_v29 = vld [vmem:[%s5820_s8 + $0x18] sm:$0xff]   ;;  %v5710_v30 = vld [vmem:[%s5855_s16 + $0x40] sm:$0xff]  }
 0x105   : > { %5099 = vmatprep.subr.bf16.mxu1 %v5749_v1  ;;  %v3436_v28 = vrot.slane %v3434_v26, 1  ;;  %v3442_v33 = vshll.u32 %v5714_v29, 16 }
 0x106   : > { %v1208_v36 = vrot.slane %v1206_v34, 1 }
 0x108   : > { %v1212_v42 = vor.u32 %v1210_v40, %v1208_v36 }
 0x10a   : > { %4672 = vmatmul.mubr.msk.bf16.gmra.mrb[4].mxu1 %vm434_vm1, %v1137_v37  ;;  %v5686_v37 = vld [vmem:[%s5820_s8 + $0x60] sm:$0xff]  }
 0x10b   : > { %4948 = vmatmul.mubr.msk.bf16.gmra.mrb[32].mxu0 %vm434_vm1, %v5666_v38  ;;  %4675 = vmatprep.mubr.msk.bf16.mxu1 %vm5750_vm0, %v5749_v1  ;;  %v1209_v38 = vsel %vm1117_vm2, %v1204_v35, %v1208_v36  ;;  %v1214_v41 = vshll.u32 %v5686_v37, 16  ;;  %v1218_v47 = vshrl.u32 %v5686_v37, 16  ;;  %v3444_v35 = vrot.slane %v3442_v33, 1  ;;  %v5716_v36 = vld [vmem:[%s5820_s8 + $0x20] sm:$0xff]   ;;  %v5713_v37 = vld [vmem:[%s5855_s16 + $0x48] sm:$0xff]  }
 0x10c   : > { %4951 = vmatprep.mubr.msk.bf16.mxu0 %vm5750_vm0, %v5749_v1  ;;  %v3450_v40 = vshll.u32 %v5716_v36, 16 }
 0x10d   : > { %v1216_v43 = vrot.slane %v1214_v41, 1 }
 0x10f   : > { %v1220_v49 = vor.u32 %v1218_v47, %v1216_v43 }
 0x112   : > { %4676 = vmatmul.mubr.msk.bf16.gmra.mrb[8].mxu1 %vm434_vm1, %v1145_v44  ;;  %v5688_v44 = vld [vmem:[%s5820_s8 + $0x68] sm:$0xff]  }
 0x113   : > { %4952 = vmatmul.mubr.msk.bf16.gmra.mrb[36].mxu0 %vm434_vm1, %v5668_v45  ;;  %4679 = vmatprep.mubr.msk.bf16.mxu1 %vm5750_vm0, %v5749_v1  ;;  %v1217_v45 = vsel %vm1117_vm2, %v1212_v42, %v1216_v43  ;;  %v1222_v48 = vshll.u32 %v5688_v44, 16  ;;  %v1226_v54 = vshrl.u32 %v5688_v44, 16  ;;  %v3452_v42 = vrot.slane %v3450_v40, 1  ;;  %v5718_v43 = vld [vmem:[%s5820_s8 + $0x28] sm:$0xff]   ;;  %v5715_v44 = vld [vmem:[%s5855_s16 + $0x50] sm:$0xff]  }
 0x114   : > { %4955 = vmatprep.mubr.msk.bf16.mxu0 %vm5750_vm0, %v5749_v1  ;;  %v3458_v47 = vshll.u32 %v5718_v43, 16 }
 0x115   : > { %v1224_v50 = vrot.slane %v1222_v48, 1 }
 0x117   : > { %v1228_v56 = vor.u32 %v1226_v54, %v1224_v50 }
 0x11a   : > { %4680 = vmatmul.mubr.msk.bf16.gmra.mrb[12].mxu1 %vm434_vm1, %v1153_v51  ;;  %v5690_v51 = vld [vmem:[%s5820_s8 + $0x70] sm:$0xff]  }
 0x11b   : > { %4956 = vmatmul.mubr.msk.bf16.gmra.mrb[40].mxu0 %vm434_vm1, %v5670_v52  ;;  %4683 = vmatprep.mubr.msk.bf16.mxu1 %vm5750_vm0, %v5749_v1  ;;  %v1225_v52 = vsel %vm1117_vm2, %v1220_v49, %v1224_v50  ;;  %v1230_v55 = vshll.u32 %v5690_v51, 16  ;;  %v1234_v61 = vshrl.u32 %v5690_v51, 16  ;;  %v3460_v49 = vrot.slane %v3458_v47, 1  ;;  %v5720_v50 = vld [vmem:[%s5820_s8 + $0x30] sm:$0xff]   ;;  %v5717_v51 = vld [vmem:[%s5855_s16 + $0x58] sm:$0xff]  }
 0x11c   : > { %4959 = vmatprep.mubr.msk.bf16.mxu0 %vm5750_vm0, %v5749_v1  ;;  %v3466_v54 = vshll.u32 %v5720_v50, 16 }
 0x11d   : > { %v1232_v57 = vrot.slane %v1230_v55, 1 }
 0x11f   : > { %v1236_v63 = vor.u32 %v1234_v61, %v1232_v57 }
 0x122   : > { %4684 = vmatmul.mubr.msk.bf16.gmra.mrb[16].mxu1 %vm434_vm1, %v1161_v58  ;;  %v5692_v58 = vld [vmem:[%s5820_s8 + $0x78] ss:$0 sps:$4 sm:$0x11]  }
 0x123   : > { %4960 = vmatmul.mubr.msk.bf16.gmra.mrb[44].mxu0 %vm434_vm1, %v5672_v59  ;;  %4687 = vmatprep.mubr.msk.bf16.mxu1 %vm5750_vm0, %v5749_v1  ;;  %v1233_v59 = vsel %vm1117_vm2, %v1228_v56, %v1232_v57  ;;  %v1238_v62 = vshll.u32 %v5692_v58, 16  ;;  %v3468_v56 = vrot.slane %v3466_v54, 1  ;;  %v5722_v57 = vld [vmem:[%s5820_s8 + $0x38] sm:$0xff]   ;;  %v5719_v58 = vld [vmem:[%s5855_s16 + $0x60] sm:$0xff]  }
 0x124   : > { %4963 = vmatprep.mubr.msk.bf16.mxu0 %vm5750_vm0, %v5749_v1  ;;  %v3474_v61 = vshll.u32 %v5722_v57, 16 }
 0x125   : > { %v1240_v0 = vrot.slane %v1238_v62, 1 }
 0x12a   : > { %4688 = vmatmul.mubr.msk.bf16.gmra.mrb[20].mxu1 %vm434_vm1, %v1169_v2  ;;  %v1241_v2 = vsel %vm1117_vm2, %v1236_v63, %v1240_v0  ;;  %v3476_v63 = vrot.slane %v3474_v61, 1  ;;  %v5724_v0 = vld [vmem:[%s5820_s8 + $0x40] sm:$0xff]  }
 0x12b   : > { %4964 = vmatmul.mubr.msk.bf16.gmra.mrb[48].mxu0 %vm434_vm1, %v5674_v3  ;;  %4691 = vmatprep.mubr.msk.bf16.mxu1 %vm5750_vm0, %v5749_v1  ;;  %v5693_v3 = vld [vmem:[%s5877_s19 + $0x38] sm:$0xff]  }
 0x12c   : > { %4967 = vmatprep.mubr.msk.bf16.mxu0 %vm5750_vm0, %v5749_v1 }
 0x132   : > { %4692 = vmatmul.mubr.msk.bf16.gmra.mrb[24].mxu1 %vm434_vm1, %v1177_v9  ;;  %v5698_v9 = vld [vmem:[%s5855_s16 + $0x10] sm:$0xff]  }
 0x133   : > { %4968 = vmatmul.mubr.msk.bf16.gmra.mrb[52].mxu0 %vm434_vm1, %v5676_v10  ;;  %4695 = vmatprep.mubr.msk.bf16.mxu1 %vm5750_vm0, %v5749_v1  ;;  %v5699_v10 = vld [vmem:[%s5877_s19 + $0x50] sm:$0xff]  }
 0x134   : > { %4971 = vmatprep.mubr.msk.bf16.mxu0 %vm5750_vm0, %v5749_v1 }
 0x13a   : > { %4696 = vmatmul.mubr.msk.bf16.gmra.mrb[28].mxu1 %vm434_vm1, %v1185_v16  ;;  %v5705_v16 = vld [vmem:[%s5877_s19 + $0x68] sm:$0xff]  }
 0x13b   : > { %4972 = vmatmul.mubr.msk.bf16.gmra.mrb[56].mxu0 %vm434_vm1, %v5678_v17  ;;  %4699 = vmatprep.mubr.msk.bf16.mxu1 %vm5750_vm0, %v5749_v1  ;;  %v5706_v17 = vld [vmem:[%s5855_s16 + $0x30] sm:$0xff]  }
 0x13c   : > { %4977 = vmatprep.mubr.msk.bf16.mxu0 %vm5750_vm0, %v5749_v1 }
 0x142   : > { %4700 = vmatmul.mubr.msk.bf16.gmra.mrb[32].mxu1 %vm434_vm1, %v1193_v23  ;;  %v5709_v23 = vld [vmem:[%s5877_s19 + $0x78] sm:$0xff]  }
 0x143   : > { %4978 = vmatmul.mubr.msk.bf16.vlgmr.msra.gmra.mrb[0].mxu0 %vm434_vm1, %v5680_v24  ;;  %4703 = vmatprep.mubr.msk.bf16.mxu1 %vm5750_vm0, %v5749_v1  ;;  %v3427_v24 = vshrl.u32 %v5711_v19, 16 }
 0x144   : > { %5038 = vmatpush3.bf16.msra.mxu0 %v5681_v27  ;;  %4981 = vmatprep.mubr.msk.bf16.mxu0 %vm5750_vm0, %v5749_v1 }
 0x145   : > { %v3432_v27 = vor.u32 %v3431_v25, %v3427_v24 }
 0x14a   : > { %4704 = vmatmul.mubr.msk.bf16.gmra.mrb[36].mxu1 %vm434_vm1, %v1201_v31  ;;  %v3437_v31 = vsel %vm1117_vm2, %v3432_v27, %v3436_v28 }
 0x14b   : > { %4982 = vmatmul.mubr.msk.bf16.gmra.mrb[4].mxu0 %vm434_vm1, %v5683_v32  ;;  %4707 = vmatprep.mubr.msk.bf16.mxu1 %vm5750_vm0, %v5749_v1  ;;  %v3438_v32 = vshrl.u32 %v5712_v20, 16 }
 0x14c   : > { %4985 = vmatprep.mubr.msk.bf16.mxu0 %vm5750_vm0, %v5749_v1 }
 0x14d   : > { %v3440_v34 = vor.u32 %v3438_v32, %v3436_v28 }
 0x152   : > { %4708 = vmatmul.mubr.msk.bf16.gmra.mrb[40].mxu1 %vm434_vm1, %v1209_v38  ;;  %v3445_v38 = vsel %vm1117_vm2, %v3440_v34, %v3444_v35 }
 0x153   : > { %4986 = vmatmul.mubr.msk.bf16.gmra.mrb[8].mxu0 %vm434_vm1, %v5685_v39  ;;  %4711 = vmatprep.mubr.msk.bf16.mxu1 %vm5750_vm0, %v5749_v1  ;;  %v3446_v39 = vshrl.u32 %v5714_v29, 16  ;;  %v5732_v29 = vld [vmem:[%s5820_s8 + $0x60] sm:$0xff]  }
 0x154   : > { %4989 = vmatprep.mubr.msk.bf16.mxu0 %vm5750_vm0, %v5749_v1  ;;  %v3514_v33 = vshll.u32 %v5732_v29, 16 }
 0x155   : > { %v3448_v41 = vor.u32 %v3446_v39, %v3444_v35  ;;  %v3518_v39 = vshrl.u32 %v5732_v29, 16 }
 0x156   : > { %v3516_v35 = vrot.slane %v3514_v33, 1  ;;  %v6470_v33 = vld [vmem:[%s6584_s5] ss:$0 sm:$0xff] }
 0x15a   : > { %4712 = vmatmul.mubr.msk.bf16.gmra.mrb[44].mxu1 %vm434_vm1, %v1217_v45  ;;  %v3453_v45 = vsel %vm1117_vm2, %v3448_v41, %v3452_v42  ;;  %v3520_v41 = vor.u32 %v3518_v39, %v3516_v35 }
 0x15b   : > { %4990 = vmatmul.mubr.msk.bf16.gmra.mrb[12].mxu0 %vm434_vm1, %v5687_v46  ;;  %4715 = vmatprep.mubr.msk.bf16.mxu1 %vm5750_vm0, %v5749_v1  ;;  %v3454_v46 = vshrl.u32 %v5716_v36, 16  ;;  %v5734_v36 = vld [vmem:[%s5820_s8 + $0x68] sm:$0xff]  }
 0x15c   : > { %4993 = vmatprep.mubr.msk.bf16.mxu0 %vm5750_vm0, %v5749_v1  ;;  %v3522_v40 = vshll.u32 %v5734_v36, 16 }
 0x15d   : > { %v3456_v48 = vor.u32 %v3454_v46, %v3452_v42  ;;  %v3526_v46 = vshrl.u32 %v5734_v36, 16 }
 0x15e   : > { %v3524_v42 = vrot.slane %v3522_v40, 1 }
 0x162   : > { %4716 = vmatmul.mubr.msk.bf16.gmra.mrb[48].mxu1 %vm434_vm1, %v1225_v52  ;;  %v3461_v52 = vsel %vm1117_vm2, %v3456_v48, %v3460_v49  ;;  %v3528_v48 = vor.u32 %v3526_v46, %v3524_v42 }
 0x163   : > { %4994 = vmatmul.mubr.msk.bf16.gmra.mrb[16].mxu0 %vm434_vm1, %v5689_v53  ;;  %4719 = vmatprep.mubr.msk.bf16.mxu1 %vm5750_vm0, %v5749_v1  ;;  %v3462_v53 = vshrl.u32 %v5718_v43, 16  ;;  %v5736_v43 = vld [vmem:[%s5820_s8 + $0x70] sm:$0xff]  }
 0x164   : > { %4997 = vmatprep.mubr.msk.bf16.mxu0 %vm5750_vm0, %v5749_v1  ;;  %v3530_v47 = vshll.u32 %v5736_v43, 16 }
 0x165   : > { %v3464_v55 = vor.u32 %v3462_v53, %v3460_v49  ;;  %v3534_v53 = vshrl.u32 %v5736_v43, 16 }
 0x166   : > { %v3532_v49 = vrot.slane %v3530_v47, 1 }
 0x16a   : > { %4720 = vmatmul.mubr.msk.bf16.gmra.mrb[52].mxu1 %vm434_vm1, %v1233_v59  ;;  %v3469_v59 = vsel %vm1117_vm2, %v3464_v55, %v3468_v56  ;;  %v3536_v55 = vor.u32 %v3534_v53, %v3532_v49 }
 0x16b   : > { %4998 = vmatmul.mubr.msk.bf16.gmra.mrb[20].mxu0 %vm434_vm1, %v5691_v60  ;;  %4723 = vmatprep.mubr.msk.bf16.mxu1 %vm5750_vm0, %v5749_v1  ;;  %v3470_v60 = vshrl.u32 %v5720_v50, 16  ;;  %v5738_v50 = vld [vmem:[%s5820_s8 + $0x78] sm:$0xff]  }
 0x16c   : > { %5001 = vmatprep.mubr.msk.bf16.mxu0 %vm5750_vm0, %v5749_v1  ;;  %v3538_v54 = vshll.u32 %v5738_v50, 16 }
 0x16d   : > { %v3472_v62 = vor.u32 %v3470_v60, %v3468_v56  ;;  %v3542_v60 = vshrl.u32 %v5738_v50, 16 }
 0x16e   : > { %v3540_v56 = vrot.slane %v3538_v54, 1 }
 0x172   : > { %4724 = vmatmul.mubr.msk.bf16.gmra.mrb[56].mxu1 %vm434_vm1, %v1241_v2  ;;  %v5721_v2 = vld [vmem:[%s5855_s16 + $0x68] sm:$0xff]  }
 0x173   : > { %5002 = vmatmul.mubr.msk.bf16.gmra.mrb[24].mxu0 %vm434_vm1, %v5693_v3  ;;  %4729 = vmatprep.mubr.msk.bf16.mxu1 %vm5750_vm0, %v5749_v1  ;;  %v3477_v3 = vsel %vm1117_vm2, %v3472_v62, %v3476_v63  ;;  %v3544_v62 = vor.u32 %v3542_v60, %v3540_v56 }
 0x174   : > { %5005 = vmatprep.mubr.msk.bf16.mxu0 %vm5750_vm0, %v5749_v1 }
 0x17a   : > { %4730 = vmatmul.mubr.msk.bf16.vlgmr.msra.gmra.mrb[0].mxu1 %vm434_vm1, %v5694_v4  ;;  %v3478_v4 = vshrl.u32 %v5722_v57, 16  ;;  %v5739_v57 = vld [vmem:[%s5820_s8 + $0x80] ss:$0 sps:$4 sm:$0x11]  }
 0x17b   : > { %5006 = vmatmul.mubr.msk.bf16.gmra.mrb[28].mxu0 %vm434_vm1, %v5695_v5  ;;  %5100 = vmatpush3.bf16.msra.mxu1 %v5740_v6  ;;  %v3482_v5 = vshll.u32 %v5724_v0, 16  ;;  %v3546_v61 = vshll.u32 %v5739_v57, 16 }
 0x17c   : > { %4733 = vmatprep.mubr.msk.bf16.mxu1 %vm5750_vm0, %v5749_v1  ;;  %5009 = vmatprep.mubr.msk.bf16.mxu0 %vm5750_vm0, %v5749_v1  ;;  %v3480_v6 = vor.u32 %v3478_v4, %v3476_v63 }
 0x17d   : > { %v3548_v63 = vrot.slane %v3546_v61, 1 }
 0x182   : > { %4734 = vmatmul.mubr.msk.bf16.gmra.mrb[4].mxu1 %vm434_vm1, %v5696_v7  ;;  %v3484_v7 = vrot.slane %v3482_v5, 1 }
 0x183   : > { %5010 = vmatmul.mubr.msk.bf16.gmra.mrb[32].mxu0 %vm434_vm1, %v5697_v8  ;;  %4737 = vmatprep.mubr.msk.bf16.mxu1 %vm5750_vm0, %v5749_v1  ;;  %v5726_v8 = vld [vmem:[%s5820_s8 + $0x48] sm:$0xff]  }
 0x184   : > { %5013 = vmatprep.mubr.msk.bf16.mxu0 %vm5750_vm0, %v5749_v1 }
 0x18a   : > { %4738 = vmatmul.mubr.msk.bf16.gmra.mrb[8].mxu1 %vm434_vm1, %v5698_v9  ;;  %v5723_v9 = vld [vmem:[%s5855_s16 + $0x70] sm:$0xff]  }
 0x18b   : > { %5014 = vmatmul.mubr.msk.bf16.gmra.mrb[36].mxu0 %vm434_vm1, %v5699_v10  ;;  %4741 = vmatprep.mubr.msk.bf16.mxu1 %vm5750_vm0, %v5749_v1  ;;  %v3485_v10 = vsel %vm1117_vm2, %v3480_v6, %v3484_v7 }
 0x18c   : > { %5017 = vmatprep.mubr.msk.bf16.mxu0 %vm5750_vm0, %v5749_v1 }
 0x192   : > { %4742 = vmatmul.mubr.msk.bf16.gmra.mrb[12].mxu1 %vm434_vm1, %v5700_v11  ;;  %v3486_v11 = vshrl.u32 %v5724_v0, 16  ;;  %v3549_v0 = vsel %vm1117_vm2, %v3544_v62, %v3548_v63 }
 0x193   : > { %5018 = vmatmul.mubr.msk.bf16.gmra.mrb[40].mxu0 %vm434_vm1, %v5701_v12  ;;  %4745 = vmatprep.mubr.msk.bf16.mxu1 %vm5750_vm0, %v5749_v1  ;;  %v3490_v12 = vshll.u32 %v5726_v8, 16 }
 0x194   : > { %5021 = vmatprep.mubr.msk.bf16.mxu0 %vm5750_vm0, %v5749_v1 }
 0x19a   : > { %4746 = vmatmul.mubr.msk.bf16.gmra.mrb[16].mxu1 %vm434_vm1, %v5702_v13  ;;  %v3488_v13 = vor.u32 %v3486_v11, %v3484_v7 }
 0x19b   : > { %5022 = vmatmul.mubr.msk.bf16.gmra.mrb[44].mxu0 %vm434_vm1, %v5703_v14  ;;  %4749 = vmatprep.mubr.msk.bf16.mxu1 %vm5750_vm0, %v5749_v1  ;;  %v3492_v14 = vrot.slane %v3490_v12, 1 }
 0x19c   : > { %5025 = vmatprep.mubr.msk.bf16.mxu0 %vm5750_vm0, %v5749_v1 }
 0x1a2   : > { %4750 = vmatmul.mubr.msk.bf16.gmra.mrb[20].mxu1 %vm434_vm1, %v5704_v15  ;;  %v5728_v15 = vld [vmem:[%s5820_s8 + $0x50] sm:$0xff]  }
 0x1a3   : > { %5026 = vmatmul.mubr.msk.bf16.gmra.mrb[48].mxu0 %vm434_vm1, %v5705_v16  ;;  %4753 = vmatprep.mubr.msk.bf16.mxu1 %vm5750_vm0, %v5749_v1  ;;  %v5725_v16 = vld [vmem:[%s5826_s11 + $0x40] sm:$0xff]   ;;  %v3498_v19 = vshll.u32 %v5728_v15, 16  ;;  %v3502_v25 = vshrl.u32 %v5728_v15, 16 }
 0x1a4   : > { %5029 = vmatprep.mubr.msk.bf16.mxu0 %vm5750_vm0, %v5749_v1 }
 0x1a5   : > { %v3500_v21 = vrot.slane %v3498_v19, 1 }
 0x1a7   : > { %v3504_v27 = vor.u32 %v3502_v25, %v3500_v21 }
 0x1aa   : > { %4754 = vmatmul.mubr.msk.bf16.gmra.mrb[24].mxu1 %vm434_vm1, %v5706_v17  ;;  %v3493_v17 = vsel %vm1117_vm2, %v3488_v13, %v3492_v14 }
 0x1ab   : > { %5030 = vmatmul.mubr.msk.bf16.gmra.mrb[52].mxu0 %vm434_vm1, %v5707_v18  ;;  %4757 = vmatprep.mubr.msk.bf16.mxu1 %vm5750_vm0, %v5749_v1  ;;  %v3494_v18 = vshrl.u32 %v5726_v8, 16 }
 0x1ac   : > { %5033 = vmatprep.mubr.msk.bf16.mxu0 %vm5750_vm0, %v5749_v1 }
 0x1ad   : > { %v3496_v20 = vor.u32 %v3494_v18, %v3492_v14 }
 0x1af   : > { %v3501_v24 = vsel %vm1117_vm2, %v3496_v20, %v3500_v21 }
 0x1b2   : > { %4758 = vmatmul.mubr.msk.bf16.gmra.mrb[28].mxu1 %vm434_vm1, %v5708_v22  ;;  %v5730_v22 = vld [vmem:[%s5820_s8 + $0x58] sm:$0xff]  }
 0x1b3   : > { %5034 = vmatmul.mubr.msk.bf16.gmra.mrb[56].mxu0 %vm434_vm1, %v5709_v23  ;;  %4761 = vmatprep.mubr.msk.bf16.mxu1 %vm5750_vm0, %v5749_v1  ;;  %v5727_v23 = vld [vmem:[%s5826_s11 + $0x48] sm:$0xff]   ;;  %v3506_v26 = vshll.u32 %v5730_v22, 16  ;;  %v3510_v32 = vshrl.u32 %v5730_v22, 16 }
 0x1b4   : > { %5039 = vmatprep.mubr.msk.bf16.mxu0 %vm5750_vm0, %v5749_v1 }
 0x1b5   : > { %v3508_v28 = vrot.slane %v3506_v26, 1 }
 0x1b7   : > { %v3512_v34 = vor.u32 %v3510_v32, %v3508_v28 }
 0x1ba   : > { %4762 = vmatmul.mubr.msk.bf16.gmra.mrb[32].mxu1 %vm434_vm1, %v5710_v30  ;;  %v5729_v30 = vld [vmem:[%s5826_s11 + $0x50] sm:$0xff]  }
 0x1bb   : > { %5040 = vmatmul.mubr.msk.bf16.vlgmr.msra.gmra.mrb[0].mxu0 %vm434_vm1, %v3437_v31  ;;  %4765 = vmatprep.mubr.msk.bf16.mxu1 %vm5750_vm0, %v5749_v1  ;;  %v3509_v31 = vsel %vm1117_vm2, %v3504_v27, %v3508_v28 }
 0x1bc   : > { %5043 = vmatprep.mubr.msk.bf16.mxu0 %vm5750_vm0, %v5749_v1 }
 0x1c2   : > { %4766 = vmatmul.mubr.msk.bf16.gmra.mrb[36].mxu1 %vm434_vm1, %v5713_v37  ;;  %v5731_v37 = vld [vmem:[%s5826_s11 + $0x58] sm:$0xff]  }
 0x1c3   : > { %5044 = vmatmul.mubr.msk.bf16.gmra.mrb[4].mxu0 %vm434_vm1, %v3445_v38  ;;  %4769 = vmatprep.mubr.msk.bf16.mxu1 %vm5750_vm0, %v5749_v1  ;;  %v3517_v38 = vsel %vm1117_vm2, %v3512_v34, %v3516_v35 }
 0x1c4   : > { %5047 = vmatprep.mubr.msk.bf16.mxu0 %vm5750_vm0, %v5749_v1 }
 0x1ca   : > { %4770 = vmatmul.mubr.msk.bf16.gmra.mrb[40].mxu1 %vm434_vm1, %v5715_v44  ;;  %v5733_v44 = vld [vmem:[%s5826_s11 + $0x60] sm:$0xff]  }
 0x1cb   : > { %5048 = vmatmul.mubr.msk.bf16.gmra.mrb[8].mxu0 %vm434_vm1, %v3453_v45  ;;  %4773 = vmatprep.mubr.msk.bf16.mxu1 %vm5750_vm0, %v5749_v1  ;;  %v3525_v45 = vsel %vm1117_vm2, %v3520_v41, %v3524_v42 }
 0x1cc   : > { %5051 = vmatprep.mubr.msk.bf16.mxu0 %vm5750_vm0, %v5749_v1 }
 0x1d2   : > { %4774 = vmatmul.mubr.msk.bf16.gmra.mrb[44].mxu1 %vm434_vm1, %v5717_v51  ;;  %v5735_v51 = vld [vmem:[%s5826_s11 + $0x68] sm:$0xff]  }
 0x1d3   : > { %5052 = vmatmul.mubr.msk.bf16.gmra.mrb[12].mxu0 %vm434_vm1, %v3461_v52  ;;  %4777 = vmatprep.mubr.msk.bf16.mxu1 %vm5750_vm0, %v5749_v1  ;;  %v3533_v52 = vsel %vm1117_vm2, %v3528_v48, %v3532_v49 }
 0x1d4   : > { %5055 = vmatprep.mubr.msk.bf16.mxu0 %vm5750_vm0, %v5749_v1 }
 0x1da   : > { %4778 = vmatmul.mubr.msk.bf16.gmra.mrb[48].mxu1 %vm434_vm1, %v5719_v58  ;;  %v5737_v58 = vld [vmem:[%s5826_s11 + $0x70] sm:$0xff]  }
 0x1db   : > { %5056 = vmatmul.mubr.msk.bf16.gmra.mrb[16].mxu0 %vm434_vm1, %v3469_v59  ;;  %4781 = vmatprep.mubr.msk.bf16.mxu1 %vm5750_vm0, %v5749_v1  ;;  %v3541_v59 = vsel %vm1117_vm2, %v3536_v55, %v3540_v56 }
 0x1dc   : > { %5059 = vmatprep.mubr.msk.bf16.mxu0 %vm5750_vm0, %v5749_v1 }
 0x1e2   : > { %4782 = vmatmul.mubr.msk.bf16.gmra.mrb[52].mxu1 %vm434_vm1, %v5721_v2 }
 0x1e3   : > { %5060 = vmatmul.mubr.msk.bf16.gmra.mrb[20].mxu0 %vm434_vm1, %v3477_v3  ;;  %4785 = vmatprep.mubr.msk.bf16.mxu1 %vm5750_vm0, %v5749_v1 }
 0x1e4   : > { %5063 = vmatprep.mubr.msk.bf16.mxu0 %vm5750_vm0, %v5749_v1 }
 0x1ea   : > { %4786 = vmatmul.mubr.msk.bf16.gmra.mrb[56].mxu1 %vm434_vm1, %v5723_v9 }
 0x1eb   : > { %5064 = vmatmul.mubr.msk.bf16.gmra.mrb[24].mxu0 %vm434_vm1, %v3485_v10  ;;  %4823 = vmatprep.mubr.msk.bf16.mxu1 %vm5750_vm0, %v5749_v1 }
 0x1ec   : > { %5067 = vmatprep.mubr.msk.bf16.mxu0 %vm5750_vm0, %v5749_v1 }
 0x1f2   : > { %4824 = vmatmul.mubr.msk.bf16.vlgmr.msra.gmra.mrb[32].mxu1 %vm434_vm1, %v5725_v16 }
 0x1f3   : > { %5068 = vmatmul.mubr.msk.bf16.gmra.mrb[28].mxu0 %vm434_vm1, %v3493_v17  ;;  %4827 = vmatprep.mubr.msk.bf16.mxu1 %vm5750_vm0, %v5749_v1 }
 0x1f4   : > { %5071 = vmatprep.mubr.msk.bf16.mxu0 %vm5750_vm0, %v5749_v1 }
 0x1fa   : > { %4828 = vmatmul.mubr.msk.bf16.gmra.mrb[36].mxu1 %vm434_vm1, %v5727_v23 }
 0x1fb   : > { %5072 = vmatmul.mubr.msk.bf16.gmra.mrb[32].mxu0 %vm434_vm1, %v3501_v24  ;;  %4831 = vmatprep.mubr.msk.bf16.mxu1 %vm5750_vm0, %v5749_v1 }
 0x1fc   : > { %5075 = vmatprep.mubr.msk.bf16.mxu0 %vm5750_vm0, %v5749_v1 }
 0x202   : > { %4832 = vmatmul.mubr.msk.bf16.gmra.mrb[40].mxu1 %vm434_vm1, %v5729_v30 }
 0x203   : > { %5076 = vmatmul.mubr.msk.bf16.gmra.mrb[36].mxu0 %vm434_vm1, %v3509_v31  ;;  %4835 = vmatprep.mubr.msk.bf16.mxu1 %vm5750_vm0, %v5749_v1 }
 0x204   : > { %5079 = vmatprep.mubr.msk.bf16.mxu0 %vm5750_vm0, %v5749_v1 }
 0x20a   : > { %4836 = vmatmul.mubr.msk.bf16.gmra.mrb[44].mxu1 %vm434_vm1, %v5731_v37 }
 0x20b   : > { %5080 = vmatmul.mubr.msk.bf16.gmra.mrb[40].mxu0 %vm434_vm1, %v3517_v38  ;;  %4839 = vmatprep.mubr.msk.bf16.mxu1 %vm5750_vm0, %v5749_v1 }
 0x20c   : > { %5083 = vmatprep.mubr.msk.bf16.mxu0 %vm5750_vm0, %v5749_v1 }
 0x212   : > { %4840 = vmatmul.mubr.msk.bf16.gmra.mrb[48].mxu1 %vm434_vm1, %v5733_v44 }
 0x213   : > { %5084 = vmatmul.mubr.msk.bf16.gmra.mrb[44].mxu0 %vm434_vm1, %v3525_v45  ;;  %4843 = vmatprep.mubr.msk.bf16.mxu1 %vm5750_vm0, %v5749_v1 }
 0x214   : > { %5087 = vmatprep.mubr.msk.bf16.mxu0 %vm5750_vm0, %v5749_v1 }
 0x21a   : > { %4844 = vmatmul.mubr.msk.bf16.gmra.mrb[52].mxu1 %vm434_vm1, %v5735_v51 }
 0x21b   : > { %5088 = vmatmul.mubr.msk.bf16.gmra.mrb[48].mxu0 %vm434_vm1, %v3533_v52  ;;  %4847 = vmatprep.mubr.msk.bf16.mxu1 %vm5750_vm0, %v5749_v1 }
 0x21c   : > { %5091 = vmatprep.mubr.msk.bf16.mxu0 %vm5750_vm0, %v5749_v1 }
 0x222   : > { %4848 = vmatmul.mubr.msk.bf16.gmra.mrb[56].mxu1 %vm434_vm1, %v5737_v58 }
 0x223   : > { %5092 = vmatmul.mubr.msk.bf16.gmra.mrb[52].mxu0 %vm434_vm1, %v3541_v59 }
 0x224   : > { %5095 = vmatprep.mubr.msk.bf16.mxu0 %vm5750_vm0, %v5749_v1 }
 0x22b   : > { %5096 = vmatmul.mubr.msk.bf16.gmra.mrb[56].mxu0 %vm434_vm1, %v3549_v0 }
 0x24d   : > { %v1669_v2 = vpop.f32.mrb[0].mxu1 }
 0x24e   : > { %v4731_v3 = vpop.f32.mrb[1].mxu1  ;;  %v5101_v34 = vadd.f32 %v6470_v33, %v1669_v2 }
 0x24f   : > { %v1672_v4 = vpop.f32.mrb[2].mxu1 }
 0x250   : > { %v4732_v5 = vpop.f32.mrb[3].mxu1  ;;  %v5103_v36 = vadd.f32 %v6470_v33, %v1672_v4 }
 0x255   : > { %v1677_v6 = vpop.f32.mrb[4].mxu1 }
 0x256   : > { %v4735_v7 = vpop.f32.mrb[5].mxu1  ;;  %v5105_v44 = vadd.f32 %v6470_v33, %v1677_v6 }
 0x257   : > { %v1680_v8 = vpop.f32.mrb[6].mxu1 }
 0x258   : > { %v4736_v9 = vpop.f32.mrb[7].mxu1  ;;  %v5107_v46 = vadd.f32 %v6470_v33, %v1680_v8 }
 0x25d   : > { %v1685_v10 = vpop.f32.mrb[8].mxu1 }
 0x25e   : > { %v4739_v11 = vpop.f32.mrb[9].mxu1  ;;  %v5109_v54 = vadd.f32 %v6470_v33, %v1685_v10 }
 0x25f   : > { %v1688_v12 = vpop.f32.mrb[10].mxu1 }
 0x260   : > { %v4740_v13 = vpop.f32.mrb[11].mxu1  ;;  %v5111_v56 = vadd.f32 %v6470_v33, %v1688_v12 }
 0x265   : > { %v1693_v14 = vpop.f32.mrb[12].mxu1 }
 0x266   : > { %v4743_v1 = vpop.f32.mrb[13].mxu1  ;;  %v5113_v0 = vadd.f32 %v6470_v33, %v1693_v14 }
 0x267   : > { %v1696_v15 = vpop.f32.mrb[14].mxu1 }
 0x268   : > { %v4744_v16 = vpop.f32.mrb[15].mxu1  ;;  %v5115_v3 = vadd.f32 %v6470_v33, %v1696_v15 }
 0x26d   : > { %v6451_v17 = vpop.f32.mrb[16].mxu1 }
 0x26e   : > { %v4747_v18 = vpop.f32.mrb[17].mxu1  ;;  %v5117_v11 = vadd.f32 %v6470_v33, %v6451_v17 }
 0x26f   : > { %v6453_v19 = vpop.f32.mrb[18].mxu1 }
 0x270   : > { %v4748_v20 = vpop.f32.mrb[19].mxu1  ;;  %v5119_v13 = vadd.f32 %v6470_v33, %v6453_v19 }
 0x275   : > { %v6455_v21 = vpop.f32.mrb[20].mxu1 }
 0x276   : > { %v4751_v22 = vpop.f32.mrb[21].mxu1  ;;  %v5121_v17 = vadd.f32 %v6470_v33, %v6455_v21 }
 0x277   : > { %v6457_v23 = vpop.f32.mrb[22].mxu1 }
 0x278   : > { %v4752_v24 = vpop.f32.mrb[23].mxu1  ;;  %v5123_v19 = vadd.f32 %v6470_v33, %v6457_v23 }
 0x27d   : > { %v6459_v25 = vpop.f32.mrb[24].mxu1 }
 0x27e   : > { %v4755_v26 = vpop.f32.mrb[25].mxu1  ;;  %v5125_v21 = vadd.f32 %v6470_v33, %v6459_v25 }
 0x27f   : > { %v6461_v27 = vpop.f32.mrb[26].mxu1 }
 0x280   : > { %v4756_v28 = vpop.f32.mrb[27].mxu1  ;;  %v5127_v23 = vadd.f32 %v6470_v33, %v6461_v27 }
 0x285   : > { %v6463_v29 = vpop.f32.mrb[28].mxu1 }
 0x286   : > { %v4759_v30 = vpop.f32.mrb[29].mxu1 }
 0x287   : > { %v6465_v31 = vpop.f32.mrb[30].mxu1 }
 0x288   : > { %v4760_v32 = vpop.f32.mrb[31].mxu1  ;;  %v5131_v27 = vadd.f32 %v6470_v33, %v6465_v31 }
 0x28e   : > { %v3635_v35 = vpop.f32.mrb[0].mxu0 }
 0x28f   : > { %v5102_v37 = vadd.f32 %v5101_v34, %v3635_v35  ;;  %v5041_v38 = vpop.f32.mrb[1].mxu0 }
 0x290   : > { %v3638_v39 = vpop.f32.mrb[2].mxu0 }
 0x291   : > { %v4367_v40 = vpack.c.bf16 %v5102_v37, %v5102_v37  ;;  %v5104_v41 = vadd.f32 %v5103_v36, %v3638_v39  ;;  %v5042_v42 = vpop.f32.mrb[3].mxu0 }
 0x293   : > { %3905 = vst.msk [vmem:[%s6478_s15] sm:$0xf] %vm3904_vm3, %v4367_v40  ;;  %v4368_v43 = vpack.c.bf16 %v5104_v41, %v5104_v41 }
 0x295   : > { %3906 = vst.msk [vmem:[%s6478_s15 + $0x4] sm:$0xf] %vm3904_vm3, %v4368_v43 }
 0x296   : > { %v3643_v45 = vpop.f32.mrb[4].mxu0 }
 0x297   : > { %v5106_v47 = vadd.f32 %v5105_v44, %v3643_v45  ;;  %v5045_v48 = vpop.f32.mrb[5].mxu0  ;;  %v5129_v45 = vadd.f32 %v6470_v33, %v6463_v29 }
 0x298   : > { %v3646_v49 = vpop.f32.mrb[6].mxu0 }
 0x299   : > { %v4369_v50 = vpack.c.bf16 %v5106_v47, %v5106_v47  ;;  %v5108_v51 = vadd.f32 %v5107_v46, %v3646_v49  ;;  %v5046_v52 = vpop.f32.mrb[7].mxu0 }
 0x29b   : > { %3907 = vst.msk [vmem:[%s6478_s15 + $0x8] sm:$0xf] %vm3904_vm3, %v4369_v50  ;;  %v4370_v53 = vpack.c.bf16 %v5108_v51, %v5108_v51 }
 0x29d   : > { %3908 = vst.msk [vmem:[%s6478_s15 + $0xc] sm:$0xf] %vm3904_vm3, %v4370_v53 }
 0x29e   : > { %v3651_v55 = vpop.f32.mrb[8].mxu0 }
 0x29f   : > { %v5110_v57 = vadd.f32 %v5109_v54, %v3651_v55  ;;  %v5049_v58 = vpop.f32.mrb[9].mxu0 }
 0x2a0   : > { %v3654_v59 = vpop.f32.mrb[10].mxu0 }
 0x2a1   : > { %v4371_v60 = vpack.c.bf16 %v5110_v57, %v5110_v57  ;;  %v5112_v61 = vadd.f32 %v5111_v56, %v3654_v59  ;;  %v5050_v62 = vpop.f32.mrb[11].mxu0 }
 0x2a3   : > { %3909 = vst.msk [vmem:[%s6478_s15 + $0x10] sm:$0xf] %vm3904_vm3, %v4371_v60  ;;  %v4372_v63 = vpack.c.bf16 %v5112_v61, %v5112_v61 }
 0x2a5   : > { %3910 = vst.msk [vmem:[%s6478_s15 + $0x14] sm:$0xf] %vm3904_vm3, %v4372_v63 }
 0x2a6   : > { %v3659_v2 = vpop.f32.mrb[12].mxu0 }
 0x2a7   : > { %v5114_v4 = vadd.f32 %v5113_v0, %v3659_v2  ;;  %v5053_v5 = vpop.f32.mrb[13].mxu0 }
 0x2a8   : > { %v3662_v6 = vpop.f32.mrb[14].mxu0 }
 0x2a9   : > { %v4373_v7 = vpack.c.bf16 %v5114_v4, %v5114_v4  ;;  %v5116_v8 = vadd.f32 %v5115_v3, %v3662_v6  ;;  %v5054_v9 = vpop.f32.mrb[15].mxu0 }
 0x2ab   : > { %3911 = vst.msk [vmem:[%s6478_s15 + $0x18] sm:$0xf] %vm3904_vm3, %v4373_v7  ;;  %v4374_v10 = vpack.c.bf16 %v5116_v8, %v5116_v8 }
 0x2ad   : > { %3912 = vst.msk [vmem:[%s6478_s15 + $0x1c] sm:$0xf] %vm3904_vm3, %v4374_v10 }
 0x2ae   : > { %v3667_v12 = vpop.f32.mrb[16].mxu0 }
 0x2af   : > { %v5118_v14 = vadd.f32 %v5117_v11, %v3667_v12  ;;  %v5057_v1 = vpop.f32.mrb[17].mxu0 }
 0x2b0   : > { %v3670_v15 = vpop.f32.mrb[18].mxu0 }
 0x2b1   : > { %v4375_v16 = vpack.c.bf16 %v5118_v14, %v5118_v14  ;;  %v5120_v18 = vadd.f32 %v5119_v13, %v3670_v15  ;;  %v5058_v20 = vpop.f32.mrb[19].mxu0 }
 0x2b3   : > { %3913 = vst.msk [vmem:[%s6478_s15 + $0x20] sm:$0xf] %vm3904_vm3, %v4375_v16  ;;  %v4376_v22 = vpack.c.bf16 %v5120_v18, %v5120_v18 }
 0x2b5   : > { %3914 = vst.msk [vmem:[%s6478_s15 + $0x24] sm:$0xf] %vm3904_vm3, %v4376_v22 }
 0x2b6   : > { %v3675_v24 = vpop.f32.mrb[20].mxu0 }
 0x2b7   : > { %v5122_v26 = vadd.f32 %v5121_v17, %v3675_v24  ;;  %v5061_v28 = vpop.f32.mrb[21].mxu0 }
 0x2b8   : > { %v3678_v30 = vpop.f32.mrb[22].mxu0 }
 0x2b9   : > { %v4377_v32 = vpack.c.bf16 %v5122_v26, %v5122_v26  ;;  %v5124_v34 = vadd.f32 %v5123_v19, %v3678_v30  ;;  %v5062_v35 = vpop.f32.mrb[23].mxu0 }
 0x2bb   : > { %3915 = vst.msk [vmem:[%s6478_s15 + $0x28] sm:$0xf] %vm3904_vm3, %v4377_v32  ;;  %v4378_v36 = vpack.c.bf16 %v5124_v34, %v5124_v34 }
 0x2bd   : > { %3916 = vst.msk [vmem:[%s6478_s15 + $0x2c] sm:$0xf] %vm3904_vm3, %v4378_v36 }
 0x2be   : > { %v3683_v37 = vpop.f32.mrb[24].mxu0 }
 0x2bf   : > { %v5126_v38 = vadd.f32 %v5125_v21, %v3683_v37  ;;  %v5065_v39 = vpop.f32.mrb[25].mxu0 }
 0x2c0   : > { %v3686_v40 = vpop.f32.mrb[26].mxu0 }
 0x2c1   : > { %v4379_v41 = vpack.c.bf16 %v5126_v38, %v5126_v38  ;;  %v5128_v42 = vadd.f32 %v5127_v23, %v3686_v40  ;;  %v5066_v43 = vpop.f32.mrb[27].mxu0 }
 0x2c3   : > { %3917 = vst.msk [vmem:[%s6478_s15 + $0x30] sm:$0xf] %vm3904_vm3, %v4379_v41  ;;  %v4380_v44 = vpack.c.bf16 %v5128_v42, %v5128_v42 }
 0x2c5   : > { %3918 = vst.msk [vmem:[%s6478_s15 + $0x34] sm:$0xf] %vm3904_vm3, %v4380_v44  ;;  %v2075_v25 = vpop.f32.mrb[32].mxu1 }
 0x2c6   : > { %v3691_v46 = vpop.f32.mrb[28].mxu0  ;;  %v4825_v47 = vpop.f32.mrb[33].mxu1  ;;  %v5133_v56 = vadd.f32 %v6470_v33, %v2075_v25 }
 0x2c7   : > { %v5130_v48 = vadd.f32 %v5129_v45, %v3691_v46  ;;  %v5069_v49 = vpop.f32.mrb[29].mxu0  ;;  %v2078_v50 = vpop.f32.mrb[34].mxu1 }
 0x2c8   : > { %v3694_v51 = vpop.f32.mrb[30].mxu0  ;;  %v4826_v52 = vpop.f32.mrb[35].mxu1  ;;  %v5135_v59 = vadd.f32 %v6470_v33, %v2078_v50 }
 0x2c9   : > { %v4381_v53 = vpack.c.bf16 %v5130_v48, %v5130_v48  ;;  %v5132_v54 = vadd.f32 %v5131_v27, %v3694_v51  ;;  %v5070_v55 = vpop.f32.mrb[31].mxu0 }
 0x2cb   : > { %3919 = vst.msk [vmem:[%s6478_s15 + $0x38] sm:$0xf] %vm3904_vm3, %v4381_v53  ;;  %v4382_v29 = vpack.c.bf16 %v5132_v54, %v5132_v54 }
 0x2cd   : > { %3920 = vst.msk [vmem:[%s6478_s15 + $0x3c] sm:$0xf] %vm3904_vm3, %v4382_v29  ;;  %v2083_v57 = vpop.f32.mrb[36].mxu1 }
 0x2ce   : > { %v3699_v58 = vpop.f32.mrb[32].mxu0  ;;  %v4829_v31 = vpop.f32.mrb[37].mxu1  ;;  %v5137_v6 = vadd.f32 %v6470_v33, %v2083_v57 }
 0x2cf   : > { %v5134_v60 = vadd.f32 %v5133_v56, %v3699_v58  ;;  %v5073_v61 = vpop.f32.mrb[33].mxu0  ;;  %v2086_v62 = vpop.f32.mrb[38].mxu1 }
 0x2d0   : > { %v3702_v63 = vpop.f32.mrb[34].mxu0  ;;  %v4830_v0 = vpop.f32.mrb[39].mxu1  ;;  %v5139_v10 = vadd.f32 %v6470_v33, %v2086_v62 }
 0x2d1   : > { %v4383_v2 = vpack.c.bf16 %v5134_v60, %v5134_v60  ;;  %v5136_v3 = vadd.f32 %v5135_v59, %v3702_v63  ;;  %v5074_v4 = vpop.f32.mrb[35].mxu0 }
 0x2d3   : > { %3921 = vst.msk [vmem:[%s6478_s15 + $0x40] sm:$0xf] %vm3904_vm3, %v4383_v2  ;;  %v4384_v5 = vpack.c.bf16 %v5136_v3, %v5136_v3 }
 0x2d5   : > { %3922 = vst.msk [vmem:[%s6478_s15 + $0x44] sm:$0xf] %vm3904_vm3, %v4384_v5  ;;  %v2091_v7 = vpop.f32.mrb[40].mxu1 }
 0x2d6   : > { %v3707_v8 = vpop.f32.mrb[36].mxu0  ;;  %v4833_v9 = vpop.f32.mrb[41].mxu1  ;;  %v5141_v22 = vadd.f32 %v6470_v33, %v2091_v7 }
 0x2d7   : > { %v5138_v11 = vadd.f32 %v5137_v6, %v3707_v8  ;;  %v5077_v12 = vpop.f32.mrb[37].mxu0  ;;  %v2094_v13 = vpop.f32.mrb[42].mxu1 }
 0x2d8   : > { %v3710_v14 = vpop.f32.mrb[38].mxu0  ;;  %v4834_v1 = vpop.f32.mrb[43].mxu1  ;;  %v5143_v26 = vadd.f32 %v6470_v33, %v2094_v13 }
 0x2d9   : > { %v4385_v15 = vpack.c.bf16 %v5138_v11, %v5138_v11  ;;  %v5140_v16 = vadd.f32 %v5139_v10, %v3710_v14  ;;  %v5078_v18 = vpop.f32.mrb[39].mxu0 }
 0x2db   : > { %3923 = vst.msk [vmem:[%s6478_s15 + $0x48] sm:$0xf] %vm3904_vm3, %v4385_v15  ;;  %v4386_v20 = vpack.c.bf16 %v5140_v16, %v5140_v16 }
 0x2dd   : > { %3924 = vst.msk [vmem:[%s6478_s15 + $0x4c] sm:$0xf] %vm3904_vm3, %v4386_v20  ;;  %v2099_v17 = vpop.f32.mrb[44].mxu1 }
 0x2de   : > { %v3715_v24 = vpop.f32.mrb[40].mxu0  ;;  %v4837_v19 = vpop.f32.mrb[45].mxu1  ;;  %v5145_v38 = vadd.f32 %v6470_v33, %v2099_v17 }
 0x2df   : > { %v5142_v28 = vadd.f32 %v5141_v22, %v3715_v24  ;;  %v5081_v30 = vpop.f32.mrb[41].mxu0  ;;  %v2102_v32 = vpop.f32.mrb[46].mxu1 }
 0x2e0   : > { %v3718_v34 = vpop.f32.mrb[42].mxu0  ;;  %v4838_v35 = vpop.f32.mrb[47].mxu1  ;;  %v5147_v42 = vadd.f32 %v6470_v33, %v2102_v32 }
 0x2e1   : > { %v4387_v36 = vpack.c.bf16 %v5142_v28, %v5142_v28  ;;  %v5144_v21 = vadd.f32 %v5143_v26, %v3718_v34  ;;  %v5082_v37 = vpop.f32.mrb[43].mxu0 }
 0x2e3   : > { %3925 = vst.msk [vmem:[%s6478_s15 + $0x50] sm:$0xf] %vm3904_vm3, %v4387_v36  ;;  %v4388_v23 = vpack.c.bf16 %v5144_v21, %v5144_v21 }
 0x2e5   : > { %3926 = vst.msk [vmem:[%s6478_s15 + $0x54] sm:$0xf] %vm3904_vm3, %v4388_v23  ;;  %v2107_v39 = vpop.f32.mrb[48].mxu1 }
 0x2e6   : > { %v3723_v40 = vpop.f32.mrb[44].mxu0  ;;  %v4841_v41 = vpop.f32.mrb[49].mxu1  ;;  %v5149_v50 = vadd.f32 %v6470_v33, %v2107_v39 }
 0x2e7   : > { %v5146_v43 = vadd.f32 %v5145_v38, %v3723_v40  ;;  %v5085_v44 = vpop.f32.mrb[45].mxu0  ;;  %v2110_v45 = vpop.f32.mrb[50].mxu1 }
 0x2e8   : > { %v3726_v25 = vpop.f32.mrb[46].mxu0  ;;  %v4842_v46 = vpop.f32.mrb[51].mxu1  ;;  %v5151_v54 = vadd.f32 %v6470_v33, %v2110_v45 }
 0x2e9   : > { %v4389_v47 = vpack.c.bf16 %v5146_v43, %v5146_v43  ;;  %v5148_v27 = vadd.f32 %v5147_v42, %v3726_v25  ;;  %v5086_v48 = vpop.f32.mrb[47].mxu0 }
 0x2eb   : > { %3927 = vst.msk [vmem:[%s6478_s15 + $0x58] sm:$0xf] %vm3904_vm3, %v4389_v47  ;;  %v4390_v49 = vpack.c.bf16 %v5148_v27, %v5148_v27 }
 0x2ed   : > { %3928 = vst.msk [vmem:[%s6478_s15 + $0x5c] sm:$0xf] %vm3904_vm3, %v4390_v49  ;;  %v2115_v51 = vpop.f32.mrb[52].mxu1 }
 0x2ee   : > { %v3731_v52 = vpop.f32.mrb[48].mxu0  ;;  %v4845_v53 = vpop.f32.mrb[53].mxu1  ;;  %v5153_v62 = vadd.f32 %v6470_v33, %v2115_v51 }
 0x2ef   : > { %v5150_v55 = vadd.f32 %v5149_v50, %v3731_v52  ;;  %v5089_v29 = vpop.f32.mrb[49].mxu0  ;;  %v2118_v56 = vpop.f32.mrb[54].mxu1 }
 0x2f0   : > { %v3734_v57 = vpop.f32.mrb[50].mxu0  ;;  %v4846_v58 = vpop.f32.mrb[55].mxu1  ;;  %v5155_v3 = vadd.f32 %v6470_v33, %v2118_v56 }
 0x2f1   : > { %v4391_v31 = vpack.c.bf16 %v5150_v55, %v5150_v55  ;;  %v5152_v59 = vadd.f32 %v5151_v54, %v3734_v57  ;;  %v5090_v60 = vpop.f32.mrb[51].mxu0 }
 0x2f3   : > { %3929 = vst.msk [vmem:[%s6478_s15 + $0x60] sm:$0xf] %vm3904_vm3, %v4391_v31  ;;  %v4392_v61 = vpack.c.bf16 %v5152_v59, %v5152_v59 }
 0x2f5   : > { %3930 = vst.msk [vmem:[%s6478_s15 + $0x64] sm:$0xf] %vm3904_vm3, %v4392_v61  ;;  %v2123_v63 = vpop.f32.mrb[56].mxu1 }
 0x2f6   : > { %v3739_v0 = vpop.f32.mrb[52].mxu0  ;;  %v4849_v2 = vpop.f32.mrb[57].mxu1  ;;  %v5157_v13 = vadd.f32 %v6470_v33, %v2123_v63 }
 0x2f7   : > { %v5154_v4 = vadd.f32 %v5153_v62, %v3739_v0  ;;  %v5093_v5 = vpop.f32.mrb[53].mxu0  ;;  %v2126_v6 = vpop.f32.mrb[58].mxu1 }
 0x2f8   : > { %v3742_v7 = vpop.f32.mrb[54].mxu0  ;;  %v4850_v8 = vpop.f32.mrb[59].mxu1  ;;  %v5159_v1 = vadd.f32 %v6470_v33, %v2126_v6 }
 0x2f9   : > { %v4393_v9 = vpack.c.bf16 %v5154_v4, %v5154_v4  ;;  %v5156_v10 = vadd.f32 %v5155_v3, %v3742_v7  ;;  %v5094_v11 = vpop.f32.mrb[55].mxu0 }
 0x2fb   : > { %3931 = vst.msk [vmem:[%s6478_s15 + $0x68] sm:$0xf] %vm3904_vm3, %v4393_v9  ;;  %v4394_v12 = vpack.c.bf16 %v5156_v10, %v5156_v10 }
 0x2fd   : > { %3932 = vst.msk [vmem:[%s6478_s15 + $0x6c] sm:$0xf] %vm3904_vm3, %v4394_v12 }
 0x2fe   : > { %v3747_v14 = vpop.f32.mrb[56].mxu0 }
 0x2ff   : > { %v5158_v15 = vadd.f32 %v5157_v13, %v3747_v14  ;;  %v5097_v16 = vpop.f32.mrb[57].mxu0 }
 0x300   : > { %v3750_v18 = vpop.f32.mrb[58].mxu0 }
 0x301   : > { %v4395_v20 = vpack.c.bf16 %v5158_v15, %v5158_v15  ;;  %v5160_v22 = vadd.f32 %v5159_v1, %v3750_v18  ;;  %v5098_v17 = vpop.f32.mrb[59].mxu0 }
 0x303   : > { %3933 = vst.msk [vmem:[%s6478_s15 + $0x70] sm:$0xf] %vm3904_vm3, %v4395_v20  ;;  %v4396_v24 = vpack.c.bf16 %v5160_v22, %v5160_v22 }
 0x305   : > { %3934 = vst.msk [vmem:[%s6478_s15 + $0x74] sm:$0xf] %vm3904_vm3, %v4396_v24 }
 0x306 PF: > { %s16_s21 = sadd.s32 1, %s5747_s21  }
 0x307   : > { %p13_p4 = scmp.ge.s32.totalorder %s16_s21, 4  }
 0x309   :  { %15 = sbr.rel (!%p13_p4) target bundleno = 1 (0x1), region = 91 }

// kernel: esa_forward.7
= control target key start
LH: loop header
LB: loop body
LE: loop exit
PB: predicated region body
PF: predicated region fallthrough
CT: control target
= control target key end

     0   :  { %s4310_s0 = inlined_call_operand.vmem [shape: s32[32], index: 0, kind: input, shape index: {}]   ;;  %s4311_s2 = inlined_call_operand.vmem [shape: f32[2,3,32,16], index: 2, kind: input, shape index: {}]   ;;  %s4312_s3 = inlined_call_operand.vmem [shape: f32[2,1024,16], index: 3, kind: input, shape index: {}]   ;;  %s4313_s4 = inlined_call_operand.vmem [shape: f32[2,1024,8], index: 4, kind: input, shape index: {}]   ;;  %s4314_s5 = inlined_call_operand.vmem [shape: f32[32,1], index: 5, kind: input, shape index: {}]   ;;  %s4315_s6 = inlined_call_operand.vmem [shape: f32[32,1], index: 6, kind: input, shape index: {}]   ;;  %s4316_s7 = inlined_call_operand.vmem [shape: bf16[16,8], index: 7, kind: input, shape index: {}]   ;;  %s4317_s8 = inlined_call_operand.vmem [shape: f32[1,8], index: 8, kind: input, shape index: {}]   ;;  %s4318_s9 = inlined_call_operand.vmem [shape: f32[2,1024,8], index: 9, kind: output, shape index: {}]   ;;  %s4319_s1 = inlined_call_operand.vmem [shape: s32[32], index: 1, kind: input, shape index: {}]  }
   0x1   :  { %4323 = sst [smem:[#allocation12_spill]] %s4311_s2  ;;  %s14_s11 = sshll.u32 %s4310_s0, 4  ;;  %s15_s11 = int_to_ptr.vmem [resolvable:$true] %s14_s11 }
   0x2   :  { %4324 = sst [smem:[#allocation13_spill]] %s4314_s5  ;;  %s18_s14 = sshll.u32 %s4319_s1, 4  ;;  %s19_s14 = int_to_ptr.vmem [resolvable:$true] %s18_s14 }
   0x3   :  { %4325 = sst [smem:[#allocation14_spill]] %s4315_s6  ;;  %s3051_s15 = scalar_lea.vmem %s15_s11, 16 }
   0x4   :  { %4326 = sst [smem:[#allocation15_spill]] %s4316_s7  ;;  %p3052_p0 = scmp.ne.s32.totalorder %s15_s11, %s3051_s15 }
   0x5   :  { %4327 = sst [smem:[#allocation16_spill]] %s4318_s9  ;;  %p3056_p1 = scmp.lt.s32.totalorder %s15_s11, %s15_s11 }
   0x6   :  { %p3057_p2 = scmp.lt.s32.totalorder %s3051_s15, %s3051_s15 }
   0x8   :  { %p3058_p3 = por %p3057_p2, %p3056_p1 }
   0xa   :  { %p3059_p4 = pnand %p3058_p3, %p3052_p0 }
   0xc   :  { %3062 = shalt.err (!%p3059_p4)  }
   0xd   :  { %s3117_s16 = smov [#allocation4]   ;;  %s3063_s17 = scalar_lea.vmem %s19_s14, 16 }
   0xe   :  { %17 = dma.vmem_to_smem %s15_s11, 16, %s3117_s16, [#allocation3] }
   0xf   :  { %p3064_p5 = scmp.ne.s32.totalorder %s19_s14, %s3063_s17  ;;  %p3068_p6 = scmp.lt.s32.totalorder %s19_s14, %s19_s14 }
  0x10   :  { %p3069_p7 = scmp.lt.s32.totalorder %s3063_s17, %s3063_s17 }
  0x12   :  { %p3070_p8 = por %p3069_p7, %p3068_p6 }
  0x14   :  { %p3071_p9 = pnand %p3070_p8, %p3064_p5 }
  0x16   :  { %3074 = shalt.err (!%p3071_p9)  }
  0x17   :  { %s3118_s0 = smov [#allocation5]  }
  0x18   :  { %21 = dma.vmem_to_smem %s19_s14, 16, %s3118_s0, [#allocation3] }
  0x19   :  { %3095 = dma.done.wait [#allocation3], 32 }
  0x1a   :  { %3096 = vsyncadd [#allocation3], 4294967264 }
  0x1b   :  { %23 = sfence }
  0x1c   :  { %s3175_s1 = smov 0   ;;  %s3177_s18 = smov 0  }
  0x1d   :  { %s3179_s19 = smov 0   ;;  %s3181_s20 = smov 0  }
  0x1e   :  { %s3183_s21 = smov 0  }
  0x1f LB: > { %4328 = sst [smem:[#allocation7_spill]] %s3107_s19  ;;  %s38_s22 = sadd.s32 1, %s3107_s19  ;;  %s3115_s21 = sphi %s3183_s21, %s29_s21   ;;  %s3111_s20 = sphi %s3181_s20, %s4343_s20   ;;  %s3107_s19 = sphi %s3179_s19, %s4342_s19   ;;  %s3103_s18 = sphi %s3177_s18, %s4341_s18   ;;  %s3099_s1 = sphi %s3175_s1, %s4340_s1  }
  0x20   : > { %4329 = sst [smem:[#allocation8_spill]] %s3111_s20  ;;  %s41_s23 = sadd.s32 1, %s3111_s20 }
  0x21   : > { %4330 = sst [smem:[#allocation9_spill]] %s3115_s21  ;;  %p39_p10 = scmp.ge.s32.totalorder %s38_s22, 2 }
  0x22   : > { %p2501_p11 = scmp.ge.s32.totalorder %s3115_s21, 1  ;;  %p319_p12 = scmp.lt.s32.totalorder %s3115_s21, 5 }
  0x23   : > { %s4345_s22 = smov (%p39_p10, %s38_s22), 0  ;;  %s4347_s23 = smov (!%p39_p10, %s41_s23), %s3111_s20 }
  0x24   : > { %4331 = sst [smem:[#allocation10_spill]] %s4345_s22  ;;  %p320_p13 = pnand %p2501_p11, %p319_p12 }
  0x25   : > { %p43_p0 = scmp.ge.s32.totalorder %s4347_s23, 2  ;;  %s2509_s24 = sshll.u32 (!%p320_p13), %s3099_s1, 1  ;;  %vm468_vm0 = vcmask (!%p320_p13), 130048   ;;  %vm2224_vm1 = vcmask (!%p320_p13), 64512  }
  0x26   : > { %323 = sbr.rel (%p320_p13) target bundleno = 505 (0x1f9), region = 48  ;;  %s4333_s7 = sld [smem:[#allocation15_spill]] (!%p320_p13) }
  0x27   : > { %s4349_s23 = smov (%p43_p0, %s4347_s23), 0  ;;  %p409_p1 = scmp.lt.s32.totalorder (!%p320_p13), %s2509_s24, 3 }
  0x28   : > { %4332 = sst [smem:[#allocation11_spill]] %s4349_s23  ;;  %s4334_s5 = sld [smem:[#allocation13_spill]] (!%p320_p13) }
  0x29   : > { %s4335_s6 = sld [smem:[#allocation14_spill]] (!%p320_p13)  ;;  %p383_p2 = scmp.lt.s32.totalorder (!%p320_p13), %s3103_s18, 1 }
  0x2a   : > { %s3246_s13 = sshll.u32 (!%p320_p13), %s3099_s1, 4  ;;  %s4336_s2 = sld [smem:[#allocation12_spill]] (!%p320_p13) }
  0x2b   : > { %s3255_s14 = sld [smem:[#allocation4 + %s3246_s13]] (!%p320_p13)  ;;  %s473_s17 = sadd.s32 (!%p320_p13), 1, %s3246_s13 }
  0x2c   : > { %v2793_v0 = vld [vmem:[%s4333_s7] sm:$0xff] (!%p320_p13)   ;;  %s3261_s16 = sld [smem:[#allocation5 + %s3246_s13]] (!%p320_p13)  ;;  %s514_s0 = sadd.s32 (!%p320_p13), 2, %s3246_s13 }
  0x2d   : > { %2618 = vmatprep.subr.bf16.mxu0 %v2793_v0  ;;  %2684 = vmatprep.subr.bf16.mxu1 %v2793_v0  ;;  %s4351_s24 = smov (!%p409_p1, %s2509_s24), 3  ;;  %s4353_s18 = smov (!%p383_p2, %s3103_s18), 1 }
  0x2e   : > { %2619 = vmatpush3.bf16.msra.mxu0 %v2793_v0  ;;  %2685 = vmatpush3.bf16.msra.mxu1 %v2793_v0  ;;  %s2510_s27 = sshll.u32 %s4351_s24, 3  ;;  %s2686_s15 = smul.u32 96, %s4353_s18 }
  0x2f   : > { %s3216_s30 = scalar_lea.vmem %s4334_s5, %s2510_s27  ;;  %s3221_s12 = scalar_lea.vmem %s4335_s6, %s2510_s27 }
  0x30   : > { %v434_v1 = vld [vmem:[%s3216_s30] sm:$0x1]  ;;  %v476_v3 = vld [vmem:[%s3216_s30 + $0x1] sm:$0x1]  ;;  %v517_v5 = vld [vmem:[%s3216_s30 + $0x2] sm:$0x1]  ;;  %s3272_s26 = scalar_lea.vmem %s4336_s2, %s2686_s15 }
  0x31   : > { %v435_v2 = vld [vmem:[%s3221_s12] sm:$0x1]  ;;  %2687 = vpush %v434_v1  ;;  %v477_v4 = vld [vmem:[%s3221_s12 + $0x1] sm:$0x1]  ;;  %v518_v6 = vld [vmem:[%s3221_s12 + $0x2] sm:$0x1] }
  0x32   : > { %2689 = vpush %v435_v2  ;;  %v558_v7 = vld [vmem:[%s3216_s30 + $0x3] sm:$0x1]  ;;  %v599_v9 = vld [vmem:[%s3216_s30 + $0x4] sm:$0x1]  ;;  %v640_v11 = vld [vmem:[%s3216_s30 + $0x5] sm:$0x1] }
  0x33   : > { %2691 = vpush %v476_v3  ;;  %v559_v8 = vld [vmem:[%s3221_s12 + $0x3] sm:$0x1]  ;;  %v600_v10 = vld [vmem:[%s3221_s12 + $0x4] sm:$0x1]  ;;  %v641_v12 = vld [vmem:[%s3221_s12 + $0x5] sm:$0x1] }
  0x34   : > { %2693 = vpush %v477_v4  ;;  %v681_v13 = vld [vmem:[%s3216_s30 + $0x6] sm:$0x1]  ;;  %v722_v15 = vld [vmem:[%s3216_s30 + $0x7] sm:$0x1]  ;;  %v763_v17 = vld [vmem:[%s3216_s30 + $0x8] sm:$0x1] }
  0x35   : > { %2695 = vpush %v517_v5  ;;  %v682_v14 = vld [vmem:[%s3221_s12 + $0x6] sm:$0x1]  ;;  %v723_v16 = vld [vmem:[%s3221_s12 + $0x7] sm:$0x1]  ;;  %v764_v18 = vld [vmem:[%s3221_s12 + $0x8] sm:$0x1] }
  0x36   : > { %2697 = vpush %v518_v6  ;;  %v804_v19 = vld [vmem:[%s3216_s30 + $0x9] sm:$0x1]  ;;  %v845_v21 = vld [vmem:[%s3216_s30 + $0xa] sm:$0x1]  ;;  %v886_v23 = vld [vmem:[%s3216_s30 + $0xb] sm:$0x1] }
  0x37   : > { %2699 = vpush %v558_v7  ;;  %v805_v20 = vld [vmem:[%s3221_s12 + $0x9] sm:$0x1]  ;;  %v846_v22 = vld [vmem:[%s3221_s12 + $0xa] sm:$0x1]  ;;  %v887_v24 = vld [vmem:[%s3221_s12 + $0xb] sm:$0x1] }
  0x38   : > { %2701 = vpush %v559_v8  ;;  %v927_v25 = vld [vmem:[%s3216_s30 + $0xc] sm:$0x1]  ;;  %v968_v27 = vld [vmem:[%s3216_s30 + $0xd] sm:$0x1]  ;;  %v1009_v29 = vld [vmem:[%s3216_s30 + $0xe] sm:$0x1] }
  0x39   : > { %2703 = vpush %v599_v9  ;;  %v928_v26 = vld [vmem:[%s3221_s12 + $0xc] sm:$0x1]  ;;  %v969_v28 = vld [vmem:[%s3221_s12 + $0xd] sm:$0x1]  ;;  %v1010_v30 = vld [vmem:[%s3221_s12 + $0xe] sm:$0x1] }
  0x3a   : > { %2705 = vpush %v600_v10  ;;  %s555_s27 = sadd.s32 3, %s3246_s13  ;;  %s474_s28 = sld [smem:[#allocation4 + %s473_s17]]  ;;  %v1050_v31 = vld [vmem:[%s3216_s30 + $0xf] sm:$0x1] }
  0x3b   : > { %2707 = vpush %v640_v11  ;;  %s475_s29 = sld [smem:[#allocation5 + %s473_s17]]  ;;  %s2517_s10 = sshll.u32 %s3255_s14, 5  ;;  %v1051_v32 = vld [vmem:[%s3221_s12 + $0xf] sm:$0x1] }
  0x3c   : > { %2709 = vpush %v641_v12  ;;  %s515_s11 = sld [smem:[#allocation4 + %s514_s0]]  ;;  %s2518_s7 = sshll.u32 %s3261_s16, 5 }
  0x3d   : > { %2711 = vpush %v681_v13  ;;  %s516_s5 = sld [smem:[#allocation5 + %s514_s0]]  ;;  %s596_s15 = sadd.s32 4, %s3246_s13 }
  0x3e   : > { %2713 = vpush %v682_v14  ;;  %s556_s6 = sld [smem:[#allocation4 + %s555_s27]]  ;;  %s3281_s17 = scalar_lea.vmem %s3272_s26, %s2517_s10 }
  0x3f   : > { %2715 = vpush %v722_v15  ;;  %s557_s24 = sld [smem:[#allocation5 + %s555_s27]]  ;;  %s3284_s30 = scalar_lea.vmem %s3272_s26, %s2518_s7  ;;  %v438_v33 = vld [vmem:[%s3281_s17] sm:$0xff]  ;;  %v439_v34 = vld [vmem:[%s3281_s17 + $0x8] sm:$0xff]  ;;  %v440_v35 = vld [vmem:[%s3281_s17 + $0x10] sm:$0xff] }
  0x40   : > { %2717 = vpush %v723_v16  ;;  %s597_s14 = sld [smem:[#allocation4 + %s596_s15]]  ;;  %s637_s25 = sadd.s32 5, %s3246_s13  ;;  %v441_v36 = vld [vmem:[%s3281_s17 + $0x18] sm:$0xff]  ;;  %v452_v37 = vld [vmem:[%s3284_s30] sm:$0xff]  ;;  %v453_v38 = vld [vmem:[%s3284_s30 + $0x8] sm:$0xff] }
  0x41   : > { %2719 = vpush %v763_v17  ;;  %s598_s12 = sld [smem:[#allocation5 + %s596_s15]]  ;;  %s2519_s0 = sshll.u32 %s474_s28, 5  ;;  %v454_v40 = vld [vmem:[%s3284_s30 + $0x10] sm:$0xff]  ;;  %v455_v41 = vld [vmem:[%s3284_s30 + $0x18] sm:$0xff] }
  0x42   : > { %2721 = vpush %v764_v18  ;;  %s2520_s2 = sshll.u32 %s475_s29, 5  ;;  %s2521_s16 = sshll.u32 %s515_s11, 5 }
  0x43   : > { %2723 = vpush %v804_v19  ;;  %s678_s23 = sadd.s32 6, %s3246_s13  ;;  %s2522_s22 = sshll.u32 %s516_s5, 5 }
  0x44   : > { %2725 = vpush %v805_v20  ;;  %s2523_s27 = sshll.u32 %s556_s6, 5  ;;  %s3289_s20 = scalar_lea.vmem %s3272_s26, %s2519_s0 }
  0x45   : > { %2727 = vpush %v845_v21  ;;  %s3292_s10 = scalar_lea.vmem %s3272_s26, %s2520_s2  ;;  %s3295_s7 = scalar_lea.vmem %s3272_s26, %s2521_s16  ;;  %v480_v42 = vld [vmem:[%s3289_s20] sm:$0xff]  ;;  %v481_v47 = vld [vmem:[%s3289_s20 + $0x8] sm:$0xff]  ;;  %v482_v48 = vld [vmem:[%s3289_s20 + $0x10] sm:$0xff] }
  0x46   : > { %2729 = vpush %v846_v22  ;;  %s2524_s15 = sshll.u32 %s557_s24, 5  ;;  %s3298_s19 = scalar_lea.vmem %s3272_s26, %s2522_s22  ;;  %v483_v49 = vld [vmem:[%s3289_s20 + $0x18] sm:$0xff]  ;;  %v494_v52 = vld [vmem:[%s3292_s10] sm:$0xff]  ;;  %v495_v57 = vld [vmem:[%s3292_s10 + $0x8] sm:$0xff] }
  0x47   : > { %2731 = vpush %v886_v23  ;;  %s3301_s28 = scalar_lea.vmem %s3272_s26, %s2523_s27  ;;  %s2525_s29 = sshll.u32 %s597_s14, 5  ;;  %v496_v58 = vld [vmem:[%s3292_s10 + $0x10] sm:$0xff]  ;;  %v497_v59 = vld [vmem:[%s3292_s10 + $0x18] sm:$0xff]  ;;  %v521_v0 = vld [vmem:[%s3295_s7] sm:$0xff] }
  0x48   : > { %2733 = vpush %v887_v24  ;;  %s3303_s11 = sld [smem:[#allocation4 + %s637_s25]]  ;;  %s3306_s5 = scalar_lea.vmem %s3272_s26, %s2524_s15  ;;  %v522_v1 = vld [vmem:[%s3295_s7 + $0x8] sm:$0xff]  ;;  %v523_v2 = vld [vmem:[%s3295_s7 + $0x10] sm:$0xff]  ;;  %v524_v7 = vld [vmem:[%s3295_s7 + $0x18] sm:$0xff] }
  0x49   : > { %2735 = vpush %v927_v25  ;;  %s2526_s6 = sshll.u32 %s598_s12, 5  ;;  %s3308_s2 = sld [smem:[#allocation5 + %s637_s25]]  ;;  %v535_v8 = vld [vmem:[%s3298_s19] sm:$0xff]  ;;  %v536_v9 = vld [vmem:[%s3298_s19 + $0x8] sm:$0xff]  ;;  %v537_v18 = vld [vmem:[%s3298_s19 + $0x10] sm:$0xff] }
  0x4a   : > { %2737 = vpush %v928_v26  ;;  %s719_s0 = sadd.s32 7, %s3246_s13  ;;  %s3312_s16 = scalar_lea.vmem %s3272_s26, %s2525_s29  ;;  %v538_v19 = vld [vmem:[%s3298_s19 + $0x18] sm:$0xff]  ;;  %v562_v20 = vld [vmem:[%s3301_s28] sm:$0xff]  ;;  %v563_v25 = vld [vmem:[%s3301_s28 + $0x8] sm:$0xff] }
  0x4b   : > { %2739 = vpush %v968_v27  ;;  %s760_s22 = sadd.s32 8, %s3246_s13  ;;  %s3316_s24 = scalar_lea.vmem %s3272_s26, %s2526_s6  ;;  %v564_v26 = vld [vmem:[%s3301_s28 + $0x10] sm:$0xff]  ;;  %v565_v27 = vld [vmem:[%s3301_s28 + $0x18] sm:$0xff] }
  0x4c   : > { %2741 = vpush %v969_v28  ;;  %s3318_s14 = sld [smem:[#allocation4 + %s678_s23]]  ;;  %s801_s6 = sadd.s32 9, %s3246_s13 }
  0x4d   : > { %2743 = vpush %v1009_v29  ;;  %s3320_s27 = sld [smem:[#allocation5 + %s678_s23]]  ;;  %s842_s9 = sadd.s32 10, %s3246_s13 }
  0x4e   : > { %2745 = vpush %v1010_v30  ;;  %s3322_s15 = sld [smem:[#allocation4 + %s719_s0]]  ;;  %s2527_s21 = sshll.u32 %s3303_s11, 5 }
  0x4f   : > { %2747 = vpush %v1050_v31  ;;  %s3325_s12 = sld [smem:[#allocation5 + %s719_s0]]  ;;  %s2528_s11 = sshll.u32 %s3308_s2, 5 }
  0x50   : > { %2749 = vpush %v1051_v32  ;;  %s3327_s25 = sld [smem:[#allocation4 + %s760_s22]]  ;;  %v576_v32 = vld [vmem:[%s3306_s5] sm:$0xff] }
  0x51   : > { %s3332_s29 = sld [smem:[#allocation5 + %s760_s22]]  ;;  %s3348_s22 = scalar_lea.vmem %s3272_s26, %s2527_s21 }
  0x52   : > { %s2529_s2 = sshll.u32 %s3318_s14, 5 }
  0x53   : > { %s2530_s14 = sshll.u32 %s3320_s27, 5 }
  0x54   : > { %s3395_s28 = scalar_lea.vmem %s3272_s26, %s2530_s14  ;;  %s3440_s14 = sld [smem:[#allocation4 + %s801_s6]] }
  0x55   : > { %s2532_s19 = sshll.u32 %s3325_s12, 5 }
  0x56   : > { %s3412_s27 = scalar_lea.vmem %s3272_s26, %s2532_s19 }
  0x62   : > { %s2688_s23 = spop %2687 }
  0x63   : > { %v444_v39 = vstv %s2688_s23  ;;  %s2690_s0 = spop %2689  ;;  %s3358_s23 = scalar_lea.vmem %s3272_s26, %s2528_s11 }
  0x64   : > { %v446_v43 = vmul.f32 %v444_v39, %v438_v33  ;;  %v447_v44 = vmul.f32 %v444_v39, %v439_v34  ;;  %v448_v45 = vmul.f32 %v444_v39, %v440_v35  ;;  %v449_v46 = vmul.f32 %v444_v39, %v441_v36  ;;  %s2692_s17 = spop %2691  ;;  %s2531_s11 = sshll.u32 %s3322_s15, 5  ;;  %v579_v39 = vld [vmem:[%s3306_s5 + $0x18] sm:$0xff] }
  0x65   : > { %v458_v50 = vstv %s2690_s0  ;;  %v486_v51 = vstv %s2692_s17  ;;  %s2694_s30 = spop %2693  ;;  %s3367_s17 = scalar_lea.vmem %s3272_s26, %s2529_s2 }
  0x66   : > { %v460_v53 = vmul.f32 %v458_v50, %v452_v37  ;;  %v461_v54 = vmul.f32 %v458_v50, %v453_v38  ;;  %v462_v55 = vmul.f32 %v458_v50, %v454_v40  ;;  %v463_v56 = vmul.f32 %v458_v50, %v455_v41  ;;  %s2696_s20 = spop %2695  ;;  %v577_v37 = vld [vmem:[%s3306_s5 + $0x8] sm:$0xff]  ;;  %v578_v38 = vld [vmem:[%s3306_s5 + $0x10] sm:$0xff]  ;;  %s3398_s2 = scalar_lea.vmem %s3272_s26, %s2531_s11 }
  0x67   : > { %v488_v60 = vmul.f32 %v486_v51, %v480_v42  ;;  %v489_v61 = vmul.f32 %v486_v51, %v481_v47  ;;  %v490_v62 = vmul.f32 %v486_v51, %v482_v48  ;;  %v491_v63 = vmul.f32 %v486_v51, %v483_v49  ;;  %s2698_s21 = spop %2697  ;;  %v606_v51 = vld [vmem:[%s3312_s16 + $0x18] sm:$0xff] }
  0x68   : > { %v464_v3 = vadd.f32 %v460_v53, %v446_v43  ;;  %v465_v4 = vadd.f32 %v461_v54, %v447_v44  ;;  %v466_v5 = vadd.f32 %v462_v55, %v448_v45  ;;  %v467_v6 = vadd.f32 %v463_v56, %v449_v46  ;;  %s2700_s10 = spop %2699  ;;  %v603_v44 = vld [vmem:[%s3312_s16] sm:$0xff]  ;;  %v604_v45 = vld [vmem:[%s3312_s16 + $0x8] sm:$0xff]  ;;  %v605_v46 = vld [vmem:[%s3312_s16 + $0x10] sm:$0xff]  ;;  %s2534_s16 = sshll.u32 %s3332_s29, 5 }
  0x69   : > { %v500_v10 = vstv %s2694_s30  ;;  %v527_v11 = vstv %s2696_s20  ;;  %v541_v12 = vstv %s2698_s21  ;;  %v568_v13 = vstv %s2700_s10  ;;  %s3364_s0 = spop %2701  ;;  %s2503_s20 = sshll.u32 %s3099_s1, 6 }
  0x6a   : > { %469 = vst.msk [vmem:[#allocation2] sm:$0xff] %vm468_vm0, %v464_v3  ;;  %470 = vst.msk [vmem:[#allocation2 + $0x8] sm:$0xff] %vm468_vm0, %v465_v4  ;;  %v502_v14 = vmul.f32 %v500_v10, %v494_v52  ;;  %v503_v15 = vmul.f32 %v500_v10, %v495_v57  ;;  %v504_v16 = vmul.f32 %v500_v10, %v496_v58  ;;  %s3376_s7 = spop %2703  ;;  %v617_v52 = vld [vmem:[%s3316_s24] sm:$0xff]  ;;  %v618_v53 = vld [vmem:[%s3316_s24 + $0x8] sm:$0xff]  ;;  %s2533_s21 = sshll.u32 %s3327_s25, 5  ;;  %v582_v54 = vstv %s3364_s0 }
  0x6b   : > { %471 = vst.msk [vmem:[#allocation2 + $0x10] sm:$0xff] %vm468_vm0, %v466_v5  ;;  %472 = vst.msk [vmem:[#allocation2 + $0x18] sm:$0xff] %vm468_vm0, %v467_v6  ;;  %v505_v17 = vmul.f32 %v500_v10, %v497_v59  ;;  %v529_v21 = vmul.f32 %v527_v11, %v521_v0  ;;  %v530_v22 = vmul.f32 %v527_v11, %v522_v1  ;;  %s3382_s30 = spop %2705  ;;  %p3420_p3 = scmp.lt.s32.totalorder %s2503_s20, 127  ;;  %v609_v55 = vstv %s3376_s7  ;;  %v644_v0 = vld [vmem:[%s3348_s22] sm:$0xff]  ;;  %v645_v5 = vld [vmem:[%s3348_s22 + $0x8] sm:$0xff] }
  0x6c   : > { %v531_v23 = vmul.f32 %v527_v11, %v523_v2  ;;  %v532_v24 = vmul.f32 %v527_v11, %v524_v7  ;;  %v506_v28 = vadd.f32 %v502_v14, %v488_v60  ;;  %v507_v29 = vadd.f32 %v503_v15, %v489_v61  ;;  %s3386_s15 = spop %2707  ;;  %s3444_s0 = sld [smem:[#allocation5 + %s801_s6]]  ;;  %v646_v6 = vld [vmem:[%s3348_s22 + $0x10] sm:$0xff]  ;;  %v647_v7 = vld [vmem:[%s3348_s22 + $0x18] sm:$0xff] }
  0x6d   : > { %v508_v30 = vadd.f32 %v504_v16, %v490_v62  ;;  %v509_v31 = vadd.f32 %v505_v17, %v491_v63  ;;  %v543_v33 = vmul.f32 %v541_v12, %v535_v8  ;;  %v544_v34 = vmul.f32 %v541_v12, %v536_v9  ;;  %s3407_s5 = spop %2709  ;;  %v619_v62 = vld [vmem:[%s3316_s24 + $0x10] sm:$0xff]  ;;  %v620_v63 = vld [vmem:[%s3316_s24 + $0x18] sm:$0xff]  ;;  %s3453_s7 = sld [smem:[#allocation4 + %s842_s9]]  ;;  %v659_v17 = vld [vmem:[%s3358_s23 + $0x8] sm:$0xff] }
  0x6e   : > { %v545_v35 = vmul.f32 %v541_v12, %v537_v18  ;;  %v546_v36 = vmul.f32 %v541_v12, %v538_v19  ;;  %510 = vst.msk [vmem:[#allocation2 + $0x20] sm:$0xff] %vm468_vm0, %v506_v28  ;;  %511 = vst.msk [vmem:[#allocation2 + $0x28] sm:$0xff] %vm468_vm0, %v507_v29  ;;  %v570_v40 = vmul.f32 %v568_v13, %v562_v20  ;;  %v623_v56 = vstv %s3382_s30  ;;  %s3428_s12 = spop %2711  ;;  %v658_v12 = vld [vmem:[%s3358_s23] sm:$0xff]  ;;  %s4355_s20 = smov (!%p3420_p3, %s2503_s20), 127  ;;  %v660_v18 = vld [vmem:[%s3358_s23 + $0x10] sm:$0xff] }
  0x6f   : > { %512 = vst.msk [vmem:[#allocation2 + $0x30] sm:$0xff] %vm468_vm0, %v508_v30  ;;  %513 = vst.msk [vmem:[#allocation2 + $0x38] sm:$0xff] %vm468_vm0, %v509_v31  ;;  %v571_v41 = vmul.f32 %v568_v13, %v563_v25  ;;  %v572_v42 = vmul.f32 %v568_v13, %v564_v26  ;;  %v573_v43 = vmul.f32 %v568_v13, %v565_v27  ;;  %v650_v57 = vstv %s3386_s15  ;;  %s3449_s24 = spop %2713  ;;  %v661_v19 = vld [vmem:[%s3358_s23 + $0x18] sm:$0xff]  ;;  %s883_s22 = sadd.s32 11, %s3246_s13  ;;  %v686_v25 = vld [vmem:[%s3367_s17 + $0x8] sm:$0xff] }
  0x70   : > { %v547_v47 = vadd.f32 %v543_v33, %v529_v21  ;;  %v548_v48 = vadd.f32 %v544_v34, %v530_v22  ;;  %v549_v49 = vadd.f32 %v545_v35, %v531_v23  ;;  %v550_v50 = vadd.f32 %v546_v36, %v532_v24  ;;  %s2716_s6 = spop %2715  ;;  %v685_v24 = vld [vmem:[%s3367_s17] sm:$0xff]  ;;  %v687_v26 = vld [vmem:[%s3367_s17 + $0x10] sm:$0xff]  ;;  %s3475_s1 = sld [smem:[#allocation5 + %s842_s9]]  ;;  %v688_v31 = vld [vmem:[%s3367_s17 + $0x18] sm:$0xff] }
  0x71   : > { %v584_v58 = vmul.f32 %v582_v54, %v576_v32  ;;  %v585_v59 = vmul.f32 %v582_v54, %v577_v37  ;;  %v586_v60 = vmul.f32 %v582_v54, %v578_v38  ;;  %v587_v61 = vmul.f32 %v582_v54, %v579_v39  ;;  %s2504_s23 = sshll.u32 %s4353_s18, 7  ;;  %v699_v32 = vld [vmem:[%s3395_s28] sm:$0xff]  ;;  %v700_v33 = vld [vmem:[%s3395_s28 + $0x8] sm:$0xff]  ;;  %s3481_s11 = spop %2717 }
  0x72   : > { %551 = vst.msk [vmem:[#allocation2 + $0x40] sm:$0xff] %vm468_vm0, %v547_v47  ;;  %552 = vst.msk [vmem:[#allocation2 + $0x48] sm:$0xff] %vm468_vm0, %v548_v48  ;;  %v611_v1 = vmul.f32 %v609_v55, %v603_v44  ;;  %v612_v2 = vmul.f32 %v609_v55, %v604_v45  ;;  %v613_v3 = vmul.f32 %v609_v55, %v605_v46  ;;  %s3486_s30 = scalar_lea.vmem %s3272_s26, %s2533_s21  ;;  %v664_v34 = vstv %s3407_s5  ;;  %s3494_s9 = scalar_lea.vmem %s3272_s26, %s2534_s16  ;;  %v726_v44 = vld [vmem:[%s3398_s2] sm:$0xff] }
  0x73   : > { %553 = vst.msk [vmem:[#allocation2 + $0x50] sm:$0xff] %vm468_vm0, %v549_v49  ;;  %554 = vst.msk [vmem:[#allocation2 + $0x58] sm:$0xff] %vm468_vm0, %v550_v50  ;;  %v614_v4 = vmul.f32 %v609_v55, %v606_v51  ;;  %v588_v8 = vadd.f32 %v584_v58, %v570_v40  ;;  %v589_v9 = vadd.f32 %v585_v59, %v571_v41  ;;  %v691_v35 = vstv %s3428_s12  ;;  %s3498_s18 = sld [smem:[#allocation4 + %s883_s22]]  ;;  %s3507_s25 = spop %2719  ;;  %v727_v49 = vld [vmem:[%s3398_s2 + $0x8] sm:$0xff]  ;;  %v728_v50 = vld [vmem:[%s3398_s2 + $0x10] sm:$0xff] }
  0x74   : > { %v590_v10 = vadd.f32 %v586_v60, %v572_v42  ;;  %v591_v11 = vadd.f32 %v587_v61, %v573_v43  ;;  %v625_v13 = vmul.f32 %v623_v56, %v617_v52  ;;  %v626_v14 = vmul.f32 %v623_v56, %v618_v53  ;;  %v701_v42 = vld [vmem:[%s3395_s28 + $0x10] sm:$0xff]  ;;  %v702_v43 = vld [vmem:[%s3395_s28 + $0x18] sm:$0xff]  ;;  %s394_s29 = sadd.s32 %s2504_s23, %s4355_s20  ;;  %s2535_s17 = sshll.u32 %s3440_s14, 5  ;;  %v741_v61 = vld [vmem:[%s3412_s27 + $0x8] sm:$0xff] }
  0x75   : > { %v627_v15 = vmul.f32 %v623_v56, %v619_v62  ;;  %v628_v16 = vmul.f32 %v623_v56, %v620_v63  ;;  %592 = vst.msk [vmem:[#allocation2 + $0x60] sm:$0xff] %vm468_vm0, %v588_v8  ;;  %593 = vst.msk [vmem:[#allocation2 + $0x68] sm:$0xff] %vm468_vm0, %v589_v9  ;;  %v652_v20 = vmul.f32 %v650_v57, %v644_v0  ;;  %v705_v36 = vstv %s3449_s24  ;;  %v729_v51 = vld [vmem:[%s3398_s2 + $0x18] sm:$0xff]  ;;  %s2536_s19 = sshll.u32 %s3444_s0, 5  ;;  %v740_v56 = vld [vmem:[%s3412_s27] sm:$0xff]  ;;  %s3516_s15 = spop %2721 }
  0x76   : > { %594 = vst.msk [vmem:[#allocation2 + $0x70] sm:$0xff] %vm468_vm0, %v590_v10  ;;  %595 = vst.msk [vmem:[#allocation2 + $0x78] sm:$0xff] %vm468_vm0, %v591_v11  ;;  %v653_v21 = vmul.f32 %v650_v57, %v645_v5  ;;  %v654_v22 = vmul.f32 %v650_v57, %v646_v6  ;;  %v655_v23 = vmul.f32 %v650_v57, %v647_v7  ;;  %v732_v37 = vstv %s2716_s6  ;;  %s2537_s20 = sshll.u32 %s3453_s7, 5  ;;  %v742_v62 = vld [vmem:[%s3412_s27 + $0x10] sm:$0xff]  ;;  %v743_v63 = vld [vmem:[%s3412_s27 + $0x18] sm:$0xff]  ;;  %s2724_s28 = spop %2723 }
  0x77   : > { %v629_v27 = vadd.f32 %v625_v13, %v611_v1  ;;  %v630_v28 = vadd.f32 %v626_v14, %v612_v2  ;;  %v631_v29 = vadd.f32 %v627_v15, %v613_v3  ;;  %v632_v30 = vadd.f32 %v628_v16, %v614_v4  ;;  %s3522_s2 = sshll.u32 %s394_s29, 3  ;;  %v767_v4 = vld [vmem:[%s3486_s30] sm:$0xff]  ;;  %v768_v5 = vld [vmem:[%s3486_s30 + $0x8] sm:$0xff]  ;;  %v769_v6 = vld [vmem:[%s3486_s30 + $0x10] sm:$0xff]  ;;  %s3534_s5 = scalar_lea.vmem %s3272_s26, %s2535_s17 }
  0x78   : > { %v666_v38 = vmul.f32 %v664_v34, %v658_v12  ;;  %v667_v39 = vmul.f32 %v664_v34, %v659_v17  ;;  %v668_v40 = vmul.f32 %v664_v34, %v660_v18  ;;  %v669_v41 = vmul.f32 %v664_v34, %v661_v19  ;;  %s3538_s27 = sld [smem:[#allocation5 + %s883_s22]]  ;;  %v770_v11 = vld [vmem:[%s3486_s30 + $0x18] sm:$0xff]  ;;  %v781_v12 = vld [vmem:[%s3494_s9] sm:$0xff]  ;;  %v782_v13 = vld [vmem:[%s3494_s9 + $0x8] sm:$0xff]  ;;  %s3546_s21 = scalar_lea.vmem %s3272_s26, %s2536_s19 }
  0x79   : > { %633 = vst.msk [vmem:[#allocation2 + $0x80] sm:$0xff] %vm468_vm0, %v629_v27  ;;  %634 = vst.msk [vmem:[#allocation2 + $0x88] sm:$0xff] %vm468_vm0, %v630_v28  ;;  %v693_v45 = vmul.f32 %v691_v35, %v685_v24  ;;  %v694_v46 = vmul.f32 %v691_v35, %v686_v25  ;;  %v695_v47 = vmul.f32 %v691_v35, %v687_v26  ;;  %s2538_s10 = sshll.u32 %s3475_s1, 5  ;;  %v746_v14 = vstv %s3481_s11  ;;  %s3555_s12 = scalar_lea.vmem %s3272_s26, %s2537_s20  ;;  %v808_v24 = vld [vmem:[%s3534_s5] sm:$0xff] }
  0x7a   : > { %635 = vst.msk [vmem:[#allocation2 + $0x90] sm:$0xff] %vm468_vm0, %v631_v29  ;;  %636 = vst.msk [vmem:[#allocation2 + $0x98] sm:$0xff] %vm468_vm0, %v632_v30  ;;  %v696_v48 = vmul.f32 %v691_v35, %v688_v31  ;;  %v670_v52 = vadd.f32 %v666_v38, %v652_v20  ;;  %v671_v53 = vadd.f32 %v667_v39, %v653_v21  ;;  %v773_v15 = vstv %s3507_s25  ;;  %s3561_s24 = scalar_lea.vmem %s4312_s3, %s3522_s2  ;;  %s3570_s0 = spop %2725  ;;  %v809_v29 = vld [vmem:[%s3534_s5 + $0x8] sm:$0xff]  ;;  %v810_v30 = vld [vmem:[%s3534_s5 + $0x10] sm:$0xff] }
  0x7b   : > { %v672_v54 = vadd.f32 %v668_v40, %v654_v22  ;;  %v673_v55 = vadd.f32 %v669_v41, %v655_v23  ;;  %v707_v57 = vmul.f32 %v705_v36, %v699_v32  ;;  %v708_v58 = vmul.f32 %v705_v36, %v700_v33  ;;  %v783_v22 = vld [vmem:[%s3494_s9 + $0x10] sm:$0xff]  ;;  %v784_v23 = vld [vmem:[%s3494_s9 + $0x18] sm:$0xff]  ;;  %s924_s7 = sadd.s32 12, %s3246_s13  ;;  %s3576_s6 = spop %2727 }
  0x7c   : > { %v709_v59 = vmul.f32 %v705_v36, %v701_v42  ;;  %v710_v60 = vmul.f32 %v705_v36, %v702_v43  ;;  %674 = vst.msk [vmem:[#allocation2 + $0xa0] sm:$0xff] %vm468_vm0, %v670_v52  ;;  %675 = vst.msk [vmem:[#allocation2 + $0xa8] sm:$0xff] %vm468_vm0, %v671_v53  ;;  %v734_v0 = vmul.f32 %v732_v37, %v726_v44  ;;  %v787_v16 = vstv %s3516_s15  ;;  %v811_v31 = vld [vmem:[%s3534_s5 + $0x18] sm:$0xff]  ;;  %v822_v36 = vld [vmem:[%s3546_s21] sm:$0xff]  ;;  %s862_s22 = scalar_lea.vmem %s3272_s26, %s2538_s10  ;;  %s2730_s23 = spop %2729 }
  0x7d   : > { %676 = vst.msk [vmem:[#allocation2 + $0xb0] sm:$0xff] %vm468_vm0, %v672_v54  ;;  %677 = vst.msk [vmem:[#allocation2 + $0xb8] sm:$0xff] %vm468_vm0, %v673_v55  ;;  %v735_v1 = vmul.f32 %v732_v37, %v727_v49  ;;  %v736_v2 = vmul.f32 %v732_v37, %v728_v50  ;;  %v737_v3 = vmul.f32 %v732_v37, %v729_v51  ;;  %v814_v17 = vstv %s2724_s28  ;;  %v823_v37 = vld [vmem:[%s3546_s21 + $0x8] sm:$0xff]  ;;  %v824_v38 = vld [vmem:[%s3546_s21 + $0x10] sm:$0xff]  ;;  %s3589_s11 = sld [smem:[#allocation4 + %s924_s7]]  ;;  %s2539_s1 = sshll.u32 %s3498_s18, 5 }
  0x7e   : > { %v711_v7 = vadd.f32 %v707_v57, %v693_v45  ;;  %v712_v8 = vadd.f32 %v708_v58, %v694_v46  ;;  %v713_v9 = vadd.f32 %v709_v59, %v695_v47  ;;  %v714_v10 = vadd.f32 %v710_v60, %v696_v48  ;;  %v825_v39 = vld [vmem:[%s3546_s21 + $0x18] sm:$0xff]  ;;  %v849_v44 = vld [vmem:[%s3555_s12] sm:$0xff]  ;;  %v850_v51 = vld [vmem:[%s3555_s12 + $0x8] sm:$0xff]  ;;  %s2540_s30 = sshll.u32 %s3538_s27, 5  ;;  %s3608_s9 = sld [smem:[#allocation5 + %s924_s7]] }
  0x7f   : > { %v748_v18 = vmul.f32 %v746_v14, %v740_v56  ;;  %v749_v19 = vmul.f32 %v746_v14, %v741_v61  ;;  %v750_v20 = vmul.f32 %v746_v14, %v742_v62  ;;  %v751_v21 = vmul.f32 %v746_v14, %v743_v63  ;;  %v1088_v45 = vld [vmem:[#allocation2] sm:$0xff]  ;;  %v851_v52 = vld [vmem:[%s3555_s12 + $0x10] sm:$0xff]  ;;  %v852_v53 = vld [vmem:[%s3555_s12 + $0x18] sm:$0xff]  ;;  %s965_s25 = sadd.s32 13, %s3246_s13  ;;  %s3620_s29 = scalar_lea.vmem %s3272_s26, %s2539_s1 }
  0x80   : > { %715 = vst.msk [vmem:[#allocation2 + $0xc0] sm:$0xff] %vm468_vm0, %v711_v7  ;;  %716 = vst.msk [vmem:[#allocation2 + $0xc8] sm:$0xff] %vm468_vm0, %v712_v8  ;;  %v775_v25 = vmul.f32 %v773_v15, %v767_v4  ;;  %v776_v26 = vmul.f32 %v773_v15, %v768_v5  ;;  %v777_v27 = vmul.f32 %v773_v15, %v769_v6  ;;  %v1152_v46 = vld [vmem:[%s3561_s24] sm:$0xff]  ;;  %v864_v59 = vld [vmem:[%s862_s22 + $0x8] sm:$0xff]  ;;  %v828_v62 = vstv %s3570_s0  ;;  %s3625_s18 = scalar_lea.vmem %s3272_s26, %s2540_s30  ;;  %s3629_s17 = sld [smem:[#allocation4 + %s965_s25]] }
  0x81   : > { %717 = vst.msk [vmem:[#allocation2 + $0xd0] sm:$0xff] %vm468_vm0, %v713_v9  ;;  %718 = vst.msk [vmem:[#allocation2 + $0xd8] sm:$0xff] %vm468_vm0, %v714_v10  ;;  %v778_v28 = vmul.f32 %v773_v15, %v770_v11  ;;  %v752_v32 = vadd.f32 %v748_v18, %v734_v0  ;;  %v753_v33 = vadd.f32 %v749_v19, %v735_v1  ;;  %v863_v58 = vld [vmem:[%s862_s22] sm:$0xff]  ;;  %v865_v60 = vld [vmem:[%s862_s22 + $0x10] sm:$0xff]  ;;  %v855_v63 = vstv %s3576_s6  ;;  %s2732_s19 = spop %2731  ;;  %s3651_s20 = sld [smem:[#allocation5 + %s965_s25]] }
  0x82   : > { %v754_v34 = vadd.f32 %v750_v20, %v736_v2  ;;  %v755_v35 = vadd.f32 %v751_v21, %v737_v3  ;;  %v789_v40 = vmul.f32 %v787_v16, %v781_v12  ;;  %v790_v41 = vmul.f32 %v787_v16, %v782_v13  ;;  %v866_v61 = vld [vmem:[%s862_s22 + $0x18] sm:$0xff]  ;;  %v1153_v1 = vld [vmem:[%s3561_s24 + $0x8] sm:$0xff]  ;;  %v1154_v3 = vld [vmem:[%s3561_s24 + $0x10] sm:$0xff]  ;;  %s3655_s28 = spop %2733  ;;  %s1006_s5 = sadd.s32 14, %s3246_s13 }
  0x83   : > { %v791_v42 = vmul.f32 %v787_v16, %v783_v22  ;;  %v792_v43 = vmul.f32 %v787_v16, %v784_v23  ;;  %756 = vst.msk [vmem:[#allocation2 + $0xe0] sm:$0xff] %vm468_vm0, %v752_v32  ;;  %757 = vst.msk [vmem:[#allocation2 + $0xe8] sm:$0xff] %vm468_vm0, %v753_v33  ;;  %v816_v47 = vmul.f32 %v814_v17, %v808_v24  ;;  %v869_v0 = vstv %s2730_s23  ;;  %v1089_v8 = vld [vmem:[#allocation2 + $0x8] sm:$0xff]  ;;  %v1155_v9 = vld [vmem:[%s3561_s24 + $0x18] sm:$0xff]  ;;  %s2541_s15 = sshll.u32 %s3589_s11, 5  ;;  %s3682_s10 = spop %2735 }
  0x84   : > { %758 = vst.msk [vmem:[#allocation2 + $0xf0] sm:$0xff] %vm468_vm0, %v754_v34  ;;  %759 = vst.msk [vmem:[#allocation2 + $0xf8] sm:$0xff] %vm468_vm0, %v755_v35  ;;  %v817_v48 = vmul.f32 %v814_v17, %v809_v29  ;;  %v818_v49 = vmul.f32 %v814_v17, %v810_v30  ;;  %v819_v50 = vmul.f32 %v814_v17, %v811_v31  ;;  %v1156_v10 = vld [vmem:[%s3561_s24 + $0x20] sm:$0xff]  ;;  %v1090_v15 = vld [vmem:[#allocation2 + $0x10] sm:$0xff]  ;;  %s3667_s27 = scalar_lea.vmem %s3272_s26, %s2541_s15  ;;  %s2542_s21 = sshll.u32 %s3608_s9, 5 }
  0x85   : > { %v793_v54 = vadd.f32 %v789_v40, %v775_v25  ;;  %v794_v55 = vadd.f32 %v790_v41, %v776_v26  ;;  %v795_v56 = vadd.f32 %v791_v42, %v777_v27  ;;  %v796_v57 = vadd.f32 %v792_v43, %v778_v28  ;;  %v1091_v16 = vld [vmem:[#allocation2 + $0x18] sm:$0xff]  ;;  %v1092_v17 = vld [vmem:[#allocation2 + $0x20] sm:$0xff]  ;;  %v1185_v27 = vld [vmem:[%s3561_s24 + $0x108] sm:$0xff]  ;;  %s3687_s12 = sld [smem:[#allocation4 + %s1006_s5]]  ;;  %s3695_s16 = scalar_lea.vmem %s3272_s26, %s2542_s21 }
  0x86   : > { %v3603_v2 = vadd.f32 %v1152_v46, %v1088_v45  ;;  %v830_v4 = vmul.f32 %v828_v62, %v822_v36  ;;  %v831_v5 = vmul.f32 %v828_v62, %v823_v37  ;;  %v832_v6 = vmul.f32 %v828_v62, %v824_v38  ;;  %v1184_v26 = vld [vmem:[%s3561_s24 + $0x100] sm:$0xff]  ;;  %v1186_v28 = vld [vmem:[%s3561_s24 + $0x110] sm:$0xff]  ;;  %v1093_v29 = vld [vmem:[#allocation2 + $0x28] sm:$0xff]  ;;  %s2543_s14 = sshll.u32 %s3629_s17, 5  ;;  %s2738_s0 = spop %2737 }
  0x87   : > { %797 = vst.msk [vmem:[#allocation2 + $0x100] sm:$0xff] %vm468_vm0, %v793_v54  ;;  %798 = vst.msk [vmem:[#allocation2 + $0x108] sm:$0xff] %vm468_vm0, %v794_v55  ;;  %v833_v7 = vmul.f32 %v828_v62, %v825_v39  ;;  %v857_v11 = vmul.f32 %v855_v63, %v849_v44  ;;  %v858_v12 = vmul.f32 %v855_v63, %v850_v51  ;;  %v1157_v30 = vld [vmem:[%s3561_s24 + $0x28] sm:$0xff]  ;;  %v890_v31 = vld [vmem:[%s3620_s29] sm:$0xff]  ;;  %v896_v51 = vstv %s2732_s19  ;;  %s3704_s7 = sld [smem:[#allocation5 + %s1006_s5]]  ;;  %s2544_s6 = sshll.u32 %s3651_s20, 5 }
  0x88   : > { %799 = vst.msk [vmem:[#allocation2 + $0x110] sm:$0xff] %vm468_vm0, %v795_v56  ;;  %800 = vst.msk [vmem:[#allocation2 + $0x118] sm:$0xff] %vm468_vm0, %v796_v57  ;;  %v859_v13 = vmul.f32 %v855_v63, %v851_v52  ;;  %v860_v14 = vmul.f32 %v855_v63, %v852_v53  ;;  %v834_v18 = vadd.f32 %v830_v4, %v816_v47  ;;  %v1187_v35 = vld [vmem:[%s3561_s24 + $0x118] sm:$0xff]  ;;  %v891_v37 = vld [vmem:[%s3620_s29 + $0x8] sm:$0xff]  ;;  %s3731_s22 = scalar_lea.vmem %s3272_s26, %s2543_s14  ;;  %s1047_s23 = sadd.s32 15, %s3246_s13 }
  0x89   : > { %v835_v19 = vadd.f32 %v831_v5, %v817_v48  ;;  %v836_v20 = vadd.f32 %v832_v6, %v818_v49  ;;  %v837_v21 = vadd.f32 %v833_v7, %v819_v50  ;;  %v871_v22 = vmul.f32 %v869_v0, %v863_v58  ;;  %v892_v38 = vld [vmem:[%s3620_s29 + $0x10] sm:$0xff]  ;;  %v893_v39 = vld [vmem:[%s3620_s29 + $0x18] sm:$0xff]  ;;  %v904_v44 = vld [vmem:[%s3625_s18] sm:$0xff]  ;;  %s2740_s11 = spop %2739  ;;  %s3745_s1 = scalar_lea.vmem %s3272_s26, %s2544_s6 }
  0x8a   : > { %v872_v23 = vmul.f32 %v869_v0, %v864_v59  ;;  %v873_v24 = vmul.f32 %v869_v0, %v865_v60  ;;  %v874_v25 = vmul.f32 %v869_v0, %v866_v61  ;;  %838 = vst.msk [vmem:[#allocation2 + $0x120] sm:$0xff] %vm468_vm0, %v834_v18  ;;  %v1217_v32 = vadd.f32 %v1153_v1, %v1089_v8  ;;  %v905_v45 = vld [vmem:[%s3625_s18 + $0x8] sm:$0xff]  ;;  %v906_v46 = vld [vmem:[%s3625_s18 + $0x10] sm:$0xff]  ;;  %v907_v52 = vld [vmem:[%s3625_s18 + $0x18] sm:$0xff]  ;;  %s3753_s9 = sld [smem:[#allocation4 + %s1047_s23]]  ;;  %s2742_s29 = spop %2741 }
  0x8b   : > { %839 = vst.msk [vmem:[#allocation2 + $0x128] sm:$0xff] %vm468_vm0, %v835_v19  ;;  %840 = vst.msk [vmem:[#allocation2 + $0x130] sm:$0xff] %vm468_vm0, %v836_v20  ;;  %v1218_v33 = vadd.f32 %v1154_v3, %v1090_v15  ;;  %v1219_v34 = vadd.f32 %v1155_v9, %v1091_v16  ;;  %v1220_v36 = vadd.f32 %v1156_v10, %v1092_v17  ;;  %v1158_v47 = vld [vmem:[%s3561_s24 + $0x30] sm:$0xff]  ;;  %v1095_v54 = vld [vmem:[#allocation2 + $0x38] sm:$0xff]  ;;  %v910_v10 = vstv %s3655_s28  ;;  %s2545_s30 = sshll.u32 %s3687_s12, 5  ;;  %s3761_s25 = sld [smem:[#allocation5 + %s1047_s23]] }
  0x8c   : > { %841 = vst.msk [vmem:[#allocation2 + $0x138] sm:$0xff] %vm468_vm0, %v837_v21  ;;  %v875_v40 = vadd.f32 %v871_v22, %v857_v11  ;;  %v876_v41 = vadd.f32 %v872_v23, %v858_v12  ;;  %v877_v42 = vadd.f32 %v873_v24, %v859_v13  ;;  %v878_v43 = vadd.f32 %v874_v25, %v860_v14  ;;  %v1094_v53 = vld [vmem:[#allocation2 + $0x30] sm:$0xff]  ;;  %v1159_v55 = vld [vmem:[%s3561_s24 + $0x38] sm:$0xff]  ;;  %v1188_v63 = vld [vmem:[%s3561_s24 + $0x120] sm:$0xff]  ;;  %s3776_s13 = scalar_lea.vmem %s3272_s26, %s2545_s30  ;;  %s3788_s17 = spop %2743 }
  0x8d   : > { %v1280_v48 = vpack.c.bf16 %v1217_v32, %v3603_v2  ;;  %v1281_v49 = vpack.c.bf16 %v1219_v34, %v1218_v33  ;;  %v1221_v50 = vadd.f32 %v1157_v30, %v1093_v29  ;;  %v898_v59 = vmul.f32 %v896_v51, %v890_v31  ;;  %v1189_v5 = vld [vmem:[%s3561_s24 + $0x128] sm:$0xff]  ;;  %v1190_v6 = vld [vmem:[%s3561_s24 + $0x130] sm:$0xff]  ;;  %v1096_v7 = vld [vmem:[#allocation2 + $0x40] sm:$0xff]  ;;  %s2546_s18 = sshll.u32 %s3704_s7, 5  ;;  %s2746_s15 = spop %2745 }
  0x8e   : > { %879 = vst.msk [vmem:[#allocation2 + $0x140] sm:$0xff] %vm468_vm0, %v875_v40  ;;  %880 = vst.msk [vmem:[#allocation2 + $0x148] sm:$0xff] %vm468_vm0, %v876_v41  ;;  %v1120_v56 = vld [vmem:[#allocation2 + $0x100] sm:$0xff]  ;;  %v1121_v57 = vld [vmem:[#allocation2 + $0x108] sm:$0xff]  ;;  %v899_v60 = vmul.f32 %v896_v51, %v891_v37  ;;  %v900_v61 = vmul.f32 %v896_v51, %v892_v38  ;;  %v901_v62 = vmul.f32 %v896_v51, %v893_v39  ;;  %s3793_s19 = scalar_lea.vmem %s3272_s26, %s2546_s18  ;;  %s3926_s14 = scalar_lea.vmem %s4313_s4, %s3522_s2 }
  0x8f   : > { %881 = vst.msk [vmem:[#allocation2 + $0x150] sm:$0xff] %vm468_vm0, %v877_v42  ;;  %882 = vst.msk [vmem:[#allocation2 + $0x158] sm:$0xff] %vm468_vm0, %v878_v43  ;;  %v1122_v58 = vld [vmem:[#allocation2 + $0x110] sm:$0xff]  ;;  %2620 = vmatprep.mubr.msk.bf16.mxu0 %vm468_vm0, %v1280_v48  ;;  %v1248_v0 = vadd.f32 %v1184_v26, %v1120_v56  ;;  %v1249_v1 = vadd.f32 %v1185_v27, %v1121_v57  ;;  %v1123_v2 = vld [vmem:[#allocation2 + $0x118] sm:$0xff]  ;;  %v1282_v4 = vpack.c.bf16 %v1221_v50, %v1220_v36  ;;  %s4338_s6 = sld [smem:[#allocation16_spill]] }
  0x90   : > { %v1250_v3 = vadd.f32 %v1186_v28, %v1122_v58  ;;  %v1160_v8 = vld [vmem:[%s3561_s24 + $0x40] sm:$0xff]  ;;  %2621 = vmatmul.mubr.msk.bf16.vlgmr.msra.gmra.mrb[0].mxu0 %vm468_vm0, %v1281_v49  ;;  %v1251_v9 = vadd.f32 %v1187_v35, %v1123_v2  ;;  %v3676_v11 = vadd.f32 %v1158_v47, %v1094_v53  ;;  %v3678_v12 = vadd.f32 %v1159_v55, %v1095_v54  ;;  %v1191_v13 = vld [vmem:[%s3561_s24 + $0x138] sm:$0xff]  ;;  %v1161_v14 = vld [vmem:[%s3561_s24 + $0x48] sm:$0xff]  ;;  %s2547_s20 = sshll.u32 %s3753_s9, 5 }
  0x91   : > { %v1162_v15 = vld [vmem:[%s3561_s24 + $0x50] sm:$0xff]  ;;  %v1296_v16 = vpack.c.bf16 %v1249_v1, %v1248_v0  ;;  %2624 = vmatprep.mubr.msk.bf16.mxu0 %vm468_vm0, %v1282_v4  ;;  %v912_v17 = vmul.f32 %v910_v10, %v904_v44  ;;  %v913_v18 = vmul.f32 %v910_v10, %v905_v45  ;;  %v914_v19 = vmul.f32 %v910_v10, %v906_v46  ;;  %v1097_v20 = vld [vmem:[#allocation2 + $0x48] sm:$0xff]  ;;  %v931_v21 = vld [vmem:[%s3667_s27] sm:$0xff]  ;;  %s2548_s28 = sshll.u32 %s3761_s25, 5  ;;  %s3824_s5 = scalar_lea.vmem %s3272_s26, %s2547_s20 }
  0x92   : > { %v932_v22 = vld [vmem:[%s3667_s27 + $0x8] sm:$0xff]  ;;  %v1098_v23 = vld [vmem:[#allocation2 + $0x50] sm:$0xff]  ;;  %v1297_v24 = vpack.c.bf16 %v1251_v9, %v1250_v3  ;;  %v915_v25 = vmul.f32 %v910_v10, %v907_v52  ;;  %v1124_v26 = vld [vmem:[#allocation2 + $0x120] sm:$0xff]  ;;  %v1283_v28 = vpack.c.bf16 %v3678_v12, %v3676_v11  ;;  %v3700_v30 = vadd.f32 %v1160_v8, %v1096_v7  ;;  %s3832_s21 = scalar_lea.vmem %s3272_s26, %s2548_s28 }
  0x93   : > { %v1125_v27 = vld [vmem:[#allocation2 + $0x128] sm:$0xff]  ;;  %v1126_v29 = vld [vmem:[#allocation2 + $0x130] sm:$0xff]  ;;  %2652 = vmatprep.mubr.msk.bf16.mxu1 %vm468_vm0, %v1296_v16  ;;  %v916_v31 = vadd.f32 %v912_v17, %v898_v59  ;;  %v917_v32 = vadd.f32 %v913_v18, %v899_v60  ;;  %v918_v33 = vadd.f32 %v914_v19, %v900_v61  ;;  %v1252_v34 = vadd.f32 %v1188_v63, %v1124_v26  ;;  %v1127_v35 = vld [vmem:[#allocation2 + $0x138] sm:$0xff] }
  0x94   : > { %v933_v36 = vld [vmem:[%s3667_s27 + $0x10] sm:$0xff]  ;;  %v934_v37 = vld [vmem:[%s3667_s27 + $0x18] sm:$0xff]  ;;  %2653 = vmatmul.mubr.msk.bf16.vlgmr.msra.gmra.mrb[0].mxu1 %vm468_vm0, %v1297_v24  ;;  %v919_v38 = vadd.f32 %v915_v25, %v901_v62  ;;  %v1253_v39 = vadd.f32 %v1189_v5, %v1125_v27  ;;  %v3710_v40 = vadd.f32 %v1190_v6, %v1126_v29  ;;  %v3712_v41 = vadd.f32 %v1191_v13, %v1127_v35  ;;  %v945_v42 = vld [vmem:[%s3695_s16] sm:$0xff]  ;;  %s3829_s27 = spop %2747 }
  0x95   : > { %v946_v43 = vld [vmem:[%s3695_s16 + $0x8] sm:$0xff]  ;;  %v947_v44 = vld [vmem:[%s3695_s16 + $0x10] sm:$0xff]  ;;  %v1192_v45 = vld [vmem:[%s3561_s24 + $0x140] sm:$0xff]  ;;  %920 = vst.msk [vmem:[#allocation2 + $0x160] sm:$0xff] %vm468_vm0, %v916_v31  ;;  %v1225_v47 = vadd.f32 %v1161_v14, %v1097_v20  ;;  %v937_v48 = vstv %s3682_s10  ;;  %v3726_v53 = vadd.f32 %v1162_v15, %v1098_v23  ;;  %s2750_s26 = spop %2749 }
  0x96   : > { %v1193_v46 = vld [vmem:[%s3561_s24 + $0x148] sm:$0xff]  ;;  %921 = vst.msk [vmem:[#allocation2 + $0x168] sm:$0xff] %vm468_vm0, %v917_v32  ;;  %922 = vst.msk [vmem:[#allocation2 + $0x170] sm:$0xff] %vm468_vm0, %v918_v33  ;;  %v948_v49 = vld [vmem:[%s3695_s16 + $0x18] sm:$0xff]  ;;  %v951_v50 = vstv %s2738_s0  ;;  %v1298_v54 = vpack.c.bf16 %v1253_v39, %v1252_v34  ;;  %v1299_v55 = vpack.c.bf16 %v3712_v41, %v3710_v40  ;;  %v939_v56 = vmul.f32 %v937_v48, %v931_v21 }
  0x97   : > { %v1099_v51 = vld [vmem:[#allocation2 + $0x58] sm:$0xff]  ;;  %923 = vst.msk [vmem:[#allocation2 + $0x178] sm:$0xff] %vm468_vm0, %v919_v38  ;;  %v940_v57 = vmul.f32 %v937_v48, %v932_v22  ;;  %v1128_v58 = vld [vmem:[#allocation2 + $0x140] sm:$0xff]  ;;  %v1129_v59 = vld [vmem:[#allocation2 + $0x148] sm:$0xff]  ;;  %v1284_v63 = vpack.c.bf16 %v1225_v47, %v3700_v30  ;;  %v941_v0 = vmul.f32 %v937_v48, %v933_v36  ;;  %v942_v1 = vmul.f32 %v937_v48, %v934_v37 }
  0x98   : > { %v1163_v52 = vld [vmem:[%s3561_s24 + $0x58] sm:$0xff]  ;;  %v1194_v60 = vld [vmem:[%s3561_s24 + $0x150] sm:$0xff]  ;;  %v1164_v62 = vld [vmem:[%s3561_s24 + $0x60] sm:$0xff]  ;;  %v953_v2 = vmul.f32 %v951_v50, %v945_v42  ;;  %2656 = vmatprep.mubr.msk.bf16.mxu1 %vm468_vm0, %v1298_v54  ;;  %2625 = vmatmul.mubr.msk.bf16.gmra.mrb[4].mxu0 %vm468_vm0, %v1283_v28  ;;  %v954_v6 = vmul.f32 %v951_v50, %v946_v43  ;;  %v955_v7 = vmul.f32 %v951_v50, %v947_v44  ;;  %v978_v18 = vstv %s2740_s11 }
  0x99   : > { %v1195_v61 = vld [vmem:[%s3561_s24 + $0x158] sm:$0xff]  ;;  %v1100_v3 = vld [vmem:[#allocation2 + $0x60] sm:$0xff]  ;;  %v1101_v4 = vld [vmem:[#allocation2 + $0x68] sm:$0xff]  ;;  %v956_v8 = vmul.f32 %v951_v50, %v948_v49  ;;  %2628 = vmatprep.mubr.msk.bf16.mxu0 %vm468_vm0, %v1284_v63  ;;  %v1256_v13 = vadd.f32 %v1192_v45, %v1128_v58  ;;  %v1257_v14 = vadd.f32 %v1193_v46, %v1129_v59  ;;  %v1227_v22 = vadd.f32 %v1163_v52, %v1099_v51 }
  0x9a   : > { %v1165_v5 = vld [vmem:[%s3561_s24 + $0x68] sm:$0xff]  ;;  %v1130_v9 = vld [vmem:[#allocation2 + $0x150] sm:$0xff]  ;;  %v1131_v10 = vld [vmem:[#allocation2 + $0x158] sm:$0xff]  ;;  %v957_v12 = vadd.f32 %v953_v2, %v939_v56  ;;  %v958_v19 = vadd.f32 %v954_v6, %v940_v57  ;;  %v959_v20 = vadd.f32 %v955_v7, %v941_v0  ;;  %v1228_v29 = vadd.f32 %v1164_v62, %v1100_v3 }
  0x9b   : > { %v972_v11 = vld [vmem:[%s3731_s22] sm:$0xff]  ;;  %v973_v15 = vld [vmem:[%s3731_s22 + $0x8] sm:$0xff]  ;;  %v974_v16 = vld [vmem:[%s3731_s22 + $0x10] sm:$0xff]  ;;  %v960_v21 = vadd.f32 %v956_v8, %v942_v1  ;;  %v1300_v26 = vpack.c.bf16 %v1257_v14, %v1256_v13  ;;  %v3768_v27 = vadd.f32 %v1194_v60, %v1130_v9  ;;  %v3770_v28 = vadd.f32 %v1195_v61, %v1131_v10 }
  0x9c   : > { %v975_v17 = vld [vmem:[%s3731_s22 + $0x18] sm:$0xff]  ;;  %v986_v23 = vld [vmem:[%s3745_s1] sm:$0xff]  ;;  %v987_v24 = vld [vmem:[%s3745_s1 + $0x8] sm:$0xff]  ;;  %961 = vst.msk [vmem:[#allocation2 + $0x180] sm:$0xff] %vm468_vm0, %v957_v12  ;;  %2657 = vmatmul.mubr.msk.bf16.gmra.mrb[4].mxu1 %vm468_vm0, %v1299_v55  ;;  %v1229_v33 = vadd.f32 %v1165_v5, %v1101_v4  ;;  %v980_v34 = vmul.f32 %v978_v18, %v972_v11  ;;  %v981_v35 = vmul.f32 %v978_v18, %v973_v15  ;;  %v992_v43 = vstv %s2742_s29  ;;  %s3949_s22 = scalar_lea.vmem %s4338_s6, %s3522_s2 }
  0x9d   : > { %v1196_v25 = vld [vmem:[%s3561_s24 + $0x160] sm:$0xff]  ;;  %v988_v30 = vld [vmem:[%s3745_s1 + $0x10] sm:$0xff]  ;;  %v989_v31 = vld [vmem:[%s3745_s1 + $0x18] sm:$0xff]  ;;  %962 = vst.msk [vmem:[#allocation2 + $0x188] sm:$0xff] %vm468_vm0, %v958_v19  ;;  %v982_v36 = vmul.f32 %v978_v18, %v974_v16  ;;  %2660 = vmatprep.mubr.msk.bf16.mxu1 %vm468_vm0, %v1300_v26  ;;  %v983_v42 = vmul.f32 %v978_v18, %v975_v17  ;;  %v1285_v48 = vpack.c.bf16 %v1227_v22, %v3726_v53  ;;  %v1019_v15 = vstv %s3788_s17 }
  0x9e   : > { %v1197_v32 = vld [vmem:[%s3561_s24 + $0x168] sm:$0xff]  ;;  %963 = vst.msk [vmem:[#allocation2 + $0x190] sm:$0xff] %vm468_vm0, %v959_v20  ;;  %964 = vst.msk [vmem:[#allocation2 + $0x198] sm:$0xff] %vm468_vm0, %v960_v21  ;;  %v1132_v37 = vld [vmem:[#allocation2 + $0x160] sm:$0xff]  ;;  %v994_v49 = vmul.f32 %v992_v43, %v986_v23  ;;  %v995_v50 = vmul.f32 %v992_v43, %v987_v24  ;;  %v996_v51 = vmul.f32 %v992_v43, %v988_v30  ;;  %v1033_v16 = vstv %s2746_s15 }
  0x9f   : > { %v1133_v38 = vld [vmem:[#allocation2 + $0x168] sm:$0xff]  ;;  %v1102_v39 = vld [vmem:[#allocation2 + $0x70] sm:$0xff]  ;;  %v1103_v40 = vld [vmem:[#allocation2 + $0x78] sm:$0xff]  ;;  %v3784_v44 = vadd.f32 %v1196_v25, %v1132_v37  ;;  %v1286_v57 = vpack.c.bf16 %v1229_v33, %v1228_v29  ;;  %v997_v58 = vmul.f32 %v992_v43, %v989_v31  ;;  %v1301_v53 = vpack.c.bf16 %v3770_v28, %v3768_v27 }
  0xa0   : > { %v1166_v41 = vld [vmem:[%s3561_s24 + $0x70] sm:$0xff]  ;;  %v1167_v45 = vld [vmem:[%s3561_s24 + $0x78] sm:$0xff]  ;;  %v1104_v47 = vld [vmem:[#allocation2 + $0x80] sm:$0xff]  ;;  %v1261_v59 = vadd.f32 %v1197_v32, %v1133_v38  ;;  %2629 = vmatmul.mubr.msk.bf16.gmra.mrb[8].mxu0 %vm468_vm0, %v1285_v48  ;;  %v998_v0 = vadd.f32 %v994_v49, %v980_v34  ;;  %v999_v1 = vadd.f32 %v995_v50, %v981_v35  ;;  %v1000_v2 = vadd.f32 %v996_v51, %v982_v36 }
  0xa1   : > { %v1198_v46 = vld [vmem:[%s3561_s24 + $0x170] sm:$0xff]  ;;  %v1105_v52 = vld [vmem:[#allocation2 + $0x88] sm:$0xff]  ;;  %v1168_v54 = vld [vmem:[%s3561_s24 + $0x80] sm:$0xff]  ;;  %2632 = vmatprep.mubr.msk.bf16.mxu0 %vm468_vm0, %v1286_v57  ;;  %v1001_v6 = vadd.f32 %v997_v58, %v983_v42  ;;  %v1230_v8 = vadd.f32 %v1166_v41, %v1102_v39  ;;  %v1231_v9 = vadd.f32 %v1167_v45, %v1103_v40 }
  0xa2   : > { %v1169_v55 = vld [vmem:[%s3561_s24 + $0x88] sm:$0xff]  ;;  %v1013_v56 = vld [vmem:[%s3776_s13] sm:$0xff]  ;;  %v1134_v60 = vld [vmem:[#allocation2 + $0x170] sm:$0xff]  ;;  %v1302_v7 = vpack.c.bf16 %v1261_v59, %v3784_v44  ;;  %1002 = vst.msk [vmem:[#allocation2 + $0x1a0] sm:$0xff] %vm468_vm0, %v998_v0  ;;  %v1232_v14 = vadd.f32 %v1168_v54, %v1104_v47  ;;  %v1074_v0 = vstv %s2750_s26 }
  0xa3   : > { %v1199_v61 = vld [vmem:[%s3561_s24 + $0x178] sm:$0xff]  ;;  %v1014_v62 = vld [vmem:[%s3776_s13 + $0x8] sm:$0xff]  ;;  %v1015_v63 = vld [vmem:[%s3776_s13 + $0x10] sm:$0xff]  ;;  %1003 = vst.msk [vmem:[#allocation2 + $0x1a8] sm:$0xff] %vm468_vm0, %v999_v1  ;;  %v3817_v13 = vadd.f32 %v1198_v46, %v1134_v60  ;;  %v1233_v20 = vadd.f32 %v1169_v55, %v1105_v52  ;;  %v1021_v21 = vmul.f32 %v1019_v15, %v1013_v56  ;;  %v1287_v40 = vpack.c.bf16 %v1231_v9, %v1230_v8 }
  0xa4   : > { %v1016_v3 = vld [vmem:[%s3776_s13 + $0x18] sm:$0xff]  ;;  %v1027_v4 = vld [vmem:[%s3793_s19] sm:$0xff]  ;;  %v1028_v5 = vld [vmem:[%s3793_s19 + $0x8] sm:$0xff]  ;;  %1004 = vst.msk [vmem:[#allocation2 + $0x1b0] sm:$0xff] %vm468_vm0, %v1000_v2  ;;  %v1022_v22 = vmul.f32 %v1019_v15, %v1014_v62  ;;  %v1023_v23 = vmul.f32 %v1019_v15, %v1015_v63  ;;  %2661 = vmatmul.mubr.msk.bf16.gmra.mrb[8].mxu1 %vm468_vm0, %v1301_v53  ;;  %v1060_v53 = vstv %s3829_s27 }
  0xa5   : > { %v1135_v10 = vld [vmem:[#allocation2 + $0x178] sm:$0xff]  ;;  %v1029_v11 = vld [vmem:[%s3793_s19 + $0x10] sm:$0xff]  ;;  %v1136_v17 = vld [vmem:[#allocation2 + $0x180] sm:$0xff]  ;;  %1005 = vst.msk [vmem:[#allocation2 + $0x1b8] sm:$0xff] %vm468_vm0, %v1001_v6  ;;  %v1024_v27 = vmul.f32 %v1019_v15, %v1016_v3  ;;  %v1035_v28 = vmul.f32 %v1033_v16, %v1027_v4  ;;  %v1036_v29 = vmul.f32 %v1033_v16, %v1028_v5  ;;  %2664 = vmatprep.mubr.msk.bf16.mxu1 %vm468_vm0, %v1302_v7 }
  0xa6   : > { %v1030_v12 = vld [vmem:[%s3793_s19 + $0x18] sm:$0xff]  ;;  %v1200_v18 = vld [vmem:[%s3561_s24 + $0x180] sm:$0xff]  ;;  %v1201_v19 = vld [vmem:[%s3561_s24 + $0x188] sm:$0xff]  ;;  %v1263_v26 = vadd.f32 %v1199_v61, %v1135_v10  ;;  %v1037_v33 = vmul.f32 %v1033_v16, %v1029_v11  ;;  %v1288_v46 = vpack.c.bf16 %v1233_v20, %v1232_v14 }
  0xa7   : > { %v1137_v24 = vld [vmem:[#allocation2 + $0x188] sm:$0xff]  ;;  %v1106_v25 = vld [vmem:[#allocation2 + $0x90] sm:$0xff]  ;;  %v1107_v30 = vld [vmem:[#allocation2 + $0x98] sm:$0xff]  ;;  %v1038_v34 = vmul.f32 %v1033_v16, %v1030_v12  ;;  %v1264_v35 = vadd.f32 %v1200_v18, %v1136_v17  ;;  %v1039_v41 = vadd.f32 %v1035_v28, %v1021_v21  ;;  %v1040_v42 = vadd.f32 %v1036_v29, %v1022_v22 }
  0xa8   : > { %v1170_v31 = vld [vmem:[%s3561_s24 + $0x90] sm:$0xff]  ;;  %v1171_v32 = vld [vmem:[%s3561_s24 + $0x98] sm:$0xff]  ;;  %v1265_v36 = vadd.f32 %v1201_v19, %v1137_v24  ;;  %v1108_v37 = vld [vmem:[#allocation2 + $0xa0] sm:$0xff]  ;;  %v1041_v47 = vadd.f32 %v1037_v33, %v1023_v23  ;;  %2633 = vmatmul.mubr.msk.bf16.gmra.mrb[12].mxu0 %vm468_vm0, %v1287_v40  ;;  %v1303_v55 = vpack.c.bf16 %v1263_v26, %v3817_v13 }
  0xa9   : > { %v1109_v38 = vld [vmem:[#allocation2 + $0xa8] sm:$0xff]  ;;  %v1172_v39 = vld [vmem:[%s3561_s24 + $0xa0] sm:$0xff]  ;;  %v1042_v48 = vadd.f32 %v1038_v34, %v1024_v27  ;;  %v1202_v49 = vld [vmem:[%s3561_s24 + $0x190] sm:$0xff]  ;;  %1043 = vst.msk [vmem:[#allocation2 + $0x1c0] sm:$0xff] %vm468_vm0, %v1039_v41  ;;  %v1234_v56 = vadd.f32 %v1170_v31, %v1106_v25  ;;  %2636 = vmatprep.mubr.msk.bf16.mxu0 %vm468_vm0, %v1288_v46  ;;  %v1235_v61 = vadd.f32 %v1171_v32, %v1107_v30 }
  0xaa   : > { %v1173_v43 = vld [vmem:[%s3561_s24 + $0xa8] sm:$0xff]  ;;  %v1054_v44 = vld [vmem:[%s3824_s5] sm:$0xff]  ;;  %v1203_v50 = vld [vmem:[%s3561_s24 + $0x198] sm:$0xff]  ;;  %1044 = vst.msk [vmem:[#allocation2 + $0x1c8] sm:$0xff] %vm468_vm0, %v1040_v42  ;;  %v1304_v60 = vpack.c.bf16 %v1265_v36, %v1264_v35  ;;  %v1236_v2 = vadd.f32 %v1172_v39, %v1108_v37 }
  0xab   : > { %v1055_v45 = vld [vmem:[%s3824_s5 + $0x8] sm:$0xff]  ;;  %v1056_v51 = vld [vmem:[%s3824_s5 + $0x10] sm:$0xff]  ;;  %v1057_v52 = vld [vmem:[%s3824_s5 + $0x18] sm:$0xff]  ;;  %1045 = vst.msk [vmem:[#allocation2 + $0x1d0] sm:$0xff] %vm468_vm0, %v1041_v47  ;;  %v1237_v3 = vadd.f32 %v1173_v43, %v1109_v38  ;;  %v1062_v4 = vmul.f32 %v1060_v53, %v1054_v44  ;;  %v1289_v22 = vpack.c.bf16 %v1235_v61, %v1234_v56 }
  0xac   : > { %v1068_v54 = vld [vmem:[%s3832_s21] sm:$0xff]  ;;  %v1069_v57 = vld [vmem:[%s3832_s21 + $0x8] sm:$0xff]  ;;  %v1070_v58 = vld [vmem:[%s3832_s21 + $0x10] sm:$0xff]  ;;  %1046 = vst.msk [vmem:[#allocation2 + $0x1d8] sm:$0xff] %vm468_vm0, %v1042_v48  ;;  %v1063_v5 = vmul.f32 %v1060_v53, %v1055_v45  ;;  %v1064_v9 = vmul.f32 %v1060_v53, %v1056_v51  ;;  %v1065_v10 = vmul.f32 %v1060_v53, %v1057_v52  ;;  %2665 = vmatmul.mubr.msk.bf16.gmra.mrb[12].mxu1 %vm468_vm0, %v1303_v55 }
  0xad   : > { %v1071_v59 = vld [vmem:[%s3832_s21 + $0x18] sm:$0xff]  ;;  %v1138_v62 = vld [vmem:[#allocation2 + $0x190] sm:$0xff]  ;;  %v1204_v1 = vld [vmem:[%s3561_s24 + $0x1a0] sm:$0xff]  ;;  %v1076_v11 = vmul.f32 %v1074_v0, %v1068_v54  ;;  %v1077_v12 = vmul.f32 %v1074_v0, %v1069_v57  ;;  %v1078_v15 = vmul.f32 %v1074_v0, %v1070_v58  ;;  %2668 = vmatprep.mubr.msk.bf16.mxu1 %vm468_vm0, %v1304_v60  ;;  %v1290_v28 = vpack.c.bf16 %v1237_v3, %v1236_v2 }
  0xae   : > { %v1139_v63 = vld [vmem:[#allocation2 + $0x198] sm:$0xff]  ;;  %v1140_v6 = vld [vmem:[#allocation2 + $0x1a0] sm:$0xff]  ;;  %v1141_v7 = vld [vmem:[#allocation2 + $0x1a8] sm:$0xff]  ;;  %v1266_v13 = vadd.f32 %v1202_v49, %v1138_v62  ;;  %v1079_v16 = vmul.f32 %v1074_v0, %v1071_v59 }
  0xaf   : > { %v1205_v8 = vld [vmem:[%s3561_s24 + $0x1a8] sm:$0xff]  ;;  %v1267_v14 = vadd.f32 %v1203_v50, %v1139_v63  ;;  %v1080_v17 = vadd.f32 %v1076_v11, %v1062_v4  ;;  %v1081_v18 = vadd.f32 %v1077_v12, %v1063_v5  ;;  %v1268_v19 = vadd.f32 %v1204_v1, %v1140_v6  ;;  %v1110_v21 = vld [vmem:[#allocation2 + $0xb0] sm:$0xff]  ;;  %v1111_v25 = vld [vmem:[#allocation2 + $0xb8] sm:$0xff] }
  0xb0   : > { %v1269_v20 = vadd.f32 %v1205_v8, %v1141_v7  ;;  %v1082_v23 = vadd.f32 %v1078_v15, %v1064_v9  ;;  %v1083_v24 = vadd.f32 %v1079_v16, %v1065_v10  ;;  %v1174_v26 = vld [vmem:[%s3561_s24 + $0xb0] sm:$0xff]  ;;  %v1175_v27 = vld [vmem:[%s3561_s24 + $0xb8] sm:$0xff]  ;;  %v1112_v31 = vld [vmem:[#allocation2 + $0xc0] sm:$0xff]  ;;  %2637 = vmatmul.mubr.msk.bf16.gmra.mrb[16].mxu0 %vm468_vm0, %v1289_v22 }
  0xb1   : > { %1084 = vst.msk [vmem:[#allocation2 + $0x1e0] sm:$0xff] %vm468_vm0, %v1080_v17  ;;  %1085 = vst.msk [vmem:[#allocation2 + $0x1e8] sm:$0xff] %vm468_vm0, %v1081_v18  ;;  %v1206_v29 = vld [vmem:[%s3561_s24 + $0x1b0] sm:$0xff]  ;;  %v1207_v30 = vld [vmem:[%s3561_s24 + $0x1b8] sm:$0xff]  ;;  %v1305_v32 = vpack.c.bf16 %v1267_v14, %v1266_v13  ;;  %2640 = vmatprep.mubr.msk.bf16.mxu0 %vm468_vm0, %v1290_v28  ;;  %v1238_v40 = vadd.f32 %v1174_v26, %v1110_v21  ;;  %v1239_v41 = vadd.f32 %v1175_v27, %v1111_v25 }
  0xb2   : > { %1086 = vst.msk [vmem:[#allocation2 + $0x1f0] sm:$0xff] %vm468_vm0, %v1082_v23  ;;  %1087 = vst.msk [vmem:[#allocation2 + $0x1f8] sm:$0xff] %vm468_vm0, %v1083_v24  ;;  %v1113_v33 = vld [vmem:[#allocation2 + $0xc8] sm:$0xff]  ;;  %v1176_v34 = vld [vmem:[%s3561_s24 + $0xc0] sm:$0xff]  ;;  %v1306_v36 = vpack.c.bf16 %v1269_v20, %v1268_v19 }
  0xb3   : > { %v1177_v35 = vld [vmem:[%s3561_s24 + $0xc8] sm:$0xff]  ;;  %v1142_v37 = vld [vmem:[#allocation2 + $0x1b0] sm:$0xff]  ;;  %v1143_v38 = vld [vmem:[#allocation2 + $0x1b8] sm:$0xff]  ;;  %v1240_v45 = vadd.f32 %v1176_v34, %v1112_v31  ;;  %v1291_v52 = vpack.c.bf16 %v1239_v41, %v1238_v40 }
  0xb4   : > { %v1208_v39 = vld [vmem:[%s3561_s24 + $0x1c0] sm:$0xff]  ;;  %v1145_v43 = vld [vmem:[#allocation2 + $0x1c8] sm:$0xff]  ;;  %v1241_v46 = vadd.f32 %v1177_v35, %v1113_v33  ;;  %2669 = vmatmul.mubr.msk.bf16.gmra.mrb[16].mxu1 %vm468_vm0, %v1305_v32  ;;  %v1270_v47 = vadd.f32 %v1206_v29, %v1142_v37  ;;  %v1271_v48 = vadd.f32 %v1207_v30, %v1143_v38  ;;  %v1114_v51 = vld [vmem:[#allocation2 + $0xd0] sm:$0xff] }
  0xb5   : > { %v1144_v42 = vld [vmem:[#allocation2 + $0x1c0] sm:$0xff]  ;;  %v1209_v44 = vld [vmem:[%s3561_s24 + $0x1c8] sm:$0xff]  ;;  %2672 = vmatprep.mubr.msk.bf16.mxu1 %vm468_vm0, %v1306_v36  ;;  %v1115_v54 = vld [vmem:[#allocation2 + $0xd8] sm:$0xff] }
  0xb6   : > { %v1272_v49 = vadd.f32 %v1208_v39, %v1144_v42  ;;  %v1273_v50 = vadd.f32 %v1209_v44, %v1145_v43  ;;  %v1178_v55 = vld [vmem:[%s3561_s24 + $0xd0] sm:$0xff]  ;;  %v1179_v56 = vld [vmem:[%s3561_s24 + $0xd8] sm:$0xff]  ;;  %v1292_v57 = vpack.c.bf16 %v1241_v46, %v1240_v45  ;;  %v1116_v60 = vld [vmem:[#allocation2 + $0xe0] sm:$0xff]  ;;  %v1307_v61 = vpack.c.bf16 %v1271_v48, %v1270_v47 }
  0xb7   : > { %v1210_v58 = vld [vmem:[%s3561_s24 + $0x1d0] sm:$0xff]  ;;  %v1211_v59 = vld [vmem:[%s3561_s24 + $0x1d8] sm:$0xff]  ;;  %v1117_v62 = vld [vmem:[#allocation2 + $0xe8] sm:$0xff]  ;;  %v1242_v4 = vadd.f32 %v1178_v55, %v1114_v51  ;;  %v1243_v5 = vadd.f32 %v1179_v56, %v1115_v54 }
  0xb8   : > { %2641 = vmatmul.mubr.msk.bf16.gmra.mrb[20].mxu0 %vm468_vm0, %v1291_v52  ;;  %v1180_v63 = vld [vmem:[%s3561_s24 + $0xe0] sm:$0xff]  ;;  %v1181_v53 = vld [vmem:[%s3561_s24 + $0xe8] sm:$0xff]  ;;  %v1308_v0 = vpack.c.bf16 %v1273_v50, %v1272_v49  ;;  %v1146_v1 = vld [vmem:[#allocation2 + $0x1d0] sm:$0xff] }
  0xb9   : > { %2644 = vmatprep.mubr.msk.bf16.mxu0 %vm468_vm0, %v1292_v57  ;;  %v1147_v2 = vld [vmem:[#allocation2 + $0x1d8] sm:$0xff]  ;;  %v1212_v3 = vld [vmem:[%s3561_s24 + $0x1e0] sm:$0xff]  ;;  %v1149_v7 = vld [vmem:[#allocation2 + $0x1e8] sm:$0xff]  ;;  %v1244_v9 = vadd.f32 %v1180_v63, %v1116_v60  ;;  %v1245_v10 = vadd.f32 %v1181_v53, %v1117_v62  ;;  %v1274_v11 = vadd.f32 %v1210_v58, %v1146_v1  ;;  %v1293_v15 = vpack.c.bf16 %v1243_v5, %v1242_v4 }
  0xba   : > { %v1148_v6 = vld [vmem:[#allocation2 + $0x1e0] sm:$0xff]  ;;  %v1213_v8 = vld [vmem:[%s3561_s24 + $0x1e8] sm:$0xff]  ;;  %v1275_v12 = vadd.f32 %v1211_v59, %v1147_v2  ;;  %v1118_v16 = vld [vmem:[#allocation2 + $0xf0] sm:$0xff] }
  0xbb   : > { %v1276_v13 = vadd.f32 %v1212_v3, %v1148_v6  ;;  %v1277_v14 = vadd.f32 %v1213_v8, %v1149_v7  ;;  %v1294_v17 = vpack.c.bf16 %v1245_v10, %v1244_v9  ;;  %v1119_v18 = vld [vmem:[#allocation2 + $0xf8] sm:$0xff]  ;;  %v1182_v19 = vld [vmem:[%s3561_s24 + $0xf0] sm:$0xff]  ;;  %v3900_v33 = vld [vmem:[%s4317_s8] ss:$0 sm:$0xff] }
  0xbc   : > { %2673 = vmatmul.mubr.msk.bf16.gmra.mrb[20].mxu1 %vm468_vm0, %v1307_v61  ;;  %v1183_v20 = vld [vmem:[%s3561_s24 + $0xf8] sm:$0xff]  ;;  %v1309_v21 = vpack.c.bf16 %v1275_v12, %v1274_v11  ;;  %v1214_v22 = vld [vmem:[%s3561_s24 + $0x1f0] sm:$0xff]  ;;  %v1246_v27 = vadd.f32 %v1182_v19, %v1118_v16 }
  0xbd   : > { %2676 = vmatprep.mubr.msk.bf16.mxu1 %vm468_vm0, %v1308_v0  ;;  %v1310_v23 = vpack.c.bf16 %v1277_v14, %v1276_v13  ;;  %v1150_v24 = vld [vmem:[#allocation2 + $0x1f0] sm:$0xff]  ;;  %v1151_v25 = vld [vmem:[#allocation2 + $0x1f8] sm:$0xff]  ;;  %v1247_v28 = vadd.f32 %v1183_v20, %v1119_v18 }
  0xbe   : > { %v1215_v26 = vld [vmem:[%s3561_s24 + $0x1f8] sm:$0xff]  ;;  %v1278_v29 = vadd.f32 %v1214_v22, %v1150_v24 }
  0xbf   : > { %v1279_v30 = vadd.f32 %v1215_v26, %v1151_v25  ;;  %v1295_v31 = vpack.c.bf16 %v1247_v28, %v1246_v27 }
  0xc0   : > { %2645 = vmatmul.mubr.msk.bf16.gmra.mrb[24].mxu0 %vm468_vm0, %v1293_v15 }
  0xc1   : > { %2648 = vmatprep.mubr.msk.bf16.mxu0 %vm468_vm0, %v1294_v17  ;;  %v1311_v32 = vpack.c.bf16 %v1279_v30, %v1278_v29 }
  0xc4   : > { %2677 = vmatmul.mubr.msk.bf16.gmra.mrb[24].mxu1 %vm468_vm0, %v1309_v21 }
  0xc5   : > { %2680 = vmatprep.mubr.msk.bf16.mxu1 %vm468_vm0, %v1310_v23 }
  0xc8   : > { %2649 = vmatmul.mubr.msk.bf16.gmra.mrb[28].mxu0 %vm468_vm0, %v1295_v31 }
  0xcc   : > { %2681 = vmatmul.mubr.msk.bf16.gmra.mrb[28].mxu1 %vm468_vm0, %v1311_v32 }
 0x163   : > { %v2622_v34 = vpop.f32.mrb[0].mxu0 }
 0x164   : > { %v1466_v35 = vadd.f32 %v2622_v34, %v3900_v33  ;;  %v1457_v36 = vpop.f32.mrb[1].mxu0 }
 0x165   : > { %v1458_v37 = vadd.f32 %v3900_v33, %v1457_v36  ;;  %v2623_v38 = vpop.f32.mrb[2].mxu0 }
 0x166   : > { %v1714_v39 = vsub.f32 0.0, %v1466_v35  ;;  %v1469_v40 = vadd.f32 %v2623_v38, %v3900_v33  ;;  %v1460_v41 = vpop.f32.mrb[3].mxu0 }
 0x167   : > { %v2654_v42 = vpop.f32.mrb[0].mxu1  ;;  %v1712_v43 = vsub.f32 0.0, %v1458_v37  ;;  %v1461_v44 = vadd.f32 %v3900_v33, %v1460_v41 }
 0x168   : > { %v1780_v45 = vmul.f32 1.442695, %v1714_v39  ;;  %v1594_v46 = vadd.f32 %v2654_v42, %v3900_v33  ;;  %v1585_v47 = vpop.f32.mrb[1].mxu1  ;;  %v1715_v48 = vsub.f32 0.0, %v1469_v40 }
 0x169   : > { %v1776_v49 = vmul.f32 1.442695, %v1712_v43  ;;  %v1586_v50 = vadd.f32 %v3900_v33, %v1585_v47  ;;  %v2655_v51 = vpop.f32.mrb[2].mxu1  ;;  %v1713_v52 = vsub.f32 0.0, %v1461_v44 }
 0x16a   : > { %2794 = vpow2.f32 %v1780_v45  ;;  %v1746_v54 = vsub.f32 0.0, %v1594_v46  ;;  %v1782_v55 = vmul.f32 1.442695, %v1715_v48  ;;  %v1597_v56 = vadd.f32 %v2655_v51, %v3900_v33  ;;  %v1588_v57 = vpop.f32.mrb[3].mxu1 }
 0x16b   : > { %2796 = vpow2.f32 %v1776_v49  ;;  %v1744_v58 = vsub.f32 0.0, %v1586_v50  ;;  %v1778_v59 = vmul.f32 1.442695, %v1713_v52  ;;  %v1589_v60 = vadd.f32 %v3900_v33, %v1588_v57  ;;  %v2626_v61 = vpop.f32.mrb[4].mxu0 }
 0x16c   : > { %v1844_v62 = vmul.f32 1.442695, %v1746_v54  ;;  %2798 = vpow2.f32 %v1782_v55  ;;  %v1747_v63 = vsub.f32 0.0, %v1597_v56  ;;  %v1482_v53 = vadd.f32 %v2626_v61, %v3900_v33  ;;  %v1473_v0 = vpop.f32.mrb[5].mxu0 }
 0x16d   : > { %v1840_v1 = vmul.f32 1.442695, %v1744_v58  ;;  %2800 = vpow2.f32 %v1778_v59  ;;  %v1745_v2 = vsub.f32 0.0, %v1589_v60  ;;  %v1474_v3 = vadd.f32 %v3900_v33, %v1473_v0  ;;  %v2627_v4 = vpop.f32.mrb[6].mxu0 }
 0x16e   : > { %2802 = vpow2.f32 %v1844_v62  ;;  %v1846_v5 = vmul.f32 1.442695, %v1747_v63  ;;  %v1718_v6 = vsub.f32 0.0, %v1482_v53  ;;  %v1485_v7 = vadd.f32 %v2627_v4, %v3900_v33  ;;  %v1476_v8 = vpop.f32.mrb[7].mxu0 }
 0x16f   : > { %2804 = vpow2.f32 %v1840_v1  ;;  %v1842_v9 = vmul.f32 1.442695, %v1745_v2  ;;  %v2658_v10 = vpop.f32.mrb[4].mxu1  ;;  %v1716_v11 = vsub.f32 0.0, %v1474_v3  ;;  %v1477_v12 = vadd.f32 %v3900_v33, %v1476_v8 }
 0x170   : > { %2806 = vpow2.f32 %v1846_v5  ;;  %v1788_v13 = vmul.f32 1.442695, %v1718_v6  ;;  %v1610_v14 = vadd.f32 %v2658_v10, %v3900_v33  ;;  %v1601_v15 = vpop.f32.mrb[5].mxu1  ;;  %v1719_v16 = vsub.f32 0.0, %v1485_v7  ;;  %v2098_v10 = vld [vmem:[%s3926_s14 + $0x10] sm:$0xff] }
 0x171   : > { %2808 = vpow2.f32 %v1842_v9  ;;  %v1784_v17 = vmul.f32 1.442695, %v1716_v11  ;;  %v2659_v18 = vpop.f32.mrb[6].mxu1  ;;  %v1717_v19 = vsub.f32 0.0, %v1477_v12  ;;  %v1602_v30 = vadd.f32 %v3900_v33, %v1601_v15 }
 0x172   : > { %2810 = vpow2.f32 %v1788_v13  ;;  %v1750_v20 = vsub.f32 0.0, %v1610_v14  ;;  %v1790_v21 = vmul.f32 1.442695, %v1719_v16  ;;  %v1604_v22 = vpop.f32.mrb[7].mxu1  ;;  %v1613_v31 = vadd.f32 %v2659_v18, %v3900_v33  ;;  %v2096_v16 = vld [vmem:[%s3926_s14] sm:$0xff] }
 0x173   : > { %2812 = vpow2.f32 %v1784_v17  ;;  %v1786_v23 = vmul.f32 1.442695, %v1717_v19  ;;  %v2630_v24 = vpop.f32.mrb[8].mxu0  ;;  %v1605_v39 = vadd.f32 %v3900_v33, %v1604_v22  ;;  %v1748_v47 = vsub.f32 0.0, %v1602_v30  ;;  %v2099_v22 = vld [vmem:[%s3926_s14 + $0x18] sm:$0xff] }
 0x174   : > { %v2795_v25 = vpop.eup %2794  ;;  %v1852_v26 = vmul.f32 1.442695, %v1750_v20  ;;  %2814 = vpow2.f32 %v1790_v21  ;;  %v1489_v27 = vpop.f32.mrb[9].mxu0  ;;  %v1498_v43 = vadd.f32 %v2630_v24, %v3900_v33  ;;  %v1751_v48 = vsub.f32 0.0, %v1613_v31 }
 0x175   : > { %v2797_v28 = vpop.eup %2796  ;;  %v1906_v29 = vadd.f32 1.0, %v2795_v25  ;;  %2816 = vpow2.f32 %v1786_v23  ;;  %v2631_v32 = vpop.f32.mrb[10].mxu0  ;;  %v1749_v57 = vsub.f32 0.0, %v1605_v39  ;;  %v3929_v62 = vadd.f32 %v3900_v33, %v1489_v27 }
 0x176   : > { %v2799_v34 = vpop.eup %2798  ;;  %v1904_v35 = vadd.f32 1.0, %v2797_v28  ;;  %2818 = vpow2.f32 %v1852_v26  ;;  %v3917_v36 = vpop.f32.mrb[11].mxu0  ;;  %v1722_v61 = vsub.f32 0.0, %v1498_v43  ;;  %v1848_v1 = vmul.f32 1.442695, %v1748_v47  ;;  %v2131_v47 = vld [vmem:[%s3926_s14 + $0x118] sm:$0xff] }
 0x177   : > { %v2801_v37 = vpop.eup %2800  ;;  %2820 = vrcp.f32 %v1906_v29  ;;  %v1907_v38 = vadd.f32 1.0, %v2799_v34  ;;  %v2662_v40 = vpop.f32.mrb[8].mxu1  ;;  %v1854_v2 = vmul.f32 1.442695, %v1751_v48  ;;  %v1850_v12 = vmul.f32 1.442695, %v1749_v57 }
 0x178   : > { %v2803_v41 = vpop.eup %2802  ;;  %2822 = vrcp.f32 %v1904_v35  ;;  %v1905_v42 = vadd.f32 1.0, %v2801_v37  ;;  %v1617_v44 = vpop.f32.mrb[9].mxu1  ;;  %v1626_v52 = vadd.f32 %v2662_v40, %v3900_v33  ;;  %v1501_v13 = vadd.f32 %v2631_v32, %v3900_v33  ;;  %v2097_v29 = vld [vmem:[%s3926_s14 + $0x8] sm:$0xff]  ;;  %v2130_v35 = vld [vmem:[%s3926_s14 + $0x110] sm:$0xff] }
 0x179   : > { %v2805_v45 = vpop.eup %2804  ;;  %v1938_v46 = vadd.f32 1.0, %v2803_v41  ;;  %2824 = vrcp.f32 %v1907_v38  ;;  %v2663_v49 = vpop.f32.mrb[10].mxu1  ;;  %v1618_v7 = vadd.f32 %v3900_v33, %v1617_v44  ;;  %v1796_v17 = vmul.f32 1.442695, %v1722_v61  ;;  %v2128_v41 = vld [vmem:[%s3926_s14 + $0x100] sm:$0xff]  ;;  %v2102_v61 = vld [vmem:[%s3926_s14 + $0x30] sm:$0xff] }
 0x17a   : > { %v2807_v50 = vpop.eup %2806  ;;  %v1936_v51 = vadd.f32 1.0, %v2805_v45  ;;  %2826 = vrcp.f32 %v1905_v42  ;;  %v1620_v54 = vpop.f32.mrb[11].mxu1  ;;  %v1754_v6 = vsub.f32 0.0, %v1626_v52  ;;  %v1720_v18 = vsub.f32 0.0, %v3929_v62 }
 0x17b   : > { %v2809_v55 = vpop.eup %2808  ;;  %2828 = vrcp.f32 %v1938_v46  ;;  %v1939_v56 = vadd.f32 1.0, %v2807_v50  ;;  %v2634_v58 = vpop.f32.mrb[12].mxu0  ;;  %v1629_v19 = vadd.f32 %v2663_v49, %v3900_v33  ;;  %v1493_v25 = vadd.f32 %v3900_v33, %v3917_v36 }
 0x17c   : > { %v2811_v59 = vpop.eup %2810  ;;  %2830 = vrcp.f32 %v1936_v51  ;;  %v1937_v60 = vadd.f32 1.0, %v2809_v55  ;;  %v3931_v63 = vpop.f32.mrb[13].mxu0  ;;  %v1860_v30 = vmul.f32 1.442695, %v1754_v6  ;;  %v1752_v31 = vsub.f32 0.0, %v1618_v7  ;;  %v2129_v55 = vld [vmem:[%s3926_s14 + $0x108] sm:$0xff] }
 0x17d   : > { %v2813_v53 = vpop.eup %2812  ;;  %2832 = vrcp.f32 %v1939_v56  ;;  %v1910_v0 = vadd.f32 1.0, %v2811_v59  ;;  %v3933_v3 = vpop.f32.mrb[14].mxu0  ;;  %v1723_v38 = vsub.f32 0.0, %v1501_v13  ;;  %v1621_v36 = vadd.f32 %v3900_v33, %v1620_v54 }
 0x17e   : > { %v2815_v4 = vpop.eup %2814  ;;  %2834 = vrcp.f32 %v1937_v60  ;;  %v1908_v5 = vadd.f32 1.0, %v2813_v53  ;;  %v3936_v8 = vpop.f32.mrb[15].mxu0  ;;  %v1755_v43 = vsub.f32 0.0, %v1629_v19  ;;  %v1514_v44 = vadd.f32 %v2634_v58, %v3900_v33  ;;  %v2134_v19 = vld [vmem:[%s3926_s14 + $0x130] sm:$0xff] }
 0x17f   : > { %v2817_v9 = vpop.eup %2816  ;;  %2836 = vrcp.f32 %v1910_v0  ;;  %v1911_v11 = vadd.f32 1.0, %v2815_v4  ;;  %v2666_v14 = vpop.f32.mrb[12].mxu1  ;;  %v1792_v49 = vmul.f32 1.442695, %v1720_v18  ;;  %v1721_v50 = vsub.f32 0.0, %v1493_v25  ;;  %v2100_v4 = vld [vmem:[%s3926_s14 + $0x20] sm:$0xff] }
 0x180   : > { %v2819_v15 = vpop.eup %2818  ;;  %2838 = vrcp.f32 %v1908_v5  ;;  %v3943_v20 = vpop.f32.mrb[13].mxu1  ;;  %v1909_v24 = vadd.f32 1.0, %v2817_v9  ;;  %v1856_v56 = vmul.f32 1.442695, %v1752_v31  ;;  %v1642_v57 = vadd.f32 %v2666_v14, %v3900_v33  ;;  %v2101_v31 = vld [vmem:[%s3926_s14 + $0x28] sm:$0xff] }
 0x181   : > { %v2821_v21 = vpop.eup %2820  ;;  %v1942_v23 = vadd.f32 1.0, %v2819_v15  ;;  %2840 = vpow2.f32 %v1848_v1  ;;  %v3954_v26 = vpop.f32.mrb[14].mxu1  ;;  %v1798_v62 = vmul.f32 1.442695, %v1723_v38  ;;  %v1753_v53 = vsub.f32 0.0, %v1621_v36  ;;  %v2103_v15 = vld [vmem:[%s3926_s14 + $0x38] sm:$0xff] }
 0x182   : > { %v2823_v27 = vpop.eup %2822  ;;  %v2162_v28 = vmul.f32 %v2821_v21, %v2098_v10  ;;  %2842 = vrcp.f32 %v1911_v11  ;;  %v3957_v32 = vpop.f32.mrb[15].mxu1  ;;  %v1862_v5 = vmul.f32 1.442695, %v1755_v43  ;;  %v1726_v6 = vsub.f32 0.0, %v1514_v44 }
 0x183   : > { %v2825_v34 = vpop.eup %2824  ;;  %v2160_v37 = vmul.f32 %v2823_v27, %v2096_v16  ;;  %2844 = vrcp.f32 %v1942_v23  ;;  %v3961_v39 = vpop.f32.mrb[16].mxu0  ;;  %v1794_v11 = vmul.f32 1.442695, %v1721_v50  ;;  %v1758_v16 = vsub.f32 0.0, %v1642_v57 }
 0x184   : > { %v2827_v40 = vpop.eup %2826  ;;  %2227 = vst.msk [vmem:[%s3949_s22 + $0x10] sm:$0xff] %vm2224_vm1, %v2162_v28  ;;  %v2163_v42 = vmul.f32 %v2825_v34, %v2099_v22  ;;  %2846 = vpow2.f32 %v1854_v2  ;;  %v3967_v45 = vpop.f32.mrb[17].mxu0  ;;  %v1858_v22 = vmul.f32 1.442695, %v1753_v53  ;;  %v1804_v27 = vmul.f32 1.442695, %v1726_v6 }
 0x185   : > { %v2829_v46 = vpop.eup %2828  ;;  %2225 = vst.msk [vmem:[%s3949_s22] sm:$0xff] %vm2224_vm1, %v2160_v37  ;;  %v2161_v48 = vmul.f32 %v2827_v40, %v2097_v29  ;;  %2848 = vrcp.f32 %v1909_v24  ;;  %v3972_v51 = vpop.f32.mrb[18].mxu0  ;;  %v1868_v38 = vmul.f32 1.442695, %v1758_v16  ;;  %v1506_v36 = vadd.f32 %v3900_v33, %v3931_v63 }
 0x186   : > { %v2831_v52 = vpop.eup %2830  ;;  %v2194_v54 = vmul.f32 %v2829_v46, %v2130_v35  ;;  %2228 = vst.msk [vmem:[%s3949_s22 + $0x18] sm:$0xff] %vm2224_vm1, %v2163_v42  ;;  %2850 = vpow2.f32 %v1850_v12  ;;  %v3978_v58 = vpop.f32.mrb[19].mxu0  ;;  %v1634_v43 = vadd.f32 %v3900_v33, %v3943_v20  ;;  %v1517_v50 = vadd.f32 %v3933_v3, %v3900_v33 }
 0x187   : > { %v2833_v59 = vpop.eup %2832  ;;  %v2192_v60 = vmul.f32 %v2831_v52, %v2128_v41  ;;  %2226 = vst.msk [vmem:[%s3949_s22 + $0x8] sm:$0xff] %vm2224_vm1, %v2161_v48  ;;  %2852 = vpow2.f32 %v1796_v17  ;;  %v3983_v0 = vpop.f32.mrb[16].mxu1 }
 0x188   : > { %v2835_v1 = vpop.eup %2834  ;;  %2259 = vst.msk [vmem:[%s3949_s22 + $0x110] sm:$0xff] %vm2224_vm1, %v2194_v54  ;;  %v2195_v2 = vmul.f32 %v2833_v59, %v2131_v47  ;;  %2854 = vpow2.f32 %v1860_v30  ;;  %v3988_v7 = vpop.f32.mrb[17].mxu1 }
 0x189   : > { %v2837_v9 = vpop.eup %2836  ;;  %2257 = vst.msk [vmem:[%s3949_s22 + $0x100] sm:$0xff] %vm2224_vm1, %v2192_v60  ;;  %v2193_v10 = vmul.f32 %v2835_v1, %v2129_v55  ;;  %2856 = vpow2.f32 %v1792_v49  ;;  %v3992_v12 = vpop.f32.mrb[18].mxu1  ;;  %v1724_v55 = vsub.f32 0.0, %v1506_v36  ;;  %v1509_v1 = vadd.f32 %v3900_v33, %v3936_v8 }
 0x18a   : > { %v2839_v13 = vpop.eup %2838  ;;  %2260 = vst.msk [vmem:[%s3949_s22 + $0x118] sm:$0xff] %vm2224_vm1, %v2195_v2  ;;  %v2166_v14 = vmul.f32 %v2837_v9, %v2102_v61  ;;  %2858 = vpow2.f32 %v1856_v56  ;;  %v3997_v17 = vpop.f32.mrb[19].mxu1  ;;  %v1645_v56 = vadd.f32 %v3954_v26, %v3900_v33  ;;  %v1756_v61 = vsub.f32 0.0, %v1634_v43 }
 0x18b   : > { %v2841_v18 = vpop.eup %2840  ;;  %2258 = vst.msk [vmem:[%s3949_s22 + $0x108] sm:$0xff] %vm2224_vm1, %v2193_v10  ;;  %v2164_v21 = vmul.f32 %v2839_v13, %v2100_v4  ;;  %2860 = vpow2.f32 %v1798_v62  ;;  %v4002_v23 = vpop.f32.mrb[20].mxu0  ;;  %v2132_v10 = vld [vmem:[%s3926_s14 + $0x120] sm:$0xff]  ;;  %v1800_v13 = vmul.f32 1.442695, %v1724_v55 }
 0x18c   : > { %v2843_v24 = vpop.eup %2842  ;;  %2231 = vst.msk [vmem:[%s3949_s22 + $0x30] sm:$0xff] %vm2224_vm1, %v2166_v14  ;;  %v1940_v25 = vadd.f32 1.0, %v2841_v18  ;;  %2862 = vpow2.f32 %v1862_v5  ;;  %v4006_v28 = vpop.f32.mrb[21].mxu0  ;;  %v1727_v5 = vsub.f32 0.0, %v1517_v50  ;;  %v1759_v14 = vsub.f32 0.0, %v1645_v56 }
 0x18d   : > { %v2845_v29 = vpop.eup %2844  ;;  %2229 = vst.msk [vmem:[%s3949_s22 + $0x20] sm:$0xff] %vm2224_vm1, %v2164_v21  ;;  %v2167_v30 = vmul.f32 %v2843_v24, %v2103_v15  ;;  %2864 = vpow2.f32 %v1794_v11  ;;  %v4011_v34 = vpop.f32.mrb[22].mxu0  ;;  %v1864_v18 = vmul.f32 1.442695, %v1756_v61  ;;  %v2138_v61 = vld [vmem:[%s3926_s14 + $0x150] sm:$0xff] }
 0x18e   : > { %v2847_v35 = vpop.eup %2846  ;;  %v2198_v37 = vmul.f32 %v2845_v29, %v2134_v19  ;;  %2866 = vrcp.f32 %v1940_v25  ;;  %v4015_v40 = vpop.f32.mrb[23].mxu0  ;;  %v1637_v19 = vadd.f32 %v3900_v33, %v3957_v32  ;;  %v1725_v25 = vsub.f32 0.0, %v1509_v1 }
 0x18f   : > { %v2849_v41 = vpop.eup %2848  ;;  %2232 = vst.msk [vmem:[%s3949_s22 + $0x38] sm:$0xff] %vm2224_vm1, %v2167_v30  ;;  %v1943_v42 = vadd.f32 1.0, %v2847_v35  ;;  %2868 = vpow2.f32 %v1858_v22  ;;  %v4021_v44 = vpop.f32.mrb[20].mxu1  ;;  %v2135_v35 = vld [vmem:[%s3926_s14 + $0x138] sm:$0xff]  ;;  %v1658_v32 = vadd.f32 %v3983_v0, %v3900_v33 }
 0x190   : > { %v2851_v46 = vpop.eup %2850  ;;  %2263 = vst.msk [vmem:[%s3949_s22 + $0x130] sm:$0xff] %vm2224_vm1, %v2198_v37  ;;  %v2165_v47 = vmul.f32 %v2849_v41, %v2101_v31  ;;  %2870 = vpow2.f32 %v1804_v27  ;;  %v4025_v48 = vpop.f32.mrb[21].mxu1  ;;  %v1530_v27 = vadd.f32 %v3961_v39, %v3900_v33  ;;  %v1806_v37 = vmul.f32 1.442695, %v1727_v5  ;;  %v2104_v5 = vld [vmem:[%s3926_s14 + $0x40] sm:$0xff] }
 0x191   : > { %v2853_v63 = vpop.eup %2852  ;;  %2872 = vrcp.f32 %v1943_v42  ;;  %v1941_v49 = vadd.f32 1.0, %v2851_v46  ;;  %v4029_v52 = vpop.f32.mrb[22].mxu1  ;;  %v1870_v42 = vmul.f32 1.442695, %v1759_v14  ;;  %v1522_v39 = vadd.f32 %v3900_v33, %v3967_v45  ;;  %v2106_v45 = vld [vmem:[%s3926_s14 + $0x50] sm:$0xff] }
 0x192   : > { %v2855_v54 = vpop.eup %2854  ;;  %2230 = vst.msk [vmem:[%s3949_s22 + $0x28] sm:$0xff] %vm2224_vm1, %v2165_v47  ;;  %v1914_v20 = vadd.f32 1.0, %v2853_v63  ;;  %2874 = vpow2.f32 %v1868_v38  ;;  %v4035_v57 = vpop.f32.mrb[23].mxu1  ;;  %v2133_v47 = vld [vmem:[%s3926_s14 + $0x128] sm:$0xff]  ;;  %v1757_v0 = vsub.f32 0.0, %v1637_v19  ;;  %v1730_v56 = vsub.f32 0.0, %v1530_v27 }
 0x193   : > { %v2857_v59 = vpop.eup %2856  ;;  %2876 = vrcp.f32 %v1941_v49  ;;  %v1946_v60 = vadd.f32 1.0, %v2855_v54  ;;  %v4037_v62 = vpop.f32.mrb[24].mxu0  ;;  %v1650_v49 = vadd.f32 %v3900_v33, %v3988_v7  ;;  %v1802_v55 = vmul.f32 1.442695, %v1725_v25 }
 0x194   : > { %v2859_v3 = vpop.eup %2858  ;;  %2878 = vrcp.f32 %v1914_v20  ;;  %v1912_v53 = vadd.f32 1.0, %v2857_v59  ;;  %v4041_v2 = vpop.f32.mrb[25].mxu0  ;;  %v1533_v7 = vadd.f32 %v3972_v51, %v3900_v33  ;;  %v2136_v51 = vld [vmem:[%s3926_s14 + $0x140] sm:$0xff]  ;;  %v1525_v25 = vadd.f32 %v3900_v33, %v3978_v58  ;;  %v2105_v58 = vld [vmem:[%s3926_s14 + $0x48] sm:$0xff] }
 0x195   : > { %v2861_v4 = vpop.eup %2860  ;;  %2880 = vrcp.f32 %v1946_v60  ;;  %v1944_v26 = vadd.f32 1.0, %v2859_v3  ;;  %v4043_v6 = vpop.f32.mrb[26].mxu0 }
 0x196   : > { %v2863_v9 = vpop.eup %2862  ;;  %2882 = vrcp.f32 %v1912_v53  ;;  %v1915_v11 = vadd.f32 1.0, %v2861_v4  ;;  %v4046_v15 = vpop.f32.mrb[27].mxu0  ;;  %v1762_v53 = vsub.f32 0.0, %v1658_v32 }
 0x197   : > { %v2865_v16 = vpop.eup %2864  ;;  %2884 = vrcp.f32 %v1944_v26  ;;  %v1947_v8 = vadd.f32 1.0, %v2863_v9  ;;  %v4050_v21 = vpop.f32.mrb[24].mxu1  ;;  %v1728_v9 = vsub.f32 0.0, %v1522_v39 }
 0x198   : > { %v2867_v22 = vpop.eup %2866  ;;  %2886 = vrcp.f32 %v1915_v11  ;;  %v1913_v24 = vadd.f32 1.0, %v2865_v16  ;;  %v4054_v29 = vpop.f32.mrb[25].mxu1  ;;  %v1866_v16 = vmul.f32 1.442695, %v1757_v0  ;;  %v1876_v32 = vmul.f32 1.442695, %v1762_v53 }
 0x199   : > { %v2869_v30 = vpop.eup %2868  ;;  %v2196_v31 = vmul.f32 %v2867_v22, %v2132_v10  ;;  %2888 = vrcp.f32 %v1947_v8  ;;  %v4059_v38 = vpop.f32.mrb[26].mxu1  ;;  %v1661_v10 = vadd.f32 %v3992_v12, %v3900_v33  ;;  %v1760_v8 = vsub.f32 0.0, %v1650_v49 }
 0x19a   : > { %v2871_v36 = vpop.eup %2870  ;;  %2890 = vrcp.f32 %v1913_v24  ;;  %v1945_v41 = vadd.f32 1.0, %v2869_v30  ;;  %v4063_v43 = vpop.f32.mrb[27].mxu1  ;;  %v2107_v24 = vld [vmem:[%s3926_s14 + $0x58] sm:$0xff]  ;;  %v1812_v12 = vmul.f32 1.442695, %v1730_v56 }
 0x19b   : > { %v2873_v46 = vpop.eup %2872  ;;  %2261 = vst.msk [vmem:[%s3949_s22 + $0x120] sm:$0xff] %vm2224_vm1, %v2196_v31  ;;  %v1918_v63 = vadd.f32 1.0, %v2871_v36  ;;  %2892 = vpow2.f32 %v1800_v13  ;;  %v4070_v50 = vpop.f32.mrb[28].mxu0  ;;  %v1731_v36 = vsub.f32 0.0, %v1533_v7  ;;  %v1872_v49 = vmul.f32 1.442695, %v1760_v8 }
 0x19c   : > { %v2875_v54 = vpop.eup %2874  ;;  %v2199_v20 = vmul.f32 %v2873_v46, %v2135_v35  ;;  %2894 = vrcp.f32 %v1945_v41  ;;  %v4073_v59 = vpop.f32.mrb[29].mxu0  ;;  %v2139_v35 = vld [vmem:[%s3926_s14 + $0x158] sm:$0xff]  ;;  %v1808_v46 = vmul.f32 1.442695, %v1728_v9  ;;  %v2142_v9 = vld [vmem:[%s3926_s14 + $0x170] sm:$0xff] }
 0x19d   : > { %v2877_v60 = vpop.eup %2876  ;;  %2896 = vrcp.f32 %v1918_v63  ;;  %v1950_v3 = vadd.f32 1.0, %v2875_v54  ;;  %v4078_v1 = vpop.f32.mrb[30].mxu0 }
 0x19e   : > { %v2879_v4 = vpop.eup %2878  ;;  %2264 = vst.msk [vmem:[%s3949_s22 + $0x138] sm:$0xff] %vm2224_vm1, %v2199_v20  ;;  %v2197_v26 = vmul.f32 %v2877_v60, %v2133_v47  ;;  %2898 = vpow2.f32 %v1864_v18  ;;  %v4085_v11 = vpop.f32.mrb[31].mxu0  ;;  %v1763_v47 = vsub.f32 0.0, %v1661_v10 }
 0x19f   : > { %v2881_v13 = vpop.eup %2880  ;;  %v2170_v14 = vmul.f32 %v2879_v4, %v2106_v45  ;;  %2900 = vrcp.f32 %v1950_v3  ;;  %v4088_v19 = vpop.f32.mrb[28].mxu1  ;;  %v2137_v45 = vld [vmem:[%s3926_s14 + $0x148] sm:$0xff]  ;;  %v1814_v3 = vmul.f32 1.442695, %v1731_v36 }
 0x1a0   : > { %v2883_v22 = vpop.eup %2882  ;;  %2262 = vst.msk [vmem:[%s3949_s22 + $0x128] sm:$0xff] %vm2224_vm1, %v2197_v26  ;;  %v2202_v18 = vmul.f32 %v2881_v13, %v2138_v61  ;;  %2902 = vpow2.f32 %v1806_v37  ;;  %v4095_v27 = vpop.f32.mrb[29].mxu1  ;;  %v2110_v61 = vld [vmem:[%s3926_s14 + $0x70] sm:$0xff]  ;;  %v1878_v4 = vmul.f32 1.442695, %v1763_v47 }
 0x1a1   : > { %v2885_v30 = vpop.eup %2884  ;;  %2235 = vst.msk [vmem:[%s3949_s22 + $0x50] sm:$0xff] %vm2224_vm1, %v2170_v14  ;;  %v2168_v31 = vmul.f32 %v2883_v22, %v2104_v5  ;;  %2904 = vpow2.f32 %v1870_v42  ;;  %v4100_v41 = vpop.f32.mrb[30].mxu1  ;;  %v1546_v22 = vadd.f32 %v4002_v23, %v3900_v33  ;;  %v1538_v23 = vadd.f32 %v3900_v33, %v4006_v28 }
 0x1a2   : > { %v2887_v39 = vpop.eup %2886  ;;  %2267 = vst.msk [vmem:[%s3949_s22 + $0x150] sm:$0xff] %vm2224_vm1, %v2202_v18  ;;  %v2200_v37 = vmul.f32 %v2885_v30, %v2136_v51  ;;  %2906 = vpow2.f32 %v1802_v55  ;;  %v4105_v63 = vpop.f32.mrb[31].mxu1  ;;  %v1729_v55 = vsub.f32 0.0, %v1525_v25  ;;  %v1653_v51 = vadd.f32 %v3900_v33, %v3997_v17 }
 0x1a3   : > { %v2889_v0 = vpop.eup %2888  ;;  %2233 = vst.msk [vmem:[%s3949_s22 + $0x40] sm:$0xff] %vm2224_vm1, %v2168_v31  ;;  %v2171_v42 = vmul.f32 %v2887_v39, %v2107_v24  ;;  %2908 = vpow2.f32 %v1866_v16  ;;  %v1674_v30 = vadd.f32 %v4021_v44, %v3900_v33  ;;  %v1734_v39 = vsub.f32 0.0, %v1546_v22 }
 0x1a4   : > { %v2891_v54 = vpop.eup %2890  ;;  %2265 = vst.msk [vmem:[%s3949_s22 + $0x140] sm:$0xff] %vm2224_vm1, %v2200_v37  ;;  %v2203_v20 = vmul.f32 %v2889_v0, %v2139_v35  ;;  %2910 = vpow2.f32 %v1812_v12  ;;  %v1810_v14 = vmul.f32 1.442695, %v1729_v55  ;;  %v1761_v35 = vsub.f32 0.0, %v1653_v51 }
 0x1a5   : > { %v2893_v56 = vpop.eup %2892  ;;  %2236 = vst.msk [vmem:[%s3949_s22 + $0x58] sm:$0xff] %vm2224_vm1, %v2171_v42  ;;  %v2169_v60 = vmul.f32 %v2891_v54, %v2105_v58  ;;  %2912 = vpow2.f32 %v1876_v32  ;;  %v1666_v44 = vadd.f32 %v3900_v33, %v4025_v48  ;;  %v1766_v0 = vsub.f32 0.0, %v1674_v30  ;;  %v2109_v30 = vld [vmem:[%s3926_s14 + $0x68] sm:$0xff] }
 0x1a6   : > { %v2895_v53 = vpop.eup %2894  ;;  %2268 = vst.msk [vmem:[%s3949_s22 + $0x158] sm:$0xff] %vm2224_vm1, %v2203_v20  ;;  %v1916_v7 = vadd.f32 1.0, %v2893_v56  ;;  %2914 = vpow2.f32 %v1808_v46  ;;  %v1874_v28 = vmul.f32 1.442695, %v1761_v35  ;;  %v1732_v20 = vsub.f32 0.0, %v1538_v23 }
 0x1a7   : > { %v2897_v26 = vpop.eup %2896  ;;  %2234 = vst.msk [vmem:[%s3949_s22 + $0x48] sm:$0xff] %vm2224_vm1, %v2169_v60  ;;  %v2201_v5 = vmul.f32 %v2895_v53, %v2137_v45  ;;  %2916 = vpow2.f32 %v1872_v49  ;;  %v2108_v49 = vld [vmem:[%s3926_s14 + $0x60] sm:$0xff]  ;;  %v1820_v56 = vmul.f32 1.442695, %v1734_v39  ;;  %v1549_v60 = vadd.f32 %v4011_v34, %v3900_v33 }
 0x1a8   : > { %v2899_v10 = vpop.eup %2898  ;;  %v2174_v13 = vmul.f32 %v2897_v26, %v2110_v61  ;;  %2918 = vrcp.f32 %v1916_v7  ;;  %v1677_v53 = vadd.f32 %v4029_v52, %v3900_v33  ;;  %v2140_v26 = vld [vmem:[%s3926_s14 + $0x160] sm:$0xff]  ;;  %v2111_v52 = vld [vmem:[%s3926_s14 + $0x78] sm:$0xff]  ;;  %v1562_v22 = vadd.f32 %v4037_v62, %v3900_v33 }
 0x1a9   : > { %v2901_v16 = vpop.eup %2900  ;;  %2266 = vst.msk [vmem:[%s3949_s22 + $0x148] sm:$0xff] %vm2224_vm1, %v2201_v5  ;;  %v1948_v8 = vadd.f32 1.0, %v2899_v10  ;;  %2920 = vpow2.f32 %v1814_v3  ;;  %v1764_v3 = vsub.f32 0.0, %v1666_v44  ;;  %v1884_v5 = vmul.f32 1.442695, %v1766_v0  ;;  %v2114_v44 = vld [vmem:[%s3926_s14 + $0x90] sm:$0xff] }
 0x1aa   : > { %v2903_v18 = vpop.eup %2902  ;;  %2239 = vst.msk [vmem:[%s3949_s22 + $0x70] sm:$0xff] %vm2224_vm1, %v2174_v13  ;;  %v2206_v24 = vmul.f32 %v2901_v16, %v2142_v9  ;;  %2922 = vpow2.f32 %v1878_v4  ;;  %v1541_v9 = vadd.f32 %v3900_v33, %v4015_v40  ;;  %v1816_v13 = vmul.f32 1.442695, %v1732_v20  ;;  %v2112_v20 = vld [vmem:[%s3926_s14 + $0x80] sm:$0xff] }
 0x1ab   : > { %v2905_v12 = vpop.eup %2904  ;;  %2924 = vrcp.f32 %v1948_v8  ;;  %v1919_v25 = vadd.f32 1.0, %v2903_v18  ;;  %v1735_v8 = vsub.f32 0.0, %v1549_v60  ;;  %v1690_v35 = vadd.f32 %v4050_v21, %v3900_v33 }
 0x1ac   : > { %v2907_v17 = vpop.eup %2906  ;;  %2271 = vst.msk [vmem:[%s3949_s22 + $0x170] sm:$0xff] %vm2224_vm1, %v2206_v24  ;;  %v1951_v31 = vadd.f32 1.0, %v2905_v12  ;;  %2926 = vpow2.f32 %v1810_v14  ;;  %v1669_v14 = vadd.f32 %v3900_v33, %v4035_v57  ;;  %v2143_v24 = vld [vmem:[%s3926_s14 + $0x178] sm:$0xff]  ;;  %v1880_v12 = vmul.f32 1.442695, %v1764_v3 }
 0x1ad   : > { %v2909_v32 = vpop.eup %2908  ;;  %2928 = vrcp.f32 %v1919_v25  ;;  %v1917_v36 = vadd.f32 1.0, %v2907_v17  ;;  %v1767_v25 = vsub.f32 0.0, %v1677_v53  ;;  %v1554_v39 = vadd.f32 %v3900_v33, %v4041_v2 }
 0x1ae   : > { %v2911_v37 = vpop.eup %2910  ;;  %2930 = vrcp.f32 %v1951_v31  ;;  %v1949_v58 = vadd.f32 1.0, %v2909_v32  ;;  %v1733_v31 = vsub.f32 0.0, %v1541_v9  ;;  %v2141_v32 = vld [vmem:[%s3926_s14 + $0x168] sm:$0xff] }
 0x1af   : > { %v2913_v46 = vpop.eup %2912  ;;  %2932 = vrcp.f32 %v1917_v36  ;;  %v1922_v47 = vadd.f32 1.0, %v2911_v37  ;;  %v1765_v36 = vsub.f32 0.0, %v1669_v14 }
 0x1b0   : > { %v2915_v42 = vpop.eup %2914  ;;  %2934 = vrcp.f32 %v1949_v58  ;;  %v1954_v54 = vadd.f32 1.0, %v2913_v46  ;;  %v1822_v46 = vmul.f32 1.442695, %v1735_v8 }
 0x1b1   : > { %v2917_v45 = vpop.eup %2916  ;;  %2936 = vrcp.f32 %v1922_v47  ;;  %v1920_v55 = vadd.f32 1.0, %v2915_v42  ;;  %v1738_v47 = vsub.f32 0.0, %v1562_v22  ;;  %v2146_v42 = vld [vmem:[%s3926_s14 + $0x190] sm:$0xff]  ;;  %v2113_v22 = vld [vmem:[%s3926_s14 + $0x88] sm:$0xff] }
 0x1b2   : > { %v2919_v61 = vpop.eup %2918  ;;  %2938 = vrcp.f32 %v1954_v54  ;;  %v1952_v48 = vadd.f32 1.0, %v2917_v45  ;;  %v1682_v54 = vadd.f32 %v3900_v33, %v4054_v29  ;;  %v1818_v45 = vmul.f32 1.442695, %v1733_v31 }
 0x1b3   : > { %v2921_v7 = vpop.eup %2920  ;;  %v2172_v4 = vmul.f32 %v2919_v61, %v2108_v49  ;;  %2940 = vrcp.f32 %v1920_v55  ;;  %v1886_v49 = vmul.f32 1.442695, %v1767_v25  ;;  %v1770_v55 = vsub.f32 0.0, %v1690_v35  ;;  %v2144_v61 = vld [vmem:[%s3926_s14 + $0x180] sm:$0xff] }
 0x1b4   : > { %v2923_v10 = vpop.eup %2922  ;;  %2942 = vrcp.f32 %v1952_v48  ;;  %v1923_v34 = vadd.f32 1.0, %v2921_v7  ;;  %v1882_v48 = vmul.f32 1.442695, %v1765_v36  ;;  %v1736_v33 = vsub.f32 0.0, %v1554_v39 }
 0x1b5   : > { %v2925_v51 = vpop.eup %2924  ;;  %2237 = vst.msk [vmem:[%s3949_s22 + $0x60] sm:$0xff] %vm2224_vm1, %v2172_v4  ;;  %v1955_v16 = vadd.f32 1.0, %v2923_v10  ;;  %2944 = vpow2.f32 %v1874_v28  ;;  %v1828_v53 = vmul.f32 1.442695, %v1738_v47 }
 0x1b6   : > { %v2927_v40 = vpop.eup %2926  ;;  %v2204_v18 = vmul.f32 %v2925_v51, %v2140_v26  ;;  %2946 = vrcp.f32 %v1923_v34  ;;  %v2115_v26 = vld [vmem:[%s3926_s14 + $0x98] sm:$0xff] }
 0x1b7   : > { %v2929_v57 = vpop.eup %2928  ;;  %2948 = vrcp.f32 %v1955_v16  ;;  %v1921_v17 = vadd.f32 1.0, %v2927_v40  ;;  %v2147_v34 = vld [vmem:[%s3926_s14 + $0x198] sm:$0xff] }
 0x1b8   : > { %v2931_v23 = vpop.eup %2930  ;;  %2269 = vst.msk [vmem:[%s3949_s22 + $0x160] sm:$0xff] %vm2224_vm1, %v2204_v18  ;;  %v2175_v62 = vmul.f32 %v2929_v57, %v2111_v52  ;;  %2950 = vpow2.f32 %v1820_v56  ;;  %v1824_v52 = vmul.f32 1.442695, %v1736_v33 }
 0x1b9   : > { %v2933_v37 = vpop.eup %2932  ;;  %v2207_v58 = vmul.f32 %v2931_v23, %v2143_v24  ;;  %2952 = vrcp.f32 %v1921_v17 }
 0x1ba   : > { %v2935_v21 = vpop.eup %2934  ;;  %2240 = vst.msk [vmem:[%s3949_s22 + $0x78] sm:$0xff] %vm2224_vm1, %v2175_v62  ;;  %v2173_v0 = vmul.f32 %v2933_v37, %v2109_v30  ;;  %2954 = vpow2.f32 %v1884_v5  ;;  %v1768_v5 = vsub.f32 0.0, %v1682_v54  ;;  %v2145_v54 = vld [vmem:[%s3926_s14 + $0x188] sm:$0xff] }
 0x1bb   : > { %v2937_v2 = vpop.eup %2936  ;;  %2272 = vst.msk [vmem:[%s3949_s22 + $0x178] sm:$0xff] %vm2224_vm1, %v2207_v58  ;;  %v2205_v28 = vmul.f32 %v2935_v21, %v2141_v32  ;;  %2956 = vpow2.f32 %v1816_v13  ;;  %v1892_v13 = vmul.f32 1.442695, %v1770_v55 }
 0x1bc   : > { %v2939_v56 = vpop.eup %2938  ;;  %2238 = vst.msk [vmem:[%s3949_s22 + $0x68] sm:$0xff] %vm2224_vm1, %v2173_v0  ;;  %v2178_v60 = vmul.f32 %v2937_v2, %v2114_v44  ;;  %2958 = vpow2.f32 %v1880_v12  ;;  %v1888_v24 = vmul.f32 1.442695, %v1768_v5  ;;  %v4188_v12 = vld [vmem:[%s4317_s8] ss:$0 sm:$0xff] }
 0x1bd   : > { %v2941_v29 = vpop.eup %2940  ;;  %2270 = vst.msk [vmem:[%s3949_s22 + $0x168] sm:$0xff] %vm2224_vm1, %v2205_v28  ;;  %v2210_v3 = vmul.f32 %v2939_v56, %v2146_v42  ;;  %2960 = vpow2.f32 %v1822_v46  ;;  %v1565_v25 = vadd.f32 %v4188_v12, %v4043_v6  ;;  %v1693_v17 = vadd.f32 %v4188_v12, %v4059_v38 }
 0x1be   : > { %v2943_v7 = vpop.eup %2942  ;;  %2243 = vst.msk [vmem:[%s3949_s22 + $0x90] sm:$0xff] %vm2224_vm1, %v2178_v60  ;;  %v2176_v4 = vmul.f32 %v2941_v29, %v2112_v20  ;;  %2962 = vpow2.f32 %v1886_v49  ;;  %v1557_v32 = vadd.f32 %v4188_v12, %v4046_v15  ;;  %v1685_v38 = vadd.f32 %v4188_v12, %v4063_v43 }
 0x1bf   : > { %v2945_v9 = vpop.eup %2944  ;;  %2275 = vst.msk [vmem:[%s3949_s22 + $0x190] sm:$0xff] %vm2224_vm1, %v2210_v3  ;;  %v2208_v10 = vmul.f32 %v2943_v7, %v2144_v61  ;;  %2964 = vpow2.f32 %v1818_v45  ;;  %v1739_v39 = vsub.f32 0.0, %v1565_v25  ;;  %v1771_v44 = vsub.f32 0.0, %v1693_v17  ;;  %v2118_v3 = vld [vmem:[%s3926_s14 + $0xb0] sm:$0xff]  ;;  %v2119_v25 = vld [vmem:[%s3926_s14 + $0xb8] sm:$0xff] }
 0x1c0   : > { %v2947_v14 = vpop.eup %2946  ;;  %2241 = vst.msk [vmem:[%s3949_s22 + $0x80] sm:$0xff] %vm2224_vm1, %v2176_v4  ;;  %v1953_v51 = vadd.f32 1.0, %v2945_v9  ;;  %2966 = vpow2.f32 %v1882_v48  ;;  %v1578_v15 = vadd.f32 %v4188_v12, %v4070_v50  ;;  %v1737_v42 = vsub.f32 0.0, %v1557_v32 }
 0x1c1   : > { %v2949_v16 = vpop.eup %2948  ;;  %2273 = vst.msk [vmem:[%s3949_s22 + $0x180] sm:$0xff] %vm2224_vm1, %v2208_v10  ;;  %v2179_v8 = vmul.f32 %v2947_v14, %v2115_v26  ;;  %2968 = vpow2.f32 %v1828_v53  ;;  %v1830_v43 = vmul.f32 1.442695, %v1739_v39  ;;  %v1769_v28 = vsub.f32 0.0, %v1685_v38 }
 0x1c2   : > { %v2951_v40 = vpop.eup %2950  ;;  %v2211_v18 = vmul.f32 %v2949_v16, %v2147_v34  ;;  %2970 = vrcp.f32 %v1953_v51  ;;  %v1894_v55 = vmul.f32 1.442695, %v1771_v44  ;;  %v1706_v56 = vadd.f32 %v4188_v12, %v4088_v19  ;;  %v2116_v51 = vld [vmem:[%s3926_s14 + $0xa0] sm:$0xff] }
 0x1c3   : > { %v2953_v57 = vpop.eup %2952  ;;  %2244 = vst.msk [vmem:[%s3949_s22 + $0x98] sm:$0xff] %vm2224_vm1, %v2179_v8  ;;  %v1926_v30 = vadd.f32 1.0, %v2951_v40  ;;  %2972 = vpow2.f32 %v1892_v13  ;;  %v1742_v61 = vsub.f32 0.0, %v1578_v15  ;;  %v1570_v48 = vadd.f32 %v4188_v12, %v4073_v59  ;;  %v2150_v59 = vld [vmem:[%s3926_s14 + $0x1b0] sm:$0xff]  ;;  %v2148_v8 = vld [vmem:[%s3926_s14 + $0x1a0] sm:$0xff] }
 0x1c4   : > { %v2955_v31 = vpop.eup %2954  ;;  %2276 = vst.msk [vmem:[%s3949_s22 + $0x198] sm:$0xff] %vm2224_vm1, %v2211_v18  ;;  %v2177_v35 = vmul.f32 %v2953_v57, %v2113_v22  ;;  %2974 = vpow2.f32 %v1824_v52  ;;  %v1826_v53 = vmul.f32 1.442695, %v1737_v42  ;;  %v1698_v7 = vadd.f32 %v4188_v12, %v4095_v27 }
 0x1c5   : > { %v2957_v23 = vpop.eup %2956  ;;  %2976 = vrcp.f32 %v1926_v30  ;;  %v1958_v62 = vadd.f32 1.0, %v2955_v31  ;;  %v1890_v26 = vmul.f32 1.442695, %v1769_v28  ;;  %v1581_v5 = vadd.f32 %v4188_v12, %v4078_v1 }
 0x1c6   : > { %v2959_v6 = vpop.eup %2958  ;;  %2242 = vst.msk [vmem:[%s3949_s22 + $0x88] sm:$0xff] %vm2224_vm1, %v2177_v35  ;;  %v1924_v36 = vadd.f32 1.0, %v2957_v23  ;;  %2978 = vpow2.f32 %v1888_v24  ;;  %v1774_v34 = vsub.f32 0.0, %v1706_v56  ;;  %v1709_v13 = vadd.f32 %v4188_v12, %v4100_v41  ;;  %v2151_v35 = vld [vmem:[%s3926_s14 + $0x1b8] sm:$0xff] }
 0x1c7   : > { %v2961_v37 = vpop.eup %2960  ;;  %2980 = vrcp.f32 %v1958_v62  ;;  %v1956_v58 = vadd.f32 1.0, %v2959_v6  ;;  %v1836_v52 = vmul.f32 1.442695, %v1742_v61  ;;  %v1740_v16 = vsub.f32 0.0, %v1570_v48  ;;  %v2117_v6 = vld [vmem:[%s3926_s14 + $0xa8] sm:$0xff]  ;;  %v2152_v48 = vld [vmem:[%s3926_s14 + $0x1c0] sm:$0xff] }
 0x1c8   : > { %v2963_v46 = vpop.eup %2962  ;;  %2982 = vrcp.f32 %v1924_v36  ;;  %v1927_v47 = vadd.f32 1.0, %v2961_v37  ;;  %v1772_v40 = vsub.f32 0.0, %v1698_v7  ;;  %v1573_v18 = vadd.f32 %v4188_v12, %v4085_v11 }
 0x1c9   : > { %v2965_v21 = vpop.eup %2964  ;;  %2984 = vrcp.f32 %v1956_v58  ;;  %v1959_v0 = vadd.f32 1.0, %v2963_v46  ;;  %v1743_v57 = vsub.f32 0.0, %v1581_v5  ;;  %v1701_v30 = vadd.f32 %v4188_v12, %v4105_v63  ;;  %v2149_v12 = vld [vmem:[%s3926_s14 + $0x1a8] sm:$0xff]  ;;  %v2122_v46 = vld [vmem:[%s3926_s14 + $0xd0] sm:$0xff] }
 0x1ca   : > { %v2967_v49 = vpop.eup %2966  ;;  %2986 = vrcp.f32 %v1927_v47  ;;  %v1925_v2 = vadd.f32 1.0, %v2965_v21  ;;  %v1900_v23 = vmul.f32 1.442695, %v1774_v34  ;;  %v1775_v11 = vsub.f32 0.0, %v1709_v13 }
 0x1cb   : > { %v2969_v20 = vpop.eup %2968  ;;  %2988 = vrcp.f32 %v1959_v0  ;;  %v1957_v45 = vadd.f32 1.0, %v2967_v49  ;;  %v1832_v36 = vmul.f32 1.442695, %v1740_v16  ;;  %v1896_v38 = vmul.f32 1.442695, %v1772_v40 }
 0x1cc   : > { %v2971_v60 = vpop.eup %2970  ;;  %2990 = vrcp.f32 %v1925_v2  ;;  %v1930_v50 = vadd.f32 1.0, %v2969_v20  ;;  %v1741_v37 = vsub.f32 0.0, %v1573_v18  ;;  %v1838_v47 = vmul.f32 1.442695, %v1743_v57  ;;  %v2154_v2 = vld [vmem:[%s3926_s14 + $0x1d0] sm:$0xff]  ;;  %v2120_v20 = vld [vmem:[%s3926_s14 + $0xc0] sm:$0xff] }
 0x1cd   : > { %v2973_v33 = vpop.eup %2972  ;;  %v2209_v29 = vmul.f32 %v2971_v60, %v2145_v54  ;;  %2992 = vrcp.f32 %v1957_v45  ;;  %v1773_v15 = vsub.f32 0.0, %v1701_v30  ;;  %v1902_v42 = vmul.f32 1.442695, %v1775_v11 }
 0x1ce   : > { %v2975_v4 = vpop.eup %2974  ;;  %2994 = vrcp.f32 %v1930_v50  ;;  %v1962_v19 = vadd.f32 1.0, %v2973_v33  ;;  %v1834_v45 = vmul.f32 1.442695, %v1741_v37 }
 0x1cf   : > { %v2977_v9 = vpop.eup %2976  ;;  %2274 = vst.msk [vmem:[%s3949_s22 + $0x188] sm:$0xff] %vm2224_vm1, %v2209_v29  ;;  %v1928_v10 = vadd.f32 1.0, %v2975_v4  ;;  %2996 = vpow2.f32 %v1830_v43  ;;  %v1898_v60 = vmul.f32 1.442695, %v1773_v15 }
 0x1d0   : > { %v2979_v27 = vpop.eup %2978  ;;  %v2182_v14 = vmul.f32 %v2977_v9, %v2118_v3  ;;  %2998 = vrcp.f32 %v1962_v19 }
 0x1d1   : > { %v2981_v1 = vpop.eup %2980  ;;  %3000 = vrcp.f32 %v1928_v10  ;;  %v1960_v22 = vadd.f32 1.0, %v2979_v27 }
 0x1d2   : > { %v2983_v24 = vpop.eup %2982  ;;  %2247 = vst.msk [vmem:[%s3949_s22 + $0xb0] sm:$0xff] %vm2224_vm1, %v2182_v14  ;;  %v2214_v41 = vmul.f32 %v2981_v1, %v2150_v59  ;;  %3002 = vpow2.f32 %v1894_v55 }
 0x1d3   : > { %v2985_v17 = vpop.eup %2984  ;;  %v2180_v31 = vmul.f32 %v2983_v24, %v2116_v51  ;;  %3004 = vrcp.f32 %v1960_v22 }
 0x1d4   : > { %v2987_v62 = vpop.eup %2986  ;;  %2279 = vst.msk [vmem:[%s3949_s22 + $0x1b0] sm:$0xff] %vm2224_vm1, %v2214_v41  ;;  %v2212_v32 = vmul.f32 %v2985_v17, %v2148_v8  ;;  %3006 = vpow2.f32 %v1826_v53  ;;  %v2155_v41 = vld [vmem:[%s3926_s14 + $0x1d8] sm:$0xff]  ;;  %v2121_v17 = vld [vmem:[%s3926_s14 + $0xc8] sm:$0xff] }
 0x1d5   : > { %v2989_v39 = vpop.eup %2988  ;;  %2245 = vst.msk [vmem:[%s3949_s22 + $0xa0] sm:$0xff] %vm2224_vm1, %v2180_v31  ;;  %v2183_v63 = vmul.f32 %v2987_v62, %v2119_v25  ;;  %3008 = vpow2.f32 %v1890_v26  ;;  %v2126_v62 = vld [vmem:[%s3926_s14 + $0xf0] sm:$0xff] }
 0x1d6   : > { %v2991_v58 = vpop.eup %2990  ;;  %2277 = vst.msk [vmem:[%s3949_s22 + $0x1a0] sm:$0xff] %vm2224_vm1, %v2212_v32  ;;  %v2215_v44 = vmul.f32 %v2989_v39, %v2151_v35  ;;  %3010 = vpow2.f32 %v1836_v52  ;;  %v2123_v52 = vld [vmem:[%s3926_s14 + $0xd8] sm:$0xff] }
 0x1d7   : > { %v2993_v21 = vpop.eup %2992  ;;  %2248 = vst.msk [vmem:[%s3949_s22 + $0xb8] sm:$0xff] %vm2224_vm1, %v2183_v63  ;;  %v2181_v0 = vmul.f32 %v2991_v58, %v2117_v6  ;;  %3012 = vpow2.f32 %v1900_v23  ;;  %v2153_v23 = vld [vmem:[%s3926_s14 + $0x1c8] sm:$0xff]  ;;  %v2156_v58 = vld [vmem:[%s3926_s14 + $0x1e0] sm:$0xff] }
 0x1d8   : > { %v2995_v49 = vpop.eup %2994  ;;  %2280 = vst.msk [vmem:[%s3949_s22 + $0x1b8] sm:$0xff] %vm2224_vm1, %v2215_v44  ;;  %v2213_v54 = vmul.f32 %v2993_v21, %v2149_v12  ;;  %3014 = vpow2.f32 %v1832_v36  ;;  %v2158_v36 = vld [vmem:[%s3926_s14 + $0x1f0] sm:$0xff]  ;;  %v2124_v12 = vld [vmem:[%s3926_s14 + $0xe0] sm:$0xff] }
 0x1d9   : > { %v2997_v43 = vpop.eup %2996  ;;  %2246 = vst.msk [vmem:[%s3949_s22 + $0xa8] sm:$0xff] %vm2224_vm1, %v2181_v0  ;;  %v2186_v28 = vmul.f32 %v2995_v49, %v2122_v46  ;;  %3016 = vpow2.f32 %v1896_v38  ;;  %v2159_v0 = vld [vmem:[%s3926_s14 + $0x1f8] sm:$0xff] }
 0x1da   : > { %v2999_v55 = vpop.eup %2998  ;;  %2278 = vst.msk [vmem:[%s3949_s22 + $0x1a8] sm:$0xff] %vm2224_vm1, %v2213_v54  ;;  %v1931_v56 = vadd.f32 1.0, %v2997_v43  ;;  %3018 = vpow2.f32 %v1838_v47  ;;  %v2127_v47 = vld [vmem:[%s3926_s14 + $0xf8] sm:$0xff]  ;;  %v2125_v43 = vld [vmem:[%s3926_s14 + $0xe8] sm:$0xff] }
 0x1db   : > { %v3001_v50 = vpop.eup %3000  ;;  %2251 = vst.msk [vmem:[%s3949_s22 + $0xd0] sm:$0xff] %vm2224_vm1, %v2186_v28  ;;  %v2218_v61 = vmul.f32 %v2999_v55, %v2154_v2  ;;  %3020 = vpow2.f32 %v1902_v42 }
 0x1dc   : > { %v3003_v33 = vpop.eup %3002  ;;  %v2184_v29 = vmul.f32 %v3001_v50, %v2120_v20  ;;  %3022 = vrcp.f32 %v1931_v56  ;;  %v2157_v20 = vld [vmem:[%s3926_s14 + $0x1e8] sm:$0xff] }
 0x1dd   : > { %v3005_v3 = vpop.eup %3004  ;;  %2283 = vst.msk [vmem:[%s3949_s22 + $0x1d0] sm:$0xff] %vm2224_vm1, %v2218_v61  ;;  %v1963_v53 = vadd.f32 1.0, %v3003_v33  ;;  %3024 = vpow2.f32 %v1834_v45 }
 0x1de   : > { %v3007_v7 = vpop.eup %3006  ;;  %2249 = vst.msk [vmem:[%s3949_s22 + $0xc0] sm:$0xff] %vm2224_vm1, %v2184_v29  ;;  %v2216_v4 = vmul.f32 %v3005_v3, %v2152_v48  ;;  %3026 = vpow2.f32 %v1898_v60 }
 0x1df   : > { %v3009_v19 = vpop.eup %3008  ;;  %3028 = vrcp.f32 %v1963_v53  ;;  %v1929_v26 = vadd.f32 1.0, %v3007_v7 }
 0x1e0   : > { %v3011_v5 = vpop.eup %3010  ;;  %2281 = vst.msk [vmem:[%s3949_s22 + $0x1c0] sm:$0xff] %vm2224_vm1, %v2216_v4  ;;  %v1961_v9 = vadd.f32 1.0, %v3009_v19 }
 0x1e1   : > { %v3013_v59 = vpop.eup %3012  ;;  %3030 = vrcp.f32 %v1929_v26  ;;  %v1934_v10 = vadd.f32 1.0, %v3011_v5 }
 0x1e2   : > { %v3015_v34 = vpop.eup %3014  ;;  %3032 = vrcp.f32 %v1961_v9  ;;  %v1966_v13 = vadd.f32 1.0, %v3013_v59 }
 0x1e3   : > { %v3017_v27 = vpop.eup %3016  ;;  %3034 = vrcp.f32 %v1934_v10  ;;  %v1932_v14 = vadd.f32 1.0, %v3015_v34 }
 0x1e4   : > { %v3019_v51 = vpop.eup %3018  ;;  %3036 = vrcp.f32 %v1966_v13  ;;  %v1964_v16 = vadd.f32 1.0, %v3017_v27 }
 0x1e5   : > { %v3021_v1 = vpop.eup %3020  ;;  %3038 = vrcp.f32 %v1932_v14  ;;  %v1935_v8 = vadd.f32 1.0, %v3019_v51 }
 0x1e6   : > { %v3023_v22 = vpop.eup %3022  ;;  %3040 = vrcp.f32 %v1964_v16  ;;  %v1967_v40 = vadd.f32 1.0, %v3021_v1 }
 0x1e7   : > { %v3025_v18 = vpop.eup %3024  ;;  %v2187_v24 = vmul.f32 %v3023_v22, %v2123_v52  ;;  %3042 = vrcp.f32 %v1935_v8 }
 0x1e8   : > { %v3027_v25 = vpop.eup %3026  ;;  %3044 = vrcp.f32 %v1967_v40  ;;  %v1933_v57 = vadd.f32 1.0, %v3025_v18 }
 0x1e9   : > { %v3029_v30 = vpop.eup %3028  ;;  %2252 = vst.msk [vmem:[%s3949_s22 + $0xd8] sm:$0xff] %vm2224_vm1, %v2187_v24  ;;  %v1965_v31 = vadd.f32 1.0, %v3027_v25 }
 0x1ea   : > { %v2219_v35 = vmul.f32 %v3029_v30, %v2155_v41  ;;  %3046 = vrcp.f32 %v1933_v57 }
 0x1eb   : > { %v3031_v11 = vpop.eup %3030  ;;  %3048 = vrcp.f32 %v1965_v31 }
 0x1ec   : > { %v3033_v32 = vpop.eup %3032  ;;  %2284 = vst.msk [vmem:[%s3949_s22 + $0x1d8] sm:$0xff] %vm2224_vm1, %v2219_v35  ;;  %v2185_v6 = vmul.f32 %v3031_v11, %v2121_v17 }
 0x1ed   : > { %v3035_v39 = vpop.eup %3034  ;;  %v2217_v63 = vmul.f32 %v3033_v32, %v2153_v23 }
 0x1ee   : > { %v3037_v38 = vpop.eup %3036  ;;  %2250 = vst.msk [vmem:[%s3949_s22 + $0xc8] sm:$0xff] %vm2224_vm1, %v2185_v6  ;;  %v2190_v37 = vmul.f32 %v3035_v39, %v2126_v62 }
 0x1ef   : > { %v3039_v44 = vpop.eup %3038  ;;  %2282 = vst.msk [vmem:[%s3949_s22 + $0x1c8] sm:$0xff] %vm2224_vm1, %v2217_v63  ;;  %v2222_v46 = vmul.f32 %v3037_v38, %v2158_v36 }
 0x1f0   : > { %v3041_v15 = vpop.eup %3040  ;;  %2255 = vst.msk [vmem:[%s3949_s22 + $0xf0] sm:$0xff] %vm2224_vm1, %v2190_v37  ;;  %v2188_v21 = vmul.f32 %v3039_v44, %v2124_v12 }
 0x1f1   : > { %v3043_v42 = vpop.eup %3042  ;;  %2287 = vst.msk [vmem:[%s3949_s22 + $0x1f0] sm:$0xff] %vm2224_vm1, %v2222_v46  ;;  %v2220_v49 = vmul.f32 %v3041_v15, %v2156_v58 }
 0x1f2   : > { %v3045_v54 = vpop.eup %3044  ;;  %2253 = vst.msk [vmem:[%s3949_s22 + $0xe0] sm:$0xff] %vm2224_vm1, %v2188_v21  ;;  %v2191_v2 = vmul.f32 %v3043_v42, %v2127_v47 }
 0x1f3   : > { %2285 = vst.msk [vmem:[%s3949_s22 + $0x1e0] sm:$0xff] %vm2224_vm1, %v2220_v49  ;;  %v2223_v28 = vmul.f32 %v3045_v54, %v2159_v0 }
 0x1f4   : > { %v3047_v45 = vpop.eup %3046  ;;  %2256 = vst.msk [vmem:[%s3949_s22 + $0xf8] sm:$0xff] %vm2224_vm1, %v2191_v2 }
 0x1f5   : > { %v3049_v55 = vpop.eup %3048  ;;  %2288 = vst.msk [vmem:[%s3949_s22 + $0x1f8] sm:$0xff] %vm2224_vm1, %v2223_v28  ;;  %v2189_v56 = vmul.f32 %v3047_v45, %v2125_v43 }
 0x1f6   : > { %v2221_v60 = vmul.f32 %v3049_v55, %v2157_v20 }
 0x1f7   : > { %2254 = vst.msk [vmem:[%s3949_s22 + $0xe8] sm:$0xff] %vm2224_vm1, %v2189_v56 }
 0x1f8   : > { %2286 = vst.msk [vmem:[%s3949_s22 + $0x1e8] sm:$0xff] %vm2224_vm1, %v2221_v60 }
 0x1f9 PF: > { %s4339_s11 = sld [smem:[#allocation9_spill]]  ;;  %s4340_s1 = sld [smem:[#allocation7_spill]] }
 0x1fa   : > { %s4341_s18 = sld [smem:[#allocation8_spill]]  ;;  %s4342_s19 = sld [smem:[#allocation10_spill]] }
 0x1fb   : > { %s4343_s20 = sld [smem:[#allocation11_spill]] }
 0x1ff   : > { %s29_s21 = sadd.s32 1, %s4339_s11  }
 0x200   : > { %p26_p4 = scmp.ge.s32.totalorder %s29_s21, 6  }
 0x202   :  { %28 = sbr.rel (!%p26_p4) target bundleno = 31 (0x1f), region = 122 }

// kernel: esa_forward.6
= control target key start
LH: loop header
LB: loop body
LE: loop exit
PB: predicated region body
PF: predicated region fallthrough
CT: control target
= control target key end

     0   :  { %s4093_s30 = smov 0   ;;  %s4455_s0 = inlined_call_operand.vmem [shape: bf16[2,45,5,16], index: 0, kind: input, shape index: {}]   ;;  %s4456_s1 = inlined_call_operand.vmem [shape: bf16[9,16,16], index: 1, kind: input, shape index: {}]   ;;  %s4457_s2 = inlined_call_operand.vmem [shape: f32[1,16], index: 2, kind: input, shape index: {}]   ;;  %s4458_s3 = inlined_call_operand.vmem [shape: bf16[9,16,16], index: 3, kind: input, shape index: {}]   ;;  %s4459_s4 = inlined_call_operand.vmem [shape: f32[1,16], index: 4, kind: input, shape index: {}]   ;;  %s4460_s5 = inlined_call_operand.vmem [shape: bf16[9,16,16], index: 5, kind: input, shape index: {}]   ;;  %s4461_s6 = inlined_call_operand.vmem [shape: f32[1,16], index: 6, kind: input, shape index: {}]   ;;  %s4462_s7 = inlined_call_operand.vmem [shape: f32[25,1], index: 7, kind: input, shape index: {}]   ;;  %s4463_s8 = inlined_call_operand.vmem [shape: f32[32,3], index: 8, kind: input, shape index: {}]   ;;  %s4464_s9 = inlined_call_operand.vmem [shape: f32[2,3,32,16], index: 9, kind: output, shape index: {}]  }
   0x1 LB: > { %s3360_s10 = sadd.s32 4294967295, %s4039_s30   ;;  %p3364_p0 = scmp.ge.s32.totalorder %s4039_s30, 1  ;;  %s4039_s30 = sphi %s4093_s30, %s19_s30  }
   0x2   : > { %p287_p1 = scmp.lt.s32.totalorder %s4039_s30, 3 }
   0x4   : > { %p288_p2 = pnand %p3364_p0, %p287_p1 }
   0x5   : > { %v4006_v0 = vld [vmem:[%s4456_s1 + $0x18] sm:$0xff] (!%p288_p2)   ;;  %p323_p3 = scmp.lt.s32.totalorder (!%p288_p2), %s3360_s10, 1  ;;  %vm918_vm0 = vcmask (!%p288_p2), 130048   ;;  %v4041_v1 = vmov (!%p288_p2), 0.0   ;;  %v4007_v58 = vld [vmem:[%s4456_s1] sm:$0xff] (!%p288_p2)   ;;  %vm923_vm1 = vcmask (!%p288_p2), 126976  }
   0x6   : > { %291 = sbr.rel (%p288_p2) target bundleno = 1332 (0x534), region = 56  ;;  %3716 = vmatprep.subr.bf16.mxu0 (!%p288_p2), %v4006_v0  ;;  %919 = vst.msk [vmem:[#allocation2] sm:$0xff] (!%p288_p2), %vm918_vm0, %v4041_v1  ;;  %920 = vst.msk [vmem:[#allocation2 + $0x8] sm:$0xff] (!%p288_p2), %vm918_vm0, %v4041_v1  ;;  %3698 = vmatprep.subr.bf16.mxu1 (!%p288_p2), %v4007_v58  ;;  %vm930_vm2 = vcmask (!%p288_p2), 124928   ;;  %vm1642_vm3 = vcmask (!%p288_p2), 122880   ;;  %vm3011_vm4 = vcmask (!%p288_p2), 23552  }
   0x7   : > { %921 = vst.msk [vmem:[#allocation2 + $0x10] sm:$0xff] (!%p288_p2), %vm918_vm0, %v4041_v1  ;;  %922 = vst.msk [vmem:[#allocation2 + $0x18] sm:$0xff] (!%p288_p2), %vm918_vm0, %v4041_v1  ;;  %3717 = vmatpush3.bf16.msra.mxu0 (!%p288_p2), %v4006_v0  ;;  %3699 = vmatpush3.bf16.msra.mxu1 (!%p288_p2), %v4007_v58  ;;  %vm3024_vm5 = vcmask (!%p288_p2), 1042432  }
   0x8   : > { %925 = vst.msk [vmem:[#allocation3] sm:$0xff] (!%p288_p2), %vm918_vm0, %v4041_v1  ;;  %926 = vst.msk [vmem:[#allocation3 + $0x8] sm:$0xff] (!%p288_p2), %vm918_vm0, %v4041_v1 }
   0x9   : > { %927 = vst.msk [vmem:[#allocation3 + $0x10] sm:$0xff] (!%p288_p2), %vm918_vm0, %v4041_v1  ;;  %928 = vst.msk [vmem:[#allocation3 + $0x18] sm:$0xff] (!%p288_p2), %vm918_vm0, %v4041_v1 }
   0xa   : > { %924 = vst.msk [vmem:[#allocation2 + $0x20] sm:$0x1f] (!%p288_p2), %vm923_vm1, %v4041_v1  ;;  %929 = vst.msk [vmem:[#allocation3 + $0x20] sm:$0x1f] (!%p288_p2), %vm923_vm1, %v4041_v1 }
   0xd   : > { %s4466_s10 = smov (!%p323_p3, %s3360_s10), 1 }
   0xe   : > { %s3992_s13 = smul.u32 180, %s4466_s10 }
   0xf   : > { %s3993_s15 = smul.u32 96, %s4466_s10 }
  0x10   : > { %s4126_s16 = scalar_lea.vmem %s4455_s0, %s3992_s13 }
  0x11   : > { %v334_v2 = vld [vmem:[%s4126_s16] sm:$0x3]  ;;  %v335_v3 = vld [vmem:[%s4126_s16 + $0x4] sm:$0x3]  ;;  %v3367_v4 = vld [vmem:[%s4126_s16 + $0x14] sm:$0x3]  ;;  %s332_s18 = scalar_lea.vmem %s4464_s9, %s3993_s15 }
  0x12   : > { %v337_v5 = vunpack.c.l.bf16 %v334_v2  ;;  %v338_v6 = vunpack.c.l.bf16 %v335_v3  ;;  %v3368_v7 = vld [vmem:[%s4126_s16 + $0x18] sm:$0x3]  ;;  %v344_v8 = vunpack.c.l.bf16 %v3367_v4  ;;  %v3370_v9 = vld [vmem:[%s4126_s16 + $0x28] sm:$0x3]  ;;  %v3371_v10 = vld [vmem:[%s4126_s16 + $0x2c] sm:$0x3] }
  0x13   : > { %v345_v11 = vunpack.c.l.bf16 %v3368_v7  ;;  %v354_v12 = vunpack.c.l.bf16 %v3370_v9  ;;  %v355_v13 = vunpack.c.l.bf16 %v3371_v10  ;;  %v396_v14 = vld [vmem:[%s4126_s16] sm:$0x6]  ;;  %v397_v17 = vld [vmem:[%s4126_s16 + $0x4] sm:$0x6]  ;;  %v3373_v30 = vld [vmem:[%s4126_s16 + $0x3c] sm:$0x3] }
  0x14   : > { %v347_v15 = vmax.f32 %v337_v5, %v344_v8  ;;  %v363_v16 = vrot.slane %v337_v5, 1  ;;  %v364_v19 = vrot.slane %v338_v6, 1  ;;  %v375_v21 = vrot.slane %v344_v8, 1  ;;  %v3374_v33 = vld [vmem:[%s4126_s16 + $0x40] sm:$0x3] }
  0x15   : > { %v348_v18 = vmax.f32 %v338_v6, %v345_v11  ;;  %v399_v22 = vunpack.c.l.bf16 %v396_v14  ;;  %v376_v24 = vrot.slane %v345_v11, 1  ;;  %v400_v25 = vunpack.c.l.bf16 %v397_v17  ;;  %v3376_v36 = vld [vmem:[%s4126_s16 + $0x50] sm:$0x3]  ;;  %v3377_v39 = vld [vmem:[%s4126_s16 + $0x54] sm:$0x3]  ;;  %v4150_v2 = vld [vmem:[%s4456_s1 + $0x20] sm:$0xff]  }
  0x16   : > { %v357_v20 = vmax.f32 %v347_v15, %v354_v12  ;;  %v387_v27 = vrot.slane %v354_v12, 1  ;;  %v388_v29 = vrot.slane %v355_v13, 1  ;;  %v418_v38 = vunpack.c.l.bf16 %v3373_v30  ;;  %v3379_v42 = vld [vmem:[%s4126_s16 + $0x64] sm:$0x3]  ;;  %v3380_v45 = vld [vmem:[%s4126_s16 + $0x68] sm:$0x3]  ;;  %3722 = vmatprep.subr.bf16.mxu0 %v4150_v2 }
  0x17   : > { %v358_v23 = vmax.f32 %v348_v18, %v355_v13  ;;  %v405_v32 = vrot.slane %v399_v22, 2  ;;  %v406_v35 = vrot.slane %v400_v25, 2  ;;  %v419_v41 = vunpack.c.l.bf16 %v3374_v33  ;;  %v3382_v52 = vld [vmem:[%s4126_s16 + $0x3c] sm:$0x6]  ;;  %v3383_v55 = vld [vmem:[%s4126_s16 + $0x40] sm:$0x6] }
  0x18   : > { %v369_v26 = vmax.f32 %v357_v20, %v363_v16  ;;  %v428_v44 = vunpack.c.l.bf16 %v3376_v36  ;;  %v429_v47 = vunpack.c.l.bf16 %v3377_v39  ;;  %v438_v49 = vunpack.c.l.bf16 %v3379_v42  ;;  %v3385_v7 = vld [vmem:[%s4126_s16 + $0x78] sm:$0x3]  ;;  %v3386_v10 = vld [vmem:[%s4126_s16 + $0x7c] sm:$0x3]  ;;  %v3388_v13 = vld [vmem:[%s4126_s16 + $0x8c] sm:$0x3] }
  0x19   : > { %v370_v28 = vmax.f32 %v358_v23, %v364_v19  ;;  %v439_v51 = vunpack.c.l.bf16 %v3380_v45  ;;  %v447_v54 = vrot.slane %v418_v38, 1  ;;  %v448_v57 = vrot.slane %v419_v41, 1  ;;  %v3389_v16 = vld [vmem:[%s4126_s16 + $0x90] sm:$0x3]  ;;  %v3391_v19 = vld [vmem:[%s4126_s16 + $0xa0] sm:$0x3] }
  0x1a   : > { %v381_v31 = vmax.f32 %v369_v26, %v375_v21  ;;  %v459_v60 = vrot.slane %v428_v44, 1  ;;  %v483_v61 = vunpack.c.l.bf16 %v3382_v52  ;;  %v460_v63 = vrot.slane %v429_v47, 1  ;;  %v3392_v22 = vld [vmem:[%s4126_s16 + $0xa4] sm:$0x3]  ;;  %v4163_v30 = vld [vmem:[%s4456_s1 + $0x8] sm:$0xff]  }
  0x1b   : > { %v382_v34 = vmax.f32 %v370_v28, %v376_v24  ;;  %v484_v0 = vunpack.c.l.bf16 %v3383_v55  ;;  %v471_v4 = vrot.slane %v438_v49, 1  ;;  %v472_v6 = vrot.slane %v439_v51, 1  ;;  %v3395_v33 = vld [vmem:[%s4126_s16 + $0x7c] sm:$0x6]  ;;  %3704 = vmatprep.subr.bf16.mxu1 %v4163_v30  ;;  %v336_v42 = vld [vmem:[%s4126_s16 + $0x8] sm:$0x3] }
  0x1c   : > { %v393_v37 = vmax.f32 %v381_v31, %v387_v27  ;;  %v489_v9 = vrot.slane %v483_v61, 2  ;;  %v502_v15 = vunpack.c.l.bf16 %v3385_v7  ;;  %v503_v18 = vunpack.c.l.bf16 %v3386_v10  ;;  %v3369_v45 = vld [vmem:[%s4126_s16 + $0x1c] sm:$0x3]  ;;  %v3403_v58 = vld [vmem:[%s4126_s16 + $0x2c] sm:$0x3] }
  0x1d   : > { %v394_v40 = vmax.f32 %v382_v34, %v388_v29  ;;  %v490_v12 = vrot.slane %v484_v0, 2  ;;  %v512_v21 = vunpack.c.l.bf16 %v3388_v13  ;;  %v513_v24 = vunpack.c.l.bf16 %v3389_v16  ;;  %v3394_v29 = vld [vmem:[%s4126_s16 + $0x78] sm:$0x6]  ;;  %v398_v61 = vld [vmem:[%s4126_s16 + $0x8] sm:$0x6] }
  0x1e   : > { %v411_v43 = vmax.f32 %v393_v37, %v405_v32  ;;  %v522_v26 = vunpack.c.l.bf16 %v3391_v19  ;;  %v523_v28 = vunpack.c.l.bf16 %v3392_v22  ;;  %v531_v32 = vrot.slane %v502_v15, 1  ;;  %v3375_v22 = vld [vmem:[%s4126_s16 + $0x44] sm:$0x3] }
  0x1f   : > { %v412_v46 = vmax.f32 %v394_v40, %v406_v35  ;;  %v532_v35 = vrot.slane %v503_v18, 1  ;;  %v543_v37 = vrot.slane %v512_v21, 1  ;;  %v544_v40 = vrot.slane %v513_v24, 1 }
  0x20   : > { %v421_v48 = vmax.f32 %v411_v43, %v418_v38  ;;  %v567_v38 = vunpack.c.l.bf16 %v3394_v29  ;;  %v339_v55 = vunpack.c.l.bf16 %v336_v42  ;;  %v606_v10 = vunpack.c.l.bf16 %v3403_v58  ;;  %v3410_v42 = vld [vmem:[%s4126_s16 + $0x44] sm:$0x3] }
  0x21   : > { %v422_v50 = vmax.f32 %v412_v46, %v419_v41  ;;  %v568_v41 = vunpack.c.l.bf16 %v3395_v33  ;;  %v3372_v46 = vld [vmem:[%s4126_s16 + $0x30] sm:$0x3] }
  0x22   : > { %v431_v53 = vmax.f32 %v421_v48, %v428_v44  ;;  %v555_v44 = vrot.slane %v522_v26, 1  ;;  %v556_v48 = vrot.slane %v523_v28, 1  ;;  %v573_v52 = vrot.slane %v567_v38, 2  ;;  %v3409_v38 = vld [vmem:[%s4126_s16 + $0x40] sm:$0x3] }
  0x23   : > { %v432_v56 = vmax.f32 %v422_v50, %v429_v47  ;;  %v3398_v50 = vld [vmem:[%s4126_s16 + $0x8] sm:$0x3]  ;;  %v365_v7 = vrot.slane %v339_v55, 1 }
  0x24   : > { %v441_v59 = vmax.f32 %v431_v53, %v438_v49  ;;  %v3397_v49 = vld [vmem:[%s4126_s16 + $0x4] sm:$0x3]  ;;  %v3400_v53 = vld [vmem:[%s4126_s16 + $0x18] sm:$0x3]  ;;  %v587_v0 = vunpack.c.l.bf16 %v3398_v50 }
  0x25   : > { %v442_v62 = vmax.f32 %v432_v56, %v439_v51 }
  0x26   : > { %v453_v3 = vmax.f32 %v441_v59, %v447_v54  ;;  %v3401_v54 = vld [vmem:[%s4126_s16 + $0x1c] sm:$0x3]  ;;  %v346_v59 = vunpack.c.l.bf16 %v3369_v45  ;;  %v616_v19 = vrot.slane %v587_v0, 1 }
  0x27   : > { %v454_v5 = vmax.f32 %v442_v62, %v448_v57  ;;  %v574_v57 = vrot.slane %v568_v41, 2 }
  0x28   : > { %v465_v8 = vmax.f32 %v453_v3, %v459_v60  ;;  %v356_v60 = vunpack.c.l.bf16 %v3372_v46  ;;  %v3404_v3 = vld [vmem:[%s4126_s16 + $0x30] sm:$0x3]  ;;  %v377_v16 = vrot.slane %v346_v59, 1  ;;  %v3412_v46 = vld [vmem:[%s4126_s16 + $0x54] sm:$0x3] }
  0x29   : > { %v466_v11 = vmax.f32 %v454_v5, %v460_v63  ;;  %v586_v63 = vunpack.c.l.bf16 %v3397_v49  ;;  %v596_v5 = vunpack.c.l.bf16 %v3400_v53  ;;  %v607_v13 = vunpack.c.l.bf16 %v3404_v3 }
  0x2a   : > { %v477_v14 = vmax.f32 %v465_v8, %v471_v4 }
  0x2b   : > { %v478_v17 = vmax.f32 %v466_v11, %v472_v6  ;;  %v349_v6 = vmax.f32 %v339_v55, %v346_v59  ;;  %v401_v11 = vunpack.c.l.bf16 %v398_v61  ;;  %v640_v45 = vrot.slane %v607_v13, 1  ;;  %v3416_v55 = vld [vmem:[%s4126_s16 + $0x6c] sm:$0x3] }
  0x2c   : > { %v495_v20 = vmax.f32 %v477_v14, %v489_v9  ;;  %v597_v9 = vunpack.c.l.bf16 %v3401_v54  ;;  %v3406_v14 = vld [vmem:[%s4126_s16 + $0x4] sm:$0x6]  ;;  %v3415_v54 = vld [vmem:[%s4126_s16 + $0x68] sm:$0x3]  ;;  %v670_v59 = vunpack.c.l.bf16 %v3409_v38 }
  0x2d   : > { %v496_v23 = vmax.f32 %v478_v17, %v490_v12  ;;  %v407_v29 = vrot.slane %v401_v11, 2 }
  0x2e   : > { %v505_v25 = vmax.f32 %v495_v20, %v502_v15  ;;  %v359_v15 = vmax.f32 %v349_v6, %v356_v60  ;;  %v627_v20 = vrot.slane %v596_v5, 1  ;;  %v699_v6 = vrot.slane %v670_v59, 1 }
  0x2f   : > { %v506_v27 = vmax.f32 %v496_v23, %v503_v18  ;;  %v615_v18 = vrot.slane %v586_v63, 1 }
  0x30   : > { %v515_v31 = vmax.f32 %v505_v25, %v512_v21  ;;  %v3407_v21 = vld [vmem:[%s4126_s16 + $0x8] sm:$0x6]  ;;  %v371_v25 = vmax.f32 %v359_v15, %v365_v7  ;;  %v3419_v15 = vld [vmem:[%s4126_s16 + $0x44] sm:$0x6] }
  0x31   : > { %v516_v34 = vmax.f32 %v506_v27, %v513_v24  ;;  %v628_v24 = vrot.slane %v597_v9, 1 }
  0x32   : > { %v525_v36 = vmax.f32 %v515_v31, %v522_v26  ;;  %v389_v26 = vrot.slane %v356_v60, 1  ;;  %v3384_v60 = vld [vmem:[%s4126_s16 + $0x44] sm:$0x6] }
  0x33   : > { %v526_v39 = vmax.f32 %v516_v34, %v523_v28  ;;  %v639_v28 = vrot.slane %v606_v10, 1  ;;  %v651_v34 = vunpack.c.l.bf16 %v3406_v14  ;;  %v485_v11 = vunpack.c.l.bf16 %v3384_v60 }
  0x34   : > { %v537_v43 = vmax.f32 %v525_v36, %v531_v32  ;;  %v383_v32 = vmax.f32 %v371_v25, %v377_v16  ;;  %v691_v14 = vunpack.c.l.bf16 %v3416_v55  ;;  %v3387_v16 = vld [vmem:[%s4126_s16 + $0x80] sm:$0x3] }
  0x35   : > { %v538_v47 = vmax.f32 %v526_v39, %v532_v35  ;;  %v3378_v35 = vld [vmem:[%s4126_s16 + $0x58] sm:$0x3] }
  0x36   : > { %v549_v51 = vmax.f32 %v537_v43, %v543_v37  ;;  %v652_v37 = vunpack.c.l.bf16 %v3407_v21  ;;  %v395_v39 = vmax.f32 %v383_v32, %v389_v26  ;;  %v3381_v43 = vld [vmem:[%s4126_s16 + $0x6c] sm:$0x3]  ;;  %v430_v49 = vunpack.c.l.bf16 %v3378_v35 }
  0x37   : > { %v550_v56 = vmax.f32 %v538_v47, %v544_v40  ;;  %v420_v40 = vunpack.c.l.bf16 %v3375_v22  ;;  %v3413_v47 = vld [vmem:[%s4126_s16 + $0x58] sm:$0x3]  ;;  %v491_v26 = vrot.slane %v485_v11, 2  ;;  %v736_v32 = vunpack.c.l.bf16 %v3419_v15  ;;  %v3399_v15 = vld [vmem:[%s4126_s16 + $0xc] sm:$0x3] }
  0x38   : > { %v561_v62 = vmax.f32 %v549_v51, %v555_v44  ;;  %v657_v51 = vrot.slane %v651_v34, 2  ;;  %v658_v53 = vrot.slane %v652_v37, 2  ;;  %v504_v34 = vunpack.c.l.bf16 %v3387_v16  ;;  %v3393_v37 = vld [vmem:[%s4126_s16 + $0xa8] sm:$0x3] }
  0x39   : > { %v562_v4 = vmax.f32 %v550_v56, %v556_v48  ;;  %v413_v48 = vmax.f32 %v395_v39, %v407_v29  ;;  %v3390_v29 = vld [vmem:[%s4126_s16 + $0x94] sm:$0x3]  ;;  %v724_v39 = vrot.slane %v691_v14, 1 }
  0x3a   : > { %v579_v8 = vmax.f32 %v561_v62, %v573_v52  ;;  %v671_v62 = vunpack.c.l.bf16 %v3410_v42  ;;  %v514_v1 = vunpack.c.l.bf16 %v3390_v29 }
  0x3b   : > { %v580_v12 = vmax.f32 %v562_v4, %v574_v57  ;;  %v423_v56 = vmax.f32 %v413_v48, %v420_v40  ;;  %v440_v57 = vunpack.c.l.bf16 %v3381_v43  ;;  %v680_v4 = vunpack.c.l.bf16 %v3412_v46  ;;  %v3425_v48 = vld [vmem:[%s4126_s16 + $0x94] sm:$0x3] }
  0x3c   : > { %v589_v17 = vmax.f32 %v579_v8, %v586_v63  ;;  %v3418_v8 = vld [vmem:[%s4126_s16 + $0x40] sm:$0x6]  ;;  %v742_v46 = vrot.slane %v736_v32, 2 }
  0x3d   : > { %v590_v23 = vmax.f32 %v580_v12, %v587_v0  ;;  %v433_v63 = vmax.f32 %v423_v56, %v430_v49  ;;  %v449_v0 = vrot.slane %v420_v40, 1  ;;  %v711_v22 = vrot.slane %v680_v4, 1  ;;  %v3421_v40 = vld [vmem:[%s4126_s16 + $0x7c] sm:$0x3]  ;;  %v3427_v56 = vld [vmem:[%s4126_s16 + $0xa4] sm:$0x3] }
  0x3e   : > { %v599_v27 = vmax.f32 %v589_v17, %v596_v5  ;;  %v681_v5 = vunpack.c.l.bf16 %v3413_v47  ;;  %v3424_v47 = vld [vmem:[%s4126_s16 + $0x90] sm:$0x3] }
  0x3f   : > { %v600_v31 = vmax.f32 %v590_v23, %v597_v9  ;;  %v443_v9 = vmax.f32 %v433_v63, %v440_v57  ;;  %v764_v60 = vunpack.c.l.bf16 %v3424_v47 }
  0x40   : > { %v609_v33 = vmax.f32 %v599_v27, %v606_v10  ;;  %v461_v10 = vrot.slane %v430_v49, 1 }
  0x41   : > { %v610_v36 = vmax.f32 %v600_v31, %v607_v13  ;;  %v690_v13 = vunpack.c.l.bf16 %v3415_v54 }
  0x42   : > { %v621_v41 = vmax.f32 %v609_v33, %v615_v18  ;;  %v700_v18 = vrot.slane %v671_v62, 1 }
  0x43   : > { %v622_v44 = vmax.f32 %v610_v36, %v616_v19  ;;  %v455_v19 = vmax.f32 %v443_v9, %v449_v0  ;;  %v723_v36 = vrot.slane %v690_v13, 1  ;;  %v3430_v9 = vld [vmem:[%s4126_s16 + $0x7c] sm:$0x6] }
  0x44   : > { %v633_v50 = vmax.f32 %v621_v41, %v627_v20  ;;  %v473_v20 = vrot.slane %v440_v57, 1 }
  0x45   : > { %v634_v52 = vmax.f32 %v622_v44, %v628_v24  ;;  %v712_v24 = vrot.slane %v681_v5, 1  ;;  %v467_v25 = vmax.f32 %v455_v19, %v461_v10  ;;  %v3422_v44 = vld [vmem:[%s4126_s16 + $0x80] sm:$0x3] }
  0x46   : > { %v645_v58 = vmax.f32 %v633_v50, %v639_v28  ;;  %v735_v28 = vunpack.c.l.bf16 %v3418_v8  ;;  %v524_v50 = vunpack.c.l.bf16 %v3393_v37  ;;  %v755_v55 = vunpack.c.l.bf16 %v3422_v44 }
  0x47   : > { %v646_v61 = vmax.f32 %v634_v52, %v640_v45  ;;  %v479_v33 = vmax.f32 %v467_v25, %v473_v20  ;;  %v754_v52 = vunpack.c.l.bf16 %v3421_v40 }
  0x48   : > { %v663_v3 = vmax.f32 %v645_v58, %v657_v51  ;;  %v741_v43 = vrot.slane %v735_v28, 2  ;;  %v533_v58 = vrot.slane %v504_v34, 1  ;;  %v557_v11 = vrot.slane %v524_v50, 1 }
  0x49   : > { %v664_v7 = vmax.f32 %v646_v61, %v658_v53  ;;  %v497_v41 = vmax.f32 %v479_v33, %v491_v26  ;;  %v3396_v53 = vld [vmem:[%s4126_s16 + $0x80] sm:$0x6]  ;;  %v765_v61 = vunpack.c.l.bf16 %v3425_v48  ;;  %v588_v28 = vunpack.c.l.bf16 %v3399_v15  ;;  %v3405_v33 = vld [vmem:[%s4126_s16 + $0x34] sm:$0x3]  ;;  %v3411_v15 = vld [vmem:[%s4126_s16 + $0x48] sm:$0x3] }
  0x4a   : > { %v673_v12 = vmax.f32 %v663_v3, %v670_v59  ;;  %v545_v3 = vrot.slane %v514_v1, 1  ;;  %v608_v48 = vunpack.c.l.bf16 %v3405_v33 }
  0x4b   : > { %v674_v17 = vmax.f32 %v664_v7, %v671_v62  ;;  %v507_v49 = vmax.f32 %v497_v41, %v504_v34  ;;  %v3428_v62 = vld [vmem:[%s4126_s16 + $0xa8] sm:$0x3] }
  0x4c   : > { %v683_v21 = vmax.f32 %v673_v12, %v680_v4  ;;  %v569_v4 = vunpack.c.l.bf16 %v3396_v53  ;;  %v775_v8 = vunpack.c.l.bf16 %v3428_v62  ;;  %v937_v53 = vld [vmem:[%s4462_s7 + $0x18] sm:$0x1]  ;;  %v3440_v62 = vld [vmem:[%s4126_s16 + $0x34] sm:$0x3] }
  0x4d   : > { %v684_v23 = vmax.f32 %v674_v17, %v681_v5  ;;  %v517_v57 = vmax.f32 %v507_v49, %v514_v1  ;;  %v784_v17 = vrot.slane %v755_v55, 1  ;;  %v3434_v1 = vld [vmem:[%s4126_s16 + $0xc] sm:$0x3] }
  0x4e   : > { %v693_v27 = vmax.f32 %v683_v21, %v690_v13  ;;  %v783_v13 = vrot.slane %v754_v52, 1  ;;  %v575_v19 = vrot.slane %v569_v4, 2  ;;  %v795_v21 = vrot.slane %v764_v60, 1 }
  0x4f   : > { %v694_v31 = vmax.f32 %v684_v23, %v691_v14  ;;  %v527_v0 = vmax.f32 %v517_v57, %v524_v50  ;;  %v3431_v14 = vld [vmem:[%s4126_s16 + $0x80] sm:$0x6]  ;;  %v819_v23 = vunpack.c.l.bf16 %v3430_v9  ;;  %v808_v32 = vrot.slane %v775_v8, 1  ;;  %v3442_v9 = vld [vmem:[%s4126_s16 + $0x8] sm:$0x6] }
  0x50   : > { %v705_v35 = vmax.f32 %v693_v27, %v699_v6  ;;  %v774_v6 = vunpack.c.l.bf16 %v3427_v56  ;;  %v820_v26 = vunpack.c.l.bf16 %v3431_v14  ;;  %v3439_v56 = vld [vmem:[%s4126_s16 + $0x30] sm:$0x3]  ;;  %v3443_v14 = vld [vmem:[%s4126_s16 + $0xc] sm:$0x6] }
  0x51   : > { %v706_v38 = vmax.f32 %v694_v31, %v700_v18  ;;  %v539_v10 = vmax.f32 %v527_v0, %v533_v58  ;;  %v825_v41 = vrot.slane %v819_v23, 2  ;;  %v617_v58 = vrot.slane %v588_v28, 1 }
  0x52   : > { %v717_v42 = vmax.f32 %v705_v35, %v711_v22  ;;  %v796_v22 = vrot.slane %v765_v61, 1  ;;  %v807_v31 = vrot.slane %v774_v6, 1  ;;  %v3433_v35 = vld [vmem:[%s4126_s16 + $0x8] sm:$0x3]  ;;  %v826_v44 = vrot.slane %v820_v26, 2 }
  0x53   : > { %v718_v45 = vmax.f32 %v706_v38, %v712_v24  ;;  %v551_v18 = vmax.f32 %v539_v10, %v545_v3  ;;  %v3402_v24 = vld [vmem:[%s4126_s16 + $0x20] sm:$0x3]  ;;  %v838_v50 = vunpack.c.l.bf16 %v3433_v35  ;;  %v903_v23 = vunpack.c.l.bf16 %v3442_v9  ;;  %v3432_v9 = vld [vmem:[%s4126_s16 + $0x84] sm:$0x6] }
  0x54   : > { %v729_v51 = vmax.f32 %v717_v42, %v723_v36  ;;  %v598_v37 = vunpack.c.l.bf16 %v3402_v24  ;;  %v934_v38 = vld [vmem:[%s4462_s7] sm:$0xff]  ;;  %v4042_v42 = vmov 0   ;;  %v3414_v24 = vld [vmem:[%s4126_s16 + $0x5c] sm:$0x3]  ;;  %v904_v26 = vunpack.c.l.bf16 %v3443_v14 }
  0x55   : > { %v730_v54 = vmax.f32 %v718_v45, %v724_v39  ;;  %v563_v27 = vmax.f32 %v551_v18, %v557_v11  ;;  %v936_v39 = vld [vmem:[%s4462_s7 + $0x10] sm:$0xff]  ;;  %4004 = vset.pattern.permute.xlu0 %v4042_v42  ;;  %4005 = vset.pattern.permute.xlu1 %v4042_v42  ;;  %v3436_v45 = vld [vmem:[%s4126_s16 + $0x1c] sm:$0x3]  ;;  %v641_v11 = vrot.slane %v608_v48, 1  ;;  %v821_v14 = vunpack.c.l.bf16 %v3432_v9 }
  0x56   : > { %v747_v59 = vmax.f32 %v729_v51, %v741_v43  ;;  %1617 = vperm.xlu0 %4004, %v934_v38   ;;  %1627 = vperm.xlu1 %4005, %v936_v39   ;;  %v3408_v51 = vld [vmem:[%s4126_s16 + $0xc] sm:$0x6]  ;;  %v629_v3 = vrot.slane %v598_v37, 1  ;;  %v909_v38 = vrot.slane %v903_v23, 2  ;;  %v3441_v23 = vld [vmem:[%s4126_s16 + $0x38] sm:$0x3] }
  0x57   : > { %v748_v63 = vmax.f32 %v730_v54, %v742_v46  ;;  %v581_v36 = vmax.f32 %v563_v27, %v575_v19  ;;  %v3437_v46 = vld [vmem:[%s4126_s16 + $0x20] sm:$0x3]  ;;  %v653_v4 = vunpack.c.l.bf16 %v3408_v51 }
  0x58   : > { %v757_v5 = vmax.f32 %v747_v59, %v754_v52  ;;  %v935_v52 = vld [vmem:[%s4462_s7 + $0x8] sm:$0xff] }
  0x59   : > { %v758_v7 = vmax.f32 %v748_v63, %v755_v55  ;;  %v591_v47 = vmax.f32 %v581_v36, %v588_v28  ;;  %v839_v55 = vunpack.c.l.bf16 %v3434_v1  ;;  %v659_v19 = vrot.slane %v653_v4, 2 }
  0x5a   : > { %v767_v12 = vmax.f32 %v757_v5, %v764_v60  ;;  %v848_v60 = vunpack.c.l.bf16 %v3436_v45  ;;  %1622 = vperm.xlu0 %4004, %v935_v52   ;;  %1632 = vperm.xlu1 %4005, %v937_v53   ;;  %v672_v28 = vunpack.c.l.bf16 %v3411_v15  ;;  %v682_v36 = vunpack.c.l.bf16 %v3414_v24 }
  0x5b   : > { %v768_v16 = vmax.f32 %v758_v7, %v765_v61  ;;  %v601_v57 = vmax.f32 %v591_v47, %v598_v37  ;;  %v849_v61 = vunpack.c.l.bf16 %v3437_v46 }
  0x5c   : > { %v777_v20 = vmax.f32 %v767_v12, %v774_v6  ;;  %v858_v6 = vunpack.c.l.bf16 %v3439_v56  ;;  %v701_v46 = vrot.slane %v672_v28, 1 }
  0x5d   : > { %v778_v25 = vmax.f32 %v768_v16, %v775_v8  ;;  %v611_v0 = vmax.f32 %v601_v57, %v608_v48  ;;  %v859_v8 = vunpack.c.l.bf16 %v3440_v62  ;;  %v3426_v57 = vld [vmem:[%s4126_s16 + $0x98] sm:$0x3] }
  0x5e   : > { %v789_v29 = vmax.f32 %v777_v20, %v783_v13  ;;  %v867_v13 = vrot.slane %v838_v50, 1 }
  0x5f   : > { %v790_v34 = vmax.f32 %v778_v25, %v784_v17  ;;  %v623_v10 = vmax.f32 %v611_v0, %v617_v58  ;;  %v868_v17 = vrot.slane %v839_v55, 1  ;;  %v766_v0 = vunpack.c.l.bf16 %v3426_v57  ;;  %v1022_v57 = vld [vmem:[#allocation2 + $0x19] sm:$0x1] }
  0x60   : > { %v801_v40 = vmax.f32 %v789_v29, %v795_v21  ;;  %v879_v21 = vrot.slane %v848_v60, 1 }
  0x61   : > { %v802_v43 = vmax.f32 %v790_v34, %v796_v22  ;;  %v635_v18 = vmax.f32 %v623_v10, %v629_v3  ;;  %v880_v22 = vrot.slane %v849_v61, 1  ;;  %v892_v34 = vrot.slane %v859_v8, 1 }
  0x62   : > { %v813_v49 = vmax.f32 %v801_v40, %v807_v31  ;;  %v891_v31 = vrot.slane %v858_v6, 1  ;;  %v910_v40 = vrot.slane %v904_v26, 2 }
  0x63   : > { %v814_v54 = vmax.f32 %v802_v43, %v808_v32  ;;  %v647_v27 = vmax.f32 %v635_v18, %v641_v11  ;;  %v3417_v32 = vld [vmem:[%s4126_s16 + $0x70] sm:$0x3]  ;;  %v3420_v43 = vld [vmem:[%s4126_s16 + $0x48] sm:$0x6] }
  0x64   : > { %v831_v59 = vmax.f32 %v813_v49, %v825_v41  ;;  %v692_v1 = vunpack.c.l.bf16 %v3417_v32  ;;  %v737_v51 = vunpack.c.l.bf16 %v3420_v43  ;;  %v1019_v43 = vld [vmem:[#allocation2 + $0x1] sm:$0xff] }
  0x65   : > { %v832_v63 = vmax.f32 %v814_v54, %v826_v44  ;;  %v665_v35 = vmax.f32 %v647_v27, %v659_v19  ;;  %v3423_v54 = vld [vmem:[%s4126_s16 + $0x84] sm:$0x3]  ;;  %v827_v19 = vrot.slane %v821_v14, 2  ;;  %v860_v27 = vunpack.c.l.bf16 %v3441_v23 }
  0x66   : > { %v841_v5 = vmax.f32 %v831_v59, %v838_v50  ;;  %v713_v50 = vrot.slane %v682_v36, 1  ;;  %v725_v53 = vrot.slane %v692_v1, 1  ;;  %v743_v56 = vrot.slane %v737_v51, 2 }
  0x67   : > { %v842_v7 = vmax.f32 %v832_v63, %v839_v55  ;;  %v675_v41 = vmax.f32 %v665_v35, %v672_v28  ;;  %v756_v59 = vunpack.c.l.bf16 %v3423_v54  ;;  %v3444_v28 = vld [vmem:[%s4126_s16 + $0x10] sm:$0x6]  ;;  %v1244_v54 = vld [vmem:[#allocation2 + $0x1e] sm:$0x1] }
  0x68   : > { %v851_v12 = vmax.f32 %v841_v5, %v848_v60  ;;  %v946_v60 = vld [vmem:[#allocation2] sm:$0xff] }
  0x69   : > { %v852_v16 = vmax.f32 %v842_v7, %v849_v61  ;;  %v685_v45 = vmax.f32 %v675_v41, %v682_v36  ;;  %v3429_v61 = vld [vmem:[%s4126_s16 + $0xac] sm:$0x3]  ;;  %v785_v11 = vrot.slane %v756_v59, 1  ;;  %v893_v36 = vrot.slane %v860_v27, 1 }
  0x6a   : > { %v861_v20 = vmax.f32 %v851_v12, %v858_v6 }
  0x6b   : > { %v862_v25 = vmax.f32 %v852_v16, %v859_v8  ;;  %v695_v49 = vmax.f32 %v685_v45, %v692_v1  ;;  %v776_v8 = vunpack.c.l.bf16 %v3429_v61 }
  0x6c   : > { %v873_v29 = vmax.f32 %v861_v20, %v867_v13  ;;  %v797_v13 = vrot.slane %v766_v0, 1  ;;  %v3438_v20 = vld [vmem:[%s4126_s16 + $0x24] sm:$0x3] }
  0x6d   : > { %v874_v33 = vmax.f32 %v862_v25, %v868_v17  ;;  %v707_v52 = vmax.f32 %v695_v49, %v701_v46  ;;  %v809_v16 = vrot.slane %v776_v8, 1  ;;  %v3435_v17 = vld [vmem:[%s4126_s16 + $0x10] sm:$0x3]  ;;  %v850_v25 = vunpack.c.l.bf16 %v3438_v20 }
  0x6e   : > { %v885_v37 = vmax.f32 %v873_v29, %v879_v21 }
  0x6f   : > { %v886_v39 = vmax.f32 %v874_v33, %v880_v22  ;;  %v719_v55 = vmax.f32 %v707_v52, %v713_v50  ;;  %v840_v22 = vunpack.c.l.bf16 %v3435_v17  ;;  %v881_v33 = vrot.slane %v850_v25, 1  ;;  %v4010_v52 = vld [vmem:[%s4456_s1 + $0x28] sm:$0xff]   ;;  %v4014_v17 = vld [vmem:[%s4456_s1 + $0x40] sm:$0xff]  }
  0x70   : > { %v897_v42 = vmax.f32 %v885_v37, %v891_v31 }
  0x71   : > { %v898_v44 = vmax.f32 %v886_v39, %v892_v34  ;;  %v731_v58 = vmax.f32 %v719_v55, %v725_v53  ;;  %v869_v31 = vrot.slane %v840_v22, 1  ;;  %v905_v34 = vunpack.c.l.bf16 %v3444_v28  ;;  %v4011_v53 = vld [vmem:[%s4456_s1 + $0x10] sm:$0xff]   ;;  %v4016_v28 = vld [vmem:[%s4458_s3 + $0x8] sm:$0xff]  }
  0x72   : > { %v915_v47 = vmax.f32 %v897_v42, %v909_v38  ;;  %v1170_v42 = vld [vmem:[#allocation2 + $0x1d] sm:$0x1] }
  0x73   : > { %v916_v48 = vmax.f32 %v898_v44, %v910_v40  ;;  %v749_v63 = vmax.f32 %v731_v58, %v743_v56  ;;  %v911_v38 = vrot.slane %v905_v34, 2  ;;  %v3445_v34 = vld [vmem:[%s4457_s2] ss:$0 sm:$0xff] }
  0x74   : > { %931 = vst.msk [vmem:[#allocation2 + $0xc] sm:$0x7] %vm930_vm2, %v915_v47 }
  0x75   : > { %932 = vst.msk [vmem:[#allocation2 + $0x11] sm:$0x7] %vm930_vm2, %v916_v48  ;;  %v759_v7 = vmax.f32 %v749_v63, %v756_v59 }
  0x77   : > { %v769_v10 = vmax.f32 %v759_v7, %v766_v0 }
  0x79   : > { %v779_v12 = vmax.f32 %v769_v10, %v776_v8  ;;  %v4013_v10 = vld [vmem:[%s4456_s1 + $0x38] sm:$0xff]  }
  0x7b   : > { %v1167_v62 = vld [vmem:[#allocation2 + $0x5] sm:$0xff]  ;;  %v791_v15 = vmax.f32 %v779_v12, %v785_v11  ;;  %v1391_v11 = vld [vmem:[#allocation2 + $0x1a] sm:$0xff]  ;;  %v1392_v12 = vld [vmem:[#allocation2 + $0x22] sm:$0x1] }
  0x7c   : > { %v947_v3 = vld [vmem:[#allocation2 + $0x8] sm:$0xff] }
  0x7d   : > { %v1168_v4 = vld [vmem:[#allocation2 + $0xd] sm:$0xff]  ;;  %v950_v5 = vpack.c.bf16 %v947_v3, %v946_v60  ;;  %v803_v18 = vmax.f32 %v791_v15, %v797_v13  ;;  %v1093_v60 = vld [vmem:[#allocation2 + $0x2] sm:$0xff]  ;;  %v1318_v3 = vld [vmem:[#allocation2 + $0x1f] sm:$0x1]  ;;  %v1394_v15 = vpack.c.bf16 %v1392_v12, %v1391_v11 }
  0x7e   : > { %v1171_v6 = vpack.c.bf16 %v1168_v4, %v1167_v62  ;;  %v1241_v41 = vld [vmem:[#allocation2 + $0x6] sm:$0xff]  ;;  %v1242_v1 = vld [vmem:[#allocation2 + $0xe] sm:$0xff] }
  0x7f   : > { %3700 = vmatprep.mubr.msk.bf16.mxu1 %vm918_vm0, %v950_v5  ;;  %v815_v21 = vmax.f32 %v803_v18, %v809_v16  ;;  %v1020_v44 = vld [vmem:[#allocation2 + $0x9] sm:$0xff]  ;;  %v1245_v48 = vpack.c.bf16 %v1242_v1, %v1241_v41  ;;  %v1465_v18 = vld [vmem:[#allocation2 + $0x1b] sm:$0xff] }
  0x80   : > { %3718 = vmatprep.mubr.msk.bf16.mxu0 %vm918_vm0, %v1171_v6  ;;  %v1023_v51 = vpack.c.bf16 %v1020_v44, %v1019_v43  ;;  %v1315_v58 = vld [vmem:[#allocation2 + $0x7] sm:$0xff]  ;;  %v1096_v6 = vld [vmem:[#allocation2 + $0x1a] sm:$0x1] }
  0x81   : > { %v833_v24 = vmax.f32 %v815_v21, %v827_v19  ;;  %v1094_v61 = vld [vmem:[#allocation2 + $0xa] sm:$0xff]  ;;  %v1466_v19 = vld [vmem:[#allocation2 + $0x23] sm:$0x1] }
  0x82   : > { %v1463_v13 = vld [vmem:[#allocation2 + $0xb] sm:$0xff] }
  0x83   : > { %v843_v26 = vmax.f32 %v833_v24, %v840_v22  ;;  %v1537_v20 = vld [vmem:[#allocation2 + $0xc] sm:$0xff]  ;;  %v1468_v22 = vpack.c.bf16 %v1466_v19, %v1465_v18  ;;  %v1539_v24 = vld [vmem:[#allocation2 + $0x1c] sm:$0xff] }
  0x85   : > { %v853_v29 = vmax.f32 %v843_v26, %v850_v25  ;;  %v1540_v25 = vld [vmem:[#allocation2 + $0x24] sm:$0x1] }
  0x86   : > { %v1542_v26 = vpack.c.bf16 %v1540_v25, %v1539_v24 }
  0x87   : > { %v863_v32 = vmax.f32 %v853_v29, %v860_v27  ;;  %v4015_v27 = vld [vmem:[%s4458_s3] sm:$0xff]  }
  0x89   : > { %v875_v35 = vmax.f32 %v863_v32, %v869_v31 }
  0x8b   : > { %v887_v37 = vmax.f32 %v875_v35, %v881_v33 }
  0x8d   : > { %v899_v39 = vmax.f32 %v887_v37, %v893_v36 }
  0x8f   : > { %v917_v40 = vmax.f32 %v899_v39, %v911_v38 }
  0x91   : > { %933 = vst.msk [vmem:[#allocation2 + $0x16] sm:$0x7] %vm930_vm2, %v917_v40 }
  0x98   : > { %v1169_v45 = vld [vmem:[#allocation2 + $0x15] sm:$0xff] }
  0x99   : > { %v948_v46 = vld [vmem:[#allocation2 + $0x10] sm:$0xff]  ;;  %v949_v47 = vld [vmem:[#allocation2 + $0x18] sm:$0x1]  ;;  %v1172_v49 = vpack.c.bf16 %v1170_v42, %v1169_v45 }
  0x9a   : > { %v951_v50 = vpack.c.bf16 %v949_v47, %v948_v46  ;;  %v1243_v55 = vld [vmem:[#allocation2 + $0x16] sm:$0xff] }
  0x9b   : > { %3719 = vmatmul.mubr.msk.bf16.vlgmr.msra.gmra.mrb[0].mxu0 %vm918_vm0, %v1172_v49  ;;  %v1021_v56 = vld [vmem:[#allocation2 + $0x11] sm:$0xff]  ;;  %v1246_v62 = vpack.c.bf16 %v1244_v54, %v1243_v55 }
  0x9c   : > { %3701 = vmatmul.mubr.msk.bf16.vlgmr.msra.gmra.mrb[0].mxu1 %vm918_vm0, %v951_v50  ;;  %3723 = vmatpush3.bf16.msra.mxu0 %v4150_v2  ;;  %v1316_v59 = vld [vmem:[#allocation2 + $0xf] sm:$0xff]  ;;  %v1024_v63 = vpack.c.bf16 %v1022_v57, %v1021_v56  ;;  %v1097_v2 = vpack.c.bf16 %v1094_v61, %v1093_v60  ;;  %v1317_v4 = vld [vmem:[#allocation2 + $0x17] sm:$0xff] }
  0x9d   : > { %3724 = vmatprep.mubr.msk.bf16.mxu0 %vm918_vm0, %v1245_v48  ;;  %3705 = vmatpush3.bf16.msra.mxu1 %v4163_v30  ;;  %v1319_v0 = vpack.c.bf16 %v1316_v59, %v1315_v58  ;;  %v4012_v30 = vld [vmem:[%s4456_s1 + $0x30] sm:$0xff]   ;;  %v1320_v7 = vpack.c.bf16 %v1318_v3, %v1317_v4 }
  0x9e   : > { %3706 = vmatprep.mubr.msk.bf16.mxu1 %vm918_vm0, %v1023_v51  ;;  %3728 = vmatprep.subr.bf16.mxu0 %v4010_v52  ;;  %v1095_v5 = vld [vmem:[#allocation2 + $0x12] sm:$0xff] }
  0x9f   : > { %3710 = vmatprep.subr.bf16.mxu1 %v4011_v53  ;;  %v1098_v8 = vpack.c.bf16 %v1096_v6, %v1095_v5  ;;  %v1393_v9 = vpack.c.bf16 %v1095_v5, %v1094_v61  ;;  %v1464_v14 = vld [vmem:[#allocation2 + $0x13] sm:$0xff] }
  0xa0   : > { %v1467_v16 = vpack.c.bf16 %v1464_v14, %v1463_v13  ;;  %v1538_v21 = vld [vmem:[#allocation2 + $0x14] sm:$0xff] }
  0xa1   : > { %v1541_v23 = vpack.c.bf16 %v1538_v21, %v1537_v20 }
  0xa7   : > { %3725 = vmatmul.mubr.msk.bf16.vlgmr.msra.gmra.mrb[0].mxu0 %vm918_vm0, %v1246_v62 }
  0xa8   : > { %3707 = vmatmul.mubr.msk.bf16.vlgmr.msra.gmra.mrb[0].mxu1 %vm918_vm0, %v1024_v63  ;;  %3729 = vmatpush3.bf16.msra.mxu0 %v4010_v52 }
  0xa9   : > { %3730 = vmatprep.mubr.msk.bf16.mxu0 %vm918_vm0, %v1319_v0  ;;  %3711 = vmatpush3.bf16.msra.mxu1 %v4011_v53 }
  0xaa   : > { %3712 = vmatprep.mubr.msk.bf16.mxu1 %vm918_vm0, %v1097_v2  ;;  %3734 = vmatprep.subr.bf16.mxu0 %v4012_v30 }
  0xab   : > { %3752 = vmatprep.subr.bf16.mxu1 %v4015_v27 }
  0xb3   : > { %3731 = vmatmul.mubr.msk.bf16.vlgmr.msra.gmra.mrb[0].mxu0 %vm918_vm0, %v1320_v7 }
  0xb4   : > { %3713 = vmatmul.mubr.msk.bf16.vlgmr.msra.gmra.mrb[0].mxu1 %vm918_vm0, %v1098_v8  ;;  %3735 = vmatpush3.bf16.msra.mxu0 %v4012_v30  ;;  %v4017_v30 = vld [vmem:[%s4458_s3 + $0x10] sm:$0xff]  }
  0xb5   : > { %3736 = vmatprep.mubr.msk.bf16.mxu0 %vm918_vm0, %v1393_v9  ;;  %3740 = vmatprep.subr.bf16.mxu0 %v4013_v10  ;;  %v4018_v9 = vld [vmem:[%s4458_s3 + $0x18] sm:$0xff]  }
  0xb6   : > { %3753 = vmatpush3.bf16.msra.mxu1 %v4015_v27 }
  0xb7   : > { %3758 = vmatprep.subr.bf16.mxu1 %v4016_v28 }
  0xbf   : > { %3737 = vmatmul.mubr.msk.bf16.vlgmr.msra.gmra.mrb[0].mxu0 %vm918_vm0, %v1394_v15 }
  0xc0   : > { %3741 = vmatpush3.bf16.msra.mxu0 %v4013_v10  ;;  %3742 = vmatprep.mubr.msk.bf16.mxu0 %vm918_vm0, %v1467_v16  ;;  %v4019_v16 = vld [vmem:[%s4458_s3 + $0x20] sm:$0xff]  }
  0xc1   : > { %3746 = vmatprep.subr.bf16.mxu0 %v4014_v17 }
  0xcb   : > { %3743 = vmatmul.mubr.msk.bf16.vlgmr.msra.gmra.mrb[0].mxu0 %vm918_vm0, %v1468_v22 }
  0xcc   : > { %3747 = vmatpush3.bf16.msra.mxu0 %v4014_v17  ;;  %3748 = vmatprep.mubr.msk.bf16.mxu0 %vm918_vm0, %v1541_v23  ;;  %v4020_v23 = vld [vmem:[%s4458_s3 + $0x28] sm:$0xff]  }
  0xd5   : > { %v4288_v35 = vpop.permute.xlu1 %1627  ;;  %v4290_v40 = vpop.permute.xlu0 %1617 }
  0xd7   : > { %3749 = vmatmul.mubr.msk.bf16.vlgmr.msra.gmra.mrb[0].mxu0 %vm918_vm0, %v1542_v26 }
  0xd9   : > { %v4292_v50 = vpop.permute.xlu1 %1632  ;;  %v4297_v55 = vpop.permute.xlu0 %1622 }
 0x187   : > { %v3714_v29 = vpop.f32.mrb[0].mxu1 }
 0x188   : > { %v1148_v31 = vpop.f32.mrb[1].mxu1  ;;  %v3884_v36 = vadd.f32 %v3714_v29, %v3445_v34 }
 0x189   : > { %v3715_v32 = vpop.f32.mrb[2].mxu1  ;;  %v3886_v37 = vadd.f32 %v3445_v34, %v1148_v31  ;;  %v4021_v31 = vld [vmem:[%s4458_s3 + $0x30] sm:$0xff]  }
 0x18a   : > { %v1151_v33 = vpop.f32.mrb[3].mxu1  ;;  %v3888_v39 = vadd.f32 %v3715_v32, %v3445_v34 }
 0x18b   : > { %v3890_v42 = vadd.f32 %v3445_v34, %v1151_v33  ;;  %v2024_v34 = vld [vmem:[#allocation3 + $0x1f] sm:$0x1] }
 0x1aa   : > { %v3750_v38 = vpop.f32.mrb[0].mxu0 }
 0x1ab   : > { %v3885_v41 = vadd.f32 %v3884_v36, %v3750_v38  ;;  %v1592_v1 = vpop.f32.mrb[1].mxu0 }
 0x1ac   : > { %v3887_v43 = vadd.f32 %v3886_v37, %v1592_v1  ;;  %v3751_v44 = vpop.f32.mrb[2].mxu0  ;;  %v4022_v37 = vld [vmem:[%s4458_s3 + $0x38] sm:$0xff]  }
 0x1ad   : > { %v1613_v45 = vmax.f32 %v3885_v41, 0.0  ;;  %v3889_v46 = vadd.f32 %v3888_v39, %v3751_v44  ;;  %v1595_v47 = vpop.f32.mrb[3].mxu0  ;;  %v2098_v41 = vld [vmem:[#allocation3 + $0x22] sm:$0x1]  ;;  %v4023_v44 = vld [vmem:[%s4458_s3 + $0x40] sm:$0xff]  }
 0x1ae   : > { %v1611_v48 = vmax.f32 %v3887_v43, 0.0  ;;  %v3891_v49 = vadd.f32 %v3890_v42, %v1595_v47  ;;  %v2172_v47 = vld [vmem:[#allocation3 + $0x23] sm:$0x1] }
 0x1af   : > { %v1637_v51 = vmul.f32 %v4288_v35, %v1613_v45  ;;  %v1614_v52 = vmax.f32 %v3889_v46, 0.0 }
 0x1b0   : > { %v1635_v53 = vmul.f32 %v4290_v40, %v1611_v48  ;;  %v1612_v54 = vmax.f32 %v3891_v49, 0.0 }
 0x1b1   : > { %1641 = vst.msk [vmem:[#allocation3 + $0x16] sm:$0xff] %vm918_vm0, %v1637_v51  ;;  %v1638_v56 = vmul.f32 %v4292_v50, %v1614_v52 }
 0x1b2   : > { %1639 = vst.msk [vmem:[#allocation3 + $0x6] sm:$0xff] %vm918_vm0, %v1635_v53  ;;  %v1636_v57 = vmul.f32 %v4297_v55, %v1612_v54  ;;  %v2246_v54 = vld [vmem:[#allocation3 + $0x24] sm:$0x1] }
 0x1b3   : > { %1643 = vst.msk [vmem:[#allocation3 + $0x1e] sm:$0x1] %vm1642_vm3, %v1638_v56 }
 0x1b4   : > { %1640 = vst.msk [vmem:[#allocation3 + $0xe] sm:$0xff] %vm918_vm0, %v1636_v57  ;;  %v4024_v57 = vld [vmem:[%s4460_s5] sm:$0xff]  }
 0x1b5   : > { %3806 = vmatprep.subr.bf16.mxu0 %v4024_v57 }
 0x1b6   : > { %3807 = vmatpush3.bf16.msra.mxu0 %v4024_v57 }
 0x1b8   : > { %v1655_v59 = vld [vmem:[#allocation3 + $0x18] sm:$0x1]  ;;  %v1728_v6 = vld [vmem:[#allocation3 + $0x19] sm:$0x1]  ;;  %v1802_v13 = vld [vmem:[#allocation3 + $0x1a] sm:$0x1] }
 0x1b9   : > { %v1652_v58 = vld [vmem:[#allocation3] sm:$0xff]  ;;  %v1876_v20 = vld [vmem:[#allocation3 + $0x1d] sm:$0x1] }
 0x1ba   : > { %v1725_v2 = vld [vmem:[#allocation3 + $0x1] sm:$0xff]  ;;  %v1950_v25 = vld [vmem:[#allocation3 + $0x1e] sm:$0x1] }
 0x1bb   : > { %v1653_v60 = vld [vmem:[#allocation3 + $0x8] sm:$0xff]  ;;  %v1654_v61 = vld [vmem:[#allocation3 + $0x10] sm:$0xff]  ;;  %v2097_v39 = vld [vmem:[#allocation3 + $0x1a] sm:$0xff] }
 0x1bc   : > { %v1726_v62 = vld [vmem:[#allocation3 + $0x9] sm:$0xff]  ;;  %v1656_v63 = vpack.c.bf16 %v1653_v60, %v1652_v58  ;;  %v1657_v0 = vpack.c.bf16 %v1655_v59, %v1654_v61  ;;  %v1727_v4 = vld [vmem:[#allocation3 + $0x11] sm:$0xff]  ;;  %v2100_v43 = vpack.c.bf16 %v2098_v41, %v2097_v39  ;;  %v2171_v46 = vld [vmem:[#allocation3 + $0x1b] sm:$0xff] }
 0x1bd   : > { %v1729_v3 = vpack.c.bf16 %v1726_v62, %v1725_v2  ;;  %v1800_v5 = vld [vmem:[#allocation3 + $0xa] sm:$0xff]  ;;  %v1730_v7 = vpack.c.bf16 %v1728_v6, %v1727_v4  ;;  %v1799_v8 = vld [vmem:[#allocation3 + $0x2] sm:$0xff]  ;;  %v1801_v11 = vld [vmem:[#allocation3 + $0x12] sm:$0xff]  ;;  %v2174_v51 = vpack.c.bf16 %v2172_v47, %v2171_v46 }
 0x1be   : > { %3754 = vmatprep.mubr.msk.bf16.mxu1 %vm918_vm0, %v1656_v63  ;;  %v1803_v10 = vpack.c.bf16 %v1800_v5, %v1799_v8  ;;  %v1874_v12 = vld [vmem:[#allocation3 + $0xd] sm:$0xff]  ;;  %v1804_v14 = vpack.c.bf16 %v1802_v13, %v1801_v11  ;;  %v1873_v15 = vld [vmem:[#allocation3 + $0x5] sm:$0xff]  ;;  %v1875_v18 = vld [vmem:[#allocation3 + $0x15] sm:$0xff]  ;;  %v2099_v38 = vpack.c.bf16 %v1801_v11, %v1800_v5 }
 0x1bf   : > { %3755 = vmatmul.mubr.msk.bf16.vlgmr.msra.gmra.mrb[4].mxu1 %vm918_vm0, %v1657_v0  ;;  %v1877_v17 = vpack.c.bf16 %v1874_v12, %v1873_v15  ;;  %v1948_v19 = vld [vmem:[#allocation3 + $0xe] sm:$0xff]  ;;  %v1878_v21 = vpack.c.bf16 %v1876_v20, %v1875_v18  ;;  %v1947_v22 = vld [vmem:[#allocation3 + $0x6] sm:$0xff]  ;;  %v2023_v33 = vld [vmem:[#allocation3 + $0x17] sm:$0xff] }
 0x1c0   : > { %3760 = vmatprep.mubr.msk.bf16.mxu1 %vm918_vm0, %v1729_v3  ;;  %3759 = vmatpush3.bf16.msra.mxu1 %v4016_v28  ;;  %v1951_v24 = vpack.c.bf16 %v1948_v19, %v1947_v22  ;;  %v2021_v26 = vld [vmem:[#allocation3 + $0x7] sm:$0xff]  ;;  %v2022_v27 = vld [vmem:[#allocation3 + $0xf] sm:$0xff]  ;;  %v2026_v36 = vpack.c.bf16 %v2024_v34, %v2023_v33  ;;  %v2245_v53 = vld [vmem:[#allocation3 + $0x1c] sm:$0xff] }
 0x1c1   : > { %3764 = vmatprep.subr.bf16.mxu1 %v4017_v30  ;;  %v1949_v28 = vld [vmem:[#allocation3 + $0x16] sm:$0xff]  ;;  %v2025_v32 = vpack.c.bf16 %v2022_v27, %v2021_v26  ;;  %v2169_v1 = vld [vmem:[#allocation3 + $0xb] sm:$0xff]  ;;  %v2248_v56 = vpack.c.bf16 %v2246_v54, %v2245_v53  ;;  %v4025_v58 = vld [vmem:[%s4460_s5 + $0x8] sm:$0xff]  }
 0x1c2   : > { %v1952_v29 = vpack.c.bf16 %v1950_v25, %v1949_v28  ;;  %v2170_v42 = vld [vmem:[#allocation3 + $0x13] sm:$0xff]  ;;  %3812 = vmatprep.subr.bf16.mxu0 %v4025_v58  ;;  %v4029_v39 = vld [vmem:[%s4460_s5 + $0x28] sm:$0xff]   ;;  %v4030_v46 = vld [vmem:[%s4460_s5 + $0x30] sm:$0xff]  }
 0x1c3   : > { %v2173_v45 = vpack.c.bf16 %v2170_v42, %v2169_v1  ;;  %v2243_v48 = vld [vmem:[#allocation3 + $0xc] sm:$0xff]  ;;  %v2244_v49 = vld [vmem:[#allocation3 + $0x14] sm:$0xff] }
 0x1c4   : > { %v2247_v52 = vpack.c.bf16 %v2244_v49, %v2243_v48  ;;  %v3489_v59 = vld [vmem:[%s4459_s4] ss:$0 sm:$0xff]  ;;  %v2709_v49 = vld [vmem:[#allocation2 + $0x1f] sm:$0x1] }
 0x1cb   : > { %3761 = vmatmul.mubr.msk.bf16.vlgmr.msra.gmra.mrb[4].mxu1 %vm918_vm0, %v1730_v7 }
 0x1cc   : > { %3766 = vmatprep.mubr.msk.bf16.mxu1 %vm918_vm0, %v1803_v10  ;;  %3765 = vmatpush3.bf16.msra.mxu1 %v4017_v30 }
 0x1cd   : > { %3770 = vmatprep.subr.bf16.mxu1 %v4018_v9 }
 0x1d7   : > { %3767 = vmatmul.mubr.msk.bf16.vlgmr.msra.gmra.mrb[4].mxu1 %vm918_vm0, %v1804_v14 }
 0x1d8   : > { %3772 = vmatprep.mubr.msk.bf16.mxu1 %vm918_vm0, %v1877_v17  ;;  %3771 = vmatpush3.bf16.msra.mxu1 %v4018_v9 }
 0x1d9   : > { %3776 = vmatprep.subr.bf16.mxu1 %v4019_v16 }
 0x1e3   : > { %3773 = vmatmul.mubr.msk.bf16.vlgmr.msra.gmra.mrb[4].mxu1 %vm918_vm0, %v1878_v21 }
 0x1e4   : > { %3778 = vmatprep.mubr.msk.bf16.mxu1 %vm918_vm0, %v1951_v24  ;;  %3777 = vmatpush3.bf16.msra.mxu1 %v4019_v16 }
 0x1e5   : > { %3782 = vmatprep.subr.bf16.mxu1 %v4020_v23 }
 0x1ef   : > { %3779 = vmatmul.mubr.msk.bf16.vlgmr.msra.gmra.mrb[4].mxu1 %vm918_vm0, %v1952_v29 }
 0x1f0   : > { %3784 = vmatprep.mubr.msk.bf16.mxu1 %vm918_vm0, %v2025_v32  ;;  %3783 = vmatpush3.bf16.msra.mxu1 %v4020_v23  ;;  %v4027_v23 = vld [vmem:[%s4460_s5 + $0x18] sm:$0xff]  }
 0x1f1   : > { %3788 = vmatprep.subr.bf16.mxu1 %v4021_v31 }
 0x1fb   : > { %3785 = vmatmul.mubr.msk.bf16.vlgmr.msra.gmra.mrb[4].mxu1 %vm918_vm0, %v2026_v36 }
 0x1fc   : > { %3790 = vmatprep.mubr.msk.bf16.mxu1 %vm918_vm0, %v2099_v38  ;;  %3789 = vmatpush3.bf16.msra.mxu1 %v4021_v31  ;;  %v4028_v31 = vld [vmem:[%s4460_s5 + $0x20] sm:$0xff]  }
 0x1fd   : > { %3794 = vmatprep.subr.bf16.mxu1 %v4022_v37 }
 0x207   : > { %3791 = vmatmul.mubr.msk.bf16.vlgmr.msra.gmra.mrb[4].mxu1 %vm918_vm0, %v2100_v43 }
 0x208   : > { %3796 = vmatprep.mubr.msk.bf16.mxu1 %vm918_vm0, %v2173_v45  ;;  %3795 = vmatpush3.bf16.msra.mxu1 %v4022_v37 }
 0x209   : > { %3800 = vmatprep.subr.bf16.mxu1 %v4023_v44 }
 0x213   : > { %3797 = vmatmul.mubr.msk.bf16.vlgmr.msra.gmra.mrb[4].mxu1 %vm918_vm0, %v2174_v51 }
 0x214   : > { %3802 = vmatprep.mubr.msk.bf16.mxu1 %vm918_vm0, %v2247_v52  ;;  %3801 = vmatpush3.bf16.msra.mxu1 %v4023_v44  ;;  %v4031_v52 = vld [vmem:[%s4460_s5 + $0x38] sm:$0xff]  }
 0x21f   : > { %3803 = vmatmul.mubr.msk.bf16.vlgmr.msra.gmra.mrb[4].mxu1 %vm918_vm0, %v2248_v56  ;;  %v2783_v56 = vld [vmem:[#allocation2 + $0x22] sm:$0x1] }
 0x2f2   : > { %v3804_v60 = vpop.f32.mrb[4].mxu1 }
 0x2f3   : > { %v3892_v61 = vadd.f32 %v3804_v60, %v3489_v59  ;;  %v2298_v62 = vpop.f32.mrb[5].mxu1  ;;  %v4032_v60 = vld [vmem:[%s4460_s5 + $0x40] sm:$0xff]  }
 0x2f4   : > { %v3893_v63 = vadd.f32 %v3489_v59, %v2298_v62  ;;  %v3805_v0 = vpop.f32.mrb[6].mxu1 }
 0x2f5   : > { %v2319_v2 = vmax.f32 %v3892_v61, 0.0  ;;  %v3894_v30 = vadd.f32 %v3805_v0, %v3489_v59  ;;  %v2301_v3 = vpop.f32.mrb[7].mxu1 }
 0x2f6   : > { %v2317_v4 = vmax.f32 %v3893_v63, 0.0  ;;  %v3895_v5 = vadd.f32 %v3489_v59, %v2301_v3  ;;  %v2857_v63 = vld [vmem:[#allocation2 + $0x23] sm:$0x1] }
 0x2f7   : > { %v2323_v6 = vmul.f32 %v2319_v2, %v4288_v35  ;;  %v2320_v7 = vmax.f32 %v3894_v30, 0.0 }
 0x2f8   : > { %v2321_v8 = vmul.f32 %v2317_v4, %v4290_v40  ;;  %v2318_v9 = vmax.f32 %v3895_v5, 0.0  ;;  %v2931_v5 = vld [vmem:[#allocation2 + $0x24] sm:$0x1] }
 0x2f9   : > { %2327 = vst.msk [vmem:[#allocation2 + $0x16] sm:$0xff] %vm918_vm0, %v2323_v6  ;;  %v2324_v10 = vmul.f32 %v2320_v7, %v4292_v50  ;;  %v4026_v50 = vld [vmem:[%s4460_s5 + $0x10] sm:$0xff]   ;;  %v3006_v7 = vld [vmem:[%s4463_s8] sm:$0xff] }
 0x2fa   : > { %2325 = vst.msk [vmem:[#allocation2 + $0x6] sm:$0xff] %vm918_vm0, %v2321_v8  ;;  %v2322_v11 = vmul.f32 %v2318_v9, %v4297_v55  ;;  %3862 = vmatprep.mubr.msk.f32.mxu1 %vm3011_vm4, %v3006_v7  ;;  %v3533_v8 = vld [vmem:[%s4461_s6] ss:$0 sm:$0xff] }
 0x2fb   : > { %2328 = vst.msk [vmem:[#allocation2 + $0x1e] sm:$0x1] %vm1642_vm3, %v2324_v10 }
 0x2fc   : > { %2326 = vst.msk [vmem:[#allocation2 + $0xe] sm:$0xff] %vm918_vm0, %v2322_v11 }
 0x300   : > { %v2340_v13 = vld [vmem:[#allocation2 + $0x18] sm:$0x1]  ;;  %v2413_v20 = vld [vmem:[#allocation2 + $0x19] sm:$0x1]  ;;  %v2487_v27 = vld [vmem:[#allocation2 + $0x1a] sm:$0x1] }
 0x301   : > { %v2337_v12 = vld [vmem:[#allocation2] sm:$0xff]  ;;  %v2561_v36 = vld [vmem:[#allocation2 + $0x1d] sm:$0x1] }
 0x302   : > { %v2410_v17 = vld [vmem:[#allocation2 + $0x1] sm:$0xff]  ;;  %v2635_v1 = vld [vmem:[#allocation2 + $0x1e] sm:$0x1]  ;;  %v2634_v44 = vld [vmem:[#allocation2 + $0x16] sm:$0xff] }
 0x303   : > { %v2338_v14 = vld [vmem:[#allocation2 + $0x8] sm:$0xff]  ;;  %v2339_v35 = vld [vmem:[#allocation2 + $0x10] sm:$0xff]  ;;  %v2637_v45 = vpack.c.bf16 %v2635_v1, %v2634_v44  ;;  %v2782_v54 = vld [vmem:[#allocation2 + $0x1a] sm:$0xff] }
 0x304   : > { %v2411_v15 = vld [vmem:[#allocation2 + $0x9] sm:$0xff]  ;;  %v2341_v16 = vpack.c.bf16 %v2338_v14, %v2337_v12  ;;  %v2342_v40 = vpack.c.bf16 %v2340_v13, %v2339_v35  ;;  %v2412_v55 = vld [vmem:[#allocation2 + $0x11] sm:$0xff]  ;;  %v2785_v59 = vpack.c.bf16 %v2783_v56, %v2782_v54  ;;  %v2856_v62 = vld [vmem:[#allocation2 + $0x1b] sm:$0xff] }
 0x305   : > { %v2414_v18 = vpack.c.bf16 %v2411_v15, %v2410_v17  ;;  %v2485_v19 = vld [vmem:[#allocation2 + $0xa] sm:$0xff]  ;;  %v2415_v21 = vpack.c.bf16 %v2413_v20, %v2412_v55  ;;  %v2484_v22 = vld [vmem:[#allocation2 + $0x2] sm:$0xff]  ;;  %v2486_v25 = vld [vmem:[#allocation2 + $0x12] sm:$0xff]  ;;  %v2859_v30 = vpack.c.bf16 %v2857_v63, %v2856_v62 }
 0x306   : > { %3808 = vmatprep.mubr.msk.bf16.mxu0 %vm918_vm0, %v2341_v16  ;;  %v2488_v24 = vpack.c.bf16 %v2485_v19, %v2484_v22  ;;  %v2559_v26 = vld [vmem:[#allocation2 + $0xd] sm:$0xff]  ;;  %v2489_v28 = vpack.c.bf16 %v2487_v27, %v2486_v25  ;;  %v2558_v29 = vld [vmem:[#allocation2 + $0x5] sm:$0xff]  ;;  %v2560_v33 = vld [vmem:[#allocation2 + $0x15] sm:$0xff]  ;;  %v2784_v53 = vpack.c.bf16 %v2486_v25, %v2485_v19 }
 0x307   : > { %3809 = vmatmul.mubr.msk.bf16.vlgmr.msra.gmra.mrb[4].mxu0 %vm918_vm0, %v2342_v40  ;;  %v2562_v32 = vpack.c.bf16 %v2559_v26, %v2558_v29  ;;  %v2633_v34 = vld [vmem:[#allocation2 + $0xe] sm:$0xff]  ;;  %v2563_v37 = vpack.c.bf16 %v2561_v36, %v2560_v33  ;;  %v2632_v38 = vld [vmem:[#allocation2 + $0x6] sm:$0xff]  ;;  %v2708_v48 = vld [vmem:[#allocation2 + $0x17] sm:$0xff] }
 0x308   : > { %3814 = vmatprep.mubr.msk.bf16.mxu0 %vm918_vm0, %v2414_v18  ;;  %3813 = vmatpush3.bf16.msra.mxu0 %v4025_v58  ;;  %v2636_v41 = vpack.c.bf16 %v2633_v34, %v2632_v38  ;;  %v2706_v42 = vld [vmem:[#allocation2 + $0x7] sm:$0xff]  ;;  %v2707_v43 = vld [vmem:[#allocation2 + $0xf] sm:$0xff]  ;;  %v2711_v51 = vpack.c.bf16 %v2709_v49, %v2708_v48  ;;  %v2930_v4 = vld [vmem:[#allocation2 + $0x1c] sm:$0xff] }
 0x309   : > { %3818 = vmatprep.subr.bf16.mxu0 %v4026_v50  ;;  %v2710_v47 = vpack.c.bf16 %v2707_v43, %v2706_v42  ;;  %v2854_v57 = vld [vmem:[#allocation2 + $0xb] sm:$0xff]  ;;  %v2855_v58 = vld [vmem:[#allocation2 + $0x13] sm:$0xff]  ;;  %v2933_v6 = vpack.c.bf16 %v2931_v5, %v2930_v4 }
 0x30a   : > { %v2858_v61 = vpack.c.bf16 %v2855_v58, %v2854_v57  ;;  %v2928_v0 = vld [vmem:[#allocation2 + $0xc] sm:$0xff]  ;;  %v2929_v2 = vld [vmem:[#allocation2 + $0x14] sm:$0xff] }
 0x30b   : > { %v2932_v3 = vpack.c.bf16 %v2929_v2, %v2928_v0  ;;  %v3007_v40 = vld [vmem:[%s4463_s8 + $0x8] sm:$0xff]  ;;  %v3008_v17 = vld [vmem:[%s4463_s8 + $0x10] sm:$0xff]  ;;  %v3009_v55 = vld [vmem:[%s4463_s8 + $0x18] sm:$0xff] }
 0x313   : > { %3815 = vmatmul.mubr.msk.bf16.vlgmr.msra.gmra.mrb[4].mxu0 %vm918_vm0, %v2415_v21 }
 0x314   : > { %3820 = vmatprep.mubr.msk.bf16.mxu0 %vm918_vm0, %v2488_v24  ;;  %3819 = vmatpush3.bf16.msra.mxu0 %v4026_v50 }
 0x315   : > { %3824 = vmatprep.subr.bf16.mxu0 %v4027_v23 }
 0x31f   : > { %3821 = vmatmul.mubr.msk.bf16.vlgmr.msra.gmra.mrb[4].mxu0 %vm918_vm0, %v2489_v28 }
 0x320   : > { %3826 = vmatprep.mubr.msk.bf16.mxu0 %vm918_vm0, %v2562_v32  ;;  %3825 = vmatpush3.bf16.msra.mxu0 %v4027_v23 }
 0x321   : > { %3830 = vmatprep.subr.bf16.mxu0 %v4028_v31 }
 0x32b   : > { %3827 = vmatmul.mubr.msk.bf16.vlgmr.msra.gmra.mrb[4].mxu0 %vm918_vm0, %v2563_v37 }
 0x32c   : > { %3832 = vmatprep.mubr.msk.bf16.mxu0 %vm918_vm0, %v2636_v41  ;;  %3831 = vmatpush3.bf16.msra.mxu0 %v4028_v31 }
 0x32d   : > { %3836 = vmatprep.subr.bf16.mxu0 %v4029_v39 }
 0x337   : > { %3833 = vmatmul.mubr.msk.bf16.vlgmr.msra.gmra.mrb[4].mxu0 %vm918_vm0, %v2637_v45 }
 0x338   : > { %3838 = vmatprep.mubr.msk.bf16.mxu0 %vm918_vm0, %v2710_v47  ;;  %3837 = vmatpush3.bf16.msra.mxu0 %v4029_v39 }
 0x339   : > { %3842 = vmatprep.subr.bf16.mxu0 %v4030_v46 }
 0x343   : > { %3839 = vmatmul.mubr.msk.bf16.vlgmr.msra.gmra.mrb[4].mxu0 %vm918_vm0, %v2711_v51 }
 0x344   : > { %3844 = vmatprep.mubr.msk.bf16.mxu0 %vm918_vm0, %v2784_v53  ;;  %3843 = vmatpush3.bf16.msra.mxu0 %v4030_v46 }
 0x345   : > { %3848 = vmatprep.subr.bf16.mxu0 %v4031_v52 }
 0x34f   : > { %3845 = vmatmul.mubr.msk.bf16.vlgmr.msra.gmra.mrb[4].mxu0 %vm918_vm0, %v2785_v59 }
 0x350   : > { %3850 = vmatprep.mubr.msk.bf16.mxu0 %vm918_vm0, %v2858_v61  ;;  %3849 = vmatpush3.bf16.msra.mxu0 %v4031_v52 }
 0x351   : > { %3854 = vmatprep.subr.bf16.mxu0 %v4032_v60 }
 0x35b   : > { %3851 = vmatmul.mubr.msk.bf16.vlgmr.msra.gmra.mrb[4].mxu0 %vm918_vm0, %v2859_v30 }
 0x35c   : > { %3856 = vmatprep.mubr.msk.bf16.mxu0 %vm918_vm0, %v2932_v3  ;;  %3855 = vmatpush3.bf16.msra.mxu0 %v4032_v60 }
 0x367   : > { %3857 = vmatmul.mubr.msk.bf16.vlgmr.msra.gmra.mrb[4].mxu0 %vm918_vm0, %v2933_v6 }
 0x43a   : > { %v3858_v9 = vpop.f32.mrb[4].mxu0 }
 0x43b   : > { %v3896_v10 = vadd.f32 %v3858_v9, %v3533_v8  ;;  %v2983_v11 = vpop.f32.mrb[5].mxu0 }
 0x43c   : > { %v3897_v12 = vadd.f32 %v3533_v8, %v2983_v11  ;;  %v3859_v13 = vpop.f32.mrb[6].mxu0 }
 0x43d   : > { %3004 = vst.msk [vmem:[#allocation3 + $0x16] sm:$0xff] %vm918_vm0, %v3896_v10  ;;  %v3898_v14 = vadd.f32 %v3859_v13, %v3533_v8  ;;  %v2986_v35 = vpop.f32.mrb[7].mxu0 }
 0x43e   : > { %3002 = vst.msk [vmem:[#allocation3 + $0x6] sm:$0xff] %vm918_vm0, %v3897_v12  ;;  %v3899_v15 = vadd.f32 %v3533_v8, %v2986_v35 }
 0x43f   : > { %3005 = vst.msk [vmem:[#allocation3 + $0x1e] sm:$0x1] %vm1642_vm3, %v3898_v14 }
 0x440   : > { %3003 = vst.msk [vmem:[#allocation3 + $0xe] sm:$0xff] %vm918_vm0, %v3899_v15 }
 0x444   : > { %v3211_v18 = vld [vmem:[#allocation3 + $0x16] sm:$0x7] }
 0x447   : > { %v3010_v16 = vld [vmem:[#allocation3 + $0xc] sm:$0x7]  ;;  %v3117_v50 = vld [vmem:[#allocation3 + $0x11] sm:$0x7] }
 0x448   : > { %3860 = vmatprep.subr.msk.mxu1 %vm3024_vm5, %v3010_v16 }
 0x449   : > { %3861 = vmatpush3.msk.msra.mxu1 %vm3024_vm5, %v3010_v16 }
 0x44a   : > { %3863 = vmatmul.mubr.msk.f32.vlgmr.msra.gmra.mrb[8].mxu1 %vm3011_vm4, %v3007_v40  ;;  %3868 = vmatprep.subr.msk.mxu1 %vm3024_vm5, %v3117_v50 }
 0x44b   : > { %3869 = vmatpush3.msk.msra.mxu1 %vm3024_vm5, %v3117_v50  ;;  %3865 = vmatprep.mubr.msk.f32.mxu1 %vm3011_vm4, %v3008_v17 }
 0x44c   : > { %3876 = vmatprep.subr.msk.mxu1 %vm3024_vm5, %v3211_v18 }
 0x44e   : > { %3866 = vmatmul.mubr.msk.f32.gmra.mrb[10].mxu1 %vm3011_vm4, %v3009_v55 }
 0x44f   : > { %3870 = vmatprep.mubr.msk.f32.mxu1 %vm3011_vm4, %v3006_v7 }
 0x452   : > { %3871 = vmatmul.mubr.msk.f32.vlgmr.msra.gmra.mrb[12].mxu1 %vm3011_vm4, %v3007_v40 }
 0x453   : > { %3877 = vmatpush3.msk.msra.mxu1 %vm3024_vm5, %v3211_v18  ;;  %3873 = vmatprep.mubr.msk.f32.mxu1 %vm3011_vm4, %v3008_v17 }
 0x456   : > { %3874 = vmatmul.mubr.msk.f32.gmra.mrb[14].mxu1 %vm3011_vm4, %v3009_v55 }
 0x457   : > { %3878 = vmatprep.mubr.msk.f32.mxu1 %vm3011_vm4, %v3006_v7 }
 0x45a   : > { %3879 = vmatmul.mubr.msk.f32.vlgmr.msra.gmra.mrb[16].mxu1 %vm3011_vm4, %v3007_v40 }
 0x45b   : > { %3881 = vmatprep.mubr.msk.f32.mxu1 %vm3011_vm4, %v3008_v17 }
 0x45e   : > { %3882 = vmatmul.mubr.msk.f32.gmra.mrb[18].mxu1 %vm3011_vm4, %v3009_v55 }
 0x51d   : > { %v3864_v19 = vpop.f32.mrb[8].mxu1 }
 0x51e   : > { %3114 = vst.msk [vmem:[%s332_s18 + $0x8] sm:$0xff] %vm918_vm0, %v3864_v19  ;;  %v3094_v20 = vpop.f32.mrb[9].mxu1 }
 0x51f   : > { %3113 = vst.msk [vmem:[%s332_s18] sm:$0xff] %vm918_vm0, %v3094_v20 }
 0x521   : > { %v3867_v21 = vpop.f32.mrb[10].mxu1 }
 0x522   : > { %3116 = vst.msk [vmem:[%s332_s18 + $0x18] sm:$0xff] %vm918_vm0, %v3867_v21  ;;  %v3104_v22 = vpop.f32.mrb[11].mxu1 }
 0x523   : > { %3115 = vst.msk [vmem:[%s332_s18 + $0x10] sm:$0xff] %vm918_vm0, %v3104_v22 }
 0x525   : > { %v3872_v23 = vpop.f32.mrb[12].mxu1 }
 0x526   : > { %3588 = vst.msk [vmem:[%s332_s18 + $0x28] sm:$0xff] %vm918_vm0, %v3872_v23  ;;  %v3187_v24 = vpop.f32.mrb[13].mxu1 }
 0x527   : > { %3587 = vst.msk [vmem:[%s332_s18 + $0x20] sm:$0xff] %vm918_vm0, %v3187_v24 }
 0x529   : > { %v3875_v25 = vpop.f32.mrb[14].mxu1 }
 0x52a   : > { %3590 = vst.msk [vmem:[%s332_s18 + $0x38] sm:$0xff] %vm918_vm0, %v3875_v25  ;;  %v3197_v26 = vpop.f32.mrb[15].mxu1 }
 0x52b   : > { %3589 = vst.msk [vmem:[%s332_s18 + $0x30] sm:$0xff] %vm918_vm0, %v3197_v26 }
 0x52d   : > { %v3880_v27 = vpop.f32.mrb[16].mxu1 }
 0x52e   : > { %3597 = vst.msk [vmem:[%s332_s18 + $0x48] sm:$0xff] %vm918_vm0, %v3880_v27  ;;  %v3281_v28 = vpop.f32.mrb[17].mxu1 }
 0x52f   : > { %3596 = vst.msk [vmem:[%s332_s18 + $0x40] sm:$0xff] %vm918_vm0, %v3281_v28 }
 0x531   : > { %v3883_v29 = vpop.f32.mrb[18].mxu1 }
 0x532   : > { %3599 = vst.msk [vmem:[%s332_s18 + $0x58] sm:$0xff] %vm918_vm0, %v3883_v29  ;;  %v3291_v31 = vpop.f32.mrb[19].mxu1 }
 0x533   : > { %3598 = vst.msk [vmem:[%s332_s18 + $0x50] sm:$0xff] %vm918_vm0, %v3291_v31 }
 0x534 PF: > { %s19_s30 = sadd.s32 1, %s4039_s30  }
 0x535   : > { %p16_p4 = scmp.ge.s32.totalorder %s19_s30, 4  }
 0x537   :  { %18 = sbr.rel (!%p16_p4) target bundleno = 1 (0x1), region = 132 }

</bundles_post_ra>
